<compile_context>
chip_gen: v6e
topology: v6e:2x2x1
jax: 0.10.0
libtpu: 0.0.40
codegen_flags: <defaults>
</compile_context>

<pallas_src>
import functools

import jax
import jax.numpy as jnp
from jax.experimental import pallas as pl
from jax.experimental.pallas import tpu as pltpu

NEG_SLOPE = 0.01          # torch.nn.LeakyReLU default
BN_EPS = 1e-5             # torch.nn.BatchNorm2d default
LANE = 128                # TPU lane width: channel axes padded to a multiple of this
TILE_M = 1024             # rows per grid step for the 1x1-conv stages
ROWS_PER_BLOCK_2 = 1024   # target output rows per stage-2 block


# ---------------------------------------------------------------------------
# small helpers
# ---------------------------------------------------------------------------
def _round_up(x, m):
    return (x + m - 1) // m * m


def _largest_divisor_le(n, cap):
    cap = max(1, min(n, cap))
    for d in range(cap, 0, -1):
        if n % d == 0:
            return d
    return 1


@functools.lru_cache(maxsize=1)
def _vmem_limit_bytes():
    cap = None
    try:
        info = pltpu.get_tpu_info()
        cap = getattr(info, "vmem_capacity_bytes", None)
    except Exception:
        cap = None
    if not cap:
        cap = 64 * 1024 * 1024  # conservative (v7x per-core) fallback
    return int(min(cap * 3 // 4, 100 * 1024 * 1024))


def _compiler_params(semantics):
    return pltpu.CompilerParams(
        dimension_semantics=semantics,
        vmem_limit_bytes=_vmem_limit_bytes(),
    )


def _full_spec(shape, grid_rank):
    zeros = (0,) * len(shape)
    if grid_rank == 1:
        return pl.BlockSpec(shape, lambda i: zeros)
    return pl.BlockSpec(shape, lambda i, j: zeros)


def _leaky(y):
    return jnp.where(y > 0, y, NEG_SLOPE * y)


def _tile_stats(y, tile_m, m_true):
    """Per-tile partial (sum, sum-of-squares) over the valid rows -> (2, C) f32."""
    row = jax.lax.broadcasted_iota(jnp.int32, (tile_m, 1), 0) + pl.program_id(0) * tile_m
    yv = jnp.where(row < m_true, y, 0.0)
    s1 = jnp.sum(yv, axis=0, keepdims=True)
    s2 = jnp.sum(yv * yv, axis=0, keepdims=True)
    return jnp.concatenate([s1, s2], axis=0)


def _bn_scale_shift(stats, m_true, gamma, beta):
    """Reduce per-tile partial stats -> per-channel (scale, shift) for y*scale+shift."""
    s = jnp.sum(stats.reshape(-1, 2, stats.shape[-1]), axis=0)
    mean = s[0] / m_true
    var = jnp.maximum(s[1] / m_true - mean * mean, 0.0)   # biased var (torch training BN)
    inv = jax.lax.rsqrt(var + BN_EPS)
    scale = gamma * inv
    shift = beta - mean * scale
    return scale, shift


def _pad_rows(x2d, mp):
    m = x2d.shape[0]
    if m == mp:
        return x2d
    return jnp.pad(x2d, ((0, mp - m), (0, 0)))


def _pad_mat(w, r, c):
    return jnp.pad(w, ((0, r - w.shape[0]), (0, c - w.shape[1])))


def _pad_vec(v, c):
    return jnp.pad(v, (0, c - v.shape[0]))


# ---------------------------------------------------------------------------
# Pallas kernels
# ---------------------------------------------------------------------------
def _stage1_kernel(x_ref, w_ref, o_ref, stats_ref, *, tile_m, m_true):
    # conv1 (1x1, no bias) -> LeakyReLU ; emits pre-bn1 activation + partial stats.
    y = jnp.dot(x_ref[...], w_ref[...], preferred_element_type=jnp.float32)
    y = _leaky(y)
    o_ref[...] = y.astype(o_ref.dtype)
    stats_ref[...] = _tile_stats(y, tile_m, m_true)


def _stage2_kernel(x_ref, w_ref, b_ref, o_ref, stats_ref, *,
                   s, toh, wo, wo_pad, ho, n_t, cmid, mask_cols, mask_rows):
    # 3x3 stride-s conv as 9 in-kernel MXU taps over a bf16, stride-phase-split,
    # row-chunked (halo-duplicated) activation block; + bias -> LeakyReLU ;
    # emits partial BN stats.  Two independent accumulators shorten the
    # MXU-pop -> VPU-add dependency chain.
    rows = toh * wo_pad
    acc_e = jnp.zeros((rows, cmid), jnp.float32)
    acc_o = jnp.zeros((rows, cmid), jnp.float32)
    for kh in range(3):
        for kw in range(3):
            tap = kh * 3 + kw
            p = (kh % s) * s + (kw % s)        # phase index
            rh = kh // s                       # row offset within chunk
            cw = kw // s                       # col offset within phase
            xt = x_ref[p, pl.ds(rh, toh), pl.ds(cw, wo_pad), :]   # bf16, no cast
            xt = xt.reshape(rows, cmid)
            d = jnp.dot(xt, w_ref[tap], preferred_element_type=jnp.float32)
            if tap % 2 == 0:
                acc_e = acc_e + d
            else:
                acc_o = acc_o + d
    y = _leaky(acc_e + acc_o + b_ref[...])
    o_ref[...] = y.astype(o_ref.dtype)
    yv = y
    if mask_cols or mask_rows:                 # static branch; off for aligned shapes
        ridx = jax.lax.broadcasted_iota(jnp.int32, (rows, 1), 0)
        valid = jnp.ones((rows, 1), jnp.bool_)
        if mask_cols:
            valid = jnp.logical_and(valid, (ridx % wo_pad) < wo)
        if mask_rows:
            t = pl.program_id(0) % n_t
            valid = jnp.logical_and(valid, (t * toh + ridx // wo_pad) < ho)
        yv = jnp.where(valid, y, 0.0)
    s1 = jnp.sum(yv, axis=0, keepdims=True)
    s2 = jnp.sum(yv * yv, axis=0, keepdims=True)
    stats_ref[...] = jnp.concatenate([s1, s2], axis=0)


def _stage3_kernel(x_ref, w_ref, b_ref, s_ref, *rest, tile_m, m_true, side_matmul):
    # conv3 (1x1, bn2 already folded into w/b) + side path -> LeakyReLU ;
    # emits pre-bn3 activation + partial stats.
    if side_matmul:
        ws_ref, o_ref, stats_ref = rest
    else:
        o_ref, stats_ref = rest
    y = jnp.dot(x_ref[...], w_ref[...], preferred_element_type=jnp.float32)
    y = y + b_ref[...]
    if side_matmul:
        y = y + jnp.dot(s_ref[...], ws_ref[...], preferred_element_type=jnp.float32)
    else:
        y = y + s_ref[...].astype(jnp.float32)   # identity side: direct add
    y = _leaky(y)
    o_ref[...] = y.astype(o_ref.dtype)
    stats_ref[...] = _tile_stats(y, tile_m, m_true)


def _bn_apply_kernel(x_ref, p_ref, o_ref):
    # Pass 2 of the final BatchNorm: y * scale + shift, packed params (2, C).
    # bf16 in / bf16 out (halves the HBM traffic of this memory-bound pass).
    x = x_ref[...].astype(jnp.float32)
    y = x * p_ref[0:1, :] + p_ref[1:2, :]
    o_ref[...] = y.astype(o_ref.dtype)


# ---------------------------------------------------------------------------
# pallas_call wrappers
# ---------------------------------------------------------------------------
def _call_stage1(xf, w1, m_true, tile_m):
    mp, cin_p = xf.shape
    cmid_p = w1.shape[1]
    g = mp // tile_m
    kernel = functools.partial(_stage1_kernel, tile_m=tile_m, m_true=m_true)
    return pl.pallas_call(
        kernel,
        grid=(g,),
        in_specs=[
            pl.BlockSpec((tile_m, cin_p), lambda i: (i, 0)),
            _full_spec(w1.shape, 1),
        ],
        out_specs=(
            pl.BlockSpec((tile_m, cmid_p), lambda i: (i, 0)),
            pl.BlockSpec((None, 2, cmid_p), lambda i: (i, 0, 0)),
        ),
        out_shape=(
            jax.ShapeDtypeStruct((mp, cmid_p), jnp.bfloat16),
            jax.ShapeDtypeStruct((g, 2, cmid_p), jnp.float32),
        ),
        compiler_params=_compiler_params(("parallel",)),
    )(xf, w1)


def _call_stage2(xch, w2, b2, *, s, geom, wo, ho, cmid_p):
    G = xch.shape[0]
    toh, n_t, wo_pad, ho_pad, rh, we = (geom["toh"], geom["n_t"], geom["wo_pad"],
                                        geom["ho_pad"], geom["rh"], geom["we"])
    rows = toh * wo_pad
    pcount = s * s
    kernel = functools.partial(
        _stage2_kernel, s=s, toh=toh, wo=wo, wo_pad=wo_pad, ho=ho, n_t=n_t,
        cmid=cmid_p, mask_cols=(wo_pad != wo), mask_rows=(ho_pad != ho))
    # TODO(synk): pipeline_mode=pl.Buffered(1) on w2/b2 (constant index) would
    # free one weight buffer of VMEM on v7x; omitted to keep lowering simple.
    return pl.pallas_call(
        kernel,
        grid=(G,),
        in_specs=[
            pl.BlockSpec((None, pcount, toh + rh, we, cmid_p),
                         lambda g: (g, 0, 0, 0, 0)),
            _full_spec(w2.shape, 1),
            _full_spec(b2.shape, 1),
        ],
        out_specs=(
            pl.BlockSpec((None, rows, cmid_p), lambda g: (g, 0, 0)),
            pl.BlockSpec((None, 2, cmid_p), lambda g: (g, 0, 0)),
        ),
        out_shape=(
            jax.ShapeDtypeStruct((G, rows, cmid_p), jnp.bfloat16),
            jax.ShapeDtypeStruct((G, 2, cmid_p), jnp.float32),
        ),
        compiler_params=_compiler_params(("parallel",)),
    )(xch, w2, b2)


def _call_stage3(y2f, w3f, b3f, side, ws, m_true, tile_m):
    mp, cmid_p = y2f.shape
    cout_p = w3f.shape[1]
    g = mp // tile_m
    side_matmul = ws is not None
    kernel = functools.partial(_stage3_kernel, tile_m=tile_m, m_true=m_true,
                               side_matmul=side_matmul)
    in_specs = [
        pl.BlockSpec((tile_m, cmid_p), lambda i: (i, 0)),
        _full_spec(w3f.shape, 1),
        _full_spec(b3f.shape, 1),
        pl.BlockSpec((tile_m, side.shape[1]), lambda i: (i, 0)),
    ]
    args = [y2f, w3f, b3f, side]
    if side_matmul:
        in_specs.append(_full_spec(ws.shape, 1))
        args.append(ws)
    return pl.pallas_call(
        kernel,
        grid=(g,),
        in_specs=in_specs,
        out_specs=(
            pl.BlockSpec((tile_m, cout_p), lambda i: (i, 0)),
            pl.BlockSpec((None, 2, cout_p), lambda i: (i, 0, 0)),
        ),
        out_shape=(
            jax.ShapeDtypeStruct((mp, cout_p), jnp.bfloat16),
            jax.ShapeDtypeStruct((g, 2, cout_p), jnp.float32),
        ),
        compiler_params=_compiler_params(("parallel",)),
    )(*args)


def _call_bn_apply(y3, scale_p, shift_p, tile_m):
    mp, c = y3.shape
    g = mp // tile_m
    params = jnp.stack([scale_p, shift_p], axis=0).astype(jnp.float32)   # (2, C)
    return pl.pallas_call(
        _bn_apply_kernel,
        grid=(g,),
        in_specs=[
            pl.BlockSpec((tile_m, c), lambda i: (i, 0)),
            _full_spec(params.shape, 1),
        ],
        out_specs=pl.BlockSpec((tile_m, c), lambda i: (i, 0)),
        out_shape=jax.ShapeDtypeStruct((mp, c), jnp.bfloat16),
        compiler_params=_compiler_params(("parallel",)),
    )(y3, params)


# ---------------------------------------------------------------------------
# JAX glue: bn1 affine fused into conv2's zero-pad + stride-phase split + row
# chunking (zero padding must happen AFTER normalization, so the bn1 affine
# cannot be folded into conv2's weights; XLA fuses it with the pad/slice glue).
# The phase tensor is stored bf16 and pre-chunked into overlapping output-row
# tiles so each grid step's VMEM-resident block is small and pipelined.
# ---------------------------------------------------------------------------
def _prep_stage2_input(y1_img, scale1_p, shift1_p, s, ho, wo):
    n, h, w, c = y1_img.shape
    rh = 2 // s                                 # halo rows needed (2 for s=1, 1 for s=2)
    rw = 2 // s
    wo_pad = _round_up(wo, 8)
    cap = max(1, ROWS_PER_BLOCK_2 // wo_pad)
    d = _largest_divisor_le(ho, cap)
    if 2 * d >= min(cap, ho):                   # a "big enough" exact divisor exists
        toh, ho_pad = d, ho
    else:                                       # avoid toh collapse: pad ho instead
        toh = min(cap, ho)
        ho_pad = _round_up(ho, toh)
    n_t = ho_pad // toh
    he = ho_pad + rh
    we = wo_pad + rw
    hp = max(h + 2, s * he)
    wp = max(w + 2, s * we)

    y = y1_img.astype(jnp.float32) * scale1_p + shift1_p      # bn1 affine
    y = y.astype(jnp.bfloat16)                                 # bf16 stage-2 input
    xp = jnp.pad(y, ((0, 0), (1, hp - h - 1), (1, wp - w - 1), (0, 0)))
    # stride-phase split: a 1x rearrangement (NOT a 9x im2col blow-up)
    phases = [xp[:, ph::s, pw::s, :][:, :he, :we, :]
              for ph in range(s) for pw in range(s)]
    xphase = jnp.stack(phases, axis=1)                         # (n, s*s, he, we, c)
    # overlapping output-row chunks (halo rows duplicated; bounds the VMEM block)
    chunks = [xphase[:, :, t * toh: t * toh + toh + rh] for t in range(n_t)]
    xch = jnp.stack(chunks, axis=1)                            # (n, n_t, p, toh+rh, we, c)
    xch = xch.reshape(n * n_t, s * s, toh + rh, we, c)
    geom = dict(toh=toh, n_t=n_t, wo_pad=wo_pad, ho_pad=ho_pad, rh=rh, we=we)
    return xch, geom


# ---------------------------------------------------------------------------
# Parameter init (matches the torch module's shapes; deterministic)
# ---------------------------------------------------------------------------
def init_params(key, indim, middim, outdim, down):
    k1, k2, k3, k4, k5 = jax.random.split(key, 5)
    p = {
        "w1": jax.random.normal(k1, (indim, middim), jnp.float32) / jnp.sqrt(indim),
        "w2": jax.random.normal(k2, (3, 3, middim, middim), jnp.float32) / jnp.sqrt(9.0 * middim),
        "b2": 0.1 * jax.random.normal(k3, (middim,), jnp.float32),
        "w3": jax.random.normal(k4, (middim, outdim), jnp.float32) / jnp.sqrt(middim),
        "g1": jnp.ones((middim,), jnp.float32), "beta1": jnp.zeros((middim,), jnp.float32),
        "g2": jnp.ones((middim,), jnp.float32), "beta2": jnp.zeros((middim,), jnp.float32),
        "g3": jnp.ones((outdim,), jnp.float32), "beta3": jnp.zeros((outdim,), jnp.float32),
    }
    if down:
        p["ws"] = jax.random.normal(k5, (indim, outdim), jnp.float32) / jnp.sqrt(indim)
    return p


# ---------------------------------------------------------------------------
# Forward pass (Pallas)
# ---------------------------------------------------------------------------
def bottle_neck_down_forward(x_nchw, params, down):
    n, cin, h, w = x_nchw.shape
    cmid = params["w1"].shape[1]
    cout = params["w3"].shape[1]
    s = 2 if down else 1
    ho = (h + 2 - 3) // s + 1
    wo = (w + 2 - 3) // s + 1
    if not down:
        assert cout == cin, "identity side path requires outdim == indim"

    # lane-dense channel padding
    cin_p = _round_up(cin, LANE)
    cmid_p = _round_up(cmid, LANE)
    cout_p = _round_up(cout, LANE)

    x = jnp.transpose(x_nchw, (0, 2, 3, 1)).astype(jnp.float32)        # NHWC
    x_p = jnp.pad(x, ((0, 0), (0, 0), (0, 0), (0, cin_p - cin)))       # channel pad

    # ---- stage 1: conv1(1x1, no bias) -> LeakyReLU  [+ bn1 partial stats]
    m1 = n * h * w
    tile1 = min(TILE_M, _round_up(m1, 8))
    m1p = _round_up(m1, tile1)
    xf = _pad_rows(x_p.reshape(m1, cin_p).astype(jnp.bfloat16), m1p)
    w1p = _pad_mat(params["w1"], cin_p, cmid_p).astype(jnp.bfloat16)
    y1, st1 = _call_stage1(xf, w1p, m1, tile1)
    scale1, shift1 = _bn_scale_shift(st1[..., :cmid], m1, params["g1"], params["beta1"])
    scale1_p = _pad_vec(scale1, cmid_p)      # padded channels: scale=0, shift=0 -> stay 0
    shift1_p = _pad_vec(shift1, cmid_p)

    # ---- stage 2: bn1(folded into pad glue) -> conv2(3x3, stride s, bias)
    #               -> LeakyReLU  [+ bn2 partial stats]
    y1_img = y1[:m1].reshape(n, h, w, cmid_p)
    xch, geom = _prep_stage2_input(y1_img, scale1_p, shift1_p, s, ho, wo)
    w2p = jnp.pad(params["w2"], ((0, 0), (0, 0), (0, cmid_p - cmid), (0, cmid_p - cmid)))
    w2p = w2p.reshape(9, cmid_p, cmid_p).astype(jnp.bfloat16)
    b2p = _pad_vec(params["b2"], cmid_p).reshape(1, cmid_p).astype(jnp.float32)
    y2, st2 = _call_stage2(xch, w2p, b2p, s=s, geom=geom, wo=wo, ho=ho, cmid_p=cmid_p)
    m2 = n * ho * wo
    scale2, shift2 = _bn_scale_shift(st2[..., :cmid], m2, params["g2"], params["beta2"])

    # un-chunk / un-pad stage-2 output -> (m2, cmid_p) bf16 rows
    ho_pad, wo_pad = geom["ho_pad"], geom["wo_pad"]
    y2img = y2.reshape(n, ho_pad, wo_pad, cmid_p)
    if ho_pad != ho or wo_pad != wo:
        y2img = y2img[:, :ho, :wo, :]
    y2f = y2img.reshape(m2, cmid_p)

    # ---- stage 3: bn2 folded into conv3's weights/bias; conv3 + side path
    #               -> LeakyReLU  [+ bn3 partial stats]
    tile3 = min(TILE_M, _round_up(m2, 8))
    m2p = _round_up(m2, tile3)
    y2f = _pad_rows(y2f, m2p)
    w3f = _pad_mat(scale2[:, None] * params["w3"], cmid_p, cout_p).astype(jnp.bfloat16)
    b3f = _pad_vec(shift2 @ params["w3"], cout_p).reshape(1, cout_p).astype(jnp.float32)
    if down:
        side = x_p[:, ::s, ::s, :].reshape(m2, cin_p)
        ws = _pad_mat(params["ws"], cin_p, cout_p).astype(jnp.bfloat16)
    else:
        side = x_p.reshape(m2, cin_p)        # identity side (cin_p == cout_p)
        ws = None
    side = _pad_rows(side.astype(jnp.bfloat16), m2p)
    y3, st3 = _call_stage3(y2f, w3f, b3f, side, ws, m2, tile3)
    scale3, shift3 = _bn_scale_shift(st3[..., :cout], m2, params["g3"], params["beta3"])

    # ---- bn3 apply (pass 2 of the two-pass BatchNorm), bf16 in/out
    out = _call_bn_apply(y3, _pad_vec(scale3, cout_p), _pad_vec(shift3, cout_p), tile3)
    out = out[:m2, :cout].astype(jnp.float32).reshape(n, ho, wo, cout)
    return jnp.transpose(out, (0, 3, 1, 2))   # back to NCHW (f32, module output layout)


# ---------------------------------------------------------------------------
# Pure-JAX reference (correctness check only)
# ---------------------------------------------------------------------------
def reference_forward(x_nchw, params, down):
    s = 2 if down else 1
    x = jnp.transpose(x_nchw, (0, 2, 3, 1)).astype(jnp.float32)
    cin = x.shape[-1]
    mid = params["w1"].shape[1]
    cout = params["w3"].shape[1]

    def conv(v, w_hwio, stride, pad):
        return jax.lax.conv_general_dilated(
            v, w_hwio, (stride, stride), [(pad, pad), (pad, pad)],
            dimension_numbers=("NHWC", "HWIO", "NHWC"))

    def bn(v, g, b):
        mean = v.mean(axis=(0, 1, 2), keepdims=True)
        var = jnp.square(v - mean).mean(axis=(0, 1, 2), keepdims=True)
        return g * (v - mean) / jnp.sqrt(var + BN_EPS) + b

    leaky = lambda v: jnp.where(v > 0, v, NEG_SLOPE * v)

    ori = x
    v = conv(x, params["w1"].reshape(1, 1, cin, mid), 1, 0)
    v = bn(leaky(v), params["g1"], params["beta1"])
    v = conv(v, params["w2"], s, 1) + params["b2"]
    v = bn(leaky(v), params["g2"], params["beta2"])
    v = conv(v, params["w3"].reshape(1, 1, mid, cout), 1, 0)
    if down:
        v = v + conv(ori, params["ws"].reshape(1, 1, cin, cout), s, 0)
    else:
        v = v + ori
    v = bn(leaky(v), params["g3"], params["beta3"])
    return jnp.transpose(v, (0, 3, 1, 2))


# ---------------------------------------------------------------------------
if __name__ == "__main__":
    key = jax.random.PRNGKey(0)
    kx, kp1, kp2 = jax.random.split(key, 3)
    x = jax.random.normal(kx, (2, 4, 16, 16), jnp.float32)   # NCHW, like PyTorch

    fwd = jax.jit(bottle_neck_down_forward, static_argnums=2)

    # Case A: down=False (identity side path -> outdim == indim)
    p_a = init_params(kp1, indim=4, middim=8, outdim=4, down=False)
    out_a = jax.block_until_ready(fwd(x, p_a, False))
    ref_a = reference_forward(x, p_a, False)
    assert out_a.shape == (2, 4, 16, 16)
    assert bool(jnp.allclose(out_a, ref_a, atol=0.1, rtol=0.1)), \
        float(jnp.max(jnp.abs(out_a - ref_a)))

    # Case B: down=True (stride-2 3x3 conv + stride-2 1x1 conv_side)
    p_b = init_params(kp2, indim=4, middim=8, outdim=16, down=True)
    out_b = jax.block_until_ready(fwd(x, p_b, True))
    ref_b = reference_forward(x, p_b, True)
    assert out_b.shape == (2, 16, 8, 8)
    assert bool(jnp.allclose(out_b, ref_b, atol=0.1, rtol=0.1)), \
        float(jnp.max(jnp.abs(out_b - ref_b)))

    print("KERNEL_OK")
</pallas_src>

<mosaic_0001>
module attributes {stable_mosaic.version = 11 : i64} {
  func.func @_stage1_kernel(%arg0: i32, %arg1: memref<512x128xbf16, #tpu.memory_space<vmem>>, %arg2: memref<128x128xbf16, #tpu.memory_space<vmem>>, %arg3: memref<512x128xbf16, #tpu.memory_space<vmem>>, %arg4: memref<1x2x128xf32, #tpu.memory_space<vmem>>) attributes {dimension_semantics = [#tpu.dimension_semantics<parallel>], iteration_bounds = array<i64: 1>, scalar_prefetch = 0 : i64, scratch_operands = 0 : i64, tpu.core_type = #tpu.core_type<tc>, window_params = [{transform_indices = @transform_0, window_bounds = array<i64: 512, 128>}, {pipeline_mode = #tpu.pipeline_mode<synchronous>, transform_indices = @transform_1, window_bounds = array<i64: 128, 128>}, {transform_indices = @transform_2, window_bounds = array<i64: 512, 128>}, {transform_indices = @transform_3, window_bounds = array<i64: 1, 2, 128>}]} {
    %c0 = arith.constant 0 : index
    %c0_0 = arith.constant 0 : index
    %0 = vector.load %arg1[%c0, %c0_0] : memref<512x128xbf16, #tpu.memory_space<vmem>>, vector<512x128xbf16>
    %c0_1 = arith.constant 0 : index
    %c0_2 = arith.constant 0 : index
    %1 = vector.load %arg2[%c0_1, %c0_2] : memref<128x128xbf16, #tpu.memory_space<vmem>>, vector<128x128xbf16>
    %cst = arith.constant dense<0.000000e+00> : vector<512x128xf32>
    %2 = tpu.matmul %0, %1, %cst {dimension_numbers = #tpu.dot_dimension_numbers<[1], [0], [0], [1], [0, 0, 1, 1], [], []>} : vector<512x128xbf16>, vector<128x128xbf16>, vector<512x128xf32> -> vector<512x128xf32>
    %cst_3 = arith.constant 0.000000e+00 : f32
    %3 = vector.broadcast %cst_3 : f32 to vector<512x128xf32>
    %4 = arith.cmpf ogt, %2, %3 : vector<512x128xf32>
    %cst_4 = arith.constant 0.00999999977 : f32
    %5 = vector.broadcast %cst_4 : f32 to vector<512x128xf32>
    %6 = arith.mulf %5, %2 : vector<512x128xf32>
    %7 = arith.select %4, %2, %6 : vector<512x128xi1>, vector<512x128xf32>
    %8 = arith.truncf %7 : vector<512x128xf32> to vector<512x128xbf16>
    %c0_5 = arith.constant 0 : index
    %c0_6 = arith.constant 0 : index
    %9 = vector.load %arg3[%c0_5, %c0_6] : memref<512x128xbf16, #tpu.memory_space<vmem>>, vector<512x128xbf16>
    tpu.vector_store %arg3[%c0_5, %c0_6], %8 {strides = array<i32>} : memref<512x128xbf16, #tpu.memory_space<vmem>>, vector<512x128xbf16>,
    %10 = tpu.iota {dimensions = array<i32: 0>} : vector<512x1xi32>
    %c512_i32 = arith.constant 512 : i32
    %11 = arith.muli %arg0, %c512_i32 : i32
    %12 = vector.broadcast %11 : i32 to vector<512x1xi32>
    %13 = arith.addi %10, %12 : vector<512x1xi32>
    %c512_i32_7 = arith.constant 512 : i32
    %14 = vector.broadcast %c512_i32_7 : i32 to vector<512x1xi32>
    %15 = arith.cmpi slt, %13, %14 : vector<512x1xi32>
    %cst_8 = arith.constant 0.000000e+00 : f32
    %16 = vector.shape_cast %15 : vector<512x1xi1> to vector<512x1xi1>
    %17 = vector.broadcast %16 : vector<512x1xi1> to vector<512x128xi1>
    %18 = vector.broadcast %cst_8 : f32 to vector<512x128xf32>
    %19 = arith.select %17, %7, %18 : vector<512x128xi1>, vector<512x128xf32>
    %cst_9 = arith.constant dense<0.000000e+00> : vector<128xf32>
    %20 = vector.multi_reduction <add>, %19, %cst_9 [0] : vector<512x128xf32> to vector<128xf32>
    %21 = vector.shape_cast %20 : vector<128xf32> to vector<1x128xf32>
    %22 = arith.mulf %19, %19 : vector<512x128xf32>
    %cst_10 = arith.constant dense<0.000000e+00> : vector<128xf32>
    %23 = vector.multi_reduction <add>, %22, %cst_10 [0] : vector<512x128xf32> to vector<128xf32>
    %24 = vector.shape_cast %23 : vector<128xf32> to vector<1x128xf32>
    %25 = tpu.concatenate %21, %24 in 0 : vector<1x128xf32>, vector<1x128xf32> -> vector<2x128xf32>
    %c0_11 = arith.constant 0 : index
    %c0_12 = arith.constant 0 : index
    %c0_13 = arith.constant 0 : index
    %26 = vector.load %arg4[%c0_11, %c0_12, %c0_13] : memref<1x2x128xf32, #tpu.memory_space<vmem>>, vector<1x2x128xf32>
    %27 = vector.shape_cast %26 : vector<1x2x128xf32> to vector<2x128xf32>
    %28 = vector.shape_cast %25 : vector<2x128xf32> to vector<1x2x128xf32>
    tpu.vector_store %arg4[%c0_11, %c0_12, %c0_13], %28 {strides = array<i32>} : memref<1x2x128xf32, #tpu.memory_space<vmem>>, vector<1x2x128xf32>,
    return
  }
  func.func @transform_0(%arg0: i32) -> (i32, i32) {
    %c0_i32 = arith.constant 0 : i32
    %c0_i32_0 = arith.constant 0 : i32
    return %arg0, %c0_i32 : i32, i32
  }
  func.func @transform_1(%arg0: i32) -> (i32, i32) {
    %c0_i32 = arith.constant 0 : i32
    %c0_i32_0 = arith.constant 0 : i32
    %c0_i32_1 = arith.constant 0 : i32
    return %c0_i32, %c0_i32_0 : i32, i32
  }
  func.func @transform_2(%arg0: i32) -> (i32, i32) {
    %c0_i32 = arith.constant 0 : i32
    %c0_i32_0 = arith.constant 0 : i32
    return %arg0, %c0_i32 : i32, i32
  }
  func.func @transform_3(%arg0: i32) -> (i32, i32, i32) {
    %c0_i32 = arith.constant 0 : i32
    %c0_i32_0 = arith.constant 0 : i32
    %c0_i32_1 = arith.constant 0 : i32
    return %arg0, %c0_i32, %c0_i32_0 : i32, i32, i32
  }
}

module attributes {stable_mosaic.version = 11 : i64} {
  func.func @_stage2_kernel(%arg0: i32, %arg1: memref<1x1x18x18x128xbf16, #tpu.memory_space<vmem>>, %arg2: memref<9x128x128xbf16, #tpu.memory_space<vmem>>, %arg3: memref<1x128xf32, #tpu.memory_space<vmem>>, %arg4: memref<1x256x128xbf16, #tpu.memory_space<vmem>>, %arg5: memref<1x2x128xf32, #tpu.memory_space<vmem>>) attributes {dimension_semantics = [#tpu.dimension_semantics<parallel>], iteration_bounds = array<i64: 2>, scalar_prefetch = 0 : i64, scratch_operands = 0 : i64, tpu.core_type = #tpu.core_type<tc>, window_params = [{transform_indices = @transform_0, window_bounds = array<i64: 1, 1, 18, 18, 128>}, {pipeline_mode = #tpu.pipeline_mode<synchronous>, transform_indices = @transform_1, window_bounds = array<i64: 9, 128, 128>}, {pipeline_mode = #tpu.pipeline_mode<synchronous>, transform_indices = @transform_2, window_bounds = array<i64: 1, 128>}, {transform_indices = @transform_3, window_bounds = array<i64: 1, 256, 128>}, {transform_indices = @transform_4, window_bounds = array<i64: 1, 2, 128>}]} {
    %cst = arith.constant 0.000000e+00 : f32
    %0 = vector.broadcast %cst : f32 to vector<256x128xf32>
    %cst_0 = arith.constant 0.000000e+00 : f32
    %1 = vector.broadcast %cst_0 : f32 to vector<256x128xf32>
    %c0 = arith.constant 0 : index
    %c0_1 = arith.constant 0 : index
    %c0_2 = arith.constant 0 : index
    %c0_3 = arith.constant 0 : index
    %c0_4 = arith.constant 0 : index
    %2 = vector.load %arg1[%c0, %c0_1, %c0_2, %c0_3, %c0_4] : memref<1x1x18x18x128xbf16, #tpu.memory_space<vmem>>, vector<1x1x16x16x128xbf16>
    %3 = vector.shape_cast %2 : vector<1x1x16x16x128xbf16> to vector<16x16x128xbf16>
    %4 = vector.shape_cast %3 : vector<16x16x128xbf16> to vector<256x128xbf16>
    %c0_5 = arith.constant 0 : index
    %c0_6 = arith.constant 0 : index
    %c0_7 = arith.constant 0 : index
    %5 = vector.load %arg2[%c0_5, %c0_6, %c0_7] : memref<9x128x128xbf16, #tpu.memory_space<vmem>>, vector<1x128x128xbf16>
    %6 = vector.shape_cast %5 : vector<1x128x128xbf16> to vector<128x128xbf16>
    %cst_8 = arith.constant dense<0.000000e+00> : vector<256x128xf32>
    %7 = tpu.matmul %4, %6, %cst_8 {dimension_numbers = #tpu.dot_dimension_numbers<[1], [0], [0], [1], [0, 0, 1, 1], [], []>} : vector<256x128xbf16>, vector<128x128xbf16>, vector<256x128xf32> -> vector<256x128xf32>
    %8 = arith.addf %0, %7 : vector<256x128xf32>
    %c0_9 = arith.constant 0 : index
    %c0_10 = arith.constant 0 : index
    %c0_11 = arith.constant 0 : index
    %c1 = arith.constant 1 : index
    %c0_12 = arith.constant 0 : index
    %9 = vector.load %arg1[%c0_9, %c0_10, %c0_11, %c1, %c0_12] : memref<1x1x18x18x128xbf16, #tpu.memory_space<vmem>>, vector<1x1x16x16x128xbf16>
    %10 = vector.shape_cast %9 : vector<1x1x16x16x128xbf16> to vector<16x16x128xbf16>
    %11 = vector.shape_cast %10 : vector<16x16x128xbf16> to vector<256x128xbf16>
    %c1_13 = arith.constant 1 : index
    %c0_14 = arith.constant 0 : index
    %c0_15 = arith.constant 0 : index
    %12 = vector.load %arg2[%c1_13, %c0_14, %c0_15] : memref<9x128x128xbf16, #tpu.memory_space<vmem>>, vector<1x128x128xbf16>
    %13 = vector.shape_cast %12 : vector<1x128x128xbf16> to vector<128x128xbf16>
    %cst_16 = arith.constant dense<0.000000e+00> : vector<256x128xf32>
    %14 = tpu.matmul %11, %13, %cst_16 {dimension_numbers = #tpu.dot_dimension_numbers<[1], [0], [0], [1], [0, 0, 1, 1], [], []>} : vector<256x128xbf16>, vector<128x128xbf16>, vector<256x128xf32> -> vector<256x128xf32>
    %15 = arith.addf %1, %14 : vector<256x128xf32>
    %c0_17 = arith.constant 0 : index
    %c0_18 = arith.constant 0 : index
    %c0_19 = arith.constant 0 : index
    %c2 = arith.constant 2 : index
    %c0_20 = arith.constant 0 : index
    %16 = vector.load %arg1[%c0_17, %c0_18, %c0_19, %c2, %c0_20] : memref<1x1x18x18x128xbf16, #tpu.memory_space<vmem>>, vector<1x1x16x16x128xbf16>
    %17 = vector.shape_cast %16 : vector<1x1x16x16x128xbf16> to vector<16x16x128xbf16>
    %18 = vector.shape_cast %17 : vector<16x16x128xbf16> to vector<256x128xbf16>
    %c2_21 = arith.constant 2 : index
    %c0_22 = arith.constant 0 : index
    %c0_23 = arith.constant 0 : index
    %19 = vector.load %arg2[%c2_21, %c0_22, %c0_23] : memref<9x128x128xbf16, #tpu.memory_space<vmem>>, vector<1x128x128xbf16>
    %20 = vector.shape_cast %19 : vector<1x128x128xbf16> to vector<128x128xbf16>
    %cst_24 = arith.constant dense<0.000000e+00> : vector<256x128xf32>
    %21 = tpu.matmul %18, %20, %cst_24 {dimension_numbers = #tpu.dot_dimension_numbers<[1], [0], [0], [1], [0, 0, 1, 1], [], []>} : vector<256x128xbf16>, vector<128x128xbf16>, vector<256x128xf32> -> vector<256x128xf32>
    %22 = arith.addf %8, %21 : vector<256x128xf32>
    %c0_25 = arith.constant 0 : index
    %c0_26 = arith.constant 0 : index
    %c1_27 = arith.constant 1 : index
    %c0_28 = arith.constant 0 : index
    %c0_29 = arith.constant 0 : index
    %23 = vector.load %arg1[%c0_25, %c0_26, %c1_27, %c0_28, %c0_29] : memref<1x1x18x18x128xbf16, #tpu.memory_space<vmem>>, vector<1x1x16x16x128xbf16>
    %24 = vector.shape_cast %23 : vector<1x1x16x16x128xbf16> to vector<16x16x128xbf16>
    %25 = vector.shape_cast %24 : vector<16x16x128xbf16> to vector<256x128xbf16>
    %c3 = arith.constant 3 : index
    %c0_30 = arith.constant 0 : index
    %c0_31 = arith.constant 0 : index
    %26 = vector.load %arg2[%c3, %c0_30, %c0_31] : memref<9x128x128xbf16, #tpu.memory_space<vmem>>, vector<1x128x128xbf16>
    %27 = vector.shape_cast %26 : vector<1x128x128xbf16> to vector<128x128xbf16>
    %cst_32 = arith.constant dense<0.000000e+00> : vector<256x128xf32>
    %28 = tpu.matmul %25, %27, %cst_32 {dimension_numbers = #tpu.dot_dimension_numbers<[1], [0], [0], [1], [0, 0, 1, 1], [], []>} : vector<256x128xbf16>, vector<128x128xbf16>, vector<256x128xf32> -> vector<256x128xf32>
    %29 = arith.addf %15, %28 : vector<256x128xf32>
    %c0_33 = arith.constant 0 : index
    %c0_34 = arith.constant 0 : index
    %c1_35 = arith.constant 1 : index
    %c1_36 = arith.constant 1 : index
    %c0_37 = arith.constant 0 : index
    %30 = vector.load %arg1[%c0_33, %c0_34, %c1_35, %c1_36, %c0_37] : memref<1x1x18x18x128xbf16, #tpu.memory_space<vmem>>, vector<1x1x16x16x128xbf16>
    %31 = vector.shape_cast %30 : vector<1x1x16x16x128xbf16> to vector<16x16x128xbf16>
    %32 = vector.shape_cast %31 : vector<16x16x128xbf16> to vector<256x128xbf16>
    %c4 = arith.constant 4 : index
    %c0_38 = arith.constant 0 : index
    %c0_39 = arith.constant 0 : index
    %33 = vector.load %arg2[%c4, %c0_38, %c0_39] : memref<9x128x128xbf16, #tpu.memory_space<vmem>>, vector<1x128x128xbf16>
    %34 = vector.shape_cast %33 : vector<1x128x128xbf16> to vector<128x128xbf16>
    %cst_40 = arith.constant dense<0.000000e+00> : vector<256x128xf32>
    %35 = tpu.matmul %32, %34, %cst_40 {dimension_numbers = #tpu.dot_dimension_numbers<[1], [0], [0], [1], [0, 0, 1, 1], [], []>} : vector<256x128xbf16>, vector<128x128xbf16>, vector<256x128xf32> -> vector<256x128xf32>
    %36 = arith.addf %22, %35 : vector<256x128xf32>
    %c0_41 = arith.constant 0 : index
    %c0_42 = arith.constant 0 : index
    %c1_43 = arith.constant 1 : index
    %c2_44 = arith.constant 2 : index
    %c0_45 = arith.constant 0 : index
    %37 = vector.load %arg1[%c0_41, %c0_42, %c1_43, %c2_44, %c0_45] : memref<1x1x18x18x128xbf16, #tpu.memory_space<vmem>>, vector<1x1x16x16x128xbf16>
    %38 = vector.shape_cast %37 : vector<1x1x16x16x128xbf16> to vector<16x16x128xbf16>
    %39 = vector.shape_cast %38 : vector<16x16x128xbf16> to vector<256x128xbf16>
    %c5 = arith.constant 5 : index
    %c0_46 = arith.constant 0 : index
    %c0_47 = arith.constant 0 : index
    %40 = vector.load %arg2[%c5, %c0_46, %c0_47] : memref<9x128x128xbf16, #tpu.memory_space<vmem>>, vector<1x128x128xbf16>
    %41 = vector.shape_cast %40 : vector<1x128x128xbf16> to vector<128x128xbf16>
    %cst_48 = arith.constant dense<0.000000e+00> : vector<256x128xf32>
    %42 = tpu.matmul %39, %41, %cst_48 {dimension_numbers = #tpu.dot_dimension_numbers<[1], [0], [0], [1], [0, 0, 1, 1], [], []>} : vector<256x128xbf16>, vector<128x128xbf16>, vector<256x128xf32> -> vector<256x128xf32>
    %43 = arith.addf %29, %42 : vector<256x128xf32>
    %c0_49 = arith.constant 0 : index
    %c0_50 = arith.constant 0 : index
    %c2_51 = arith.constant 2 : index
    %c0_52 = arith.constant 0 : index
    %c0_53 = arith.constant 0 : index
    %44 = vector.load %arg1[%c0_49, %c0_50, %c2_51, %c0_52, %c0_53] : memref<1x1x18x18x128xbf16, #tpu.memory_space<vmem>>, vector<1x1x16x16x128xbf16>
    %45 = vector.shape_cast %44 : vector<1x1x16x16x128xbf16> to vector<16x16x128xbf16>
    %46 = vector.shape_cast %45 : vector<16x16x128xbf16> to vector<256x128xbf16>
    %c6 = arith.constant 6 : index
    %c0_54 = arith.constant 0 : index
    %c0_55 = arith.constant 0 : index
    %47 = vector.load %arg2[%c6, %c0_54, %c0_55] : memref<9x128x128xbf16, #tpu.memory_space<vmem>>, vector<1x128x128xbf16>
    %48 = vector.shape_cast %47 : vector<1x128x128xbf16> to vector<128x128xbf16>
    %cst_56 = arith.constant dense<0.000000e+00> : vector<256x128xf32>
    %49 = tpu.matmul %46, %48, %cst_56 {dimension_numbers = #tpu.dot_dimension_numbers<[1], [0], [0], [1], [0, 0, 1, 1], [], []>} : vector<256x128xbf16>, vector<128x128xbf16>, vector<256x128xf32> -> vector<256x128xf32>
    %50 = arith.addf %36, %49 : vector<256x128xf32>
    %c0_57 = arith.constant 0 : index
    %c0_58 = arith.constant 0 : index
    %c2_59 = arith.constant 2 : index
    %c1_60 = arith.constant 1 : index
    %c0_61 = arith.constant 0 : index
    %51 = vector.load %arg1[%c0_57, %c0_58, %c2_59, %c1_60, %c0_61] : memref<1x1x18x18x128xbf16, #tpu.memory_space<vmem>>, vector<1x1x16x16x128xbf16>
    %52 = vector.shape_cast %51 : vector<1x1x16x16x128xbf16> to vector<16x16x128xbf16>
    %53 = vector.shape_cast %52 : vector<16x16x128xbf16> to vector<256x128xbf16>
    %c7 = arith.constant 7 : index
    %c0_62 = arith.constant 0 : index
    %c0_63 = arith.constant 0 : index
    %54 = vector.load %arg2[%c7, %c0_62, %c0_63] : memref<9x128x128xbf16, #tpu.memory_space<vmem>>, vector<1x128x128xbf16>
    %55 = vector.shape_cast %54 : vector<1x128x128xbf16> to vector<128x128xbf16>
    %cst_64 = arith.constant dense<0.000000e+00> : vector<256x128xf32>
    %56 = tpu.matmul %53, %55, %cst_64 {dimension_numbers = #tpu.dot_dimension_numbers<[1], [0], [0], [1], [0, 0, 1, 1], [], []>} : vector<256x128xbf16>, vector<128x128xbf16>, vector<256x128xf32> -> vector<256x128xf32>
    %57 = arith.addf %43, %56 : vector<256x128xf32>
    %c0_65 = arith.constant 0 : index
    %c0_66 = arith.constant 0 : index
    %c2_67 = arith.constant 2 : index
    %c2_68 = arith.constant 2 : index
    %c0_69 = arith.constant 0 : index
    %58 = vector.load %arg1[%c0_65, %c0_66, %c2_67, %c2_68, %c0_69] : memref<1x1x18x18x128xbf16, #tpu.memory_space<vmem>>, vector<1x1x16x16x128xbf16>
    %59 = vector.shape_cast %58 : vector<1x1x16x16x128xbf16> to vector<16x16x128xbf16>
    %60 = vector.shape_cast %59 : vector<16x16x128xbf16> to vector<256x128xbf16>
    %c8 = arith.constant 8 : index
    %c0_70 = arith.constant 0 : index
    %c0_71 = arith.constant 0 : index
    %61 = vector.load %arg2[%c8, %c0_70, %c0_71] : memref<9x128x128xbf16, #tpu.memory_space<vmem>>, vector<1x128x128xbf16>
    %62 = vector.shape_cast %61 : vector<1x128x128xbf16> to vector<128x128xbf16>
    %cst_72 = arith.constant dense<0.000000e+00> : vector<256x128xf32>
    %63 = tpu.matmul %60, %62, %cst_72 {dimension_numbers = #tpu.dot_dimension_numbers<[1], [0], [0], [1], [0, 0, 1, 1], [], []>} : vector<256x128xbf16>, vector<128x128xbf16>, vector<256x128xf32> -> vector<256x128xf32>
    %64 = arith.addf %50, %63 : vector<256x128xf32>
    %65 = arith.addf %64, %57 : vector<256x128xf32>
    %c0_73 = arith.constant 0 : index
    %c0_74 = arith.constant 0 : index
    %66 = vector.load %arg3[%c0_73, %c0_74] : memref<1x128xf32, #tpu.memory_space<vmem>>, vector<1x128xf32>
    %67 = vector.broadcast %66 : vector<1x128xf32> to vector<256x128xf32>
    %68 = arith.addf %65, %67 : vector<256x128xf32>
    %cst_75 = arith.constant 0.000000e+00 : f32
    %69 = vector.broadcast %cst_75 : f32 to vector<256x128xf32>
    %70 = arith.cmpf ogt, %68, %69 : vector<256x128xf32>
    %cst_76 = arith.constant 0.00999999977 : f32
    %71 = vector.broadcast %cst_76 : f32 to vector<256x128xf32>
    %72 = arith.mulf %71, %68 : vector<256x128xf32>
    %73 = arith.select %70, %68, %72 : vector<256x128xi1>, vector<256x128xf32>
    %74 = arith.truncf %73 : vector<256x128xf32> to vector<256x128xbf16>
    %c0_77 = arith.constant 0 : index
    %c0_78 = arith.constant 0 : index
    %c0_79 = arith.constant 0 : index
    %75 = vector.load %arg4[%c0_77, %c0_78, %c0_79] : memref<1x256x128xbf16, #tpu.memory_space<vmem>>, vector<1x256x128xbf16>
    %76 = vector.shape_cast %75 : vector<1x256x128xbf16> to vector<256x128xbf16>
    %77 = vector.shape_cast %74 : vector<256x128xbf16> to vector<1x256x128xbf16>
    tpu.vector_store %arg4[%c0_77, %c0_78, %c0_79], %77 {strides = array<i32>} : memref<1x256x128xbf16, #tpu.memory_space<vmem>>, vector<1x256x128xbf16>,
    %cst_80 = arith.constant dense<0.000000e+00> : vector<128xf32>
    %78 = vector.multi_reduction <add>, %73, %cst_80 [0] : vector<256x128xf32> to vector<128xf32>
    %79 = vector.shape_cast %78 : vector<128xf32> to vector<1x128xf32>
    %80 = arith.mulf %73, %73 : vector<256x128xf32>
    %cst_81 = arith.constant dense<0.000000e+00> : vector<128xf32>
    %81 = vector.multi_reduction <add>, %80, %cst_81 [0] : vector<256x128xf32> to vector<128xf32>
    %82 = vector.shape_cast %81 : vector<128xf32> to vector<1x128xf32>
    %83 = tpu.concatenate %79, %82 in 0 : vector<1x128xf32>, vector<1x128xf32> -> vector<2x128xf32>
    %c0_82 = arith.constant 0 : index
    %c0_83 = arith.constant 0 : index
    %c0_84 = arith.constant 0 : index
    %84 = vector.load %arg5[%c0_82, %c0_83, %c0_84] : memref<1x2x128xf32, #tpu.memory_space<vmem>>, vector<1x2x128xf32>
    %85 = vector.shape_cast %84 : vector<1x2x128xf32> to vector<2x128xf32>
    %86 = vector.shape_cast %83 : vector<2x128xf32> to vector<1x2x128xf32>
    tpu.vector_store %arg5[%c0_82, %c0_83, %c0_84], %86 {strides = array<i32>} : memref<1x2x128xf32, #tpu.memory_space<vmem>>, vector<1x2x128xf32>,
    return
  }
  func.func @transform_0(%arg0: i32) -> (i32, i32, i32, i32, i32) {
    %c0_i32 = arith.constant 0 : i32
    %c0_i32_0 = arith.constant 0 : i32
    %c0_i32_1 = arith.constant 0 : i32
    %c0_i32_2 = arith.constant 0 : i32
    %c0_i32_3 = arith.constant 0 : i32
    return %arg0, %c0_i32, %c0_i32_0, %c0_i32_1, %c0_i32_2 : i32, i32, i32, i32, i32
  }
  func.func @transform_1(%arg0: i32) -> (i32, i32, i32) {
    %c0_i32 = arith.constant 0 : i32
    %c0_i32_0 = arith.constant 0 : i32
    %c0_i32_1 = arith.constant 0 : i32
    %c0_i32_2 = arith.constant 0 : i32
    return %c0_i32, %c0_i32_0, %c0_i32_1 : i32, i32, i32
  }
  func.func @transform_2(%arg0: i32) -> (i32, i32) {
    %c0_i32 = arith.constant 0 : i32
    %c0_i32_0 = arith.constant 0 : i32
    %c0_i32_1 = arith.constant 0 : i32
    return %c0_i32, %c0_i32_0 : i32, i32
  }
  func.func @transform_3(%arg0: i32) -> (i32, i32, i32) {
    %c0_i32 = arith.constant 0 : i32
    %c0_i32_0 = arith.constant 0 : i32
    %c0_i32_1 = arith.constant 0 : i32
    return %arg0, %c0_i32, %c0_i32_0 : i32, i32, i32
  }
  func.func @transform_4(%arg0: i32) -> (i32, i32, i32) {
    %c0_i32 = arith.constant 0 : i32
    %c0_i32_0 = arith.constant 0 : i32
    %c0_i32_1 = arith.constant 0 : i32
    return %arg0, %c0_i32, %c0_i32_0 : i32, i32, i32
  }
}

module attributes {stable_mosaic.version = 11 : i64} {
  func.func @_stage3_kernel(%arg0: i32, %arg1: memref<512x128xbf16, #tpu.memory_space<vmem>>, %arg2: memref<128x128xbf16, #tpu.memory_space<vmem>>, %arg3: memref<1x128xf32, #tpu.memory_space<vmem>>, %arg4: memref<512x128xbf16, #tpu.memory_space<vmem>>, %arg5: memref<512x128xbf16, #tpu.memory_space<vmem>>, %arg6: memref<1x2x128xf32, #tpu.memory_space<vmem>>) attributes {dimension_semantics = [#tpu.dimension_semantics<parallel>], iteration_bounds = array<i64: 1>, scalar_prefetch = 0 : i64, scratch_operands = 0 : i64, tpu.core_type = #tpu.core_type<tc>, window_params = [{transform_indices = @transform_0, window_bounds = array<i64: 512, 128>}, {pipeline_mode = #tpu.pipeline_mode<synchronous>, transform_indices = @transform_1, window_bounds = array<i64: 128, 128>}, {pipeline_mode = #tpu.pipeline_mode<synchronous>, transform_indices = @transform_2, window_bounds = array<i64: 1, 128>}, {transform_indices = @transform_3, window_bounds = array<i64: 512, 128>}, {transform_indices = @transform_4, window_bounds = array<i64: 512, 128>}, {transform_indices = @transform_5, window_bounds = array<i64: 1, 2, 128>}]} {
    %c0 = arith.constant 0 : index
    %c0_0 = arith.constant 0 : index
    %0 = vector.load %arg1[%c0, %c0_0] : memref<512x128xbf16, #tpu.memory_space<vmem>>, vector<512x128xbf16>
    %c0_1 = arith.constant 0 : index
    %c0_2 = arith.constant 0 : index
    %1 = vector.load %arg2[%c0_1, %c0_2] : memref<128x128xbf16, #tpu.memory_space<vmem>>, vector<128x128xbf16>
    %cst = arith.constant dense<0.000000e+00> : vector<512x128xf32>
    %2 = tpu.matmul %0, %1, %cst {dimension_numbers = #tpu.dot_dimension_numbers<[1], [0], [0], [1], [0, 0, 1, 1], [], []>} : vector<512x128xbf16>, vector<128x128xbf16>, vector<512x128xf32> -> vector<512x128xf32>
    %c0_3 = arith.constant 0 : index
    %c0_4 = arith.constant 0 : index
    %3 = vector.load %arg3[%c0_3, %c0_4] : memref<1x128xf32, #tpu.memory_space<vmem>>, vector<1x128xf32>
    %4 = vector.broadcast %3 : vector<1x128xf32> to vector<512x128xf32>
    %5 = arith.addf %2, %4 : vector<512x128xf32>
    %c0_5 = arith.constant 0 : index
    %c0_6 = arith.constant 0 : index
    %6 = vector.load %arg4[%c0_5, %c0_6] : memref<512x128xbf16, #tpu.memory_space<vmem>>, vector<512x128xbf16>
    %7 = arith.extf %6 : vector<512x128xbf16> to vector<512x128xf32>
    %8 = arith.addf %5, %7 : vector<512x128xf32>
    %cst_7 = arith.constant 0.000000e+00 : f32
    %9 = vector.broadcast %cst_7 : f32 to vector<512x128xf32>
    %10 = arith.cmpf ogt, %8, %9 : vector<512x128xf32>
    %cst_8 = arith.constant 0.00999999977 : f32
    %11 = vector.broadcast %cst_8 : f32 to vector<512x128xf32>
    %12 = arith.mulf %11, %8 : vector<512x128xf32>
    %13 = arith.select %10, %8, %12 : vector<512x128xi1>, vector<512x128xf32>
    %14 = arith.truncf %13 : vector<512x128xf32> to vector<512x128xbf16>
    %c0_9 = arith.constant 0 : index
    %c0_10 = arith.constant 0 : index
    %15 = vector.load %arg5[%c0_9, %c0_10] : memref<512x128xbf16, #tpu.memory_space<vmem>>, vector<512x128xbf16>
    tpu.vector_store %arg5[%c0_9, %c0_10], %14 {strides = array<i32>} : memref<512x128xbf16, #tpu.memory_space<vmem>>, vector<512x128xbf16>,
    %16 = tpu.iota {dimensions = array<i32: 0>} : vector<512x1xi32>
    %c512_i32 = arith.constant 512 : i32
    %17 = arith.muli %arg0, %c512_i32 : i32
    %18 = vector.broadcast %17 : i32 to vector<512x1xi32>
    %19 = arith.addi %16, %18 : vector<512x1xi32>
    %c512_i32_11 = arith.constant 512 : i32
    %20 = vector.broadcast %c512_i32_11 : i32 to vector<512x1xi32>
    %21 = arith.cmpi slt, %19, %20 : vector<512x1xi32>
    %cst_12 = arith.constant 0.000000e+00 : f32
    %22 = vector.shape_cast %21 : vector<512x1xi1> to vector<512x1xi1>
    %23 = vector.broadcast %22 : vector<512x1xi1> to vector<512x128xi1>
    %24 = vector.broadcast %cst_12 : f32 to vector<512x128xf32>
    %25 = arith.select %23, %13, %24 : vector<512x128xi1>, vector<512x128xf32>
    %cst_13 = arith.constant dense<0.000000e+00> : vector<128xf32>
    %26 = vector.multi_reduction <add>, %25, %cst_13 [0] : vector<512x128xf32> to vector<128xf32>
    %27 = vector.shape_cast %26 : vector<128xf32> to vector<1x128xf32>
    %28 = arith.mulf %25, %25 : vector<512x128xf32>
    %cst_14 = arith.constant dense<0.000000e+00> : vector<128xf32>
    %29 = vector.multi_reduction <add>, %28, %cst_14 [0] : vector<512x128xf32> to vector<128xf32>
    %30 = vector.shape_cast %29 : vector<128xf32> to vector<1x128xf32>
    %31 = tpu.concatenate %27, %30 in 0 : vector<1x128xf32>, vector<1x128xf32> -> vector<2x128xf32>
    %c0_15 = arith.constant 0 : index
    %c0_16 = arith.constant 0 : index
    %c0_17 = arith.constant 0 : index
    %32 = vector.load %arg6[%c0_15, %c0_16, %c0_17] : memref<1x2x128xf32, #tpu.memory_space<vmem>>, vector<1x2x128xf32>
    %33 = vector.shape_cast %32 : vector<1x2x128xf32> to vector<2x128xf32>
    %34 = vector.shape_cast %31 : vector<2x128xf32> to vector<1x2x128xf32>
    tpu.vector_store %arg6[%c0_15, %c0_16, %c0_17], %34 {strides = array<i32>} : memref<1x2x128xf32, #tpu.memory_space<vmem>>, vector<1x2x128xf32>,
    return
  }
  func.func @transform_0(%arg0: i32) -> (i32, i32) {
    %c0_i32 = arith.constant 0 : i32
    %c0_i32_0 = arith.constant 0 : i32
    return %arg0, %c0_i32 : i32, i32
  }
  func.func @transform_1(%arg0: i32) -> (i32, i32) {
    %c0_i32 = arith.constant 0 : i32
    %c0_i32_0 = arith.constant 0 : i32
    %c0_i32_1 = arith.constant 0 : i32
    return %c0_i32, %c0_i32_0 : i32, i32
  }
  func.func @transform_2(%arg0: i32) -> (i32, i32) {
    %c0_i32 = arith.constant 0 : i32
    %c0_i32_0 = arith.constant 0 : i32
    %c0_i32_1 = arith.constant 0 : i32
    return %c0_i32, %c0_i32_0 : i32, i32
  }
  func.func @transform_3(%arg0: i32) -> (i32, i32) {
    %c0_i32 = arith.constant 0 : i32
    %c0_i32_0 = arith.constant 0 : i32
    return %arg0, %c0_i32 : i32, i32
  }
  func.func @transform_4(%arg0: i32) -> (i32, i32) {
    %c0_i32 = arith.constant 0 : i32
    %c0_i32_0 = arith.constant 0 : i32
    return %arg0, %c0_i32 : i32, i32
  }
  func.func @transform_5(%arg0: i32) -> (i32, i32, i32) {
    %c0_i32 = arith.constant 0 : i32
    %c0_i32_0 = arith.constant 0 : i32
    %c0_i32_1 = arith.constant 0 : i32
    return %arg0, %c0_i32, %c0_i32_0 : i32, i32, i32
  }
}

module attributes {stable_mosaic.version = 11 : i64} {
  func.func @_bn_apply_kernel(%arg0: i32, %arg1: memref<512x128xbf16, #tpu.memory_space<vmem>>, %arg2: memref<2x128xf32, #tpu.memory_space<vmem>>, %arg3: memref<512x128xbf16, #tpu.memory_space<vmem>>) attributes {dimension_semantics = [#tpu.dimension_semantics<parallel>], iteration_bounds = array<i64: 1>, scalar_prefetch = 0 : i64, scratch_operands = 0 : i64, tpu.core_type = #tpu.core_type<tc>, window_params = [{transform_indices = @transform_0, window_bounds = array<i64: 512, 128>}, {pipeline_mode = #tpu.pipeline_mode<synchronous>, transform_indices = @transform_1, window_bounds = array<i64: 2, 128>}, {transform_indices = @transform_2, window_bounds = array<i64: 512, 128>}]} {
    %c0 = arith.constant 0 : index
    %c0_0 = arith.constant 0 : index
    %0 = vector.load %arg1[%c0, %c0_0] : memref<512x128xbf16, #tpu.memory_space<vmem>>, vector<512x128xbf16>
    %1 = arith.extf %0 : vector<512x128xbf16> to vector<512x128xf32>
    %c0_1 = arith.constant 0 : index
    %c0_2 = arith.constant 0 : index
    %2 = vector.load %arg2[%c0_1, %c0_2] : memref<2x128xf32, #tpu.memory_space<vmem>>, vector<1x128xf32>
    %3 = vector.broadcast %2 : vector<1x128xf32> to vector<512x128xf32>
    %4 = arith.mulf %1, %3 : vector<512x128xf32>
    %c1 = arith.constant 1 : index
    %c0_3 = arith.constant 0 : index
    %5 = vector.load %arg2[%c1, %c0_3] : memref<2x128xf32, #tpu.memory_space<vmem>>, vector<1x128xf32>
    %6 = vector.broadcast %5 : vector<1x128xf32> to vector<512x128xf32>
    %7 = arith.addf %4, %6 : vector<512x128xf32>
    %8 = arith.truncf %7 : vector<512x128xf32> to vector<512x128xbf16>
    %c0_4 = arith.constant 0 : index
    %c0_5 = arith.constant 0 : index
    %9 = vector.load %arg3[%c0_4, %c0_5] : memref<512x128xbf16, #tpu.memory_space<vmem>>, vector<512x128xbf16>
    tpu.vector_store %arg3[%c0_4, %c0_5], %8 {strides = array<i32>} : memref<512x128xbf16, #tpu.memory_space<vmem>>, vector<512x128xbf16>,
    return
  }
  func.func @transform_0(%arg0: i32) -> (i32, i32) {
    %c0_i32 = arith.constant 0 : i32
    %c0_i32_0 = arith.constant 0 : i32
    return %arg0, %c0_i32 : i32, i32
  }
  func.func @transform_1(%arg0: i32) -> (i32, i32) {
    %c0_i32 = arith.constant 0 : i32
    %c0_i32_0 = arith.constant 0 : i32
    %c0_i32_1 = arith.constant 0 : i32
    return %c0_i32, %c0_i32_0 : i32, i32
  }
  func.func @transform_2(%arg0: i32) -> (i32, i32) {
    %c0_i32 = arith.constant 0 : i32
    %c0_i32_0 = arith.constant 0 : i32
    return %arg0, %c0_i32 : i32, i32
  }
}

</mosaic_0001>

<bundles_post_ra>
// kernel: bottle_neck_down_forward.4
= control target key start
LH: loop header
LB: loop body
LE: loop exit
PB: predicated region body
PF: predicated region fallthrough
CT: control target
= control target key end

     0   :  { %s2827_s1 = inlined_call_operand.vmem [shape: bf16[128,128], index: 1, kind: input, shape index: {}]   ;;  %s2828_s0 = inlined_call_operand.vmem [shape: bf16[512,128], index: 0, kind: input, shape index: {}]   ;;  %s2829_s2 = inlined_call_operand.vmem [shape: bf16[512,128], index: 2, kind: output, shape index: {0}]   ;;  %s2830_s3 = inlined_call_operand.vmem [shape: f32[1,2,128], index: 3, kind: output, shape index: {1}]  }
   0x1   :  { %v2230_v0 = vld [vmem:[%s2827_s1 + $0x38] sm:$0xff]   ;;  %v2231_v1 = vld [vmem:[%s2827_s1 + $0x30] sm:$0xff]   ;;  %v2232_v2 = vld [vmem:[%s2827_s1 + $0x28] sm:$0xff]  }
   0x2   :  { %2134 = vmatprep.subr.bf16.mxu0 %v2230_v0  ;;  %2214 = vmatprep.subr.bf16.mxu1 %v2230_v0  ;;  %v2233_v3 = vld [vmem:[%s2827_s1 + $0x20] sm:$0xff]   ;;  %v2234_v5 = vld [vmem:[%s2827_s1 + $0x18] sm:$0xff]   ;;  %v2235_v6 = vld [vmem:[%s2827_s1 + $0x10] sm:$0xff]  }
   0x3   :  { %2135 = vmatpush3.bf16.msra.mxu0 %v2230_v0  ;;  %2222 = vmatpush3.bf16.msra.mxu1 %v2230_v0  ;;  %v2238_v4 = vld [vmem:[%s2828_s0] sm:$0xff]   ;;  %v2236_v7 = vld [vmem:[%s2827_s1 + $0x8] sm:$0xff]   ;;  %v2240_v11 = vld [vmem:[%s2828_s0 + $0x10] sm:$0xff]  }
   0x4   :  { %2136 = vmatprep.subr.bf16.mxu0 %v2231_v1  ;;  %2215 = vmatprep.subr.bf16.mxu1 %v2231_v1  ;;  %v2253_v8 = vld [vmem:[%s2828_s0 + $0x80] sm:$0xff]   ;;  %v2239_v10 = vld [vmem:[%s2828_s0 + $0x8] sm:$0xff]   ;;  %v2256_v13 = vld [vmem:[%s2828_s0 + $0x90] sm:$0xff]  }
   0x5   :  { %2150 = vmatprep.mubr.bf16.mxu0 %v2238_v4  ;;  %v2237_v9 = vld [vmem:[%s2827_s1] sm:$0xff]   ;;  %2182 = vmatprep.mubr.bf16.mxu1 %v2253_v8  ;;  %v2255_v12 = vld [vmem:[%s2828_s0 + $0x88] sm:$0xff]   ;;  %v2241_v14 = vld [vmem:[%s2828_s0 + $0x18] sm:$0xff]  }
   0x6   :  { %v2242_v15 = vld [vmem:[%s2828_s0 + $0x20] sm:$0xff]   ;;  %v2257_v16 = vld [vmem:[%s2828_s0 + $0x98] sm:$0xff]   ;;  %v2243_v18 = vld [vmem:[%s2828_s0 + $0x28] sm:$0xff]  }
   0x7   :  { %2137 = vmatpush3.bf16.msra.mxu0 %v2231_v1  ;;  %2223 = vmatpush3.bf16.msra.mxu1 %v2231_v1  ;;  %v2258_v17 = vld [vmem:[%s2828_s0 + $0xa0] sm:$0xff]   ;;  %v2259_v19 = vld [vmem:[%s2828_s0 + $0xa8] sm:$0xff]   ;;  %v2244_v20 = vld [vmem:[%s2828_s0 + $0x30] sm:$0xff]  }
   0x8   :  { %2138 = vmatprep.subr.bf16.mxu0 %v2232_v2  ;;  %2216 = vmatprep.subr.bf16.mxu1 %v2232_v2  ;;  %v2260_v21 = vld [vmem:[%s2828_s0 + $0xb0] sm:$0xff]   ;;  %v2245_v22 = vld [vmem:[%s2828_s0 + $0x38] sm:$0xff]   ;;  %v2246_v24 = vld [vmem:[%s2828_s0 + $0x40] sm:$0xff]  }
   0x9   :  { %v2261_v23 = vld [vmem:[%s2828_s0 + $0xb8] sm:$0xff]   ;;  %v2262_v25 = vld [vmem:[%s2828_s0 + $0xc0] sm:$0xff]   ;;  %v2247_v26 = vld [vmem:[%s2828_s0 + $0x48] sm:$0xff]  }
   0xa   :  { %v2263_v27 = vld [vmem:[%s2828_s0 + $0xc8] sm:$0xff]   ;;  %v2248_v28 = vld [vmem:[%s2828_s0 + $0x50] sm:$0xff]   ;;  %v2249_v30 = vld [vmem:[%s2828_s0 + $0x58] sm:$0xff]  }
   0xb   :  { %2139 = vmatpush3.bf16.msra.mxu0 %v2232_v2  ;;  %2224 = vmatpush3.bf16.msra.mxu1 %v2232_v2  ;;  %v2264_v29 = vld [vmem:[%s2828_s0 + $0xd0] sm:$0xff]   ;;  %v2265_v31 = vld [vmem:[%s2828_s0 + $0xd8] sm:$0xff]   ;;  %v2250_v32 = vld [vmem:[%s2828_s0 + $0x60] sm:$0xff]  }
   0xc   :  { %2140 = vmatprep.subr.bf16.mxu0 %v2233_v3  ;;  %2217 = vmatprep.subr.bf16.mxu1 %v2233_v3  ;;  %v2266_v33 = vld [vmem:[%s2828_s0 + $0xe0] sm:$0xff]   ;;  %v2251_v34 = vld [vmem:[%s2828_s0 + $0x68] sm:$0xff]   ;;  %v2252_v36 = vld [vmem:[%s2828_s0 + $0x70] sm:$0xff]  }
   0xd   :  { %v2267_v35 = vld [vmem:[%s2828_s0 + $0xe8] sm:$0xff]   ;;  %v2268_v37 = vld [vmem:[%s2828_s0 + $0xf0] sm:$0xff]   ;;  %v2254_v38 = vld [vmem:[%s2828_s0 + $0x78] sm:$0xff]  }
   0xe   :  { %v2269_v39 = vld [vmem:[%s2828_s0 + $0xf8] sm:$0xff]  }
   0xf   :  { %2141 = vmatpush3.bf16.msra.mxu0 %v2233_v3  ;;  %2225 = vmatpush3.bf16.msra.mxu1 %v2233_v3 }
  0x10   :  { %2142 = vmatprep.subr.bf16.mxu0 %v2234_v5  ;;  %2218 = vmatprep.subr.bf16.mxu1 %v2234_v5 }
  0x13   :  { %2143 = vmatpush3.bf16.msra.mxu0 %v2234_v5  ;;  %2226 = vmatpush3.bf16.msra.mxu1 %v2234_v5 }
  0x14   :  { %2144 = vmatprep.subr.bf16.mxu0 %v2235_v6  ;;  %2219 = vmatprep.subr.bf16.mxu1 %v2235_v6 }
  0x17   :  { %2145 = vmatpush3.bf16.msra.mxu0 %v2235_v6  ;;  %2227 = vmatpush3.bf16.msra.mxu1 %v2235_v6 }
  0x18   :  { %2146 = vmatprep.subr.bf16.mxu0 %v2236_v7  ;;  %2220 = vmatprep.subr.bf16.mxu1 %v2236_v7 }
  0x1b   :  { %2147 = vmatpush3.bf16.msra.mxu0 %v2236_v7  ;;  %2228 = vmatpush3.bf16.msra.mxu1 %v2236_v7 }
  0x1c   :  { %2148 = vmatprep.subr.bf16.mxu0 %v2237_v9  ;;  %2221 = vmatprep.subr.bf16.mxu1 %v2237_v9 }
  0x1f   :  { %2149 = vmatpush3.bf16.msra.mxu0 %v2237_v9  ;;  %2229 = vmatpush3.bf16.msra.mxu1 %v2237_v9 }
  0x22   :  { %2151 = vmatmul.mubr.bf16.vlgmr.msra.gmra.mxu0 %v2239_v10  ;;  %2183 = vmatmul.mubr.bf16.vlgmr.msra.gmra.mxu1 %v2255_v12 }
  0x23   :  { %2154 = vmatprep.mubr.bf16.mxu0 %v2240_v11  ;;  %2186 = vmatprep.mubr.bf16.mxu1 %v2256_v13 }
  0x2a   :  { %2155 = vmatmul.mubr.bf16.gmra.mxu0 %v2241_v14  ;;  %2187 = vmatmul.mubr.bf16.gmra.mxu1 %v2257_v16 }
  0x2b   :  { %2158 = vmatprep.mubr.bf16.mxu0 %v2242_v15  ;;  %2190 = vmatprep.mubr.bf16.mxu1 %v2258_v17 }
  0x32   :  { %2159 = vmatmul.mubr.bf16.gmra.mxu0 %v2243_v18  ;;  %2191 = vmatmul.mubr.bf16.gmra.mxu1 %v2259_v19 }
  0x33   :  { %2162 = vmatprep.mubr.bf16.mxu0 %v2244_v20  ;;  %2194 = vmatprep.mubr.bf16.mxu1 %v2260_v21 }
  0x3a   :  { %2163 = vmatmul.mubr.bf16.gmra.mxu0 %v2245_v22  ;;  %2195 = vmatmul.mubr.bf16.gmra.mxu1 %v2261_v23 }
  0x3b   :  { %2166 = vmatprep.mubr.bf16.mxu0 %v2246_v24  ;;  %2198 = vmatprep.mubr.bf16.mxu1 %v2262_v25 }
  0x42   :  { %2167 = vmatmul.mubr.bf16.gmra.mxu0 %v2247_v26  ;;  %2199 = vmatmul.mubr.bf16.gmra.mxu1 %v2263_v27 }
  0x43   :  { %2170 = vmatprep.mubr.bf16.mxu0 %v2248_v28  ;;  %2202 = vmatprep.mubr.bf16.mxu1 %v2264_v29 }
  0x4a   :  { %2171 = vmatmul.mubr.bf16.gmra.mxu0 %v2249_v30  ;;  %2203 = vmatmul.mubr.bf16.gmra.mxu1 %v2265_v31 }
  0x4b   :  { %2174 = vmatprep.mubr.bf16.mxu0 %v2250_v32  ;;  %2206 = vmatprep.mubr.bf16.mxu1 %v2266_v33 }
  0x52   :  { %2175 = vmatmul.mubr.bf16.gmra.mxu0 %v2251_v34  ;;  %2207 = vmatmul.mubr.bf16.gmra.mxu1 %v2267_v35 }
  0x53   :  { %2178 = vmatprep.mubr.bf16.mxu0 %v2252_v36  ;;  %2210 = vmatprep.mubr.bf16.mxu1 %v2268_v37 }
  0x5a   :  { %2179 = vmatmul.mubr.bf16.gmra.mxu0 %v2254_v38  ;;  %2211 = vmatmul.mubr.bf16.gmra.mxu1 %v2269_v39 }
  0xe2   :  { %v2152_v40 = vpop.f32.mrf.mxu0  ;;  %v2184_v41 = vpop.f32.mrf.mxu1 }
  0xe3   :  { %v689_v42 = vmul.f32 0.01, %v2152_v40  ;;  %v721_v44 = vmul.f32 0.01, %v2184_v41  ;;  %vm625_vm0 = vcmp.gt.f32.partialorder %v2152_v40, 0.0  ;;  %vm657_vm2 = vcmp.gt.f32.partialorder %v2184_v41, 0.0 }
  0xe4   :  { %v368_v43 = vpop.f32.mrf.mxu0  ;;  %v496_v45 = vpop.f32.mrf.mxu1 }
  0xe5   :  { %vm623_vm1 = vcmp.gt.f32.partialorder %v368_v43, 0.0  ;;  %v687_v46 = vmul.f32 0.01, %v368_v43  ;;  %v753_v50 = vsel %vm625_vm0, %v2152_v40, %v689_v42  ;;  %v2410_v53 = vsel %vm657_vm2, %v2184_v41, %v721_v44 }
  0xe6   :  { %v2153_v47 = vpop.f32.mrf.mxu0  ;;  %v2185_v48 = vpop.f32.mrf.mxu1  ;;  %v719_v58 = vmul.f32 0.01, %v496_v45  ;;  %vm655_vm6 = vcmp.gt.f32.partialorder %v496_v45, 0.0  ;;  %v1593_v11 = vmul.f32 %v753_v50, %v753_v50 }
  0xe7   :  { %vm626_vm3 = vcmp.gt.f32.partialorder %v2153_v47, 0.0  ;;  %v690_v49 = vmul.f32 0.01, %v2153_v47  ;;  %vm658_vm4 = vcmp.gt.f32.partialorder %v2185_v48, 0.0  ;;  %v751_v51 = vsel %vm623_vm1, %v368_v43, %v687_v46 }
  0xe8   :  { %v371_v52 = vpop.f32.mrf.mxu0  ;;  %v722_v54 = vmul.f32 0.01, %v2185_v48  ;;  %v499_v55 = vpop.f32.mrf.mxu1  ;;  %v1591_v63 = vmul.f32 %v751_v51, %v751_v51  ;;  %v2424_v9 = vsel %vm655_vm6, %v496_v45, %v719_v58 }
  0xe9   :  { %v754_v56 = vsel %vm626_vm3, %v2153_v47, %v690_v49  ;;  %vm624_vm5 = vcmp.gt.f32.partialorder %v371_v52, 0.0  ;;  %v688_v57 = vmul.f32 0.01, %v371_v52  ;;  %vm656_vm7 = vcmp.gt.f32.partialorder %v499_v55, 0.0 }
  0xea   :  { %v1911_v59 = vpack.c.bf16 %v754_v56, %v753_v50  ;;  %v2156_v60 = vpop.f32.mrf.mxu0  ;;  %v2412_v61 = vsel %vm658_vm4, %v2185_v48, %v722_v54  ;;  %v2414_v62 = vpop.f32.mrf.mxu1  ;;  %v720_v10 = vmul.f32 0.01, %v499_v55  ;;  %v1594_v19 = vmul.f32 %v754_v56, %v754_v56 }
  0xeb   :  { %v752_v0 = vsel %vm624_vm5, %v371_v52, %v688_v57  ;;  %v1991_v1 = vpack.c.bf16 %v2412_v61, %v2410_v53  ;;  %v693_v5 = vmul.f32 0.01, %v2156_v60  ;;  %vm629_vm9 = vcmp.gt.f32.partialorder %v2156_v60, 0.0 }
  0xec   :  { %2063 = vst [vmem:[%s2829_s2 + $0x8] sm:$0xff] %v1911_v59   ;;  %v1906_v2 = vpack.c.bf16 %v752_v0, %v751_v51  ;;  %v1522_v3 = vadd.f32 %v752_v0, %v751_v51  ;;  %v1592_v4 = vmul.f32 %v752_v0, %v752_v0  ;;  %v384_v6 = vpop.f32.mrf.mxu0  ;;  %v2421_v7 = vpop.f32.mrf.mxu1  ;;  %v2435_v18 = vsel %vm656_vm7, %v499_v55, %v720_v10 }
  0xed   :  { %vm627_vm8 = vcmp.gt.f32.partialorder %v384_v6, 0.0  ;;  %v691_v8 = vmul.f32 0.01, %v384_v6  ;;  %2079 = vst [vmem:[%s2829_s2 + $0x88] sm:$0xff] %v1991_v1   ;;  %v1986_v23 = vpack.c.bf16 %v2435_v18, %v2424_v9  ;;  %v757_v25 = vsel %vm629_vm9, %v2156_v60, %v693_v5 }
  0xee   :  { %1907 = vst [vmem:[%s2829_s2] sm:$0xff] %v1906_v2   ;;  %v1523_v12 = vadd.f32 %v1522_v3, %v753_v50  ;;  %v1655_v13 = vadd.f32 %v1592_v4, %v1591_v63  ;;  %v2157_v14 = vpop.f32.mrf.mxu0  ;;  %v2432_v15 = vpop.f32.mrf.mxu1  ;;  %v725_v43 = vmul.f32 0.01, %v2414_v62  ;;  %v1597_v44 = vmul.f32 %v757_v25, %v757_v25 }
  0xef   :  { %v755_v16 = vsel %vm627_vm8, %v384_v6, %v691_v8  ;;  %vm630_vm10 = vcmp.gt.f32.partialorder %v2157_v14, 0.0  ;;  %v694_v17 = vmul.f32 0.01, %v2157_v14  ;;  %2078 = vst [vmem:[%s2829_s2 + $0x80] sm:$0xff] %v1986_v23   ;;  %vm661_vm14 = vcmp.gt.f32.partialorder %v2414_v62, 0.0 }
  0xf0   :  { %v1656_v20 = vadd.f32 %v1655_v13, %v1593_v11  ;;  %v1524_v21 = vadd.f32 %v1523_v12, %v754_v56  ;;  %v387_v22 = vpop.f32.mrf.mxu0  ;;  %v2439_v24 = vpop.f32.mrf.mxu1  ;;  %v1595_v29 = vmul.f32 %v755_v16, %v755_v16  ;;  %v2462_v60 = vsel %vm661_vm14, %v2414_v62, %v725_v43 }
  0xf1   :  { %v758_v26 = vsel %vm630_vm10, %v2157_v14, %v694_v17  ;;  %vm628_vm11 = vcmp.gt.f32.partialorder %v387_v22, 0.0  ;;  %v692_v27 = vmul.f32 0.01, %v387_v22  ;;  %vm659_vm1 = vcmp.gt.f32.partialorder %v2421_v7, 0.0 }
  0xf2   :  { %v1525_v28 = vadd.f32 %v1524_v21, %v755_v16  ;;  %v1657_v30 = vadd.f32 %v1656_v20, %v1594_v19  ;;  %v1921_v31 = vpack.c.bf16 %v758_v26, %v757_v25  ;;  %v2160_v32 = vpop.f32.mrf.mxu0  ;;  %v2444_v33 = vpop.f32.mrf.mxu1  ;;  %v1598_v51 = vmul.f32 %v758_v26, %v758_v26 }
  0xf3   :  { %v756_v34 = vsel %vm628_vm11, %v387_v22, %v692_v27  ;;  %v697_v35 = vmul.f32 0.01, %v2160_v32  ;;  %vm633_vm12 = vcmp.gt.f32.partialorder %v2160_v32, 0.0  ;;  %vm662_vm4 = vcmp.gt.f32.partialorder %v2432_v15, 0.0 }
  0xf4   :  { %v1658_v36 = vadd.f32 %v1657_v30, %v1595_v29  ;;  %2065 = vst [vmem:[%s2829_s2 + $0x18] sm:$0xff] %v1921_v31   ;;  %v1916_v37 = vpack.c.bf16 %v756_v34, %v755_v16  ;;  %v1526_v38 = vadd.f32 %v1525_v28, %v756_v34  ;;  %v1596_v39 = vmul.f32 %v756_v34, %v756_v34  ;;  %v400_v40 = vpop.f32.mrf.mxu0  ;;  %v2449_v41 = vpop.f32.mrf.mxu1 }
  0xf5   :  { %vm631_vm13 = vcmp.gt.f32.partialorder %v400_v40, 0.0  ;;  %v695_v42 = vmul.f32 0.01, %v400_v40  ;;  %v761_v54 = vsel %vm633_vm12, %v2160_v32, %v697_v35  ;;  %v723_v21 = vmul.f32 0.01, %v2421_v7 }
  0xf6   :  { %2064 = vst [vmem:[%s2829_s2 + $0x10] sm:$0xff] %v1916_v37   ;;  %v1527_v45 = vadd.f32 %v1526_v38, %v757_v25  ;;  %v1659_v46 = vadd.f32 %v1658_v36, %v1596_v39  ;;  %v2161_v47 = vpop.f32.mrf.mxu0  ;;  %v2456_v48 = vpop.f32.mrf.mxu1  ;;  %v1601_v5 = vmul.f32 %v761_v54, %v761_v54  ;;  %v726_v22 = vmul.f32 0.01, %v2432_v15 }
  0xf7   :  { %v759_v49 = vsel %vm631_vm13, %v400_v40, %v695_v42  ;;  %vm634_vm15 = vcmp.gt.f32.partialorder %v2161_v47, 0.0  ;;  %v698_v50 = vmul.f32 0.01, %v2161_v47  ;;  %vm660_vm7 = vcmp.gt.f32.partialorder %v2439_v24, 0.0 }
  0xf8   :  { %v1660_v52 = vadd.f32 %v1659_v46, %v1597_v44  ;;  %v1528_v55 = vadd.f32 %v1527_v45, %v758_v26  ;;  %v403_v56 = vpop.f32.mrf.mxu0  ;;  %v2459_v57 = vpop.f32.mrf.mxu1  ;;  %v1599_v0 = vmul.f32 %v759_v49, %v759_v49  ;;  %v2484_v32 = vsel %vm662_vm4, %v2432_v15, %v726_v22 }
  0xf9   :  { %v762_v58 = vsel %vm634_vm15, %v2161_v47, %v698_v50  ;;  %vm632_vm0 = vcmp.gt.f32.partialorder %v403_v56, 0.0  ;;  %v696_v59 = vmul.f32 0.01, %v403_v56  ;;  %v2001_v37 = vpack.c.bf16 %v2484_v32, %v2462_v60 }
  0xfa   :  { %v1529_v63 = vadd.f32 %v1528_v55, %v759_v49  ;;  %v1661_v1 = vadd.f32 %v1660_v52, %v1598_v51  ;;  %v1931_v2 = vpack.c.bf16 %v762_v58, %v761_v54  ;;  %v2164_v3 = vpop.f32.mrf.mxu0  ;;  %v2464_v4 = vpop.f32.mrf.mxu1  ;;  %v1602_v25 = vmul.f32 %v762_v58, %v762_v58 }
  0xfb   :  { %v760_v6 = vsel %vm632_vm0, %v403_v56, %v696_v59  ;;  %v701_v8 = vmul.f32 0.01, %v2164_v3  ;;  %vm637_vm2 = vcmp.gt.f32.partialorder %v2164_v3, 0.0  ;;  %2081 = vst [vmem:[%s2829_s2 + $0x98] sm:$0xff] %v2001_v37   ;;  %v2504_v55 = vsel %vm659_vm1, %v2421_v7, %v723_v21 }
  0xfc   :  { %v1662_v10 = vadd.f32 %v1661_v1, %v1599_v0  ;;  %2067 = vst [vmem:[%s2829_s2 + $0x28] sm:$0xff] %v1931_v2   ;;  %v1926_v11 = vpack.c.bf16 %v760_v6, %v759_v49  ;;  %v1530_v62 = vadd.f32 %v1529_v63, %v760_v6  ;;  %v1600_v12 = vmul.f32 %v760_v6, %v760_v6  ;;  %v416_v13 = vpop.f32.mrf.mxu0  ;;  %v2470_v14 = vpop.f32.mrf.mxu1 }
  0xfd   :  { %vm635_vm3 = vcmp.gt.f32.partialorder %v416_v13, 0.0  ;;  %v699_v16 = vmul.f32 0.01, %v416_v13  ;;  %v765_v29 = vsel %vm637_vm2, %v2164_v3, %v701_v8  ;;  %v724_v56 = vmul.f32 0.01, %v2439_v24 }
  0xfe   :  { %2066 = vst [vmem:[%s2829_s2 + $0x20] sm:$0xff] %v1926_v11   ;;  %v1531_v17 = vadd.f32 %v1530_v62, %v761_v54  ;;  %v1663_v19 = vadd.f32 %v1662_v10, %v1600_v12  ;;  %v2165_v20 = vpop.f32.mrf.mxu0  ;;  %v2478_v23 = vpop.f32.mrf.mxu1  ;;  %vm665_vm14 = vcmp.gt.f32.partialorder %v2444_v33, 0.0  ;;  %vm663_vm1 = vcmp.gt.f32.partialorder %v2449_v41, 0.0 }
  0xff   :  { %v763_v26 = vsel %vm635_vm3, %v416_v13, %v699_v16  ;;  %vm638_vm5 = vcmp.gt.f32.partialorder %v2165_v20, 0.0  ;;  %v702_v27 = vmul.f32 0.01, %v2165_v20  ;;  %v2513_v3 = vsel %vm660_vm7, %v2439_v24, %v724_v56 }
 0x100   :  { %v1664_v28 = vadd.f32 %v1663_v19, %v1601_v5  ;;  %v1532_v30 = vadd.f32 %v1531_v17, %v762_v58  ;;  %v419_v31 = vpop.f32.mrf.mxu0  ;;  %v2486_v34 = vpop.f32.mrf.mxu1  ;;  %v1603_v39 = vmul.f32 %v763_v26, %v763_v26  ;;  %v1605_v58 = vmul.f32 %v765_v29, %v765_v29 }
 0x101   :  { %v766_v35 = vsel %vm638_vm5, %v2165_v20, %v702_v27  ;;  %vm636_vm6 = vcmp.gt.f32.partialorder %v419_v31, 0.0  ;;  %v700_v36 = vmul.f32 0.01, %v419_v31  ;;  %v1996_v10 = vpack.c.bf16 %v2513_v3, %v2504_v55 }
 0x102   :  { %v1533_v38 = vadd.f32 %v1532_v30, %v763_v26  ;;  %v1665_v40 = vadd.f32 %v1664_v28, %v1602_v25  ;;  %v1941_v42 = vpack.c.bf16 %v766_v35, %v765_v29  ;;  %v2168_v43 = vpop.f32.mrf.mxu0  ;;  %v2490_v44 = vpop.f32.mrf.mxu1  ;;  %v1606_v7 = vmul.f32 %v766_v35, %v766_v35 }
 0x103   :  { %v764_v45 = vsel %vm636_vm6, %v419_v31, %v700_v36  ;;  %v705_v46 = vmul.f32 0.01, %v2168_v43  ;;  %vm641_vm9 = vcmp.gt.f32.partialorder %v2168_v43, 0.0  ;;  %2080 = vst [vmem:[%s2829_s2 + $0x90] sm:$0xff] %v1996_v10   ;;  %vm666_vm4 = vcmp.gt.f32.partialorder %v2456_v48, 0.0 }
 0x104   :  { %v1666_v15 = vadd.f32 %v1665_v40, %v1603_v39  ;;  %2069 = vst [vmem:[%s2829_s2 + $0x38] sm:$0xff] %v1941_v42   ;;  %v1936_v47 = vpack.c.bf16 %v764_v45, %v763_v26  ;;  %v1534_v49 = vadd.f32 %v1533_v38, %v764_v45  ;;  %v1604_v50 = vmul.f32 %v764_v45, %v764_v45  ;;  %v432_v51 = vpop.f32.mrf.mxu0  ;;  %v2499_v52 = vpop.f32.mrf.mxu1 }
 0x105   :  { %vm639_vm8 = vcmp.gt.f32.partialorder %v432_v51, 0.0  ;;  %v703_v54 = vmul.f32 0.01, %v432_v51  ;;  %v769_v62 = vsel %vm641_vm9, %v2168_v43, %v705_v46  ;;  %vm664_vm7 = vcmp.gt.f32.partialorder %v2459_v57, 0.0 }
 0x106   :  { %2068 = vst [vmem:[%s2829_s2 + $0x30] sm:$0xff] %v1936_v47   ;;  %v1535_v59 = vadd.f32 %v1534_v49, %v765_v29  ;;  %v1667_v63 = vadd.f32 %v1666_v15, %v1604_v50  ;;  %v2169_v0 = vpop.f32.mrf.mxu0  ;;  %v2517_v11 = vpop.f32.mrf.mxu1  ;;  %v1609_v36 = vmul.f32 %v769_v62, %v769_v62 }
 0x107   :  { %v767_v1 = vsel %vm639_vm8, %v432_v51, %v703_v54  ;;  %vm642_vm10 = vcmp.gt.f32.partialorder %v2169_v0, 0.0  ;;  %v706_v2 = vmul.f32 0.01, %v2169_v0 }
 0x108   :  { %v1668_v5 = vadd.f32 %v1667_v63, %v1605_v58  ;;  %v1536_v6 = vadd.f32 %v1535_v59, %v766_v35  ;;  %v435_v8 = vpop.f32.mrf.mxu0  ;;  %v1607_v17 = vmul.f32 %v767_v1, %v767_v1  ;;  %v2525_v30 = vpop.f32.mrf.mxu1  ;;  %v729_v35 = vmul.f32 0.01, %v2444_v33 }
 0x109   :  { %v770_v12 = vsel %vm642_vm10, %v2169_v0, %v706_v2  ;;  %vm640_vm11 = vcmp.gt.f32.partialorder %v435_v8, 0.0  ;;  %v704_v13 = vmul.f32 0.01, %v435_v8 }
 0x10a   :  { %v1537_v16 = vadd.f32 %v1536_v6, %v767_v1  ;;  %v1669_v19 = vadd.f32 %v1668_v5, %v1606_v7  ;;  %v1951_v20 = vpack.c.bf16 %v770_v12, %v769_v62  ;;  %v2172_v21 = vpop.f32.mrf.mxu0  ;;  %v1610_v43 = vmul.f32 %v770_v12, %v770_v12  ;;  %v2532_v49 = vpop.f32.mrf.mxu1 }
 0x10b   :  { %v768_v24 = vsel %vm640_vm11, %v435_v8, %v704_v13  ;;  %v709_v22 = vmul.f32 0.01, %v2172_v21  ;;  %vm645_vm12 = vcmp.gt.f32.partialorder %v2172_v21, 0.0  ;;  %v2535_v54 = vsel %vm665_vm14, %v2444_v33, %v729_v35 }
 0x10c   :  { %v1670_v25 = vadd.f32 %v1669_v19, %v1607_v17  ;;  %2071 = vst [vmem:[%s2829_s2 + $0x48] sm:$0xff] %v1951_v20   ;;  %v1946_v26 = vpack.c.bf16 %v768_v24, %v767_v1  ;;  %v1538_v27 = vadd.f32 %v1537_v16, %v768_v24  ;;  %v1608_v28 = vmul.f32 %v768_v24, %v768_v24  ;;  %v448_v29 = vpop.f32.mrf.mxu0 }
 0x10d   :  { %vm643_vm13 = vcmp.gt.f32.partialorder %v448_v29, 0.0  ;;  %v707_v31 = vmul.f32 0.01, %v448_v29  ;;  %v773_v46 = vsel %vm645_vm12, %v2172_v21, %v709_v22  ;;  %v727_v19 = vmul.f32 0.01, %v2449_v41 }
 0x10e   :  { %2070 = vst [vmem:[%s2829_s2 + $0x40] sm:$0xff] %v1946_v26   ;;  %v1539_v37 = vadd.f32 %v1538_v27, %v769_v62  ;;  %v1671_v38 = vadd.f32 %v1670_v25, %v1608_v28  ;;  %v2173_v39 = vpop.f32.mrf.mxu0  ;;  %v1613_v1 = vmul.f32 %v773_v46, %v773_v46  ;;  %v2541_v62 = vpop.f32.mrf.mxu1  ;;  %v730_v20 = vmul.f32 0.01, %v2456_v48 }
 0x10f   :  { %v771_v40 = vsel %vm643_vm13, %v448_v29, %v707_v31  ;;  %vm646_vm15 = vcmp.gt.f32.partialorder %v2173_v39, 0.0  ;;  %v710_v42 = vmul.f32 0.01, %v2173_v39  ;;  %vm669_vm12 = vcmp.gt.f32.partialorder %v2464_v4, 0.0 }
 0x110   :  { %v1672_v45 = vadd.f32 %v1671_v38, %v1609_v36  ;;  %v1540_v15 = vadd.f32 %v1539_v37, %v770_v12  ;;  %v451_v47 = vpop.f32.mrf.mxu0  ;;  %v1611_v58 = vmul.f32 %v771_v40, %v771_v40  ;;  %v2550_v29 = vsel %vm666_vm4, %v2456_v48, %v730_v20  ;;  %v2552_v31 = vpop.f32.mrf.mxu1 }
 0x111   :  { %v774_v50 = vsel %vm646_vm15, %v2173_v39, %v710_v42  ;;  %vm644_vm0 = vcmp.gt.f32.partialorder %v451_v47, 0.0  ;;  %v708_v51 = vmul.f32 0.01, %v451_v47  ;;  %v2011_v37 = vpack.c.bf16 %v2550_v29, %v2535_v54 }
 0x112   :  { %v1541_v56 = vadd.f32 %v1540_v15, %v771_v40  ;;  %v1673_v59 = vadd.f32 %v1672_v45, %v1610_v43  ;;  %v1961_v63 = vpack.c.bf16 %v774_v50, %v773_v46  ;;  %v2176_v0 = vpop.f32.mrf.mxu0  ;;  %v1614_v21 = vmul.f32 %v774_v50, %v774_v50 }
 0x113   :  { %v772_v2 = vsel %vm644_vm0, %v451_v47, %v708_v51  ;;  %v713_v7 = vmul.f32 0.01, %v2176_v0  ;;  %vm649_vm2 = vcmp.gt.f32.partialorder %v2176_v0, 0.0  ;;  %v2559_v48 = vsel %vm663_vm1, %v2449_v41, %v727_v19  ;;  %2083 = vst [vmem:[%s2829_s2 + $0xa8] sm:$0xff] %v2011_v37  }
 0x114   :  { %v1674_v5 = vadd.f32 %v1673_v59, %v1611_v58  ;;  %2073 = vst [vmem:[%s2829_s2 + $0x58] sm:$0xff] %v1961_v63   ;;  %v1956_v6 = vpack.c.bf16 %v772_v2, %v771_v40  ;;  %v1542_v8 = vadd.f32 %v1541_v56, %v772_v2  ;;  %v1612_v10 = vmul.f32 %v772_v2, %v772_v2  ;;  %v464_v33 = vpop.f32.mrf.mxu0  ;;  %v2568_v58 = vpop.f32.mrf.mxu1 }
 0x115   :  { %vm647_vm3 = vcmp.gt.f32.partialorder %v464_v33, 0.0  ;;  %v711_v12 = vmul.f32 0.01, %v464_v33  ;;  %v777_v26 = vsel %vm649_vm2, %v2176_v0, %v713_v7  ;;  %v728_v59 = vmul.f32 0.01, %v2459_v57 }
 0x116   :  { %2072 = vst [vmem:[%s2829_s2 + $0x50] sm:$0xff] %v1956_v6   ;;  %v1543_v13 = vadd.f32 %v1542_v8, %v773_v46  ;;  %v1675_v16 = vadd.f32 %v1674_v5, %v1612_v10  ;;  %v2177_v17 = vpop.f32.mrf.mxu0  ;;  %v1617_v63 = vmul.f32 %v777_v26, %v777_v26  ;;  %vm667_vm13 = vcmp.gt.f32.partialorder %v2470_v14, 0.0 }
 0x117   :  { %v775_v24 = vsel %vm647_vm3, %v464_v33, %v711_v12  ;;  %vm650_vm5 = vcmp.gt.f32.partialorder %v2177_v17, 0.0  ;;  %v714_v22 = vmul.f32 0.01, %v2177_v17  ;;  %v2577_v8 = vsel %vm664_vm7, %v2459_v57, %v728_v59 }
 0x118   :  { %v1676_v25 = vadd.f32 %v1675_v16, %v1613_v1  ;;  %v1544_v27 = vadd.f32 %v1543_v13, %v774_v50  ;;  %v467_v28 = vpop.f32.mrf.mxu0  ;;  %v1615_v39 = vmul.f32 %v775_v24, %v775_v24  ;;  %v2006_v16 = vpack.c.bf16 %v2577_v8, %v2559_v48 }
 0x119   :  { %v778_v35 = vsel %vm650_vm5, %v2177_v17, %v714_v22  ;;  %vm648_vm6 = vcmp.gt.f32.partialorder %v467_v28, 0.0  ;;  %v712_v36 = vmul.f32 0.01, %v467_v28  ;;  %v2581_v17 = vpop.f32.mrf.mxu1  ;;  %vm670_vm14 = vcmp.gt.f32.partialorder %v2478_v23, 0.0 }
 0x11a   :  { %v1545_v38 = vadd.f32 %v1544_v27, %v775_v24  ;;  %v1677_v40 = vadd.f32 %v1676_v25, %v1614_v21  ;;  %v1971_v42 = vpack.c.bf16 %v778_v35, %v777_v26  ;;  %v2180_v43 = vpop.f32.mrf.mxu0  ;;  %v1618_v0 = vmul.f32 %v778_v35, %v778_v35  ;;  %2082 = vst [vmem:[%s2829_s2 + $0xa0] sm:$0xff] %v2006_v16  }
 0x11b   :  { %v776_v45 = vsel %vm648_vm6, %v467_v28, %v712_v36  ;;  %v717_v46 = vmul.f32 0.01, %v2180_v43  ;;  %vm653_vm8 = vcmp.gt.f32.partialorder %v2180_v43, 0.0  ;;  %v731_v27 = vmul.f32 0.01, %v2470_v14 }
 0x11c   :  { %v1678_v15 = vadd.f32 %v1677_v40, %v1615_v39  ;;  %2075 = vst [vmem:[%s2829_s2 + $0x68] sm:$0xff] %v1971_v42   ;;  %v1966_v47 = vpack.c.bf16 %v776_v45, %v775_v24  ;;  %v1546_v50 = vadd.f32 %v1545_v38, %v776_v45  ;;  %v1616_v51 = vmul.f32 %v776_v45, %v776_v45  ;;  %v480_v56 = vpop.f32.mrf.mxu0  ;;  %v2593_v38 = vpop.f32.mrf.mxu1 }
 0x11d   :  { %vm651_vm9 = vcmp.gt.f32.partialorder %v480_v56, 0.0  ;;  %v715_v41 = vmul.f32 0.01, %v480_v56  ;;  %v781_v33 = vsel %vm653_vm8, %v2180_v43, %v717_v46  ;;  %v734_v40 = vmul.f32 0.01, %v2478_v23 }
 0x11e   :  { %2074 = vst [vmem:[%s2829_s2 + $0x60] sm:$0xff] %v1966_v47   ;;  %v1547_v1 = vadd.f32 %v1546_v50, %v777_v26  ;;  %v1679_v2 = vadd.f32 %v1678_v15, %v1616_v51  ;;  %v2181_v7 = vpop.f32.mrf.mxu0  ;;  %v733_v26 = vmul.f32 0.01, %v2464_v4  ;;  %v1621_v42 = vmul.f32 %v781_v33, %v781_v33 }
 0x11f   :  { %v779_v5 = vsel %vm651_vm9, %v480_v56, %v715_v41  ;;  %vm654_vm10 = vcmp.gt.f32.partialorder %v2181_v7, 0.0  ;;  %v718_v6 = vmul.f32 0.01, %v2181_v7  ;;  %v2608_v15 = vsel %vm667_vm13, %v2470_v14, %v731_v27  ;;  %v2618_v41 = vpop.f32.mrf.mxu1 }
 0x120   :  { %v1680_v10 = vadd.f32 %v1679_v2, %v1617_v63  ;;  %v1548_v12 = vadd.f32 %v1547_v1, %v778_v35  ;;  %v483_v13 = vpop.f32.mrf.mxu0  ;;  %v1619_v24 = vmul.f32 %v779_v5, %v779_v5  ;;  %v2598_v39 = vsel %vm669_vm12, %v2464_v4, %v733_v26 }
 0x121   :  { %v782_v19 = vsel %vm654_vm10, %v2181_v7, %v718_v6  ;;  %vm652_vm11 = vcmp.gt.f32.partialorder %v483_v13, 0.0  ;;  %v716_v20 = vmul.f32 0.01, %v483_v13  ;;  %v2611_v4 = vsel %vm670_vm14, %v2478_v23, %v734_v40 }
 0x122   :  { %v1549_v21 = vadd.f32 %v1548_v12, %v779_v5  ;;  %v1681_v22 = vadd.f32 %v1680_v10, %v1618_v0  ;;  %v1981_v25 = vpack.c.bf16 %v782_v19, %v781_v33  ;;  %v1622_v43 = vmul.f32 %v782_v19, %v782_v19 }
 0x123   :  { %v780_v57 = vsel %vm652_vm11, %v483_v13, %v716_v20  ;;  %vm668_vm15 = vcmp.gt.f32.partialorder %v2486_v34, 0.0  ;;  %v732_v47 = vmul.f32 0.01, %v2486_v34  ;;  %v2021_v56 = vpack.c.bf16 %v2611_v4, %v2598_v39 }
 0x124   :  { %v1682_v28 = vadd.f32 %v1681_v22, %v1619_v24  ;;  %2077 = vst [vmem:[%s2829_s2 + $0x78] sm:$0xff] %v1981_v25   ;;  %v1976_v35 = vpack.c.bf16 %v780_v57, %v779_v5  ;;  %v1550_v36 = vadd.f32 %v1549_v21, %v780_v57  ;;  %v1620_v37 = vmul.f32 %v780_v57, %v780_v57 }
 0x125   :  { %vm673_vm0 = vcmp.gt.f32.partialorder %v2490_v44, 0.0  ;;  %v1623_v14 = vmul.f32 %v2424_v9, %v2424_v9  ;;  %v2623_v59 = vsel %vm668_vm15, %v2486_v34, %v732_v47  ;;  %v737_v23 = vmul.f32 0.01, %v2490_v44  ;;  %2085 = vst [vmem:[%s2829_s2 + $0xb8] sm:$0xff] %v2021_v56  }
 0x126   :  { %2076 = vst [vmem:[%s2829_s2 + $0x70] sm:$0xff] %v1976_v35   ;;  %v1551_v45 = vadd.f32 %v1550_v36, %v781_v33  ;;  %v1683_v46 = vadd.f32 %v1682_v28, %v1620_v37  ;;  %v735_v63 = vmul.f32 0.01, %v2499_v52  ;;  %v2016_v2 = vpack.c.bf16 %v2623_v59, %v2608_v15  ;;  %v2647_v33 = vpop.f32.mrf.mxu1 }
 0x127   :  { %vm671_vm1 = vcmp.gt.f32.partialorder %v2499_v52, 0.0  ;;  %v2635_v7 = vsel %vm673_vm0, %v2490_v44, %v737_v23  ;;  %vm674_vm2 = vcmp.gt.f32.partialorder %v2517_v11, 0.0  ;;  %v738_v34 = vmul.f32 0.01, %v2517_v11 }
 0x128   :  { %v1552_v50 = vadd.f32 %v1551_v45, %v782_v19  ;;  %v1684_v51 = vadd.f32 %v1683_v46, %v1621_v42  ;;  %v1625_v5 = vmul.f32 %v2410_v53, %v2410_v53  ;;  %v1624_v6 = vmul.f32 %v2435_v18, %v2435_v18  ;;  %2084 = vst [vmem:[%s2829_s2 + $0xb0] sm:$0xff] %v2016_v2   ;;  %v2212_v25 = vpop.f32.mrf.mxu1 }
 0x129   :  { %v2650_v44 = vsel %vm671_vm1, %v2499_v52, %v735_v63  ;;  %v2653_v12 = vsel %vm674_vm2, %v2517_v11, %v738_v34  ;;  %vm672_vm3 = vcmp.gt.f32.partialorder %v2525_v30, 0.0  ;;  %v736_v13 = vmul.f32 0.01, %v2525_v30 }
 0x12a   :  { %v1685_v0 = vadd.f32 %v1684_v51, %v1622_v43  ;;  %v1553_v1 = vadd.f32 %v1552_v50, %v2424_v9  ;;  %v2031_v19 = vpack.c.bf16 %v2653_v12, %v2635_v7  ;;  %vm677_vm4 = vcmp.gt.f32.partialorder %v2532_v49, 0.0  ;;  %v608_v42 = vpop.f32.mrf.mxu1 }
 0x12b   :  { %v1626_v20 = vmul.f32 %v2412_v61, %v2412_v61  ;;  %v2664_v52 = vsel %vm672_vm3, %v2525_v30, %v736_v13  ;;  %v741_v11 = vmul.f32 0.01, %v2532_v49  ;;  %v739_v21 = vmul.f32 0.01, %v2541_v62 }
 0x12c   :  { %v1554_v9 = vadd.f32 %v1553_v1, %v2435_v18  ;;  %v1686_v10 = vadd.f32 %v1685_v0, %v1623_v14  ;;  %2087 = vst [vmem:[%s2829_s2 + $0xc8] sm:$0xff] %v2031_v19   ;;  %vm675_vm5 = vcmp.gt.f32.partialorder %v2541_v62, 0.0  ;;  %vm678_vm6 = vcmp.gt.f32.partialorder %v2552_v31, 0.0  ;;  %v2213_v23 = vpop.f32.mrf.mxu1 }
 0x12d   :  { %v2676_v30 = vsel %vm677_vm4, %v2532_v49, %v741_v11  ;;  %v742_v57 = vmul.f32 0.01, %v2552_v31  ;;  %v1628_v28 = vmul.f32 %v2513_v3, %v2513_v3  ;;  %v2689_v49 = vsel %vm675_vm5, %v2541_v62, %v739_v21 }
 0x12e   :  { %v1555_v16 = vadd.f32 %v1554_v9, %v2410_v53  ;;  %v1687_v18 = vadd.f32 %v1686_v10, %v1624_v6  ;;  %v2026_v53 = vpack.c.bf16 %v2664_v52, %v2650_v44  ;;  %vm676_vm7 = vcmp.gt.f32.partialorder %v2568_v58, 0.0  ;;  %v611_v10 = vpop.f32.mrf.mxu1 }
 0x12f   :  { %v2692_v35 = vsel %vm678_vm6, %v2552_v31, %v742_v57  ;;  %v740_v36 = vmul.f32 0.01, %v2568_v58  ;;  %vm681_vm8 = vcmp.gt.f32.partialorder %v2581_v17, 0.0  ;;  %v1629_v62 = vmul.f32 %v2462_v60, %v2462_v60 }
 0x130   :  { %v1688_v24 = vadd.f32 %v1687_v18, %v1625_v5  ;;  %v1556_v22 = vadd.f32 %v1555_v16, %v2412_v61  ;;  %v1627_v61 = vmul.f32 %v2504_v55, %v2504_v55  ;;  %2086 = vst [vmem:[%s2829_s2 + $0xc0] sm:$0xff] %v2026_v53   ;;  %v2041_v40 = vpack.c.bf16 %v2692_v35, %v2676_v30 }
 0x131   :  { %v2703_v43 = vsel %vm676_vm7, %v2568_v58, %v740_v36  ;;  %v745_v31 = vmul.f32 0.01, %v2581_v17  ;;  %v743_v45 = vmul.f32 0.01, %v2593_v38  ;;  %vm679_vm9 = vcmp.gt.f32.partialorder %v2593_v38, 0.0 }
 0x132   :  { %v1557_v26 = vadd.f32 %v1556_v22, %v2504_v55  ;;  %v1689_v27 = vadd.f32 %v1688_v24, %v1626_v20  ;;  %2089 = vst [vmem:[%s2829_s2 + $0xd8] sm:$0xff] %v2041_v40   ;;  %vm682_vm10 = vcmp.gt.f32.partialorder %v2618_v41, 0.0  ;;  %v746_v58 = vmul.f32 0.01, %v2618_v41 }
 0x133   :  { %v2715_v50 = vsel %vm681_vm8, %v2581_v17, %v745_v31  ;;  %v1631_v14 = vmul.f32 %v2559_v48, %v2559_v48  ;;  %v2728_v17 = vsel %vm679_vm9, %v2593_v38, %v743_v45  ;;  %vm680_vm11 = vcmp.gt.f32.partialorder %v2647_v33, 0.0 }
 0x134   :  { %v1690_v37 = vadd.f32 %v1689_v27, %v1627_v61  ;;  %v1558_v55 = vadd.f32 %v1557_v26, %v2513_v3  ;;  %v2036_v3 = vpack.c.bf16 %v2703_v43, %v2689_v49  ;;  %v2731_v63 = vsel %vm682_vm10, %v2618_v41, %v746_v58 }
 0x135   :  { %v744_v0 = vmul.f32 0.01, %v2647_v33  ;;  %v2051_v2 = vpack.c.bf16 %v2731_v63, %v2715_v50  ;;  %vm685_vm12 = vcmp.gt.f32.partialorder %v2212_v25, 0.0  ;;  %v1632_v34 = vmul.f32 %v2577_v8, %v2577_v8 }
 0x136   :  { %v1559_v46 = vadd.f32 %v1558_v55, %v2462_v60  ;;  %v1691_v47 = vadd.f32 %v1690_v37, %v1628_v28  ;;  %v1630_v60 = vmul.f32 %v2484_v32, %v2484_v32  ;;  %2088 = vst [vmem:[%s2829_s2 + $0xd0] sm:$0xff] %v2036_v3   ;;  %v749_v5 = vmul.f32 0.01, %v2212_v25 }
 0x137   :  { %v2741_v38 = vsel %vm680_vm11, %v2647_v33, %v744_v0  ;;  %v747_v41 = vmul.f32 0.01, %v608_v42  ;;  %2091 = vst [vmem:[%s2829_s2 + $0xe8] sm:$0xff] %v2051_v2   ;;  %vm683_vm13 = vcmp.gt.f32.partialorder %v608_v42, 0.0  ;;  %vm686_vm14 = vcmp.gt.f32.partialorder %v2213_v23, 0.0 }
 0x138   :  { %v1692_v51 = vadd.f32 %v1691_v47, %v1629_v62  ;;  %v1560_v56 = vadd.f32 %v1559_v46, %v2484_v32  ;;  %v2749_v13 = vsel %vm685_vm12, %v2212_v25, %v749_v5  ;;  %v750_v16 = vmul.f32 0.01, %v2213_v23 }
 0x139   :  { %v1633_v33 = vmul.f32 %v2535_v54, %v2535_v54  ;;  %vm684_vm15 = vcmp.gt.f32.partialorder %v611_v10, 0.0  ;;  %v748_v11 = vmul.f32 0.01, %v611_v10  ;;  %v1634_v21 = vmul.f32 %v2550_v29, %v2550_v29 }
 0x13a   :  { %v1561_v32 = vadd.f32 %v1560_v56, %v2559_v48  ;;  %v1693_v1 = vadd.f32 %v1692_v51, %v1630_v60  ;;  %v2046_v48 = vpack.c.bf16 %v2741_v38, %v2728_v17  ;;  %v2757_v20 = vsel %vm686_vm14, %v2213_v23, %v750_v16 }
 0x13b   :  { %v2061_v53 = vpack.c.bf16 %v2757_v20, %v2749_v13  ;;  %v1635_v57 = vmul.f32 %v2608_v15, %v2608_v15  ;;  %v1637_v36 = vmul.f32 %v2598_v39, %v2598_v39  ;;  %v1638_v55 = vmul.f32 %v2611_v4, %v2611_v4 }
 0x13c   :  { %v1694_v9 = vadd.f32 %v1693_v1, %v1631_v14  ;;  %v1562_v6 = vadd.f32 %v1561_v32, %v2577_v8  ;;  %2090 = vst [vmem:[%s2829_s2 + $0xe0] sm:$0xff] %v2046_v48   ;;  %v811_v8 = vsel %vm683_vm13, %v608_v42, %v747_v41  ;;  %v1640_v47 = vmul.f32 %v2664_v52, %v2664_v52 }
 0x13d   :  { %2093 = vst [vmem:[%s2829_s2 + $0xf8] sm:$0xff] %v2061_v53   ;;  %v1643_v56 = vmul.f32 %v2689_v49, %v2689_v49  ;;  %v1644_v0 = vmul.f32 %v2703_v43, %v2703_v43  ;;  %v1647_v5 = vmul.f32 %v2728_v17, %v2728_v17  ;;  %vm1724_vm0 = vcmask 1040384  }
 0x13e   :  { %v1563_v18 = vadd.f32 %v1562_v6, %v2535_v54  ;;  %v1695_v19 = vadd.f32 %v1694_v9, %v1632_v34  ;;  %v812_v54 = vsel %vm684_vm15, %v611_v10, %v748_v11  ;;  %v1648_v6 = vmul.f32 %v2741_v38, %v2741_v38 }
 0x13f   :  { %v2056_v61 = vpack.c.bf16 %v812_v54, %v811_v8 }
 0x140   :  { %v1696_v24 = vadd.f32 %v1695_v19, %v1633_v33  ;;  %v1564_v22 = vadd.f32 %v1563_v18, %v2550_v29  ;;  %v1636_v29 = vmul.f32 %v2623_v59, %v2623_v59  ;;  %v1651_v18 = vmul.f32 %v811_v8, %v811_v8 }
 0x141   :  { %2092 = vst [vmem:[%s2829_s2 + $0xf0] sm:$0xff] %v2056_v61  }
 0x142   :  { %v1565_v25 = vadd.f32 %v1564_v22, %v2608_v15  ;;  %v1697_v26 = vadd.f32 %v1696_v24, %v1634_v21  ;;  %v1652_v24 = vmul.f32 %v812_v54, %v812_v54 }
 0x144   :  { %v1698_v27 = vadd.f32 %v1697_v26, %v1635_v57  ;;  %v1566_v28 = vadd.f32 %v1565_v25, %v2623_v59  ;;  %v1639_v59 = vmul.f32 %v2650_v44, %v2650_v44 }
 0x146   :  { %v1567_v15 = vadd.f32 %v1566_v28, %v2598_v39  ;;  %v1699_v37 = vadd.f32 %v1698_v27, %v1636_v29  ;;  %v1641_v39 = vmul.f32 %v2635_v7, %v2635_v7 }
 0x148   :  { %v1700_v40 = vadd.f32 %v1699_v37, %v1637_v36  ;;  %v1568_v42 = vadd.f32 %v1567_v15, %v2611_v4  ;;  %v1642_v4 = vmul.f32 %v2653_v12, %v2653_v12 }
 0x14a   :  { %v1569_v62 = vadd.f32 %v1568_v42, %v2650_v44  ;;  %v1701_v31 = vadd.f32 %v1700_v40, %v1638_v55 }
 0x14c   :  { %v1702_v45 = vadd.f32 %v1701_v31, %v1639_v59  ;;  %v1570_v46 = vadd.f32 %v1569_v62, %v2664_v52 }
 0x14e   :  { %v1571_v3 = vadd.f32 %v1570_v46, %v2635_v7  ;;  %v1703_v58 = vadd.f32 %v1702_v45, %v1640_v47  ;;  %v1645_v7 = vmul.f32 %v2676_v30, %v2676_v30 }
 0x150   :  { %v1704_v60 = vadd.f32 %v1703_v58, %v1641_v39  ;;  %v1572_v51 = vadd.f32 %v1571_v3, %v2653_v12  ;;  %v1646_v12 = vmul.f32 %v2692_v35, %v2692_v35 }
 0x152   :  { %v1573_v44 = vadd.f32 %v1572_v51, %v2689_v49  ;;  %v1705_v14 = vadd.f32 %v1704_v60, %v1642_v4 }
 0x154   :  { %v1706_v23 = vadd.f32 %v1705_v14, %v1643_v56  ;;  %v1574_v52 = vadd.f32 %v1573_v44, %v2703_v43 }
 0x156   :  { %v1575_v32 = vadd.f32 %v1574_v52, %v2676_v30  ;;  %v1707_v1 = vadd.f32 %v1706_v23, %v1644_v0  ;;  %v1649_v30 = vmul.f32 %v2715_v50, %v2715_v50 }
 0x158   :  { %v1708_v2 = vadd.f32 %v1707_v1, %v1645_v7  ;;  %v1576_v34 = vadd.f32 %v1575_v32, %v2692_v35  ;;  %v1650_v35 = vmul.f32 %v2731_v63, %v2731_v63 }
 0x15a   :  { %v1577_v49 = vadd.f32 %v1576_v34, %v2728_v17  ;;  %v1709_v41 = vadd.f32 %v1708_v2, %v1646_v12 }
 0x15c   :  { %v1710_v9 = vadd.f32 %v1709_v41, %v1647_v5  ;;  %v1578_v43 = vadd.f32 %v1577_v49, %v2741_v38  ;;  %v1653_v38 = vmul.f32 %v2749_v13, %v2749_v13 }
 0x15e   :  { %v1579_v48 = vadd.f32 %v1578_v43, %v2715_v50  ;;  %v1711_v10 = vadd.f32 %v1710_v9, %v1648_v6  ;;  %v1654_v50 = vmul.f32 %v2757_v20, %v2757_v20 }
 0x160   :  { %v1712_v16 = vadd.f32 %v1711_v10, %v1649_v30  ;;  %v1580_v33 = vadd.f32 %v1579_v48, %v2731_v63 }
 0x162   :  { %v1581_v17 = vadd.f32 %v1580_v33, %v811_v8  ;;  %v1713_v19 = vadd.f32 %v1712_v16, %v1650_v35 }
 0x164   :  { %v1714_v11 = vadd.f32 %v1713_v19, %v1651_v18  ;;  %v1582_v21 = vadd.f32 %v1581_v17, %v812_v54 }
 0x166   :  { %v1583_v22 = vadd.f32 %v1582_v21, %v2749_v13  ;;  %v1715_v53 = vadd.f32 %v1714_v11, %v1652_v24 }
 0x168   :  { %v1584_v25 = vadd.f32 %v1583_v22, %v2757_v20  ;;  %v1716_v57 = vadd.f32 %v1715_v53, %v1653_v38 }
 0x16a   :  { %v1585_v26 = vrot.slane %v1584_v25, 4  ;;  %v1717_v63 = vadd.f32 %v1716_v57, %v1654_v50 }
 0x16c   :  { %v1586_v61 = vadd.f32 %v1585_v26, %v1584_v25  ;;  %v1718_v8 = vrot.slane %v1717_v63, 4 }
 0x16e   :  { %v1587_v27 = vrot.slane %v1586_v61, 2  ;;  %v1719_v28 = vadd.f32 %v1718_v8, %v1717_v63 }
 0x170   :  { %v1588_v29 = vadd.f32 %v1587_v27, %v1586_v61  ;;  %v1720_v54 = vrot.slane %v1719_v28, 2 }
 0x172   :  { %v1589_v36 = vrot.slane %v1588_v29, 1  ;;  %v1721_v15 = vadd.f32 %v1720_v54, %v1719_v28 }
 0x174   :  { %v1722_v37 = vrot.slane %v1721_v15, 1  ;;  %v1590_v13 = vadd.f32 %v1589_v36, %v1588_v29 }
 0x176   :  { %v1723_v55 = vadd.f32 %v1722_v37, %v1721_v15 }
 0x178   :  { %v1725_v40 = vsel %vm1724_vm0, %v1590_v13, %v1723_v55 }
 0x179   :  { %1726 = vst [vmem:[%s2830_s3] sm:$0x3] %v1725_v40 }

// kernel: bottle_neck_down_forward.7
= control target key start
LH: loop header
LB: loop body
LE: loop exit
PB: predicated region body
PF: predicated region fallthrough
CT: control target
= control target key end

     0   :  { %s1426_s0 = inlined_call_operand.vmem [shape: bf16[512,128], index: 0, kind: input, shape index: {}]   ;;  %s1427_s1 = inlined_call_operand.vmem [shape: f32[2,128], index: 1, kind: input, shape index: {}]   ;;  %s1428_s2 = inlined_call_operand.vmem [shape: bf16[512,128], index: 2, kind: output, shape index: {}]  }
   0x1   :  { %v732_v0 = vld [vmem:[%s1426_s0] sm:$0xff]   ;;  %v1019_v4 = vld [vmem:[%s1426_s0 + $0x8] sm:$0xff]   ;;  %v1020_v5 = vld [vmem:[%s1426_s0 + $0x10] sm:$0xff]  }
   0x2   :  { %v1102_v1 = vld [vmem:[%s1427_s1] ss:$0 sm:$0xff]  ;;  %v733_v2 = vunpack.c.l.bf16 %v732_v0  ;;  %v734_v3 = vunpack.c.h.bf16 %v732_v0  ;;  %v1021_v6 = vld [vmem:[%s1426_s0 + $0x18] sm:$0xff]   ;;  %v1116_v7 = vld [vmem:[%s1427_s1 + $0x1] ss:$0 sm:$0xff]  ;;  %v737_v8 = vunpack.c.l.bf16 %v1019_v4  ;;  %v738_v9 = vunpack.c.h.bf16 %v1019_v4 }
   0x3   :  { %v741_v10 = vunpack.c.l.bf16 %v1020_v5  ;;  %v742_v11 = vunpack.c.h.bf16 %v1020_v5  ;;  %v745_v14 = vunpack.c.l.bf16 %v1021_v6  ;;  %v746_v15 = vunpack.c.h.bf16 %v1021_v6  ;;  %v1022_v20 = vld [vmem:[%s1426_s0 + $0x20] sm:$0xff]   ;;  %v1023_v25 = vld [vmem:[%s1426_s0 + $0x28] sm:$0xff]   ;;  %v1024_v30 = vld [vmem:[%s1426_s0 + $0x30] sm:$0xff]  }
   0x4   :  { %v144_v12 = vmul.f32 %v733_v2, %v1102_v1  ;;  %v145_v13 = vmul.f32 %v734_v3, %v1102_v1  ;;  %v146_v16 = vmul.f32 %v737_v8, %v1102_v1  ;;  %v147_v17 = vmul.f32 %v738_v9, %v1102_v1  ;;  %v1025_v35 = vld [vmem:[%s1426_s0 + $0x38] sm:$0xff]   ;;  %v1026_v48 = vld [vmem:[%s1426_s0 + $0x40] sm:$0xff]   ;;  %v1027_v57 = vld [vmem:[%s1426_s0 + $0x48] sm:$0xff]  }
   0x5   :  { %v148_v18 = vmul.f32 %v741_v10, %v1102_v1  ;;  %v149_v19 = vmul.f32 %v742_v11, %v1102_v1  ;;  %v150_v23 = vmul.f32 %v745_v14, %v1102_v1  ;;  %v151_v24 = vmul.f32 %v746_v15, %v1102_v1  ;;  %v1028_v62 = vld [vmem:[%s1426_s0 + $0x50] sm:$0xff]   ;;  %v1029_v9 = vld [vmem:[%s1426_s0 + $0x58] sm:$0xff]   ;;  %v1030_v14 = vld [vmem:[%s1426_s0 + $0x60] sm:$0xff]  }
   0x6   :  { %v213_v21 = vadd.f32 %v1116_v7, %v144_v12  ;;  %v214_v22 = vadd.f32 %v1116_v7, %v145_v13  ;;  %v215_v26 = vadd.f32 %v1116_v7, %v146_v16  ;;  %v216_v27 = vadd.f32 %v1116_v7, %v147_v17 }
   0x7   :  { %v217_v28 = vadd.f32 %v1116_v7, %v148_v18  ;;  %v218_v29 = vadd.f32 %v1116_v7, %v149_v19  ;;  %v219_v32 = vadd.f32 %v1116_v7, %v150_v23  ;;  %v220_v33 = vadd.f32 %v1116_v7, %v151_v24 }
   0x8   :  { %v862_v31 = vpack.c.bf16 %v214_v22, %v213_v21  ;;  %v749_v34 = vunpack.c.l.bf16 %v1022_v20  ;;  %v867_v36 = vpack.c.bf16 %v216_v27, %v215_v26  ;;  %v750_v38 = vunpack.c.h.bf16 %v1022_v20  ;;  %v1031_v27 = vld [vmem:[%s1426_s0 + $0x68] sm:$0xff]  }
   0x9   :  { %v872_v37 = vpack.c.bf16 %v218_v29, %v217_v28  ;;  %v753_v39 = vunpack.c.l.bf16 %v1023_v25  ;;  %v877_v40 = vpack.c.bf16 %v220_v33, %v219_v32  ;;  %v754_v42 = vunpack.c.h.bf16 %v1023_v25 }
   0xa   :  { %863 = vst [vmem:[%s1428_s2] sm:$0xff] %v862_v31   ;;  %v152_v41 = vmul.f32 %v749_v34, %v1102_v1  ;;  %v757_v43 = vunpack.c.l.bf16 %v1024_v30  ;;  %1050 = vst [vmem:[%s1428_s2 + $0x8] sm:$0xff] %v867_v36   ;;  %v153_v44 = vmul.f32 %v750_v38, %v1102_v1  ;;  %v758_v46 = vunpack.c.h.bf16 %v1024_v30  ;;  %v1032_v36 = vld [vmem:[%s1426_s0 + $0x70] sm:$0xff]  }
   0xb   :  { %1051 = vst [vmem:[%s1428_s2 + $0x10] sm:$0xff] %v872_v37   ;;  %v154_v45 = vmul.f32 %v753_v39, %v1102_v1  ;;  %v761_v47 = vunpack.c.l.bf16 %v1025_v35  ;;  %1052 = vst [vmem:[%s1428_s2 + $0x18] sm:$0xff] %v877_v40   ;;  %v155_v50 = vmul.f32 %v754_v42, %v1102_v1  ;;  %v762_v52 = vunpack.c.h.bf16 %v1025_v35 }
   0xc   :  { %v221_v49 = vadd.f32 %v1116_v7, %v152_v41  ;;  %v156_v51 = vmul.f32 %v757_v43, %v1102_v1  ;;  %v222_v53 = vadd.f32 %v1116_v7, %v153_v44  ;;  %v157_v55 = vmul.f32 %v758_v46, %v1102_v1  ;;  %v1033_v41 = vld [vmem:[%s1426_s0 + $0x78] sm:$0xff]  }
   0xd   :  { %v223_v54 = vadd.f32 %v1116_v7, %v154_v45  ;;  %v158_v56 = vmul.f32 %v761_v47, %v1102_v1  ;;  %v224_v58 = vadd.f32 %v1116_v7, %v155_v50  ;;  %v159_v60 = vmul.f32 %v762_v52, %v1102_v1  ;;  %v1034_v50 = vld [vmem:[%s1426_s0 + $0x80] sm:$0xff]  }
   0xe   :  { %v225_v59 = vadd.f32 %v1116_v7, %v156_v51  ;;  %v765_v61 = vunpack.c.l.bf16 %v1026_v48  ;;  %v882_v63 = vpack.c.bf16 %v222_v53, %v221_v49  ;;  %v226_v0 = vadd.f32 %v1116_v7, %v157_v55 }
   0xf   :  { %v227_v2 = vadd.f32 %v1116_v7, %v158_v56  ;;  %v766_v3 = vunpack.c.h.bf16 %v1026_v48  ;;  %v887_v4 = vpack.c.bf16 %v224_v58, %v223_v54  ;;  %v228_v5 = vadd.f32 %v1116_v7, %v159_v60 }
  0x10   :  { %v160_v6 = vmul.f32 %v765_v61, %v1102_v1  ;;  %v769_v8 = vunpack.c.l.bf16 %v1027_v57  ;;  %1053 = vst [vmem:[%s1428_s2 + $0x20] sm:$0xff] %v882_v63   ;;  %v892_v10 = vpack.c.bf16 %v226_v0, %v225_v59  ;;  %v770_v12 = vunpack.c.h.bf16 %v1027_v57  ;;  %v1035_v59 = vld [vmem:[%s1426_s0 + $0x88] sm:$0xff]   ;;  %v1036_v0 = vld [vmem:[%s1426_s0 + $0x90] sm:$0xff]  }
  0x11   :  { %v161_v11 = vmul.f32 %v766_v3, %v1102_v1  ;;  %v773_v13 = vunpack.c.l.bf16 %v1028_v62  ;;  %1054 = vst [vmem:[%s1428_s2 + $0x28] sm:$0xff] %v887_v4   ;;  %v897_v15 = vpack.c.bf16 %v228_v5, %v227_v2  ;;  %v774_v18 = vunpack.c.h.bf16 %v1028_v62 }
  0x12   :  { %v229_v16 = vadd.f32 %v1116_v7, %v160_v6  ;;  %v162_v17 = vmul.f32 %v769_v8, %v1102_v1  ;;  %1055 = vst [vmem:[%s1428_s2 + $0x30] sm:$0xff] %v892_v10   ;;  %v163_v20 = vmul.f32 %v770_v12, %v1102_v1  ;;  %v777_v22 = vunpack.c.l.bf16 %v1029_v9 }
  0x13   :  { %v230_v19 = vadd.f32 %v1116_v7, %v161_v11  ;;  %v164_v21 = vmul.f32 %v773_v13, %v1102_v1  ;;  %1056 = vst [vmem:[%s1428_s2 + $0x38] sm:$0xff] %v897_v15   ;;  %v165_v24 = vmul.f32 %v774_v18, %v1102_v1  ;;  %v778_v25 = vunpack.c.h.bf16 %v1029_v9  ;;  %v1037_v11 = vld [vmem:[%s1426_s0 + $0x98] sm:$0xff]  }
  0x14   :  { %v231_v23 = vadd.f32 %v1116_v7, %v162_v17  ;;  %v781_v26 = vunpack.c.l.bf16 %v1030_v14  ;;  %v232_v29 = vadd.f32 %v1116_v7, %v163_v20  ;;  %v166_v31 = vmul.f32 %v777_v22, %v1102_v1 }
  0x15   :  { %v902_v28 = vpack.c.bf16 %v230_v19, %v229_v16  ;;  %v233_v30 = vadd.f32 %v1116_v7, %v164_v21  ;;  %v234_v32 = vadd.f32 %v1116_v7, %v165_v24  ;;  %v167_v33 = vmul.f32 %v778_v25, %v1102_v1  ;;  %v1038_v16 = vld [vmem:[%s1426_s0 + $0xa0] sm:$0xff]  }
  0x16   :  { %v782_v34 = vunpack.c.h.bf16 %v1030_v14  ;;  %v168_v35 = vmul.f32 %v781_v26, %v1102_v1  ;;  %v907_v37 = vpack.c.bf16 %v232_v29, %v231_v23  ;;  %v235_v38 = vadd.f32 %v1116_v7, %v166_v31  ;;  %v1039_v29 = vld [vmem:[%s1426_s0 + $0xa8] sm:$0xff]  }
  0x17   :  { %1057 = vst [vmem:[%s1428_s2 + $0x40] sm:$0xff] %v902_v28   ;;  %v785_v39 = vunpack.c.l.bf16 %v1031_v27  ;;  %v786_v40 = vunpack.c.h.bf16 %v1031_v27  ;;  %v912_v42 = vpack.c.bf16 %v234_v32, %v233_v30  ;;  %v236_v43 = vadd.f32 %v1116_v7, %v167_v33 }
  0x18   :  { %v169_v44 = vmul.f32 %v782_v34, %v1102_v1  ;;  %v237_v45 = vadd.f32 %v1116_v7, %v168_v35  ;;  %1058 = vst [vmem:[%s1428_s2 + $0x48] sm:$0xff] %v907_v37   ;;  %v789_v48 = vunpack.c.l.bf16 %v1032_v36  ;;  %v790_v49 = vunpack.c.h.bf16 %v1032_v36 }
  0x19   :  { %v170_v46 = vmul.f32 %v785_v39, %v1102_v1  ;;  %v171_v47 = vmul.f32 %v786_v40, %v1102_v1  ;;  %1059 = vst [vmem:[%s1428_s2 + $0x50] sm:$0xff] %v912_v42   ;;  %v917_v51 = vpack.c.bf16 %v236_v43, %v235_v38  ;;  %v793_v53 = vunpack.c.l.bf16 %v1033_v41  ;;  %v1040_v38 = vld [vmem:[%s1426_s0 + $0xb0] sm:$0xff]   ;;  %v1041_v43 = vld [vmem:[%s1426_s0 + $0xb8] sm:$0xff]  }
  0x1a   :  { %v238_v52 = vadd.f32 %v1116_v7, %v169_v44  ;;  %v794_v54 = vunpack.c.h.bf16 %v1033_v41  ;;  %v172_v57 = vmul.f32 %v789_v48, %v1102_v1  ;;  %v173_v58 = vmul.f32 %v790_v49, %v1102_v1 }
  0x1b   :  { %v239_v55 = vadd.f32 %v1116_v7, %v170_v46  ;;  %v240_v56 = vadd.f32 %v1116_v7, %v171_v47  ;;  %1060 = vst [vmem:[%s1428_s2 + $0x58] sm:$0xff] %v917_v51   ;;  %v174_v61 = vmul.f32 %v793_v53, %v1102_v1  ;;  %v797_v63 = vunpack.c.l.bf16 %v1034_v50 }
  0x1c   :  { %v922_v60 = vpack.c.bf16 %v238_v52, %v237_v45  ;;  %v175_v62 = vmul.f32 %v794_v54, %v1102_v1  ;;  %v241_v3 = vadd.f32 %v1116_v7, %v172_v57  ;;  %v242_v4 = vadd.f32 %v1116_v7, %v173_v58  ;;  %v1042_v52 = vld [vmem:[%s1426_s0 + $0xc0] sm:$0xff]  }
  0x1d   :  { %v927_v2 = vpack.c.bf16 %v240_v56, %v239_v55  ;;  %v798_v5 = vunpack.c.h.bf16 %v1034_v50  ;;  %v243_v6 = vadd.f32 %v1116_v7, %v174_v61  ;;  %v176_v9 = vmul.f32 %v797_v63, %v1102_v1  ;;  %v1043_v61 = vld [vmem:[%s1426_s0 + $0xc8] sm:$0xff]  }
  0x1e   :  { %1061 = vst [vmem:[%s1428_s2 + $0x60] sm:$0xff] %v922_v60   ;;  %v244_v8 = vadd.f32 %v1116_v7, %v175_v62  ;;  %v801_v10 = vunpack.c.l.bf16 %v1035_v59  ;;  %v932_v12 = vpack.c.bf16 %v242_v4, %v241_v3  ;;  %v802_v14 = vunpack.c.h.bf16 %v1035_v59  ;;  %v1044_v3 = vld [vmem:[%s1426_s0 + $0xd0] sm:$0xff]  }
  0x1f   :  { %1062 = vst [vmem:[%s1428_s2 + $0x68] sm:$0xff] %v927_v2   ;;  %v177_v13 = vmul.f32 %v798_v5, %v1102_v1  ;;  %v805_v15 = vunpack.c.l.bf16 %v1036_v0  ;;  %v245_v18 = vadd.f32 %v1116_v7, %v176_v9  ;;  %v806_v20 = vunpack.c.h.bf16 %v1036_v0 }
  0x20   :  { %v937_v17 = vpack.c.bf16 %v244_v8, %v243_v6  ;;  %v178_v19 = vmul.f32 %v801_v10, %v1102_v1  ;;  %1063 = vst [vmem:[%s1428_s2 + $0x70] sm:$0xff] %v932_v12   ;;  %v179_v22 = vmul.f32 %v802_v14, %v1102_v1  ;;  %v809_v24 = vunpack.c.l.bf16 %v1037_v11 }
  0x21   :  { %v246_v21 = vadd.f32 %v1116_v7, %v177_v13  ;;  %v180_v23 = vmul.f32 %v805_v15, %v1102_v1  ;;  %v181_v26 = vmul.f32 %v806_v20, %v1102_v1  ;;  %v810_v27 = vunpack.c.h.bf16 %v1037_v11  ;;  %v1045_v13 = vld [vmem:[%s1426_s0 + $0xd8] sm:$0xff]  }
  0x22   :  { %1064 = vst [vmem:[%s1428_s2 + $0x78] sm:$0xff] %v937_v17   ;;  %v247_v25 = vadd.f32 %v1116_v7, %v178_v19  ;;  %v813_v28 = vunpack.c.l.bf16 %v1038_v16  ;;  %v248_v31 = vadd.f32 %v1116_v7, %v179_v22  ;;  %v182_v33 = vmul.f32 %v809_v24, %v1102_v1 }
  0x23   :  { %v942_v30 = vpack.c.bf16 %v246_v21, %v245_v18  ;;  %v249_v32 = vadd.f32 %v1116_v7, %v180_v23  ;;  %v250_v34 = vadd.f32 %v1116_v7, %v181_v26  ;;  %v183_v35 = vmul.f32 %v810_v27, %v1102_v1  ;;  %v1046_v18 = vld [vmem:[%s1426_s0 + $0xe0] sm:$0xff]  }
  0x24   :  { %v814_v36 = vunpack.c.h.bf16 %v1038_v16  ;;  %v184_v37 = vmul.f32 %v813_v28, %v1102_v1  ;;  %v947_v39 = vpack.c.bf16 %v248_v31, %v247_v25  ;;  %v251_v40 = vadd.f32 %v1116_v7, %v182_v33  ;;  %v1047_v31 = vld [vmem:[%s1426_s0 + $0xe8] sm:$0xff]  }
  0x25   :  { %1065 = vst [vmem:[%s1428_s2 + $0x80] sm:$0xff] %v942_v30   ;;  %v817_v41 = vunpack.c.l.bf16 %v1039_v29  ;;  %v818_v42 = vunpack.c.h.bf16 %v1039_v29  ;;  %v952_v44 = vpack.c.bf16 %v250_v34, %v249_v32  ;;  %v252_v45 = vadd.f32 %v1116_v7, %v183_v35 }
  0x26   :  { %v185_v46 = vmul.f32 %v814_v36, %v1102_v1  ;;  %v253_v47 = vadd.f32 %v1116_v7, %v184_v37  ;;  %1066 = vst [vmem:[%s1428_s2 + $0x88] sm:$0xff] %v947_v39   ;;  %v821_v50 = vunpack.c.l.bf16 %v1040_v38  ;;  %v822_v51 = vunpack.c.h.bf16 %v1040_v38 }
  0x27   :  { %v186_v48 = vmul.f32 %v817_v41, %v1102_v1  ;;  %v187_v49 = vmul.f32 %v818_v42, %v1102_v1  ;;  %1067 = vst [vmem:[%s1428_s2 + $0x90] sm:$0xff] %v952_v44   ;;  %v957_v53 = vpack.c.bf16 %v252_v45, %v251_v40  ;;  %v825_v55 = vunpack.c.l.bf16 %v1041_v43  ;;  %v1048_v40 = vld [vmem:[%s1426_s0 + $0xf0] sm:$0xff]   ;;  %v1049_v45 = vld [vmem:[%s1426_s0 + $0xf8] sm:$0xff]  }
  0x28   :  { %v254_v54 = vadd.f32 %v1116_v7, %v185_v46  ;;  %v826_v56 = vunpack.c.h.bf16 %v1041_v43  ;;  %v188_v59 = vmul.f32 %v821_v50, %v1102_v1  ;;  %v189_v60 = vmul.f32 %v822_v51, %v1102_v1 }
  0x29   :  { %v255_v57 = vadd.f32 %v1116_v7, %v186_v48  ;;  %v256_v58 = vadd.f32 %v1116_v7, %v187_v49  ;;  %1068 = vst [vmem:[%s1428_s2 + $0x98] sm:$0xff] %v957_v53   ;;  %v190_v63 = vmul.f32 %v825_v55, %v1102_v1  ;;  %v829_v2 = vunpack.c.l.bf16 %v1042_v52 }
  0x2a   :  { %v962_v62 = vpack.c.bf16 %v254_v54, %v253_v47  ;;  %v191_v0 = vmul.f32 %v826_v56, %v1102_v1  ;;  %v257_v5 = vadd.f32 %v1116_v7, %v188_v59  ;;  %v258_v6 = vadd.f32 %v1116_v7, %v189_v60 }
  0x2b   :  { %v967_v4 = vpack.c.bf16 %v256_v58, %v255_v57  ;;  %v830_v8 = vunpack.c.h.bf16 %v1042_v52  ;;  %v259_v9 = vadd.f32 %v1116_v7, %v190_v63  ;;  %v192_v11 = vmul.f32 %v829_v2, %v1102_v1 }
  0x2c   :  { %1069 = vst [vmem:[%s1428_s2 + $0xa0] sm:$0xff] %v962_v62   ;;  %v260_v10 = vadd.f32 %v1116_v7, %v191_v0  ;;  %v833_v12 = vunpack.c.l.bf16 %v1043_v61  ;;  %v972_v14 = vpack.c.bf16 %v258_v6, %v257_v5  ;;  %v834_v16 = vunpack.c.h.bf16 %v1043_v61 }
  0x2d   :  { %1070 = vst [vmem:[%s1428_s2 + $0xa8] sm:$0xff] %v967_v4   ;;  %v193_v15 = vmul.f32 %v830_v8, %v1102_v1  ;;  %v837_v17 = vunpack.c.l.bf16 %v1044_v3  ;;  %v261_v20 = vadd.f32 %v1116_v7, %v192_v11  ;;  %v838_v22 = vunpack.c.h.bf16 %v1044_v3 }
  0x2e   :  { %v977_v19 = vpack.c.bf16 %v260_v10, %v259_v9  ;;  %v194_v21 = vmul.f32 %v833_v12, %v1102_v1  ;;  %1071 = vst [vmem:[%s1428_s2 + $0xb0] sm:$0xff] %v972_v14   ;;  %v195_v24 = vmul.f32 %v834_v16, %v1102_v1  ;;  %v841_v26 = vunpack.c.l.bf16 %v1045_v13 }
  0x2f   :  { %v262_v23 = vadd.f32 %v1116_v7, %v193_v15  ;;  %v196_v25 = vmul.f32 %v837_v17, %v1102_v1  ;;  %v197_v28 = vmul.f32 %v838_v22, %v1102_v1  ;;  %v842_v29 = vunpack.c.h.bf16 %v1045_v13 }
  0x30   :  { %1072 = vst [vmem:[%s1428_s2 + $0xb8] sm:$0xff] %v977_v19   ;;  %v263_v27 = vadd.f32 %v1116_v7, %v194_v21  ;;  %v845_v30 = vunpack.c.l.bf16 %v1046_v18  ;;  %v264_v33 = vadd.f32 %v1116_v7, %v195_v24  ;;  %v198_v35 = vmul.f32 %v841_v26, %v1102_v1 }
  0x31   :  { %v982_v32 = vpack.c.bf16 %v262_v23, %v261_v20  ;;  %v265_v34 = vadd.f32 %v1116_v7, %v196_v25  ;;  %v266_v36 = vadd.f32 %v1116_v7, %v197_v28  ;;  %v199_v37 = vmul.f32 %v842_v29, %v1102_v1 }
  0x32   :  { %v846_v38 = vunpack.c.h.bf16 %v1046_v18  ;;  %v200_v39 = vmul.f32 %v845_v30, %v1102_v1  ;;  %v987_v41 = vpack.c.bf16 %v264_v33, %v263_v27  ;;  %v267_v42 = vadd.f32 %v1116_v7, %v198_v35 }
  0x33   :  { %1073 = vst [vmem:[%s1428_s2 + $0xc0] sm:$0xff] %v982_v32   ;;  %v849_v43 = vunpack.c.l.bf16 %v1047_v31  ;;  %v850_v44 = vunpack.c.h.bf16 %v1047_v31  ;;  %v992_v46 = vpack.c.bf16 %v266_v36, %v265_v34  ;;  %v268_v47 = vadd.f32 %v1116_v7, %v199_v37 }
  0x34   :  { %v201_v48 = vmul.f32 %v846_v38, %v1102_v1  ;;  %v269_v49 = vadd.f32 %v1116_v7, %v200_v39  ;;  %1074 = vst [vmem:[%s1428_s2 + $0xc8] sm:$0xff] %v987_v41   ;;  %v853_v52 = vunpack.c.l.bf16 %v1048_v40  ;;  %v854_v53 = vunpack.c.h.bf16 %v1048_v40 }
  0x35   :  { %v202_v50 = vmul.f32 %v849_v43, %v1102_v1  ;;  %v203_v51 = vmul.f32 %v850_v44, %v1102_v1  ;;  %1075 = vst [vmem:[%s1428_s2 + $0xd0] sm:$0xff] %v992_v46   ;;  %v997_v54 = vpack.c.bf16 %v268_v47, %v267_v42  ;;  %v857_v56 = vunpack.c.l.bf16 %v1049_v45 }
  0x36   :  { %v270_v55 = vadd.f32 %v1116_v7, %v201_v48  ;;  %v858_v57 = vunpack.c.h.bf16 %v1049_v45  ;;  %v204_v60 = vmul.f32 %v853_v52, %v1102_v1  ;;  %v205_v61 = vmul.f32 %v854_v53, %v1102_v1 }
  0x37   :  { %v271_v58 = vadd.f32 %v1116_v7, %v202_v50  ;;  %v272_v59 = vadd.f32 %v1116_v7, %v203_v51  ;;  %1076 = vst [vmem:[%s1428_s2 + $0xd8] sm:$0xff] %v997_v54   ;;  %v206_v63 = vmul.f32 %v857_v56, %v1102_v1 }
  0x38   :  { %v1002_v62 = vpack.c.bf16 %v270_v55, %v269_v49  ;;  %v207_v0 = vmul.f32 %v858_v57, %v1102_v1  ;;  %v273_v3 = vadd.f32 %v1116_v7, %v204_v60  ;;  %v274_v4 = vadd.f32 %v1116_v7, %v205_v61 }
  0x39   :  { %v1007_v2 = vpack.c.bf16 %v272_v59, %v271_v58  ;;  %v275_v5 = vadd.f32 %v1116_v7, %v206_v63 }
  0x3a   :  { %1077 = vst [vmem:[%s1428_s2 + $0xe0] sm:$0xff] %v1002_v62   ;;  %v276_v6 = vadd.f32 %v1116_v7, %v207_v0  ;;  %v1012_v8 = vpack.c.bf16 %v274_v4, %v273_v3 }
  0x3b   :  { %1078 = vst [vmem:[%s1428_s2 + $0xe8] sm:$0xff] %v1007_v2  }
  0x3c   :  { %v1017_v9 = vpack.c.bf16 %v276_v6, %v275_v5  ;;  %1079 = vst [vmem:[%s1428_s2 + $0xf0] sm:$0xff] %v1012_v8  }
  0x3e   :  { %1080 = vst [vmem:[%s1428_s2 + $0xf8] sm:$0xff] %v1017_v9  }

// kernel: bottle_neck_down_forward.6
= control target key start
LH: loop header
LB: loop body
LE: loop exit
PB: predicated region body
PF: predicated region fallthrough
CT: control target
= control target key end

     0   :  { %s3429_s1 = inlined_call_operand.vmem [shape: bf16[128,128], index: 1, kind: input, shape index: {}]   ;;  %s3430_s0 = inlined_call_operand.vmem [shape: bf16[512,128], index: 0, kind: input, shape index: {}]   ;;  %s3431_s3 = inlined_call_operand.vmem [shape: bf16[512,128], index: 3, kind: input, shape index: {}]   ;;  %s3432_s2 = inlined_call_operand.vmem [shape: f32[1,128], index: 2, kind: input, shape index: {}]   ;;  %s3433_s4 = inlined_call_operand.vmem [shape: bf16[512,128], index: 4, kind: output, shape index: {0}]   ;;  %s3434_s5 = inlined_call_operand.vmem [shape: f32[1,2,128], index: 5, kind: output, shape index: {1}]  }
   0x1   :  { %v2595_v0 = vld [vmem:[%s3429_s1 + $0x38] sm:$0xff]   ;;  %v2596_v1 = vld [vmem:[%s3429_s1 + $0x30] sm:$0xff]   ;;  %v2597_v2 = vld [vmem:[%s3429_s1 + $0x28] sm:$0xff]  }
   0x2   :  { %2499 = vmatprep.subr.bf16.mxu0 %v2595_v0  ;;  %2579 = vmatprep.subr.bf16.mxu1 %v2595_v0  ;;  %v2598_v3 = vld [vmem:[%s3429_s1 + $0x20] sm:$0xff]   ;;  %v2599_v5 = vld [vmem:[%s3429_s1 + $0x18] sm:$0xff]   ;;  %v2600_v6 = vld [vmem:[%s3429_s1 + $0x10] sm:$0xff]  }
   0x3   :  { %2500 = vmatpush3.bf16.msra.mxu0 %v2595_v0  ;;  %2587 = vmatpush3.bf16.msra.mxu1 %v2595_v0  ;;  %v2603_v4 = vld [vmem:[%s3430_s0] sm:$0xff]   ;;  %v2601_v7 = vld [vmem:[%s3429_s1 + $0x8] sm:$0xff]   ;;  %v2605_v11 = vld [vmem:[%s3430_s0 + $0x10] sm:$0xff]  }
   0x4   :  { %2501 = vmatprep.subr.bf16.mxu0 %v2596_v1  ;;  %2580 = vmatprep.subr.bf16.mxu1 %v2596_v1  ;;  %v2618_v8 = vld [vmem:[%s3430_s0 + $0x80] sm:$0xff]   ;;  %v2604_v10 = vld [vmem:[%s3430_s0 + $0x8] sm:$0xff]   ;;  %v2621_v13 = vld [vmem:[%s3430_s0 + $0x90] sm:$0xff]  }
   0x5   :  { %2515 = vmatprep.mubr.bf16.mxu0 %v2603_v4  ;;  %v2602_v9 = vld [vmem:[%s3429_s1] sm:$0xff]   ;;  %2547 = vmatprep.mubr.bf16.mxu1 %v2618_v8  ;;  %v2620_v12 = vld [vmem:[%s3430_s0 + $0x88] sm:$0xff]   ;;  %v2606_v14 = vld [vmem:[%s3430_s0 + $0x18] sm:$0xff]  }
   0x6   :  { %v2607_v15 = vld [vmem:[%s3430_s0 + $0x20] sm:$0xff]   ;;  %v2622_v16 = vld [vmem:[%s3430_s0 + $0x98] sm:$0xff]   ;;  %v2608_v18 = vld [vmem:[%s3430_s0 + $0x28] sm:$0xff]  }
   0x7   :  { %2502 = vmatpush3.bf16.msra.mxu0 %v2596_v1  ;;  %2588 = vmatpush3.bf16.msra.mxu1 %v2596_v1  ;;  %v2623_v17 = vld [vmem:[%s3430_s0 + $0xa0] sm:$0xff]   ;;  %v2624_v19 = vld [vmem:[%s3430_s0 + $0xa8] sm:$0xff]   ;;  %v2609_v20 = vld [vmem:[%s3430_s0 + $0x30] sm:$0xff]  }
   0x8   :  { %2503 = vmatprep.subr.bf16.mxu0 %v2597_v2  ;;  %2581 = vmatprep.subr.bf16.mxu1 %v2597_v2  ;;  %v2625_v21 = vld [vmem:[%s3430_s0 + $0xb0] sm:$0xff]   ;;  %v2610_v22 = vld [vmem:[%s3430_s0 + $0x38] sm:$0xff]   ;;  %v2611_v24 = vld [vmem:[%s3430_s0 + $0x40] sm:$0xff]  }
   0x9   :  { %v2626_v23 = vld [vmem:[%s3430_s0 + $0xb8] sm:$0xff]   ;;  %v2627_v25 = vld [vmem:[%s3430_s0 + $0xc0] sm:$0xff]   ;;  %v2612_v26 = vld [vmem:[%s3430_s0 + $0x48] sm:$0xff]  }
   0xa   :  { %v2628_v27 = vld [vmem:[%s3430_s0 + $0xc8] sm:$0xff]   ;;  %v2613_v28 = vld [vmem:[%s3430_s0 + $0x50] sm:$0xff]   ;;  %v2614_v30 = vld [vmem:[%s3430_s0 + $0x58] sm:$0xff]  }
   0xb   :  { %2504 = vmatpush3.bf16.msra.mxu0 %v2597_v2  ;;  %2589 = vmatpush3.bf16.msra.mxu1 %v2597_v2  ;;  %v2629_v29 = vld [vmem:[%s3430_s0 + $0xd0] sm:$0xff]   ;;  %v2630_v31 = vld [vmem:[%s3430_s0 + $0xd8] sm:$0xff]   ;;  %v2615_v32 = vld [vmem:[%s3430_s0 + $0x60] sm:$0xff]  }
   0xc   :  { %2505 = vmatprep.subr.bf16.mxu0 %v2598_v3  ;;  %2582 = vmatprep.subr.bf16.mxu1 %v2598_v3  ;;  %v2631_v33 = vld [vmem:[%s3430_s0 + $0xe0] sm:$0xff]   ;;  %v2616_v34 = vld [vmem:[%s3430_s0 + $0x68] sm:$0xff]   ;;  %v2617_v36 = vld [vmem:[%s3430_s0 + $0x70] sm:$0xff]  }
   0xd   :  { %v2632_v35 = vld [vmem:[%s3430_s0 + $0xe8] sm:$0xff]   ;;  %v2633_v37 = vld [vmem:[%s3430_s0 + $0xf0] sm:$0xff]   ;;  %v2619_v38 = vld [vmem:[%s3430_s0 + $0x78] sm:$0xff]  }
   0xe   :  { %v2634_v39 = vld [vmem:[%s3430_s0 + $0xf8] sm:$0xff]   ;;  %v2789_v40 = vld [vmem:[%s3431_s3 + $0x8] sm:$0xff]   ;;  %v2794_v41 = vld [vmem:[%s3431_s3] sm:$0xff]  }
   0xf   :  { %2506 = vmatpush3.bf16.msra.mxu0 %v2598_v3  ;;  %2590 = vmatpush3.bf16.msra.mxu1 %v2598_v3  ;;  %v2799_v42 = vld [vmem:[%s3431_s3 + $0x18] sm:$0xff]   ;;  %v2804_v43 = vld [vmem:[%s3431_s3 + $0x10] sm:$0xff]   ;;  %v2809_v44 = vld [vmem:[%s3431_s3 + $0x28] sm:$0xff]   ;;  %v2115_v45 = vunpack.c.l.bf16 %v2789_v40  ;;  %v2111_v48 = vunpack.c.l.bf16 %v2794_v41  ;;  %v2116_v49 = vunpack.c.h.bf16 %v2789_v40  ;;  %v2112_v50 = vunpack.c.h.bf16 %v2794_v41 }
  0x10   :  { %2507 = vmatprep.subr.bf16.mxu0 %v2599_v5  ;;  %2583 = vmatprep.subr.bf16.mxu1 %v2599_v5  ;;  %v2815_v46 = vld [vmem:[%s3431_s3 + $0x20] sm:$0xff]   ;;  %v2820_v47 = vld [vmem:[%s3431_s3 + $0x38] sm:$0xff]   ;;  %v2123_v51 = vunpack.c.l.bf16 %v2799_v42  ;;  %v2829_v52 = vld [vmem:[%s3431_s3 + $0x30] sm:$0xff]   ;;  %v2119_v54 = vunpack.c.l.bf16 %v2804_v43  ;;  %v2124_v55 = vunpack.c.h.bf16 %v2799_v42  ;;  %v2120_v56 = vunpack.c.h.bf16 %v2804_v43 }
  0x11   :  { %v2834_v53 = vld [vmem:[%s3431_s3 + $0x48] sm:$0xff]   ;;  %v2843_v58 = vld [vmem:[%s3431_s3 + $0x40] sm:$0xff]   ;;  %v2848_v59 = vld [vmem:[%s3431_s3 + $0x58] sm:$0xff]  }
  0x12   :  { %v2857_v0 = vld [vmem:[%s3431_s3 + $0x50] sm:$0xff]   ;;  %v2862_v1 = vld [vmem:[%s3431_s3 + $0x68] sm:$0xff]   ;;  %v3005_v8 = vld [vmem:[%s3431_s3 + $0xf8] sm:$0xff]  }
  0x13   :  { %2508 = vmatpush3.bf16.msra.mxu0 %v2599_v5  ;;  %2591 = vmatpush3.bf16.msra.mxu1 %v2599_v5  ;;  %3439 = vst [vmem:[#allocation2_spill] sm:$0xff] %v3005_v8 }
  0x14   :  { %2509 = vmatprep.subr.bf16.mxu0 %v2600_v6  ;;  %2584 = vmatprep.subr.bf16.mxu1 %v2600_v6 }
  0x17   :  { %2510 = vmatpush3.bf16.msra.mxu0 %v2600_v6  ;;  %2592 = vmatpush3.bf16.msra.mxu1 %v2600_v6  ;;  %v2871_v6 = vld [vmem:[%s3431_s3 + $0x60] sm:$0xff]  }
  0x18   :  { %2511 = vmatprep.subr.bf16.mxu0 %v2601_v7  ;;  %2585 = vmatprep.subr.bf16.mxu1 %v2601_v7 }
  0x1b   :  { %2512 = vmatpush3.bf16.msra.mxu0 %v2601_v7  ;;  %2593 = vmatpush3.bf16.msra.mxu1 %v2601_v7  ;;  %v2876_v7 = vld [vmem:[%s3431_s3 + $0x78] sm:$0xff]  }
  0x1c   :  { %2513 = vmatprep.subr.bf16.mxu0 %v2602_v9  ;;  %2586 = vmatprep.subr.bf16.mxu1 %v2602_v9 }
  0x1f   :  { %2514 = vmatpush3.bf16.msra.mxu0 %v2602_v9  ;;  %2594 = vmatpush3.bf16.msra.mxu1 %v2602_v9 }
  0x22   :  { %2516 = vmatmul.mubr.bf16.vlgmr.msra.gmra.mxu0 %v2604_v10  ;;  %2548 = vmatmul.mubr.bf16.vlgmr.msra.gmra.mxu1 %v2620_v12  ;;  %v2885_v12 = vld [vmem:[%s3431_s3 + $0x88] sm:$0xff]  }
  0x23   :  { %2519 = vmatprep.mubr.bf16.mxu0 %v2605_v11  ;;  %2551 = vmatprep.mubr.bf16.mxu1 %v2621_v13  ;;  %v2890_v13 = vld [vmem:[%s3431_s3 + $0x70] sm:$0xff]  }
  0x2a   :  { %2520 = vmatmul.mubr.bf16.gmra.mxu0 %v2606_v14  ;;  %2552 = vmatmul.mubr.bf16.gmra.mxu1 %v2622_v16  ;;  %v2895_v14 = vld [vmem:[%s3431_s3 + $0x80] sm:$0xff]  }
  0x2b   :  { %2523 = vmatprep.mubr.bf16.mxu0 %v2607_v15  ;;  %2555 = vmatprep.mubr.bf16.mxu1 %v2623_v17  ;;  %v2987_v15 = vld [vmem:[%s3431_s3 + $0xe8] sm:$0xff]  }
  0x32   :  { %2524 = vmatmul.mubr.bf16.gmra.mxu0 %v2608_v18  ;;  %2556 = vmatmul.mubr.bf16.gmra.mxu1 %v2624_v19  ;;  %v2904_v19 = vld [vmem:[%s3431_s3 + $0x98] sm:$0xff]  }
  0x33   :  { %2527 = vmatprep.mubr.bf16.mxu0 %v2609_v20  ;;  %2559 = vmatprep.mubr.bf16.mxu1 %v2625_v21 }
  0x3a   :  { %2528 = vmatmul.mubr.bf16.gmra.mxu0 %v2610_v22  ;;  %2560 = vmatmul.mubr.bf16.gmra.mxu1 %v2626_v23  ;;  %v2992_v23 = vld [vmem:[%s3431_s3 + $0xe0] sm:$0xff]  }
  0x3b   :  { %2531 = vmatprep.mubr.bf16.mxu0 %v2611_v24  ;;  %2563 = vmatprep.mubr.bf16.mxu1 %v2627_v25  ;;  %v2913_v24 = vld [vmem:[%s3431_s3 + $0x90] sm:$0xff]   ;;  %v2918_v25 = vld [vmem:[%s3431_s3 + $0xa8] sm:$0xff]  }
  0x42   :  { %2532 = vmatmul.mubr.bf16.gmra.mxu0 %v2612_v26  ;;  %2564 = vmatmul.mubr.bf16.gmra.mxu1 %v2628_v27  ;;  %v2179_v26 = vunpack.c.l.bf16 %v2885_v12 }
  0x43   :  { %2535 = vmatprep.mubr.bf16.mxu0 %v2613_v28  ;;  %2567 = vmatprep.mubr.bf16.mxu1 %v2629_v29  ;;  %v2175_v28 = vunpack.c.l.bf16 %v2895_v14  ;;  %v2960_v29 = vld [vmem:[%s3431_s3 + $0xc0] sm:$0xff]  }
  0x4a   :  { %2536 = vmatmul.mubr.bf16.gmra.mxu0 %v2614_v30  ;;  %2568 = vmatmul.mubr.bf16.gmra.mxu1 %v2630_v31  ;;  %v2927_v30 = vld [vmem:[%s3431_s3 + $0xa0] sm:$0xff]   ;;  %v2932_v31 = vld [vmem:[%s3431_s3 + $0xb8] sm:$0xff]  }
  0x4b   :  { %2539 = vmatprep.mubr.bf16.mxu0 %v2615_v32  ;;  %2571 = vmatprep.mubr.bf16.mxu1 %v2631_v33  ;;  %v2180_v32 = vunpack.c.h.bf16 %v2885_v12  ;;  %v2974_v33 = vld [vmem:[%s3431_s3 + $0xd0] sm:$0xff]  }
  0x52   :  { %2540 = vmatmul.mubr.bf16.gmra.mxu0 %v2616_v34  ;;  %2572 = vmatmul.mubr.bf16.gmra.mxu1 %v2632_v35  ;;  %v2969_v34 = vld [vmem:[%s3431_s3 + $0xd8] sm:$0xff]  }
  0x53   :  { %2543 = vmatprep.mubr.bf16.mxu0 %v2617_v36  ;;  %2575 = vmatprep.mubr.bf16.mxu1 %v2633_v37  ;;  %v2941_v36 = vld [vmem:[%s3431_s3 + $0xb0] sm:$0xff]   ;;  %v2946_v37 = vld [vmem:[%s3431_s3 + $0xc8] sm:$0xff]  }
  0x5a   :  { %2544 = vmatmul.mubr.bf16.gmra.mxu0 %v2619_v38  ;;  %2576 = vmatmul.mubr.bf16.gmra.mxu1 %v2634_v39  ;;  %v2951_v38 = vld [vmem:[%s3432_s2] ss:$0 sm:$0xff] }
  0xe2   :  { %v2517_v35 = vpop.f32.mrf.mxu0  ;;  %v2549_v39 = vpop.f32.mrf.mxu1 }
  0xe3   :  { %v390_v20 = vadd.f32 %v2517_v35, %v2951_v38  ;;  %v518_v18 = vadd.f32 %v2549_v39, %v2951_v38  ;;  %v3010_v39 = vld [vmem:[%s3431_s3 + $0xf0] sm:$0xff]  }
  0xe4   :  { %v381_v22 = vpop.f32.mrf.mxu0  ;;  %v509_v10 = vpop.f32.mrf.mxu1  ;;  %3440 = vst [vmem:[#allocation3_spill] sm:$0xff] %v3010_v39 }
  0xe5   :  { %v766_v16 = vadd.f32 %v2115_v45, %v390_v20  ;;  %v382_v27 = vadd.f32 %v2951_v38, %v381_v22  ;;  %v798_v11 = vadd.f32 %v2179_v26, %v518_v18  ;;  %v510_v4 = vadd.f32 %v2951_v38, %v509_v10 }
  0xe6   :  { %v2518_v17 = vpop.f32.mrf.mxu0  ;;  %v2550_v18 = vpop.f32.mrf.mxu1 }
  0xe7   :  { %vm830_vm0 = vcmp.gt.f32.partialorder %v766_v16, 0.0  ;;  %v894_v22 = vmul.f32 0.01, %v766_v16  ;;  %v764_v26 = vadd.f32 %v2111_v48, %v382_v27  ;;  %v393_v9 = vadd.f32 %v2518_v17, %v2951_v38 }
  0xe8   :  { %v384_v21 = vpop.f32.mrf.mxu0  ;;  %v926_v5 = vmul.f32 0.01, %v798_v11  ;;  %vm862_vm2 = vcmp.gt.f32.partialorder %v798_v11, 0.0  ;;  %v521_v17 = vadd.f32 %v2550_v18, %v2951_v38 }
  0xe9   :  { %vm828_vm1 = vcmp.gt.f32.partialorder %v764_v26, 0.0  ;;  %v892_v45 = vmul.f32 0.01, %v764_v26  ;;  %v767_v20 = vadd.f32 %v2116_v49, %v393_v9  ;;  %v958_v2 = vsel %vm830_vm0, %v766_v16, %v894_v22 }
  0xea   :  { %v385_v48 = vadd.f32 %v2951_v38, %v384_v21  ;;  %v2521_v27 = vpop.f32.mrf.mxu0  ;;  %v3031_v9 = vsel %vm862_vm2, %v798_v11, %v926_v5  ;;  %v3035_v16 = vadd.f32 %v2175_v28, %v510_v4  ;;  %v1798_v21 = vmul.f32 %v958_v2, %v958_v2 }
  0xeb   :  { %vm831_vm3 = vcmp.gt.f32.partialorder %v767_v20, 0.0  ;;  %v895_v10 = vmul.f32 0.01, %v767_v20  ;;  %v406_v3 = vadd.f32 %v2521_v27, %v2951_v38  ;;  %v956_v62 = vsel %vm828_vm1, %v764_v26, %v892_v45 }
  0xec   :  { %v765_v40 = vadd.f32 %v2112_v50, %v385_v48  ;;  %v397_v49 = vpop.f32.mrf.mxu0  ;;  %v799_v41 = vadd.f32 %v2180_v32, %v521_v17  ;;  %v3042_v50 = vpop.f32.mrf.mxu1  ;;  %v1796_v5 = vmul.f32 %v956_v62, %v956_v62  ;;  %v3055_v32 = vmul.f32 0.01, %v3035_v16 }
  0xed   :  { %v959_v18 = vsel %vm831_vm3, %v767_v20, %v895_v10  ;;  %v770_v22 = vadd.f32 %v2123_v51, %v406_v3  ;;  %v398_v27 = vadd.f32 %v2951_v38, %v397_v49  ;;  %v3049_v51 = vmul.f32 %v3031_v9, %v3031_v9 }
  0xee   :  { %v2245_v63 = vpack.c.bf16 %v959_v18, %v958_v2  ;;  %vm829_vm4 = vcmp.gt.f32.partialorder %v765_v40, 0.0  ;;  %v893_v45 = vmul.f32 0.01, %v765_v40  ;;  %v2522_v26 = vpop.f32.mrf.mxu0  ;;  %v1799_v3 = vmul.f32 %v959_v18, %v959_v18  ;;  %v3059_v35 = vpop.f32.mrf.mxu1 }
  0xef   :  { %v768_v4 = vadd.f32 %v2119_v54, %v398_v27  ;;  %v409_v11 = vadd.f32 %v2522_v26, %v2951_v38  ;;  %vm834_vm5 = vcmp.gt.f32.partialorder %v770_v22, 0.0  ;;  %v898_v17 = vmul.f32 0.01, %v770_v22 }
  0xf0   :  { %2428 = vst [vmem:[%s3433_s4 + $0x8] sm:$0xff] %v2245_v63   ;;  %v957_v28 = vsel %vm829_vm4, %v765_v40, %v893_v45  ;;  %v400_v12 = vpop.f32.mrf.mxu0  ;;  %v927_v26 = vmul.f32 0.01, %v799_v41  ;;  %vm863_vm8 = vcmp.gt.f32.partialorder %v799_v41, 0.0 }
  0xf1   :  { %v2240_v20 = vpack.c.bf16 %v957_v28, %v956_v62  ;;  %v1727_v48 = vadd.f32 %v957_v28, %v956_v62  ;;  %v1797_v54 = vmul.f32 %v957_v28, %v957_v28  ;;  %vm832_vm6 = vcmp.gt.f32.partialorder %v768_v4, 0.0 }
  0xf2   :  { %v896_v10 = vmul.f32 0.01, %v768_v4  ;;  %v771_v49 = vadd.f32 %v2124_v55, %v409_v11  ;;  %v2525_v27 = vpop.f32.mrf.mxu0  ;;  %v401_v45 = vadd.f32 %v2951_v38, %v400_v12  ;;  %v962_v55 = vsel %vm834_vm5, %v770_v22, %v898_v17 }
  0xf3   :  { %2241 = vst [vmem:[%s3433_s4] sm:$0xff] %v2240_v20   ;;  %v1728_v63 = vadd.f32 %v1727_v48, %v958_v2  ;;  %v1860_v40 = vadd.f32 %v1797_v54, %v1796_v5  ;;  %v422_v62 = vadd.f32 %v2525_v27, %v2951_v38  ;;  %v3441_v2 = vunpack.c.l.bf16 %v2809_v44 }
  0xf4   :  { %v960_v28 = vsel %vm832_vm6, %v768_v4, %v896_v10  ;;  %vm835_vm7 = vcmp.gt.f32.partialorder %v771_v49, 0.0  ;;  %v899_v61 = vmul.f32 0.01, %v771_v49  ;;  %v413_v60 = vpop.f32.mrf.mxu0  ;;  %v769_v57 = vadd.f32 %v2120_v56, %v401_v45  ;;  %v3072_v4 = vpop.f32.mrf.mxu1 }
  0xf5   :  { %v1861_v42 = vadd.f32 %v1860_v40, %v1798_v21  ;;  %v1729_v11 = vadd.f32 %v1728_v63, %v959_v18  ;;  %v1800_v39 = vmul.f32 %v960_v28, %v960_v28  ;;  %v774_v5 = vadd.f32 %v3441_v2, %v422_v62 }
  0xf6   :  { %v963_v20 = vsel %vm835_vm7, %v771_v49, %v899_v61  ;;  %v414_v12 = vadd.f32 %v2951_v38, %v413_v60  ;;  %v2526_v48 = vpop.f32.mrf.mxu0  ;;  %v3074_v21 = vsel %vm863_vm8, %v799_v41, %v927_v26  ;;  %vm833_vm9 = vcmp.gt.f32.partialorder %v769_v57, 0.0  ;;  %v3085_v45 = vpop.f32.mrf.mxu1 }
  0xf7   :  { %v1730_v54 = vadd.f32 %v1729_v11, %v960_v28  ;;  %v1862_v10 = vadd.f32 %v1861_v42, %v1799_v3  ;;  %v2255_v27 = vpack.c.bf16 %v963_v20, %v962_v55  ;;  %v897_v18 = vmul.f32 0.01, %v769_v57 }
  0xf8   :  { %vm838_vm10 = vcmp.gt.f32.partialorder %v774_v5, 0.0  ;;  %v902_v43 = vmul.f32 0.01, %v774_v5  ;;  %v416_v56 = vpop.f32.mrf.mxu0  ;;  %v3442_v60 = vunpack.c.l.bf16 %v2815_v46  ;;  %v425_v17 = vadd.f32 %v2526_v48, %v2951_v38 }
  0xf9   :  { %v1863_v22 = vadd.f32 %v1862_v10, %v1800_v39  ;;  %2430 = vst [vmem:[%s3433_s4 + $0x18] sm:$0xff] %v2255_v27   ;;  %v417_v3 = vadd.f32 %v2951_v38, %v416_v56  ;;  %v1802_v49 = vmul.f32 %v962_v55, %v962_v55  ;;  %v1803_v41 = vmul.f32 %v963_v20, %v963_v20 }
  0xfa   :  { %v772_v61 = vadd.f32 %v3442_v60, %v414_v12  ;;  %v961_v26 = vsel %vm833_vm9, %v769_v57, %v897_v18  ;;  %v2529_v63 = vpop.f32.mrf.mxu0  ;;  %v2325_v40 = vpack.c.bf16 %v3074_v21, %v3031_v9  ;;  %v966_v11 = vsel %vm838_vm10, %v774_v5, %v902_v43  ;;  %v3100_v60 = vpop.f32.mrf.mxu1 }
  0xfb   :  { %v2250_v39 = vpack.c.bf16 %v961_v26, %v960_v28  ;;  %v1731_v62 = vadd.f32 %v1730_v54, %v961_v26  ;;  %v1801_v42 = vmul.f32 %v961_v26, %v961_v26  ;;  %v3443_v12 = vunpack.c.h.bf16 %v2809_v44 }
  0xfc   :  { %vm836_vm11 = vcmp.gt.f32.partialorder %v772_v61, 0.0  ;;  %v900_v2 = vmul.f32 0.01, %v772_v61  ;;  %v3444_v10 = vunpack.c.h.bf16 %v2815_v46  ;;  %v429_v57 = vpop.f32.mrf.mxu0  ;;  %2444 = vst [vmem:[%s3433_s4 + $0x88] sm:$0xff] %v2325_v40   ;;  %v438_v5 = vadd.f32 %v2529_v63, %v2951_v38 }
  0xfd   :  { %v775_v48 = vadd.f32 %v3443_v12, %v425_v17  ;;  %2429 = vst [vmem:[%s3433_s4 + $0x10] sm:$0xff] %v2250_v39   ;;  %v1732_v28 = vadd.f32 %v1731_v62, %v962_v55  ;;  %v1864_v54 = vadd.f32 %v1863_v22, %v1801_v42  ;;  %v430_v18 = vadd.f32 %v2951_v38, %v429_v57 }
  0xfe   :  { %v773_v27 = vadd.f32 %v3444_v10, %v417_v3  ;;  %v1806_v44 = vmul.f32 %v966_v11, %v966_v11  ;;  %v964_v43 = vsel %vm836_vm11, %v772_v61, %v900_v2  ;;  %v2530_v56 = vpop.f32.mrf.mxu0  ;;  %v3445_v39 = vunpack.c.l.bf16 %v2820_v47 }
  0xff   :  { %vm839_vm12 = vcmp.gt.f32.partialorder %v775_v48, 0.0  ;;  %v903_v46 = vmul.f32 0.01, %v775_v48  ;;  %v1865_v17 = vadd.f32 %v1864_v54, %v1802_v49  ;;  %v1733_v3 = vadd.f32 %v1732_v28, %v963_v20  ;;  %v3107_v28 = vpop.f32.mrf.mxu1 }
 0x100   :  { %vm837_vm13 = vcmp.gt.f32.partialorder %v773_v27, 0.0  ;;  %v901_v26 = vmul.f32 0.01, %v773_v27  ;;  %v778_v55 = vadd.f32 %v3445_v39, %v438_v5  ;;  %v3446_v22 = vunpack.c.l.bf16 %v2829_v52  ;;  %v432_v42 = vpop.f32.mrf.mxu0 }
 0x101   :  { %v967_v40 = vsel %vm839_vm12, %v775_v48, %v903_v46  ;;  %v441_v62 = vadd.f32 %v2530_v56, %v2951_v38  ;;  %v1734_v61 = vadd.f32 %v1733_v3, %v964_v43  ;;  %v1804_v2 = vmul.f32 %v964_v43, %v964_v43 }
 0x102   :  { %v776_v63 = vadd.f32 %v3446_v22, %v430_v18  ;;  %v1866_v12 = vadd.f32 %v1865_v17, %v1803_v41  ;;  %v2265_v10 = vpack.c.bf16 %v967_v40, %v966_v11  ;;  %v965_v57 = vsel %vm837_vm13, %v773_v27, %v901_v26  ;;  %v2533_v20 = vpop.f32.mrf.mxu0 }
 0x103   :  { %vm842_vm14 = vcmp.gt.f32.partialorder %v778_v55, 0.0  ;;  %v906_v49 = vmul.f32 0.01, %v778_v55  ;;  %v2260_v54 = vpack.c.bf16 %v965_v57, %v964_v43  ;;  %v1735_v5 = vadd.f32 %v1734_v61, %v965_v57 }
 0x104   :  { %vm840_vm15 = vcmp.gt.f32.partialorder %v776_v63, 0.0  ;;  %v1867_v48 = vadd.f32 %v1866_v12, %v1804_v2  ;;  %2432 = vst [vmem:[%s3433_s4 + $0x28] sm:$0xff] %v2265_v10   ;;  %v1805_v18 = vmul.f32 %v965_v57, %v965_v57  ;;  %v904_v56 = vmul.f32 0.01, %v776_v63  ;;  %v445_v3 = vpop.f32.mrf.mxu0  ;;  %v3122_v12 = vpop.f32.mrf.mxu1 }
 0x105   :  { %v970_v46 = vsel %vm842_vm14, %v778_v55, %v906_v49  ;;  %v3447_v41 = vunpack.c.h.bf16 %v2820_v47  ;;  %v433_v27 = vadd.f32 %v2951_v38, %v432_v42  ;;  %v1807_v26 = vmul.f32 %v967_v40, %v967_v40  ;;  %2431 = vst [vmem:[%s3433_s4 + $0x20] sm:$0xff] %v2260_v54  }
 0x106   :  { %v1736_v39 = vadd.f32 %v1735_v5, %v966_v11  ;;  %v1868_v22 = vadd.f32 %v1867_v48, %v1805_v18  ;;  %v454_v2 = vadd.f32 %v2533_v20, %v2951_v38  ;;  %v968_v43 = vsel %vm840_vm15, %v776_v63, %v904_v56 }
 0x107   :  { %v779_v17 = vadd.f32 %v3447_v41, %v441_v62  ;;  %v3448_v61 = vunpack.c.h.bf16 %v2829_v52  ;;  %v2534_v62 = vpop.f32.mrf.mxu0  ;;  %v1810_v10 = vmul.f32 %v970_v46, %v970_v46  ;;  %v3449_v49 = vunpack.c.l.bf16 %v2834_v53 }
 0x108   :  { %v1869_v42 = vadd.f32 %v1868_v22, %v1806_v44  ;;  %v1737_v57 = vadd.f32 %v1736_v39, %v967_v40  ;;  %v446_v20 = vadd.f32 %v2951_v38, %v445_v3  ;;  %v1808_v18 = vmul.f32 %v968_v43, %v968_v43  ;;  %v3129_v39 = vpop.f32.mrf.mxu1 }
 0x109   :  { %vm843_vm0 = vcmp.gt.f32.partialorder %v779_v17, 0.0  ;;  %v907_v55 = vmul.f32 0.01, %v779_v17  ;;  %v777_v47 = vadd.f32 %v3448_v61, %v433_v27  ;;  %v782_v54 = vadd.f32 %v3449_v49, %v454_v2  ;;  %v448_v63 = vpop.f32.mrf.mxu0 }
 0x10a   :  { %v1738_v5 = vadd.f32 %v1737_v57, %v968_v43  ;;  %v1870_v56 = vadd.f32 %v1869_v42, %v1807_v26  ;;  %v3450_v44 = vunpack.c.l.bf16 %v2843_v58  ;;  %vm860_vm6 = vcmp.gt.f32.partialorder %v3035_v16, 0.0 }
 0x10b   :  { %v971_v11 = vsel %vm843_vm0, %v779_v17, %v907_v55  ;;  %vm841_vm1 = vcmp.gt.f32.partialorder %v777_v47, 0.0  ;;  %v905_v48 = vmul.f32 0.01, %v777_v47  ;;  %vm846_vm2 = vcmp.gt.f32.partialorder %v782_v54, 0.0  ;;  %v2537_v40 = vpop.f32.mrf.mxu0 }
 0x10c   :  { %v2275_v52 = vpack.c.bf16 %v971_v11, %v970_v46  ;;  %v910_v27 = vmul.f32 0.01, %v782_v54  ;;  %v780_v22 = vadd.f32 %v3450_v44, %v446_v20  ;;  %v1871_v2 = vadd.f32 %v1870_v56, %v1808_v18 }
 0x10d   :  { %v969_v41 = vsel %vm841_vm1, %v777_v47, %v905_v48  ;;  %v1811_v61 = vmul.f32 %v971_v11, %v971_v11  ;;  %v457_v47 = vadd.f32 %v2534_v62, %v2951_v38  ;;  %v461_v42 = vpop.f32.mrf.mxu0  ;;  %v449_v20 = vadd.f32 %v2951_v38, %v448_v63 }
 0x10e   :  { %2434 = vst [vmem:[%s3433_s4 + $0x38] sm:$0xff] %v2275_v52   ;;  %v2270_v17 = vpack.c.bf16 %v969_v41, %v968_v43  ;;  %v1739_v3 = vadd.f32 %v1738_v5, %v969_v41  ;;  %v1809_v55 = vmul.f32 %v969_v41, %v969_v41  ;;  %vm844_vm3 = vcmp.gt.f32.partialorder %v780_v22, 0.0  ;;  %v3144_v41 = vpop.f32.mrf.mxu1 }
 0x10f   :  { %v908_v26 = vmul.f32 0.01, %v780_v22  ;;  %v974_v48 = vsel %vm846_vm2, %v782_v54, %v910_v27  ;;  %v3451_v43 = vunpack.c.h.bf16 %v2834_v53  ;;  %v470_v56 = vadd.f32 %v2537_v40, %v2951_v38  ;;  %v2538_v62 = vpop.f32.mrf.mxu0 }
 0x110   :  { %2433 = vst [vmem:[%s3433_s4 + $0x30] sm:$0xff] %v2270_v17   ;;  %v1740_v57 = vadd.f32 %v1739_v3, %v970_v46  ;;  %v1872_v49 = vadd.f32 %v1871_v2, %v1809_v55  ;;  %v462_v52 = vadd.f32 %v2951_v38, %v461_v42  ;;  %v3452_v46 = vunpack.c.h.bf16 %v2843_v58  ;;  %v3153_v42 = vpop.f32.mrf.mxu1 }
 0x111   :  { %v972_v18 = vsel %vm844_vm3, %v780_v22, %v908_v26  ;;  %v783_v5 = vadd.f32 %v3451_v43, %v457_v47  ;;  %v3453_v63 = vunpack.c.l.bf16 %v2848_v59  ;;  %v3454_v53 = vunpack.c.l.bf16 %v2857_v0  ;;  %v464_v40 = vpop.f32.mrf.mxu0 }
 0x112   :  { %v1873_v44 = vadd.f32 %v1872_v49, %v1810_v10  ;;  %v1741_v8 = vadd.f32 %v1740_v57, %v971_v11  ;;  %v1812_v17 = vmul.f32 %v972_v18, %v972_v18  ;;  %v781_v2 = vadd.f32 %v3452_v46, %v449_v20 }
 0x113   :  { %vm847_vm4 = vcmp.gt.f32.partialorder %v783_v5, 0.0  ;;  %v911_v54 = vmul.f32 0.01, %v783_v5  ;;  %v786_v27 = vadd.f32 %v3453_v63, %v470_v56  ;;  %v784_v22 = vadd.f32 %v3454_v53, %v462_v52  ;;  %v2541_v47 = vpop.f32.mrf.mxu0 }
 0x114   :  { %v1742_v3 = vadd.f32 %v1741_v8, %v972_v18  ;;  %v1874_v55 = vadd.f32 %v1873_v44, %v1811_v61  ;;  %vm845_vm5 = vcmp.gt.f32.partialorder %v781_v2, 0.0  ;;  %v909_v26 = vmul.f32 0.01, %v781_v2 }
 0x115   :  { %v1814_v10 = vmul.f32 %v974_v48, %v974_v48  ;;  %v975_v11 = vsel %vm847_vm4, %v783_v5, %v911_v54  ;;  %vm850_vm7 = vcmp.gt.f32.partialorder %v786_v27, 0.0  ;;  %v914_v58 = vmul.f32 0.01, %v786_v27  ;;  %v477_v61 = vpop.f32.mrf.mxu0 }
 0x116   :  { %v1875_v57 = vadd.f32 %v1874_v55, %v1812_v17  ;;  %v2285_v49 = vpack.c.bf16 %v975_v11, %v974_v48  ;;  %v973_v20 = vsel %vm845_vm5, %v781_v2, %v909_v26  ;;  %vm848_vm8 = vcmp.gt.f32.partialorder %v784_v22, 0.0 }
 0x117   :  { %v1815_v43 = vmul.f32 %v975_v11, %v975_v11  ;;  %v2280_v56 = vpack.c.bf16 %v973_v20, %v972_v18  ;;  %v1743_v52 = vadd.f32 %v1742_v3, %v973_v20  ;;  %v1813_v8 = vmul.f32 %v973_v20, %v973_v20  ;;  %v2542_v53 = vpop.f32.mrf.mxu0  ;;  %v3165_v3 = vpop.f32.mrf.mxu1 }
 0x118   :  { %2436 = vst [vmem:[%s3433_s4 + $0x48] sm:$0xff] %v2285_v49   ;;  %v978_v44 = vsel %vm850_vm7, %v786_v27, %v914_v58  ;;  %v912_v5 = vmul.f32 0.01, %v784_v22  ;;  %v473_v46 = vadd.f32 %v2538_v62, %v2951_v38  ;;  %v465_v54 = vadd.f32 %v2951_v38, %v464_v40 }
 0x119   :  { %2435 = vst [vmem:[%s3433_s4 + $0x40] sm:$0xff] %v2280_v56   ;;  %v1744_v17 = vadd.f32 %v1743_v52, %v974_v48  ;;  %v1876_v2 = vadd.f32 %v1875_v57, %v1813_v8  ;;  %v486_v18 = vadd.f32 %v2541_v47, %v2951_v38  ;;  %v478_v63 = vadd.f32 %v2951_v38, %v477_v61  ;;  %v480_v56 = vpop.f32.mrf.mxu0 }
 0x11a   :  { %v976_v27 = vsel %vm848_vm8, %v784_v22, %v912_v5  ;;  %v3455_v55 = vunpack.c.h.bf16 %v2848_v59  ;;  %v3456_v40 = vunpack.c.h.bf16 %v2857_v0  ;;  %v489_v58 = vadd.f32 %v2542_v53, %v2951_v38  ;;  %v3175_v0 = vpop.f32.mrf.mxu1 }
 0x11b   :  { %v1877_v49 = vadd.f32 %v1876_v2, %v1814_v10  ;;  %v1745_v48 = vadd.f32 %v1744_v17, %v975_v11  ;;  %v1816_v57 = vmul.f32 %v976_v27, %v976_v27  ;;  %v3457_v47 = vunpack.c.l.bf16 %v2862_v1  ;;  %v2545_v5 = vpop.f32.mrf.mxu0 }
 0x11c   :  { %v787_v62 = vadd.f32 %v3455_v55, %v473_v46  ;;  %v785_v26 = vadd.f32 %v3456_v40, %v465_v54  ;;  %v3458_v10 = vunpack.c.l.bf16 %v2871_v6  ;;  %v3459_v17 = vunpack.c.h.bf16 %v2862_v1 }
 0x11d   :  { %v790_v20 = vadd.f32 %v3457_v47, %v486_v18  ;;  %v1746_v22 = vadd.f32 %v1745_v48, %v976_v27  ;;  %v1878_v61 = vadd.f32 %v1877_v49, %v1815_v43  ;;  %v493_v40 = vpop.f32.mrf.mxu0  ;;  %v3185_v43 = vsel %vm860_vm6, %v3035_v16, %v3055_v32  ;;  %v3194_v16 = vpop.f32.mrf.mxu1 }
 0x11e   :  { %vm851_vm9 = vcmp.gt.f32.partialorder %v787_v62, 0.0  ;;  %v915_v52 = vmul.f32 0.01, %v787_v62  ;;  %vm849_vm10 = vcmp.gt.f32.partialorder %v785_v26, 0.0  ;;  %v913_v8 = vmul.f32 0.01, %v785_v26 }
 0x11f   :  { %vm854_vm11 = vcmp.gt.f32.partialorder %v790_v20, 0.0  ;;  %v918_v59 = vmul.f32 0.01, %v790_v20  ;;  %v788_v11 = vadd.f32 %v3458_v10, %v478_v63  ;;  %v791_v2 = vadd.f32 %v3459_v17, %v489_v58 }
 0x120   :  { %v979_v46 = vsel %vm851_vm9, %v787_v62, %v915_v52  ;;  %v977_v54 = vsel %vm849_vm10, %v785_v26, %v913_v8  ;;  %v1879_v18 = vadd.f32 %v1878_v61, %v1816_v57  ;;  %v1818_v49 = vmul.f32 %v978_v44, %v978_v44  ;;  %v2546_v26 = vpop.f32.mrf.mxu0 }
 0x121   :  { %v2295_v53 = vpack.c.bf16 %v979_v46, %v978_v44  ;;  %v2290_v55 = vpack.c.bf16 %v977_v54, %v976_v27  ;;  %v1747_v48 = vadd.f32 %v1746_v22, %v977_v54  ;;  %v1817_v62 = vmul.f32 %v977_v54, %v977_v54 }
 0x122   :  { %vm852_vm12 = vcmp.gt.f32.partialorder %v788_v11, 0.0  ;;  %v982_v1 = vsel %vm854_vm11, %v790_v20, %v918_v59  ;;  %v916_v63 = vmul.f32 0.01, %v788_v11  ;;  %vm855_vm13 = vcmp.gt.f32.partialorder %v791_v2, 0.0  ;;  %v496_v54 = vpop.f32.mrf.mxu0 }
 0x123   :  { %2438 = vst [vmem:[%s3433_s4 + $0x58] sm:$0xff] %v2295_v53   ;;  %2437 = vst [vmem:[%s3433_s4 + $0x50] sm:$0xff] %v2290_v55   ;;  %v919_v27 = vmul.f32 0.01, %v791_v2  ;;  %v1748_v32 = vadd.f32 %v1747_v48, %v978_v44  ;;  %v1880_v58 = vadd.f32 %v1879_v18, %v1817_v62  ;;  %v481_v57 = vadd.f32 %v2951_v38, %v480_v56 }
 0x124   :  { %v502_v47 = vadd.f32 %v2545_v5, %v2951_v38  ;;  %v980_v52 = vsel %vm852_vm12, %v788_v11, %v916_v63  ;;  %v494_v22 = vadd.f32 %v2951_v38, %v493_v40  ;;  %v505_v61 = vadd.f32 %v2546_v26, %v2951_v38 }
 0x125   :  { %v983_v8 = vsel %vm855_vm13, %v791_v2, %v919_v27  ;;  %v1819_v20 = vmul.f32 %v979_v46, %v979_v46  ;;  %v1881_v59 = vadd.f32 %v1880_v58, %v1818_v49  ;;  %v1749_v10 = vadd.f32 %v1748_v32, %v979_v46  ;;  %v3206_v2 = vpop.f32.mrf.mxu1 }
 0x126   :  { %v2305_v17 = vpack.c.bf16 %v983_v8, %v982_v1  ;;  %v1820_v53 = vmul.f32 %v980_v52, %v980_v52  ;;  %v3460_v55 = vunpack.c.h.bf16 %v2871_v6  ;;  %v3461_v18 = vunpack.c.l.bf16 %v2876_v7 }
 0x127   :  { %v3462_v5 = vunpack.c.l.bf16 %v2890_v13  ;;  %v1750_v40 = vadd.f32 %v1749_v10, %v980_v52  ;;  %v1882_v48 = vadd.f32 %v1881_v59, %v1819_v20  ;;  %v3463_v46 = vunpack.c.h.bf16 %v2876_v7  ;;  %v3216_v20 = vpop.f32.mrf.mxu1 }
 0x128   :  { %v789_v44 = vadd.f32 %v3460_v55, %v481_v57  ;;  %v794_v56 = vadd.f32 %v3461_v18, %v502_v47  ;;  %2440 = vst [vmem:[%s3433_s4 + $0x68] sm:$0xff] %v2305_v17   ;;  %v497_v6 = vadd.f32 %v2951_v38, %v496_v54  ;;  %v1822_v32 = vmul.f32 %v982_v1, %v982_v1 }
 0x129   :  { %v792_v11 = vadd.f32 %v3462_v5, %v494_v22  ;;  %v795_v49 = vadd.f32 %v3463_v46, %v505_v61  ;;  %v1883_v27 = vadd.f32 %v1882_v48, %v1820_v53  ;;  %v3464_v47 = vunpack.c.h.bf16 %v2890_v13 }
 0x12a   :  { %vm853_vm14 = vcmp.gt.f32.partialorder %v789_v44, 0.0  ;;  %v917_v62 = vmul.f32 0.01, %v789_v44  ;;  %vm858_vm15 = vcmp.gt.f32.partialorder %v794_v56, 0.0  ;;  %v922_v63 = vmul.f32 0.01, %v794_v56 }
 0x12b   :  { %vm856_vm0 = vcmp.gt.f32.partialorder %v792_v11, 0.0  ;;  %v920_v26 = vmul.f32 0.01, %v792_v11  ;;  %vm859_vm1 = vcmp.gt.f32.partialorder %v795_v49, 0.0  ;;  %v923_v57 = vmul.f32 0.01, %v795_v49 }
 0x12c   :  { %v981_v58 = vsel %vm853_vm14, %v789_v44, %v917_v62  ;;  %v793_v22 = vadd.f32 %v3464_v47, %v497_v6  ;;  %v986_v54 = vsel %vm858_vm15, %v794_v56, %v922_v63  ;;  %v1823_v53 = vmul.f32 %v983_v8, %v983_v8 }
 0x12d   :  { %v2300_v7 = vpack.c.bf16 %v981_v58, %v980_v52  ;;  %v1751_v61 = vadd.f32 %v1750_v40, %v981_v58  ;;  %v1821_v59 = vmul.f32 %v981_v58, %v981_v58  ;;  %v984_v10 = vsel %vm856_vm0, %v792_v11, %v920_v26  ;;  %v3225_v11 = vpop.f32.mrf.mxu1 }
 0x12e   :  { %v987_v17 = vsel %vm859_vm1, %v795_v49, %v923_v57  ;;  %vm857_vm2 = vcmp.gt.f32.partialorder %v793_v22, 0.0  ;;  %v921_v55 = vmul.f32 0.01, %v793_v22  ;;  %v1824_v13 = vmul.f32 %v984_v10, %v984_v10 }
 0x12f   :  { %2439 = vst [vmem:[%s3433_s4 + $0x60] sm:$0xff] %v2300_v7   ;;  %v1752_v44 = vadd.f32 %v1751_v61, %v982_v1  ;;  %v1884_v18 = vadd.f32 %v1883_v27, %v1821_v59  ;;  %v2315_v5 = vpack.c.bf16 %v987_v17, %v986_v54  ;;  %v513_v52 = vadd.f32 %v2951_v38, %v3042_v50 }
 0x130   :  { %v985_v48 = vsel %vm857_vm2, %v793_v22, %v921_v55  ;;  %v534_v56 = vadd.f32 %v3059_v35, %v2951_v38  ;;  %v3465_v6 = vunpack.c.h.bf16 %v2895_v14  ;;  %v3466_v63 = vunpack.c.l.bf16 %v2904_v19 }
 0x131   :  { %v1885_v40 = vadd.f32 %v1884_v18, %v1822_v32  ;;  %v1753_v46 = vadd.f32 %v1752_v44, %v983_v8  ;;  %2442 = vst [vmem:[%s3433_s4 + $0x78] sm:$0xff] %v2315_v5   ;;  %v2310_v49 = vpack.c.bf16 %v985_v48, %v984_v10  ;;  %v1825_v1 = vmul.f32 %v985_v48, %v985_v48 }
 0x132   :  { %v797_v62 = vadd.f32 %v3465_v6, %v513_v52  ;;  %v802_v27 = vadd.f32 %v3466_v63, %v534_v56  ;;  %v526_v50 = vadd.f32 %v2951_v38, %v3072_v4  ;;  %v537_v35 = vadd.f32 %v3085_v45, %v2951_v38  ;;  %v3245_v4 = vpop.f32.mrf.mxu1 }
 0x133   :  { %v1754_v26 = vadd.f32 %v1753_v46, %v984_v10  ;;  %v1886_v8 = vadd.f32 %v1885_v40, %v1823_v53  ;;  %2441 = vst [vmem:[%s3433_s4 + $0x70] sm:$0xff] %v2310_v49   ;;  %v529_v32 = vadd.f32 %v2951_v38, %v3100_v60  ;;  %v550_v14 = vadd.f32 %v3107_v28, %v2951_v38 }
 0x134   :  { %vm861_vm3 = vcmp.gt.f32.partialorder %v797_v62, 0.0  ;;  %v925_v58 = vmul.f32 0.01, %v797_v62  ;;  %vm866_vm4 = vcmp.gt.f32.partialorder %v802_v27, 0.0  ;;  %v930_v57 = vmul.f32 0.01, %v802_v27 }
 0x135   :  { %v1887_v47 = vadd.f32 %v1886_v8, %v1824_v13  ;;  %v1755_v45 = vadd.f32 %v1754_v26, %v985_v48  ;;  %v3467_v22 = vunpack.c.l.bf16 %v2913_v24  ;;  %v3468_v61 = vunpack.c.h.bf16 %v2904_v19  ;;  %v3258_v19 = vpop.f32.mrf.mxu1 }
 0x136   :  { %v1826_v10 = vmul.f32 %v986_v54, %v986_v54  ;;  %v1827_v55 = vmul.f32 %v987_v17, %v987_v17  ;;  %v989_v60 = vsel %vm861_vm3, %v797_v62, %v925_v58  ;;  %v3469_v53 = vunpack.c.h.bf16 %v2913_v24 }
 0x137   :  { %v800_v7 = vadd.f32 %v3467_v22, %v526_v50  ;;  %v803_v59 = vadd.f32 %v3468_v61, %v537_v35  ;;  %v1756_v44 = vadd.f32 %v1755_v45, %v986_v54  ;;  %v1888_v18 = vadd.f32 %v1887_v47, %v1825_v1  ;;  %v3271_v8 = vpop.f32.mrf.mxu1 }
 0x138   :  { %v801_v28 = vadd.f32 %v3469_v53, %v529_v32  ;;  %v2320_v5 = vpack.c.bf16 %v989_v60, %v3185_v43  ;;  %v3254_v52 = vsel %vm866_vm4, %v802_v27, %v930_v57  ;;  %v3470_v48 = vunpack.c.l.bf16 %v2918_v25 }
 0x139   :  { %vm864_vm5 = vcmp.gt.f32.partialorder %v800_v7, 0.0  ;;  %v928_v13 = vmul.f32 0.01, %v800_v7  ;;  %vm867_vm6 = vcmp.gt.f32.partialorder %v803_v59, 0.0  ;;  %v1889_v40 = vadd.f32 %v1888_v18, %v1826_v10 }
 0x13a   :  { %v806_v56 = vadd.f32 %v3470_v48, %v550_v14  ;;  %2443 = vst [vmem:[%s3433_s4 + $0x80] sm:$0xff] %v2320_v5   ;;  %v1757_v24 = vadd.f32 %v1756_v44, %v987_v17  ;;  %v931_v54 = vmul.f32 0.01, %v803_v59  ;;  %vm865_vm7 = vcmp.gt.f32.partialorder %v801_v28, 0.0 }
 0x13b   :  { %v1828_v46 = vmul.f32 %v3185_v43, %v3185_v43  ;;  %v1831_v49 = vmul.f32 %v3074_v21, %v3074_v21  ;;  %v992_v1 = vsel %vm864_vm5, %v800_v7, %v928_v13  ;;  %v929_v6 = vmul.f32 0.01, %v801_v28 }
 0x13c   :  { %v1758_v62 = vadd.f32 %v1757_v24, %v3185_v43  ;;  %v1829_v63 = vmul.f32 %v989_v60, %v989_v60  ;;  %v1890_v27 = vadd.f32 %v1889_v40, %v1827_v55  ;;  %v995_v50 = vsel %vm867_vm6, %v803_v59, %v931_v54 }
 0x13d   :  { %v1834_v35 = vmul.f32 %v3254_v52, %v3254_v52  ;;  %v2335_v17 = vpack.c.bf16 %v995_v50, %v3254_v52  ;;  %v993_v26 = vsel %vm865_vm7, %v801_v28, %v929_v6  ;;  %vm870_vm8 = vcmp.gt.f32.partialorder %v806_v56, 0.0  ;;  %v3296_v28 = vpop.f32.mrf.mxu1 }
 0x13e   :  { %v1759_v32 = vadd.f32 %v1758_v62, %v989_v60  ;;  %v1891_v14 = vadd.f32 %v1890_v27, %v1828_v46  ;;  %v2330_v58 = vpack.c.bf16 %v993_v26, %v992_v1  ;;  %v934_v57 = vmul.f32 0.01, %v806_v56 }
 0x13f   :  { %v1832_v47 = vmul.f32 %v992_v1, %v992_v1  ;;  %2446 = vst [vmem:[%s3433_s4 + $0x98] sm:$0xff] %v2335_v17   ;;  %v542_v43 = vadd.f32 %v2951_v38, %v3122_v12  ;;  %v553_v45 = vadd.f32 %v3129_v39, %v2951_v38  ;;  %v545_v22 = vadd.f32 %v2951_v38, %v3144_v41 }
 0x140   :  { %v1760_v7 = vadd.f32 %v1759_v32, %v3031_v9  ;;  %v1892_v61 = vadd.f32 %v1891_v14, %v1829_v63  ;;  %v1835_v59 = vmul.f32 %v995_v50, %v995_v50  ;;  %2445 = vst [vmem:[%s3433_s4 + $0x90] sm:$0xff] %v2330_v58   ;;  %v566_v10 = vadd.f32 %v3153_v42, %v2951_v38 }
 0x141   :  { %v3471_v55 = vunpack.c.l.bf16 %v2927_v30  ;;  %v3472_v60 = vunpack.c.h.bf16 %v2918_v25  ;;  %v3473_v53 = vunpack.c.h.bf16 %v2927_v30  ;;  %v558_v9 = vadd.f32 %v2951_v38, %v3165_v3 }
 0x142   :  { %v1893_v44 = vadd.f32 %v1892_v61, %v3049_v51  ;;  %v1761_v18 = vadd.f32 %v1760_v7, %v3074_v21  ;;  %v998_v42 = vsel %vm870_vm8, %v806_v56, %v934_v57  ;;  %v3474_v5 = vunpack.c.l.bf16 %v2932_v31  ;;  %v3307_v56 = vpop.f32.mrf.mxu1 }
 0x143   :  { %v804_v12 = vadd.f32 %v3471_v55, %v542_v43  ;;  %v807_v39 = vadd.f32 %v3472_v60, %v553_v45  ;;  %v805_v41 = vadd.f32 %v3473_v53, %v545_v22  ;;  %v3475_v46 = vunpack.c.l.bf16 %v2941_v36 }
 0x144   :  { %v810_v13 = vadd.f32 %v3474_v5, %v566_v10  ;;  %v1762_v30 = vadd.f32 %v1761_v18, %v992_v1  ;;  %v1894_v40 = vadd.f32 %v1893_v44, %v1831_v49  ;;  %v569_v21 = vadd.f32 %v3175_v0, %v2951_v38  ;;  %v3317_v45 = vpop.f32.mrf.mxu1 }
 0x145   :  { %vm868_vm9 = vcmp.gt.f32.partialorder %v804_v12, 0.0  ;;  %v932_v25 = vmul.f32 0.01, %v804_v12  ;;  %vm871_vm10 = vcmp.gt.f32.partialorder %v807_v39, 0.0  ;;  %v935_v48 = vmul.f32 0.01, %v807_v39 }
 0x146   :  { %vm869_vm11 = vcmp.gt.f32.partialorder %v805_v41, 0.0  ;;  %v933_v24 = vmul.f32 0.01, %v805_v41  ;;  %v808_v51 = vadd.f32 %v3475_v46, %v558_v9  ;;  %v1895_v6 = vadd.f32 %v1894_v40, %v1832_v47  ;;  %v3332_v9 = vpop.f32.mrf.mxu1  ;;  %v3342_v46 = vld [vmem:[%s3432_s2] ss:$0 sm:$0xff] }
 0x147   :  { %v996_v3 = vsel %vm868_vm9, %v804_v12, %v932_v25  ;;  %v999_v54 = vsel %vm871_vm10, %v807_v39, %v935_v48  ;;  %v1763_v62 = vadd.f32 %v1762_v30, %v993_v26  ;;  %v1833_v63 = vmul.f32 %v993_v26, %v993_v26 }
 0x148   :  { %v2345_v27 = vpack.c.bf16 %v999_v54, %v998_v42  ;;  %v1838_v17 = vmul.f32 %v998_v42, %v998_v42  ;;  %v997_v32 = vsel %vm869_vm11, %v805_v41, %v933_v24  ;;  %vm874_vm12 = vcmp.gt.f32.partialorder %v810_v13, 0.0 }
 0x149   :  { %v938_v49 = vmul.f32 0.01, %v810_v13  ;;  %v1764_v1 = vadd.f32 %v1763_v62, %v3254_v52  ;;  %v1896_v14 = vadd.f32 %v1895_v6, %v1833_v63  ;;  %v1836_v58 = vmul.f32 %v996_v3, %v996_v3 }
 0x14a   :  { %2448 = vst [vmem:[%s3433_s4 + $0xa8] sm:$0xff] %v2345_v27   ;;  %v2340_v57 = vpack.c.bf16 %v997_v32, %v996_v3  ;;  %vm872_vm13 = vcmp.gt.f32.partialorder %v808_v51, 0.0  ;;  %v936_v0 = vmul.f32 0.01, %v808_v51  ;;  %v3476_v47 = vunpack.c.h.bf16 %v2932_v31 }
 0x14b   :  { %v561_v26 = vadd.f32 %v2951_v38, %v3194_v16  ;;  %v1897_v22 = vadd.f32 %v1896_v14, %v1834_v35  ;;  %v1765_v7 = vadd.f32 %v1764_v1, %v995_v50  ;;  %v582_v52 = vadd.f32 %v3206_v2, %v2951_v38 }
 0x14c   :  { %v811_v43 = vadd.f32 %v3476_v47, %v569_v21  ;;  %2447 = vst [vmem:[%s3433_s4 + $0xa0] sm:$0xff] %v2340_v57   ;;  %v574_v61 = vadd.f32 %v2951_v38, %v3216_v20  ;;  %v1002_v31 = vsel %vm874_vm12, %v810_v13, %v938_v49  ;;  %v3477_v16 = vunpack.c.h.bf16 %v2941_v36  ;;  %v2574_v21 = vpop.f32.mrf.mxu1 }
 0x14d   :  { %v1766_v12 = vadd.f32 %v1765_v7, %v996_v3  ;;  %v1898_v35 = vadd.f32 %v1897_v22, %v1835_v59  ;;  %v1000_v50 = vsel %vm872_vm13, %v808_v51, %v936_v0  ;;  %v3478_v60 = vunpack.c.l.bf16 %v2946_v37 }
 0x14e   :  { %vm875_vm14 = vcmp.gt.f32.partialorder %v811_v43, 0.0  ;;  %v939_v10 = vmul.f32 0.01, %v811_v43  ;;  %v809_v55 = vadd.f32 %v3477_v16, %v561_v26  ;;  %v1837_v53 = vmul.f32 %v997_v32, %v997_v32  ;;  %v3362_v47 = vpop.f32.mrf.mxu1 }
 0x14f   :  { %v814_v39 = vadd.f32 %v3478_v60, %v582_v52  ;;  %v1899_v38 = vadd.f32 %v1898_v35, %v1836_v58  ;;  %v1767_v20 = vadd.f32 %v1766_v12, %v997_v32  ;;  %v3479_v18 = vunpack.c.l.bf16 %v2960_v29 }
 0x150   :  { %v1003_v41 = vsel %vm875_vm14, %v811_v43, %v939_v10  ;;  %vm873_vm15 = vcmp.gt.f32.partialorder %v809_v55, 0.0  ;;  %v937_v2 = vmul.f32 0.01, %v809_v55  ;;  %v1839_v5 = vmul.f32 %v999_v54, %v999_v54 }
 0x151   :  { %v2355_v44 = vpack.c.bf16 %v1003_v41, %v1002_v31  ;;  %v812_v36 = vadd.f32 %v3479_v18, %v574_v61  ;;  %v1842_v13 = vmul.f32 %v1002_v31, %v1002_v31  ;;  %v1840_v59 = vmul.f32 %v1000_v50, %v1000_v50 }
 0x152   :  { %v1001_v25 = vsel %vm873_vm15, %v809_v55, %v937_v2  ;;  %v1768_v48 = vadd.f32 %v1767_v20, %v998_v42  ;;  %v1900_v30 = vadd.f32 %v1899_v38, %v1837_v53  ;;  %v942_v24 = vmul.f32 0.01, %v814_v39 }
 0x153   :  { %2450 = vst [vmem:[%s3433_s4 + $0xb8] sm:$0xff] %v2355_v44   ;;  %v2350_v40 = vpack.c.bf16 %v1001_v25, %v1000_v50  ;;  %v1843_v3 = vmul.f32 %v1003_v41, %v1003_v41  ;;  %vm878_vm0 = vcmp.gt.f32.partialorder %v814_v39, 0.0  ;;  %v585_v51 = vadd.f32 %v3342_v46, %v3225_v11 }
 0x154   :  { %v577_v42 = vadd.f32 %v3342_v46, %v3245_v4  ;;  %v1901_v6 = vadd.f32 %v1900_v30, %v1838_v17  ;;  %v1769_v62 = vadd.f32 %v1768_v48, %v999_v54  ;;  %v940_v63 = vmul.f32 0.01, %v812_v36 }
 0x155   :  { %2449 = vst [vmem:[%s3433_s4 + $0xb0] sm:$0xff] %v2350_v40   ;;  %v598_v27 = vadd.f32 %v3342_v46, %v3258_v19  ;;  %vm876_vm1 = vcmp.gt.f32.partialorder %v812_v36, 0.0  ;;  %v3480_v32 = vunpack.c.h.bf16 %v2946_v37  ;;  %v3481_v11 = vunpack.c.h.bf16 %v2960_v29 }
 0x156   :  { %v590_v4 = vadd.f32 %v3342_v46, %v3271_v8  ;;  %v1770_v17 = vadd.f32 %v1769_v62, %v1000_v50  ;;  %v1902_v54 = vadd.f32 %v1901_v6, %v1839_v5  ;;  %v1006_v14 = vsel %vm878_vm0, %v814_v39, %v942_v24  ;;  %v2577_v39 = vpop.f32.mrf.mxu1 }
 0x157   :  { %v815_v49 = vadd.f32 %v3480_v32, %v585_v51  ;;  %v813_v1 = vadd.f32 %v3481_v11, %v577_v42  ;;  %v3482_v58 = vunpack.c.l.bf16 %v2969_v34  ;;  %v1841_v29 = vmul.f32 %v1001_v25, %v1001_v25 }
 0x158   :  { %v1903_v37 = vadd.f32 %v1902_v54, %v1840_v59  ;;  %v1771_v43 = vadd.f32 %v1770_v17, %v1001_v25  ;;  %v1004_v26 = vsel %vm876_vm1, %v812_v36, %v940_v63  ;;  %v3483_v7 = vunpack.c.l.bf16 %v2974_v33  ;;  %v621_v30 = vpop.f32.mrf.mxu1 }
 0x159   :  { %v818_v57 = vadd.f32 %v3482_v58, %v598_v27  ;;  %vm879_vm2 = vcmp.gt.f32.partialorder %v815_v49, 0.0  ;;  %v943_v0 = vmul.f32 0.01, %v815_v49  ;;  %vm877_vm3 = vcmp.gt.f32.partialorder %v813_v1, 0.0 }
 0x15a   :  { %v941_v19 = vmul.f32 0.01, %v813_v1  ;;  %v816_v52 = vadd.f32 %v3483_v7, %v590_v4  ;;  %v601_v61 = vadd.f32 %v3342_v46, %v3296_v28  ;;  %v1772_v10 = vadd.f32 %v1771_v43, %v1002_v31 }
 0x15b   :  { %v1007_v22 = vsel %vm879_vm2, %v815_v49, %v943_v0  ;;  %v1904_v16 = vadd.f32 %v1903_v37, %v1841_v29  ;;  %v946_v12 = vmul.f32 0.01, %v818_v57  ;;  %v1844_v35 = vmul.f32 %v1004_v26, %v1004_v26 }
 0x15c   :  { %v1005_v8 = vsel %vm877_vm3, %v813_v1, %v941_v19  ;;  %v2365_v55 = vpack.c.bf16 %v1007_v22, %v1006_v14  ;;  %vm882_vm4 = vcmp.gt.f32.partialorder %v818_v57, 0.0  ;;  %v1773_v2 = vadd.f32 %v1772_v10, %v1003_v41  ;;  %v2578_v1 = vpop.f32.mrf.mxu1 }
 0x15d   :  { %v2360_v50 = vpack.c.bf16 %v1005_v8, %v1004_v26  ;;  %v1845_v60 = vmul.f32 %v1005_v8, %v1005_v8  ;;  %v1905_v53 = vadd.f32 %v1904_v16, %v1842_v13  ;;  %vm880_vm5 = vcmp.gt.f32.partialorder %v816_v52, 0.0 }
 0x15e   :  { %2452 = vst [vmem:[%s3433_s4 + $0xc8] sm:$0xff] %v2365_v55   ;;  %v944_v38 = vmul.f32 0.01, %v816_v52  ;;  %v3484_v28 = vunpack.c.h.bf16 %v2969_v34  ;;  %v593_v20 = vadd.f32 %v3342_v46, %v3307_v56  ;;  %v614_v44 = vadd.f32 %v3342_v46, %v3317_v45 }
 0x15f   :  { %2451 = vst [vmem:[%s3433_s4 + $0xc0] sm:$0xff] %v2360_v50   ;;  %v606_v41 = vadd.f32 %v3342_v46, %v3332_v9  ;;  %v1774_v18 = vadd.f32 %v1773_v2, %v1004_v26  ;;  %v1906_v36 = vadd.f32 %v1905_v53, %v1843_v3  ;;  %v1010_v5 = vsel %vm882_vm4, %v818_v57, %v946_v12  ;;  %v3492_v53 = vld [vmem:[#allocation3_spill] sm:$0xff] }
 0x160   :  { %v819_v31 = vadd.f32 %v3484_v28, %v601_v61  ;;  %v617_v13 = vadd.f32 %v3342_v46, %v2574_v21  ;;  %v1008_v59 = vsel %vm880_vm5, %v816_v52, %v944_v38  ;;  %v3485_v34 = vunpack.c.h.bf16 %v2974_v33 }
 0x161   :  { %v1907_v40 = vadd.f32 %v1906_v36, %v1844_v35  ;;  %v1775_v56 = vadd.f32 %v1774_v18, %v1005_v8  ;;  %v3486_v24 = vunpack.c.l.bf16 %v2987_v15  ;;  %v3487_v51 = vunpack.c.l.bf16 %v2992_v23  ;;  %v624_v8 = vpop.f32.mrf.mxu1  ;;  %v3490_v35 = vld [vmem:[#allocation2_spill] sm:$0xff] }
 0x162   :  { %vm883_vm6 = vcmp.gt.f32.partialorder %v819_v31, 0.0  ;;  %v947_v25 = vmul.f32 0.01, %v819_v31  ;;  %v817_v48 = vadd.f32 %v3485_v34, %v593_v20  ;;  %v3488_v21 = vunpack.c.h.bf16 %v2987_v15 }
 0x163   :  { %v822_v45 = vadd.f32 %v3486_v24, %v614_v44  ;;  %v820_v9 = vadd.f32 %v3487_v51, %v606_v41  ;;  %v1846_v62 = vmul.f32 %v1006_v14, %v1006_v14  ;;  %v1776_v63 = vadd.f32 %v1775_v56, %v1006_v14 }
 0x164   :  { %v1011_v42 = vsel %vm883_vm6, %v819_v31, %v947_v25  ;;  %vm881_vm7 = vcmp.gt.f32.partialorder %v817_v48, 0.0  ;;  %v945_v3 = vmul.f32 0.01, %v817_v48  ;;  %v823_v6 = vadd.f32 %v3488_v21, %v617_v13 }
 0x165   :  { %v1908_v27 = vadd.f32 %v1907_v40, %v1845_v60  ;;  %v2375_v33 = vpack.c.bf16 %v1011_v42, %v1010_v5  ;;  %v1847_v32 = vmul.f32 %v1007_v22, %v1007_v22  ;;  %vm886_vm8 = vcmp.gt.f32.partialorder %v822_v45, 0.0 }
 0x166   :  { %v1009_v49 = vsel %vm881_vm7, %v817_v48, %v945_v3  ;;  %v950_v11 = vmul.f32 0.01, %v822_v45  ;;  %v1777_v17 = vadd.f32 %v1776_v63, %v1007_v22  ;;  %v1848_v54 = vmul.f32 %v1008_v59, %v1008_v59 }
 0x167   :  { %v1909_v4 = vadd.f32 %v1908_v27, %v1846_v62  ;;  %2454 = vst [vmem:[%s3433_s4 + $0xd8] sm:$0xff] %v2375_v33   ;;  %v2370_v58 = vpack.c.bf16 %v1009_v49, %v1008_v59  ;;  %v948_v15 = vmul.f32 0.01, %v820_v9  ;;  %vm887_vm9 = vcmp.gt.f32.partialorder %v823_v6, 0.0 }
 0x168   :  { %v1014_v57 = vsel %vm886_vm8, %v822_v45, %v950_v11  ;;  %v951_v0 = vmul.f32 0.01, %v823_v6  ;;  %v1778_v14 = vadd.f32 %v1777_v17, %v1008_v59  ;;  %vm884_vm10 = vcmp.gt.f32.partialorder %v820_v9, 0.0 }
 0x169   :  { %v1910_v19 = vadd.f32 %v1909_v4, %v1847_v32  ;;  %2453 = vst [vmem:[%s3433_s4 + $0xd0] sm:$0xff] %v2370_v58   ;;  %v609_v37 = vadd.f32 %v3342_v46, %v3362_v47  ;;  %v1850_v43 = vmul.f32 %v1010_v5, %v1010_v5  ;;  %v630_v26 = vadd.f32 %v3342_v46, %v2577_v39 }
 0x16a   :  { %v1015_v29 = vsel %vm887_vm9, %v823_v6, %v951_v0  ;;  %v622_v22 = vadd.f32 %v3342_v46, %v621_v30  ;;  %v1779_v52 = vadd.f32 %v1778_v14, %v1009_v49  ;;  %v1849_v61 = vmul.f32 %v1009_v49, %v1009_v49 }
 0x16b   :  { %v1911_v7 = vadd.f32 %v1910_v19, %v1848_v54  ;;  %v2385_v10 = vpack.c.bf16 %v1015_v29, %v1014_v57  ;;  %v1012_v16 = vsel %vm884_vm10, %v820_v9, %v948_v15  ;;  %v3489_v55 = vunpack.c.h.bf16 %v2992_v23 }
 0x16c   :  { %v3491_v50 = vunpack.c.l.bf16 %v3490_v35  ;;  %v3493_v47 = vunpack.c.l.bf16 %v3492_v53  ;;  %v1780_v38 = vadd.f32 %v1779_v52, %v1010_v5  ;;  %v633_v39 = vadd.f32 %v3342_v46, %v2578_v1 }
 0x16d   :  { %v821_v12 = vadd.f32 %v3489_v55, %v609_v37  ;;  %v1912_v28 = vadd.f32 %v1911_v7, %v1849_v61  ;;  %2456 = vst [vmem:[%s3433_s4 + $0xe8] sm:$0xff] %v2385_v10   ;;  %v625_v31 = vadd.f32 %v3342_v46, %v624_v8  ;;  %v1851_v20 = vmul.f32 %v1011_v42, %v1011_v42 }
 0x16e   :  { %v826_v60 = vadd.f32 %v3491_v50, %v630_v26  ;;  %v824_v2 = vadd.f32 %v3493_v47, %v622_v22  ;;  %v1781_v18 = vadd.f32 %v1780_v38, %v1011_v42  ;;  %v1852_v36 = vmul.f32 %v1012_v16, %v1012_v16 }
 0x16f   :  { %vm885_vm11 = vcmp.gt.f32.partialorder %v821_v12, 0.0  ;;  %v949_v23 = vmul.f32 0.01, %v821_v12  ;;  %v1913_v41 = vadd.f32 %v1912_v28, %v1850_v43  ;;  %v3494_v5 = vunpack.c.h.bf16 %v3490_v35 }
 0x170   :  { %v954_v44 = vmul.f32 0.01, %v826_v60  ;;  %vm890_vm12 = vcmp.gt.f32.partialorder %v826_v60, 0.0  ;;  %v952_v59 = vmul.f32 0.01, %v824_v2  ;;  %v3495_v34 = vunpack.c.h.bf16 %v3492_v53 }
 0x171   :  { %v1013_v13 = vsel %vm885_vm11, %v821_v12, %v949_v23  ;;  %v827_v25 = vadd.f32 %v3494_v5, %v633_v39  ;;  %v1782_v30 = vadd.f32 %v1781_v18, %v1012_v16  ;;  %v1914_v40 = vadd.f32 %v1913_v41, %v1851_v20 }
 0x172   :  { %v825_v48 = vadd.f32 %v3495_v34, %v625_v31  ;;  %v2380_v56 = vpack.c.bf16 %v1013_v13, %v1012_v16  ;;  %vm888_vm13 = vcmp.gt.f32.partialorder %v824_v2, 0.0  ;;  %v1018_v46 = vsel %vm890_vm12, %v826_v60, %v954_v44 }
 0x173   :  { %vm891_vm14 = vcmp.gt.f32.partialorder %v827_v25, 0.0  ;;  %v955_v24 = vmul.f32 0.01, %v827_v25  ;;  %v1915_v45 = vadd.f32 %v1914_v40, %v1852_v36  ;;  %v1783_v51 = vadd.f32 %v1782_v30, %v1013_v13 }
 0x174   :  { %2455 = vst [vmem:[%s3433_s4 + $0xe0] sm:$0xff] %v2380_v56   ;;  %v1853_v9 = vmul.f32 %v1013_v13, %v1013_v13  ;;  %vm889_vm15 = vcmp.gt.f32.partialorder %v825_v48, 0.0  ;;  %v1016_v42 = vsel %vm888_vm13, %v824_v2, %v952_v59  ;;  %v953_v21 = vmul.f32 0.01, %v825_v48 }
 0x175   :  { %v1019_v3 = vsel %vm891_vm14, %v827_v25, %v955_v24  ;;  %v1854_v6 = vmul.f32 %v1014_v57, %v1014_v57  ;;  %v1784_v62 = vadd.f32 %v1783_v51, %v1014_v57  ;;  %v1855_v32 = vmul.f32 %v1015_v29, %v1015_v29 }
 0x176   :  { %v1916_v63 = vadd.f32 %v1915_v45, %v1853_v9  ;;  %v2395_v27 = vpack.c.bf16 %v1019_v3, %v1018_v46  ;;  %v1017_v33 = vsel %vm889_vm15, %v825_v48, %v953_v21  ;;  %v1856_v17 = vmul.f32 %v1016_v42, %v1016_v42 }
 0x177   :  { %v1785_v11 = vadd.f32 %v1784_v62, %v1015_v29  ;;  %v2390_v1 = vpack.c.bf16 %v1017_v33, %v1016_v42  ;;  %v1857_v15 = vmul.f32 %v1017_v33, %v1017_v33  ;;  %v1858_v0 = vmul.f32 %v1018_v46, %v1018_v46 }
 0x178   :  { %v1917_v49 = vadd.f32 %v1916_v63, %v1854_v6  ;;  %2458 = vst [vmem:[%s3433_s4 + $0xf8] sm:$0xff] %v2395_v27   ;;  %v1859_v37 = vmul.f32 %v1019_v3, %v1019_v3  ;;  %vm1929_vm0 = vcmask 1040384  }
 0x179   :  { %v1786_v4 = vadd.f32 %v1785_v11, %v1016_v42  ;;  %2457 = vst [vmem:[%s3433_s4 + $0xf0] sm:$0xff] %v2390_v1  }
 0x17a   :  { %v1918_v54 = vadd.f32 %v1917_v49, %v1855_v32 }
 0x17b   :  { %v1787_v57 = vadd.f32 %v1786_v4, %v1017_v33 }
 0x17c   :  { %v1919_v58 = vadd.f32 %v1918_v54, %v1856_v17 }
 0x17d   :  { %v1788_v14 = vadd.f32 %v1787_v57, %v1018_v46 }
 0x17e   :  { %v1920_v19 = vadd.f32 %v1919_v58, %v1857_v15 }
 0x17f   :  { %v1789_v43 = vadd.f32 %v1788_v14, %v1019_v3 }
 0x180   :  { %v1921_v29 = vadd.f32 %v1920_v19, %v1858_v0 }
 0x181   :  { %v1790_v26 = vrot.slane %v1789_v43, 4 }
 0x182   :  { %v1922_v22 = vadd.f32 %v1921_v29, %v1859_v37 }
 0x183   :  { %v1791_v8 = vadd.f32 %v1790_v26, %v1789_v43 }
 0x184   :  { %v1923_v7 = vrot.slane %v1922_v22, 4 }
 0x185   :  { %v1792_v52 = vrot.slane %v1791_v8, 2 }
 0x186   :  { %v1924_v61 = vadd.f32 %v1923_v7, %v1922_v22 }
 0x187   :  { %v1793_v10 = vadd.f32 %v1792_v52, %v1791_v8 }
 0x188   :  { %v1925_v16 = vrot.slane %v1924_v61, 2 }
 0x189   :  { %v1794_v55 = vrot.slane %v1793_v10, 1 }
 0x18a   :  { %v1926_v12 = vadd.f32 %v1925_v16, %v1924_v61 }
 0x18b   :  { %v1795_v50 = vadd.f32 %v1794_v55, %v1793_v10 }
 0x18c   :  { %v1927_v35 = vrot.slane %v1926_v12, 1 }
 0x18e   :  { %v1928_v60 = vadd.f32 %v1927_v35, %v1926_v12 }
 0x190   :  { %v1930_v53 = vsel %vm1929_vm0, %v1795_v50, %v1928_v60 }
 0x191   :  { %1931 = vst [vmem:[%s3434_s5] sm:$0x3] %v1930_v53 }

// kernel: bottle_neck_down_forward.5
= control target key start
LH: loop header
LB: loop body
LE: loop exit
PB: predicated region body
PF: predicated region fallthrough
CT: control target
= control target key end

     0   :  { %s7098_s15 = smov 0   ;;  %s9642_s0 = inlined_call_operand.vmem [shape: bf16[2,1,18,18,128], index: 0, kind: input, shape index: {}]   ;;  %s9643_s1 = inlined_call_operand.vmem [shape: bf16[9,128,128], index: 1, kind: input, shape index: {}]   ;;  %s9644_s2 = inlined_call_operand.vmem [shape: f32[1,128], index: 2, kind: input, shape index: {}]   ;;  %s9645_s3 = inlined_call_operand.vmem [shape: bf16[2,256,128], index: 3, kind: output, shape index: {0}]   ;;  %s9646_s4 = inlined_call_operand.vmem [shape: f32[2,2,128], index: 4, kind: output, shape index: {1}]  }
   0x1 LB: > { %s5477_s16 = sadd.s32 4294967295, %s7071_s15   ;;  %p5481_p0 = scmp.ge.s32.totalorder %s7071_s15, 1  ;;  %s7071_s15 = sphi %s7098_s15, %s15_s15  }
   0x2   : > { %p165_p1 = scmp.lt.s32.totalorder %s7071_s15, 3 }
   0x4   : > { %p166_p2 = pnand %p5481_p0, %p165_p1 }
   0x6   : > { %169 = sbr.rel (%p166_p2) target bundleno = 597 (0x255), region = 32 }
   0xb   : > { %v6906_v0 = vld [vmem:[%s9643_s1 + $0xb8] sm:$0xff]   ;;  %p195_p3 = scmp.lt.s32.totalorder %s5477_s16, 1  ;;  %v6907_v1 = vld [vmem:[%s9643_s1 + $0xb0] sm:$0xff]   ;;  %v6908_v2 = vld [vmem:[%s9643_s1 + $0xa8] sm:$0xff]   ;;  %vm742_vm0 = vcmask 1042432   ;;  %vm743_vm1 = vcmask 1046532  }
   0xc   : > { %6449 = vmatprep.subr.bf16.mxu0 %v6906_v0  ;;  %6881 = vmatprep.subr.bf16.mxu1 %v6906_v0  ;;  %v6909_v3 = vld [vmem:[%s9643_s1 + $0xa0] sm:$0xff]   ;;  %vm7133_vm2 = vmor %vm742_vm0, %vm743_vm1  ;;  %v9656_v7 = vmov 0  ;;  %v6910_v17 = vld [vmem:[%s9643_s1 + $0x98] sm:$0xff]   ;;  %vm274_vm3 = vsmask.f32 3328 }
   0xd   : > { %s9912_s16 = smov (!%p195_p3, %s5477_s16), 1  ;;  %6450 = vmatpush3.bf16.msra.mxu0 %v6906_v0  ;;  %6889 = vmatpush3.bf16.msra.mxu1 %v6906_v0  ;;  %v9657_v7 = vsel %vm7133_vm2, 4294967295, %v9656_v7  ;;  %v6911_v29 = vld [vmem:[%s9643_s1 + $0x90] sm:$0xff]   ;;  %v6912_v39 = vld [vmem:[%s9643_s1 + $0x88] sm:$0xff]   ;;  %v6913_v50 = vld [vmem:[%s9643_s1 + $0x80] sm:$0xff]  }
   0xe   : > { %6451 = vmatprep.subr.bf16.mxu0 %v6907_v1  ;;  %6882 = vmatprep.subr.bf16.mxu1 %v6907_v1  ;;  %s6897_s23 = smul.u32 216, %s9912_s16  ;;  %9658 = vst [vmem:[#allocation2_spill] sm:$0xff] %v9657_v7  ;;  %vm275_vm4 = vsmask.f32 7440  ;;  %s6105_s28 = sshll.u32 %s9912_s16, 7 }
   0xf   : > { %vm7622_vm5 = vmor %vm274_vm3, %vm275_vm4  ;;  %s9511_s5 = scalar_lea.vmem %s9645_s3, %s6105_s28  ;;  %s5485_s6 = sshll.u32 %s9912_s16, 1 }
  0x10   : > { %s7121_s26 = scalar_lea.vmem %s9642_s0, %s6897_s23  ;;  %s208_s9 = scalar_lea.vmem %s9646_s4, %s5485_s6 }
  0x11   : > { %6452 = vmatpush3.bf16.msra.mxu0 %v6907_v1  ;;  %6890 = vmatpush3.bf16.msra.mxu1 %v6907_v1  ;;  %v7127_v4 = vld [vmem:[%s7121_s26 + $0x4] sm:$0xf]  ;;  %v7130_v5 = vld [vmem:[%s7121_s26 + $0x8] sm:$0x1]  ;;  %v678_v6 = vld [vmem:[%s7121_s26] sm:$0xe] }
  0x12   : > { %6453 = vmatprep.subr.bf16.mxu0 %v6908_v2  ;;  %6883 = vmatprep.subr.bf16.mxu1 %v6908_v2  ;;  %v5502_v8 = vrot.slane %v678_v6, 9  ;;  %v747_v9 = vrot.slane %v7127_v4, 5  ;;  %v750_v10 = vrot.slane %v7130_v5, 5  ;;  %v7140_v11 = vld [vmem:[%s7121_s26 + $0x64] sm:$0xf]  ;;  %v297_v24 = vshll.u32 %v7130_v5, 16 }
  0x13   : > { %v7143_v12 = vld [vmem:[%s7121_s26 + $0x68] sm:$0x1]  ;;  %v686_v13 = vld [vmem:[%s7121_s26 + $0x60] sm:$0xe]  ;;  %v803_v14 = vrot.slane %v7140_v11, 5  ;;  %v6957_v7 = vld [vmem:[%s7121_s26 + $0x78] sm:$0xff]  }
  0x14   : > { %v748_v15 = vsel %vm7133_vm2, %v5502_v8, %v747_v9  ;;  %v749_v16 = vrot.slane %v747_v9, 4  ;;  %v5510_v18 = vrot.slane %v686_v13, 9  ;;  %v806_v20 = vrot.slane %v7143_v12, 5  ;;  %v7156_v22 = vld [vmem:[%s7121_s26 + $0x10] sm:$0xf]  ;;  %v6914_v9 = vld [vmem:[%s9643_s1 + $0x38] sm:$0xff]  }
  0x15   : > { %6454 = vmatpush3.bf16.msra.mxu0 %v6908_v2  ;;  %6891 = vmatpush3.bf16.msra.mxu1 %v6908_v2  ;;  %v805_v19 = vrot.slane %v803_v14, 4  ;;  %v679_v23 = vld [vmem:[%s7121_s26 + $0xc] sm:$0xe]  ;;  %v7165_v28 = vld [vmem:[%s7121_s26 + $0x14] sm:$0x1]  ;;  %v489_v30 = vshll.u32 %v7143_v12, 16 }
  0x16   : > { %6455 = vmatprep.subr.bf16.mxu0 %v6909_v3  ;;  %6884 = vmatprep.subr.bf16.mxu1 %v6909_v3  ;;  %v751_v21 = vsel %vm7133_vm2, %v749_v16, %v750_v10  ;;  %v804_v26 = vsel %vm7133_vm2, %v5510_v18, %v803_v14  ;;  %v315_v32 = vshrl.u32 %v7156_v22, 16  ;;  %v321_v33 = vshll.u32 %v7165_v28, 16  ;;  %v7174_v34 = vld [vmem:[%s7121_s26 + $0x70] sm:$0xf]  ;;  %v267_v37 = vld [vmem:[%s7121_s26 + $0x74] sm:$0x1] }
  0x17   : > { %v5534_v25 = vcombine.low %v748_v15, %v751_v21  ;;  %v807_v27 = vsel %vm7133_vm2, %v805_v19, %v806_v20  ;;  %v5503_v35 = vrot.slane %v679_v23, 9  ;;  %v754_v36 = vrot.slane %v7156_v22, 5  ;;  %v687_v38 = vld [vmem:[%s7121_s26 + $0x6c] sm:$0xe]  ;;  %v7185_v42 = vld [vmem:[%s7121_s26 + $0x1c] sm:$0xf] }
  0x18   : > { %v5542_v31 = vcombine.low %v804_v26, %v807_v27  ;;  %v757_v40 = vrot.slane %v7165_v28, 5  ;;  %v810_v41 = vrot.slane %v7174_v34, 5  ;;  %v260_v43 = vld [vmem:[%s7121_s26 + $0x20] sm:$0x1]  ;;  %v680_v44 = vld [vmem:[%s7121_s26 + $0x18] sm:$0xe] }
  0x19   : > { %6456 = vmatpush3.bf16.msra.mxu0 %v6909_v3  ;;  %6892 = vmatpush3.bf16.msra.mxu1 %v6909_v3  ;;  %v756_v45 = vrot.slane %v754_v36, 4  ;;  %v5511_v46 = vrot.slane %v687_v38, 9  ;;  %v813_v47 = vrot.slane %v267_v37, 5  ;;  %v761_v48 = vrot.slane %v7185_v42, 5  ;;  %v7191_v49 = vld [vmem:[%s7121_s26 + $0x7c] sm:$0xf] }
  0x1a   : > { %6457 = vmatprep.subr.bf16.mxu0 %v6910_v17  ;;  %6885 = vmatprep.subr.bf16.mxu1 %v6910_v17  ;;  %v812_v51 = vrot.slane %v810_v41, 4  ;;  %v268_v52 = vld [vmem:[%s7121_s26 + $0x80] sm:$0x1]  ;;  %v688_v53 = vld [vmem:[%s7121_s26 + $0x78] sm:$0xe]  ;;  %v817_v54 = vrot.slane %v7191_v49, 5  ;;  %v755_v6 = vsel %vm7133_vm2, %v5503_v35, %v754_v36 }
  0x1b   : > { %6465 = vmatprep.mubr.bf16.mxu0 %v5534_v25  ;;  %6481 = vmatprep.mubr.bf16.mxu1 %v5542_v31  ;;  %v5504_v55 = vrot.slane %v680_v44, 9  ;;  %v763_v56 = vrot.slane %v761_v48, 4  ;;  %v764_v57 = vrot.slane %v260_v43, 5  ;;  %v5512_v58 = vrot.slane %v688_v53, 9  ;;  %v7200_v59 = vld [vmem:[%s7121_s26 + $0x28] sm:$0xf] }
  0x1c   : > { %v820_v60 = vrot.slane %v268_v52, 5  ;;  %v261_v61 = vld [vmem:[%s7121_s26 + $0x2c] sm:$0x1]  ;;  %v681_v62 = vld [vmem:[%s7121_s26 + $0x24] sm:$0xe]  ;;  %v768_v63 = vrot.slane %v7200_v59, 5  ;;  %v811_v8 = vsel %vm7133_vm2, %v5511_v46, %v810_v41  ;;  %v758_v16 = vsel %vm7133_vm2, %v756_v45, %v757_v40 }
  0x1d   : > { %6458 = vmatpush3.bf16.msra.mxu0 %v6910_v17  ;;  %6893 = vmatpush3.bf16.msra.mxu1 %v6910_v17  ;;  %v819_v0 = vrot.slane %v817_v54, 4  ;;  %v5505_v1 = vrot.slane %v681_v62, 9  ;;  %v7206_v2 = vld [vmem:[%s7121_s26 + $0x88] sm:$0xf]  ;;  %v269_v3 = vld [vmem:[%s7121_s26 + $0x8c] sm:$0x1]  ;;  %v814_v17 = vsel %vm7133_vm2, %v812_v51, %v813_v47  ;;  %v762_v23 = vsel %vm7133_vm2, %v5504_v55, %v761_v48 }
  0x1e   : > { %6459 = vmatprep.subr.bf16.mxu0 %v6911_v29  ;;  %6886 = vmatprep.subr.bf16.mxu1 %v6911_v29  ;;  %v6915_v10 = vld [vmem:[%s9643_s1 + $0xf8] sm:$0xff]   ;;  %v771_v13 = vrot.slane %v261_v61, 5  ;;  %v689_v14 = vld [vmem:[%s7121_s26 + $0x84] sm:$0xe]  ;;  %v824_v15 = vrot.slane %v7206_v2, 5  ;;  %v770_v18 = vrot.slane %v768_v63, 4  ;;  %v765_v25 = vsel %vm7133_vm2, %v763_v56, %v764_v57 }
  0x1f   : > { %v5513_v19 = vrot.slane %v689_v14, 9  ;;  %v827_v21 = vrot.slane %v269_v3, 5  ;;  %v818_v26 = vsel %vm7133_vm2, %v5512_v58, %v817_v54  ;;  %v821_v27 = vsel %vm7133_vm2, %v819_v0, %v820_v60  ;;  %v7234_v35 = vld [vmem:[%s7121_s26 + $0x34] sm:$0xf]  ;;  %v262_v36 = vld [vmem:[%s7121_s26 + $0x38] sm:$0x1] }
  0x20   : > { %v826_v20 = vrot.slane %v824_v15, 4  ;;  %v5543_v31 = vcombine.low %v811_v8, %v814_v17  ;;  %v682_v37 = vld [vmem:[%s7121_s26 + $0x30] sm:$0xe]  ;;  %v775_v40 = vrot.slane %v7234_v35, 5  ;;  %v778_v41 = vrot.slane %v262_v36, 5  ;;  %v6918_v60 = vld [vmem:[%s9643_s1 + $0x28] sm:$0xff]  }
  0x21   : > { %6460 = vmatpush3.bf16.msra.mxu0 %v6911_v29  ;;  %6894 = vmatpush3.bf16.msra.mxu1 %v6911_v29  ;;  %v5535_v29 = vcombine.low %v755_v6, %v758_v16  ;;  %v6916_v38 = vld [vmem:[%s9643_s1 + $0x30] sm:$0xff]   ;;  %v5536_v45 = vcombine.low %v762_v23, %v765_v25  ;;  %v5544_v46 = vcombine.low %v818_v26, %v821_v27  ;;  %v270_v48 = vld [vmem:[%s7121_s26 + $0x98] sm:$0x1]  ;;  %v7256_v56 = vld [vmem:[%s7121_s26 + $0x40] sm:$0xf]  ;;  %v7374_v5 = vrot.slane %v321_v33, 5 }
  0x22   : > { %6461 = vmatprep.subr.bf16.mxu0 %v6912_v39  ;;  %6887 = vmatprep.subr.bf16.mxu1 %v6912_v39  ;;  %v7243_v43 = vld [vmem:[%s7121_s26 + $0x94] sm:$0xf]  ;;  %v769_v47 = vsel %vm7133_vm2, %v5505_v1, %v768_v63  ;;  %v772_v52 = vsel %vm7133_vm2, %v770_v18, %v771_v13  ;;  %v777_v53 = vrot.slane %v775_v40, 4  ;;  %v834_v55 = vrot.slane %v270_v48, 5  ;;  %v6919_v61 = vld [vmem:[%s9643_s1 + $0xe8] sm:$0xff]   ;;  %v6920_v25 = vld [vmem:[%s9643_s1 + $0x20] sm:$0xff]  }
  0x23   : > { %v6917_v44 = vld [vmem:[%s9643_s1 + $0xf0] sm:$0xff]   ;;  %v831_v51 = vrot.slane %v7243_v43, 5  ;;  %v825_v57 = vsel %vm7133_vm2, %v5513_v19, %v824_v15  ;;  %v828_v58 = vsel %vm7133_vm2, %v826_v20, %v827_v21  ;;  %v263_v63 = vld [vmem:[%s7121_s26 + $0x44] sm:$0x1]  ;;  %v683_v0 = vld [vmem:[%s7121_s26 + $0x3c] sm:$0xe]  ;;  %v5537_v21 = vcombine.low %v769_v47, %v772_v52 }
  0x24   : > { %v782_v1 = vrot.slane %v7256_v56, 5  ;;  %v779_v6 = vsel %vm7133_vm2, %v777_v53, %v778_v41  ;;  %v5507_v8 = vrot.slane %v683_v0, 9  ;;  %v785_v13 = vrot.slane %v263_v63, 5  ;;  %v7276_v14 = vld [vmem:[%s7121_s26 + $0xa0] sm:$0xf]  ;;  %v6931_v28 = vld [vmem:[%s7121_s26 + $0xc] sm:$0xff]  }
  0x25   : > { %6462 = vmatpush3.bf16.msra.mxu0 %v6912_v39  ;;  %6895 = vmatpush3.bf16.msra.mxu1 %v6912_v39  ;;  %v5506_v39 = vrot.slane %v682_v37, 9  ;;  %v833_v62 = vrot.slane %v831_v51, 4  ;;  %v271_v15 = vld [vmem:[%s7121_s26 + $0xa4] sm:$0x1]  ;;  %v691_v17 = vld [vmem:[%s7121_s26 + $0x9c] sm:$0xe]  ;;  %v5545_v23 = vcombine.low %v825_v57, %v828_v58 }
  0x26   : > { %6463 = vmatprep.subr.bf16.mxu0 %v6913_v50  ;;  %6888 = vmatprep.subr.bf16.mxu1 %v6913_v50  ;;  %v838_v18 = vrot.slane %v7276_v14, 5  ;;  %v5515_v19 = vrot.slane %v691_v17, 9  ;;  %v841_v20 = vrot.slane %v271_v15, 5  ;;  %v6921_v26 = vld [vmem:[%s9643_s1 + $0xe0] sm:$0xff]   ;;  %v783_v36 = vsel %vm7133_vm2, %v5507_v8, %v782_v1  ;;  %v684_v41 = vld [vmem:[%s7121_s26 + $0x48] sm:$0xe] }
  0x27   : > { %v776_v3 = vsel %vm7133_vm2, %v5506_v39, %v775_v40  ;;  %v7298_v40 = vld [vmem:[%s7121_s26 + $0x4c] sm:$0xf]  ;;  %v692_v52 = vld [vmem:[%s7121_s26 + $0xa8] sm:$0xe]  ;;  %v6928_v12 = vld [vmem:[%s9643_s1] sm:$0xff]  }
  0x28   : > { %v840_v27 = vrot.slane %v838_v18, 4  ;;  %v839_v39 = vsel %vm7133_vm2, %v5515_v19, %v838_v18  ;;  %v7306_v48 = vld [vmem:[%s7121_s26 + $0xac] sm:$0xf]  ;;  %v5516_v57 = vrot.slane %v692_v52, 9  ;;  %v7361_v52 = vrot.slane %v297_v24, 5  ;;  %v6929_v24 = vld [vmem:[%s9643_s1 + $0xc0] sm:$0xff]  }
  0x29   : > { %6464 = vmatpush3.bf16.msra.mxu0 %v6913_v50  ;;  %6896 = vmatpush3.bf16.msra.mxu1 %v6913_v50  ;;  %v690_v50 = vld [vmem:[%s7121_s26 + $0x90] sm:$0xe]  ;;  %v845_v53 = vrot.slane %v7306_v48, 5 }
  0x2a   : > { %6497 = vmatprep.subr.bf16.mxu1 %v6914_v9  ;;  %6545 = vmatprep.subr.bf16.mxu0 %v6915_v10  ;;  %v5514_v54 = vrot.slane %v690_v50, 9  ;;  %v6922_v50 = vld [vmem:[%s9643_s1 + $0x18] sm:$0xff]  }
  0x2b   : > { %v846_v17 = vsel %vm7133_vm2, %v5516_v57, %v845_v53  ;;  %v7365_v57 = vrot.slane %v489_v30, 5 }
  0x2c   : > { %6466 = vmatmul.mubr.bf16.vlgmr.msra.gmra.mxu0 %v5535_v29  ;;  %6482 = vmatmul.mubr.bf16.vlgmr.msra.gmra.mxu1 %v5543_v31  ;;  %v832_v16 = vsel %vm7133_vm2, %v5514_v54, %v831_v51  ;;  %v5538_v29 = vcombine.low %v776_v3, %v779_v6  ;;  %v272_v51 = vld [vmem:[%s7121_s26 + $0xb0] sm:$0x1]  ;;  %v6923_v54 = vld [vmem:[%s9643_s1 + $0xd8] sm:$0xff]  }
  0x2d   : > { %6498 = vmatpush3.bf16.msra.mxu1 %v6914_v9  ;;  %6546 = vmatpush3.bf16.msra.mxu0 %v6915_v10  ;;  %v835_v9 = vsel %vm7133_vm2, %v833_v62, %v834_v55  ;;  %v784_v10 = vrot.slane %v782_v1, 4  ;;  %v848_v58 = vrot.slane %v272_v51, 5  ;;  %v7318_v62 = vld [vmem:[%s7121_s26 + $0x58] sm:$0xf]  ;;  %v847_v1 = vrot.slane %v845_v53, 4 }
  0x2e   : > { %6499 = vmatprep.subr.bf16.mxu1 %v6916_v38  ;;  %6547 = vmatprep.subr.bf16.mxu0 %v6917_v44  ;;  %v5546_v31 = vcombine.low %v832_v16, %v835_v9  ;;  %v265_v3 = vld [vmem:[%s7121_s26 + $0x5c] sm:$0x1]  ;;  %v7328_v16 = vld [vmem:[%s7121_s26 + $0xb8] sm:$0xf] }
  0x2f   : > { %6469 = vmatprep.mubr.bf16.mxu0 %v5536_v45  ;;  %6485 = vmatprep.mubr.bf16.mxu1 %v5544_v46  ;;  %v786_v37 = vsel %vm7133_vm2, %v784_v10, %v785_v13  ;;  %v5508_v45 = vrot.slane %v684_v41, 9  ;;  %v789_v46 = vrot.slane %v7298_v40, 5  ;;  %v799_v15 = vrot.slane %v265_v3, 5  ;;  %v273_v9 = vld [vmem:[%s7121_s26 + $0xbc] sm:$0x1]  ;;  %v6924_v10 = vld [vmem:[%s9643_s1 + $0x10] sm:$0xff]  }
  0x30   : > { %v5539_v63 = vcombine.low %v783_v36, %v786_v37  ;;  %v849_v18 = vsel %vm7133_vm2, %v847_v1, %v848_v58  ;;  %v6934_v3 = vld [vmem:[%s9643_s1 + $0x78] sm:$0xff]   ;;  %v9669_v58 = vshll.u32 %v7156_v22, 16 }
  0x31   : > { %6500 = vmatpush3.bf16.msra.mxu1 %v6916_v38  ;;  %6548 = vmatpush3.bf16.msra.mxu0 %v6917_v44  ;;  %v264_v38 = vld [vmem:[%s7121_s26 + $0x50] sm:$0x1]  ;;  %v842_v44 = vsel %vm7133_vm2, %v840_v27, %v841_v20  ;;  %v791_v55 = vrot.slane %v789_v46, 4  ;;  %v790_v6 = vsel %vm7133_vm2, %v5508_v45, %v789_v46  ;;  %v693_v20 = vld [vmem:[%s7121_s26 + $0xb4] sm:$0xe]  ;;  %v855_v27 = vrot.slane %v273_v9, 5 }
  0x32   : > { %6501 = vmatprep.subr.bf16.mxu1 %v6918_v60  ;;  %6549 = vmatprep.subr.bf16.mxu0 %v6919_v61  ;;  %v792_v47 = vrot.slane %v264_v38, 5  ;;  %v5547_v0 = vcombine.low %v839_v39, %v842_v44  ;;  %v5548_v37 = vcombine.low %v846_v17, %v849_v18  ;;  %v210_v38 = vld [vmem:[%s7121_s26] sm:$0xf]  ;;  %v6926_v44 = vld [vmem:[%s9643_s1 + $0x8] sm:$0xff]   ;;  %v218_v17 = vld [vmem:[%s7121_s26 + $0x30] sm:$0xf] }
  0x33   : > { %v6927_v45 = vld [vmem:[%s9643_s1 + $0xc8] sm:$0xff]   ;;  %v278_v46 = vshrl.u32 %v210_v38, 16 }
  0x34   : > { %6470 = vmatmul.mubr.bf16.gmra.mxu0 %v5537_v21  ;;  %6486 = vmatmul.mubr.bf16.gmra.mxu1 %v5545_v23  ;;  %v793_v8 = vsel %vm7133_vm2, %v791_v55, %v792_v47  ;;  %v852_v21 = vrot.slane %v7328_v16, 5  ;;  %v5517_v23 = vrot.slane %v693_v20, 9  ;;  %v212_v47 = vld [vmem:[%s7121_s26 + $0xc] sm:$0xf]  ;;  %v374_v20 = vshrl.u32 %v218_v17, 16 }
  0x35   : > { %6502 = vmatpush3.bf16.msra.mxu1 %v6918_v60  ;;  %6550 = vmatpush3.bf16.msra.mxu0 %v6919_v61  ;;  %v685_v60 = vld [vmem:[%s7121_s26 + $0x54] sm:$0xe]  ;;  %v796_v61 = vrot.slane %v7318_v62, 5  ;;  %v5540_v36 = vcombine.low %v790_v6, %v793_v8  ;;  %v302_v51 = vshrl.u32 %v212_v47, 16  ;;  %v305_v55 = vshll.u32 %v212_v47, 16  ;;  %v6933_v6 = vld [vmem:[%s7121_s26 + $0x18] sm:$0xff]  }
  0x36   : > { %6503 = vmatprep.subr.bf16.mxu1 %v6920_v25  ;;  %6551 = vmatprep.subr.bf16.mxu0 %v6921_v26  ;;  %v5509_v13 = vrot.slane %v685_v60, 9  ;;  %v280_v30 = vrot.slane %v278_v46, 4  ;;  %v6935_v60 = vld [vmem:[%s9643_s1 + $0x138] sm:$0xff]   ;;  %v5559_v18 = vcombine.low %v212_v47, %v7156_v22  ;;  %v6946_v46 = vld [vmem:[%s9643_s1 + $0x68] sm:$0xff]   ;;  %v287_v47 = vshll.u32 %v7127_v4, 16 }
  0x37   : > { %6473 = vmatprep.mubr.bf16.mxu0 %v5538_v29  ;;  %6489 = vmatprep.mubr.bf16.mxu1 %v5546_v31  ;;  %v798_v19 = vrot.slane %v796_v61, 4  ;;  %v6925_v29 = vld [vmem:[%s9643_s1 + $0xd0] sm:$0xff]   ;;  %v854_v31 = vrot.slane %v852_v21, 4  ;;  %v7384_v33 = vrot.slane %v302_v51, 4  ;;  %v7386_v1 = vrot.slane %v305_v55, 5  ;;  %v6943_v55 = vld [vmem:[%s7121_s26 + $0x3c] sm:$0xff]  }
  0x38   : > { %v797_v39 = vsel %vm7133_vm2, %v5509_v13, %v796_v61  ;;  %v214_v61 = vld [vmem:[%s7121_s26 + $0x18] sm:$0xf] }
  0x39   : > { %6504 = vmatpush3.bf16.msra.mxu1 %v6920_v25  ;;  %6552 = vmatpush3.bf16.msra.mxu0 %v6921_v26  ;;  %v800_v25 = vsel %vm7133_vm2, %v798_v19, %v799_v15  ;;  %v853_v26 = vsel %vm7133_vm2, %v5517_v23, %v852_v21  ;;  %v856_v41 = vsel %vm7133_vm2, %v854_v31, %v855_v27  ;;  %v326_v8 = vshrl.u32 %v214_v61, 16  ;;  %v216_v15 = vld [vmem:[%s7121_s26 + $0x24] sm:$0xf]  ;;  %v6940_v23 = vld [vmem:[%s9643_s1 + $0x70] sm:$0xff]  }
  0x3a   : > { %6505 = vmatprep.subr.bf16.mxu1 %v6922_v50  ;;  %6553 = vmatprep.subr.bf16.mxu0 %v6923_v54  ;;  %v5541_v53 = vcombine.low %v797_v39, %v800_v25  ;;  %v329_v13 = vshll.u32 %v214_v61, 16  ;;  %v350_v9 = vshrl.u32 %v216_v15, 16  ;;  %v6937_v19 = vld [vmem:[%s7121_s26 + $0x24] sm:$0xff]   ;;  %v377_v27 = vshll.u32 %v218_v17, 16 }
  0x3b   : > { %v7406_v31 = vrot.slane %v326_v8, 4  ;;  %v7461_v8 = vld [vmem:[%s7121_s26 + $0x6c] sm:$0xf] }
  0x3c   : > { %6474 = vmatmul.mubr.bf16.gmra.mxu0 %v5539_v63  ;;  %6490 = vmatmul.mubr.bf16.gmra.mxu1 %v5547_v0  ;;  %v7370_v63 = vrot.slane %v315_v32, 4  ;;  %v5558_v32 = vcombine.low %v210_v38, %v7127_v4  ;;  %v7410_v39 = vrot.slane %v329_v13, 5 }
  0x3d   : > { %6506 = vmatpush3.bf16.msra.mxu1 %v6922_v50  ;;  %6554 = vmatpush3.bf16.msra.mxu0 %v6923_v54  ;;  %v281_v50 = vshll.u32 %v210_v38, 16  ;;  %v5549_v54 = vcombine.low %v853_v26, %v856_v41  ;;  %v7412_v38 = vrot.slane %v350_v9, 4  ;;  %v6941_v26 = vld [vmem:[%s9643_s1 + $0x130] sm:$0xff]   ;;  %v7419_v41 = vrot.slane %v374_v20, 4 }
  0x3e   : > { %6507 = vmatprep.subr.bf16.mxu1 %v6924_v10  ;;  %6555 = vmatprep.subr.bf16.mxu0 %v6925_v29 }
  0x3f   : > { %6477 = vmatprep.mubr.bf16.mxu0 %v5540_v36  ;;  %6493 = vmatprep.mubr.bf16.mxu1 %v5548_v37  ;;  %v283_v0 = vrot.slane %v281_v50, 5  ;;  %v5560_v36 = vcombine.low %v214_v61, %v7185_v42  ;;  %v6939_v50 = vld [vmem:[%s7121_s26 + $0x30] sm:$0xff]   ;;  %v6952_v61 = vld [vmem:[%s9643_s1 + $0x60] sm:$0xff]  }
  0x41   : > { %6508 = vmatpush3.bf16.msra.mxu1 %v6924_v10  ;;  %6556 = vmatpush3.bf16.msra.mxu0 %v6925_v29  ;;  %v353_v10 = vshll.u32 %v216_v15, 16  ;;  %v284_v21 = vor.u32 %v283_v0, %v280_v30  ;;  %v7404_v29 = vld [vmem:[%s7121_s26 + $0x3c] sm:$0xf]  ;;  %v5561_v30 = vcombine.low %v216_v15, %v7200_v59  ;;  %v7444_v0 = vld [vmem:[%s7121_s26 + $0x54] sm:$0xf]  ;;  %v6953_v59 = vld [vmem:[%s9643_s1 + $0x120] sm:$0xff]  }
  0x42   : > { %6509 = vmatprep.subr.bf16.mxu1 %v6926_v44  ;;  %6557 = vmatprep.subr.bf16.mxu0 %v6927_v45  ;;  %v398_v37 = vshrl.u32 %v7404_v29, 16 }
  0x43   : > { %v7414_v25 = vrot.slane %v353_v10, 5  ;;  %v7421_v42 = vrot.slane %v284_v21, 4  ;;  %v494_v10 = vshrl.u32 %v7461_v8, 16  ;;  %v497_v21 = vshll.u32 %v7461_v8, 16 }
  0x44   : > { %6478 = vmatmul.mubr.bf16.gmra.mxu0 %v5541_v53  ;;  %6494 = vmatmul.mubr.bf16.gmra.mxu1 %v5549_v54  ;;  %v7431_v51 = vrot.slane %v398_v37, 4  ;;  %v6947_v53 = vld [vmem:[%s9643_s1 + $0x128] sm:$0xff]  }
  0x45   : > { %6510 = vmatpush3.bf16.msra.mxu1 %v6926_v44  ;;  %6558 = vmatpush3.bf16.msra.mxu0 %v6927_v45  ;;  %v7423_v44 = vrot.slane %v377_v27, 5  ;;  %v401_v45 = vshll.u32 %v7404_v29, 16  ;;  %v7437_v54 = vld [vmem:[%s7121_s26 + $0x48] sm:$0xf]  ;;  %v7481_v27 = vrot.slane %v287_v47, 5 }
  0x46   : > { %6511 = vmatprep.subr.bf16.mxu1 %v6928_v12  ;;  %6559 = vmatprep.subr.bf16.mxu0 %v6929_v24  ;;  %v5564_v47 = vcombine.low %v7437_v54, %v7298_v40  ;;  %v6964_v40 = vld [vmem:[%s9643_s1 + $0x50] sm:$0xff]  }
  0x47   : > { %6513 = vmatprep.mubr.bf16.mxu1 %v5558_v32  ;;  %6561 = vmatprep.mubr.bf16.mxu0 %v6931_v28  ;;  %v5562_v32 = vcombine.low %v218_v17, %v7234_v35  ;;  %v446_v28 = vshrl.u32 %v7444_v0, 16  ;;  %v7463_v13 = vrot.slane %v401_v45, 5  ;;  %v5563_v45 = vcombine.low %v7404_v29, %v7256_v56  ;;  %v5679_v29 = vld [vmem:[%s7121_s26 + $0x10] sm:$0xf] }
  0x49   : > { %6512 = vmatpush3.bf16.msra.mxu1 %v6928_v12  ;;  %6560 = vmatpush3.bf16.msra.mxu0 %v6929_v24  ;;  %v422_v12 = vshrl.u32 %v7437_v54, 16  ;;  %v425_v24 = vshll.u32 %v7437_v54, 16  ;;  %v7470_v17 = vrot.slane %v446_v28, 4  ;;  %v7519_v28 = vld [vmem:[%s7121_s26 + $0x90] sm:$0xf] }
  0x4a   : > { %6593 = vmatprep.subr.bf16.mxu1 %v6934_v3  ;;  %6641 = vmatprep.subr.bf16.mxu0 %v6935_v60 }
  0x4b   : > { %v7465_v15 = vrot.slane %v422_v12, 4  ;;  %v7467_v9 = vrot.slane %v425_v24, 5  ;;  %v7502_v24 = vld [vmem:[%s7121_s26 + $0x84] sm:$0xf] }
  0x4c   : > { %6514 = vmatmul.mubr.bf16.vlgmr.msra.gmra.mxu1 %v5559_v18  ;;  %6562 = vmatmul.mubr.bf16.vlgmr.msra.gmra.mxu0 %v6933_v6  ;;  %v542_v56 = vshrl.u32 %v7502_v24, 16 }
  0x4d   : > { %6594 = vmatpush3.bf16.msra.mxu1 %v6934_v3  ;;  %6642 = vmatpush3.bf16.msra.mxu0 %v6935_v60  ;;  %v449_v3 = vshll.u32 %v7444_v0, 16  ;;  %v7450_v60 = vld [vmem:[%s7121_s26 + $0x60] sm:$0xf] }
  0x4e   : > { %6517 = vmatprep.mubr.bf16.mxu1 %v5560_v36  ;;  %6565 = vmatprep.mubr.bf16.mxu0 %v6937_v19  ;;  %v470_v6 = vshrl.u32 %v7450_v60, 16  ;;  %v473_v35 = vshll.u32 %v7450_v60, 16  ;;  %v6945_v19 = vld [vmem:[%s7121_s26 + $0x48] sm:$0xff]   ;;  %v6949_v36 = vld [vmem:[%s7121_s26 + $0x54] sm:$0xff]  }
  0x4f   : > { %6595 = vmatprep.subr.bf16.mxu1 %v6940_v23  ;;  %6643 = vmatprep.subr.bf16.mxu0 %v6941_v26  ;;  %v7472_v18 = vrot.slane %v449_v3, 5 }
  0x50   : > { %v7475_v20 = vrot.slane %v470_v6, 4  ;;  %v7484_v37 = vrot.slane %v473_v35, 5  ;;  %v7539_v6 = vld [vmem:[%s7121_s26 + $0x9c] sm:$0xf] }
  0x51   : > { %6596 = vmatpush3.bf16.msra.mxu1 %v6940_v23  ;;  %6644 = vmatpush3.bf16.msra.mxu0 %v6941_v26  ;;  %v6958_v23 = vld [vmem:[%s9643_s1 + $0x58] sm:$0xff]  }
  0x52   : > { %6597 = vmatprep.subr.bf16.mxu1 %v6946_v46  ;;  %6645 = vmatprep.subr.bf16.mxu0 %v6947_v53  ;;  %v6959_v26 = vld [vmem:[%s9643_s1 + $0x118] sm:$0xff]  }
  0x54   : > { %6518 = vmatmul.mubr.bf16.gmra.mxu1 %v5561_v30  ;;  %6566 = vmatmul.mubr.bf16.gmra.mxu0 %v6939_v50  ;;  %v7494_v50 = vld [vmem:[%s7121_s26 + $0x78] sm:$0xf]  ;;  %v7504_v30 = vrot.slane %v497_v21, 5  ;;  %v569_v21 = vshll.u32 %v7519_v28, 16 }
  0x55   : > { %6521 = vmatprep.mubr.bf16.mxu1 %v5562_v32  ;;  %6569 = vmatprep.mubr.bf16.mxu0 %v6943_v55  ;;  %v518_v55 = vshrl.u32 %v7494_v50, 16  ;;  %v521_v12 = vshll.u32 %v7494_v50, 16  ;;  %v6965_v32 = vld [vmem:[%s9643_s1 + $0x110] sm:$0xff]  }
  0x56   : > { %6598 = vmatpush3.bf16.msra.mxu1 %v6946_v46  ;;  %6646 = vmatpush3.bf16.msra.mxu0 %v6947_v53  ;;  %v7491_v46 = vrot.slane %v494_v10, 4  ;;  %v291_v53 = vshrl.u32 %v7127_v4, 16  ;;  %v545_v4 = vshll.u32 %v7502_v24, 16 }
  0x57   : > { %6599 = vmatprep.subr.bf16.mxu1 %v6952_v61  ;;  %6647 = vmatprep.subr.bf16.mxu0 %v6953_v59  ;;  %v7527_v35 = vrot.slane %v518_v55, 4  ;;  %v7529_v10 = vrot.slane %v521_v12, 5  ;;  %v7544_v55 = vrot.slane %v542_v56, 4 }
  0x58   : > { %v293_v3 = vrot.slane %v291_v53, 4  ;;  %v6951_v53 = vld [vmem:[%s7121_s26 + $0x60] sm:$0xff]   ;;  %v7546_v12 = vrot.slane %v545_v4, 5  ;;  %v7560_v4 = vrot.slane %v569_v21, 5  ;;  %v7576_v21 = vld [vmem:[%s7121_s26 + $0xa8] sm:$0xf] }
  0x59   : > { %v617_v54 = vshll.u32 %v7576_v21, 16 }
  0x5a   : > { %6600 = vmatpush3.bf16.msra.mxu1 %v6952_v61  ;;  %6648 = vmatpush3.bf16.msra.mxu0 %v6953_v59  ;;  %v5566_v59 = vcombine.low %v7450_v60, %v7140_v11  ;;  %v614_v11 = vshrl.u32 %v7576_v21, 16 }
  0x5b   : > { %6601 = vmatprep.subr.bf16.mxu1 %v6958_v23  ;;  %6649 = vmatprep.subr.bf16.mxu0 %v6959_v26 }
  0x5c   : > { %6522 = vmatmul.mubr.bf16.gmra.mxu1 %v5563_v45  ;;  %6570 = vmatmul.mubr.bf16.gmra.mxu0 %v6945_v19  ;;  %v566_v19 = vshrl.u32 %v7519_v28, 16  ;;  %v5565_v45 = vcombine.low %v7444_v0, %v7318_v62  ;;  %v590_v62 = vshrl.u32 %v7539_v6, 16  ;;  %v593_v0 = vshll.u32 %v7539_v6, 16 }
  0x5d   : > { %6525 = vmatprep.mubr.bf16.mxu1 %v5564_v47  ;;  %6573 = vmatprep.mubr.bf16.mxu0 %v6949_v36  ;;  %v6955_v47 = vld [vmem:[%s7121_s26 + $0x6c] sm:$0xff]  }
  0x5e   : > { %6602 = vmatpush3.bf16.msra.mxu1 %v6958_v23  ;;  %6650 = vmatpush3.bf16.msra.mxu0 %v6959_v26  ;;  %v7552_v60 = vrot.slane %v566_v19, 4  ;;  %v6970_v23 = vld [vmem:[%s9643_s1 + $0x48] sm:$0xff]   ;;  %v294_v26 = vor.u32 %v293_v3, %v7481_v27  ;;  %v7562_v36 = vrot.slane %v590_v62, 4  ;;  %v7564_v61 = vrot.slane %v593_v0, 5  ;;  %v7585_v3 = vld [vmem:[%s7121_s26 + $0xb4] sm:$0xf] }
  0x5f   : > { %6603 = vmatprep.subr.bf16.mxu1 %v6964_v40  ;;  %6651 = vmatprep.subr.bf16.mxu0 %v6965_v32  ;;  %v6971_v19 = vld [vmem:[%s9643_s1 + $0x108] sm:$0xff]   ;;  %v641_v62 = vshll.u32 %v7585_v3, 16  ;;  %v6976_v0 = vld [vmem:[%s9643_s1 + $0x40] sm:$0xff]  }
  0x60   : > { %9659 = vst [vmem:[#allocation3_spill] sm:$0xff] %v7552_v60  ;;  %9660 = vst [vmem:[#allocation4_spill] sm:$0xff] %v7562_v36  ;;  %v295_v56 = vrot.slane %v294_v26, 4  ;;  %v313_v26 = vrot.slane %v9669_v58, 5  ;;  %v5680_v58 = vld [vmem:[%s7121_s26 + $0x14] sm:$0x1] }
  0x61   : > { %9661 = vst [vmem:[#allocation5_spill] sm:$0xff] %v7564_v61  ;;  %v2126_v61 = vshrl.u32 %v5679_v29, 16 }
  0x62   : > { %6604 = vmatpush3.bf16.msra.mxu1 %v6964_v40  ;;  %6652 = vmatpush3.bf16.msra.mxu0 %v6965_v32  ;;  %v638_v32 = vshrl.u32 %v7585_v3, 16  ;;  %v9670_v40 = vor.u32 %v7410_v39, %v7406_v31  ;;  %v300_v22 = vsel %vm7622_vm5, %v295_v56, %v7361_v52 }
  0x63   : > { %6605 = vmatprep.subr.bf16.mxu1 %v6970_v23  ;;  %6653 = vmatprep.subr.bf16.mxu0 %v6971_v19 }
  0x64   : > { %6526 = vmatmul.mubr.bf16.gmra.mxu1 %v5565_v45  ;;  %6574 = vmatmul.mubr.bf16.gmra.mxu0 %v6951_v53  ;;  %v7598_v45 = vrot.slane %v614_v11, 4  ;;  %v7600_v53 = vrot.slane %v617_v54, 5  ;;  %v6961_v54 = vld [vmem:[%s7121_s26 + $0x84] sm:$0xff]   ;;  %v5678_v11 = vld [vmem:[%s7121_s26 + $0xc] sm:$0xf]  ;;  %v7633_v36 = vrot.slane %v9670_v40, 4 }
  0x65   : > { %6529 = vmatprep.mubr.bf16.mxu1 %v5566_v59  ;;  %6577 = vmatprep.mubr.bf16.mxu0 %v6955_v47  ;;  %v7607_v59 = vrot.slane %v638_v32, 4  ;;  %v7609_v47 = vrot.slane %v641_v62, 5  ;;  %v2113_v31 = vshrl.u32 %v5678_v11, 16  ;;  %v2116_v39 = vshll.u32 %v5678_v11, 16  ;;  %v5681_v40 = vld [vmem:[%s7121_s26 + $0x18] sm:$0xf] }
  0x66   : > { %9662 = vst [vmem:[#allocation6_spill] sm:$0xff] %v7598_v45  ;;  %9663 = vst [vmem:[#allocation7_spill] sm:$0xff] %v7600_v53  ;;  %6606 = vmatpush3.bf16.msra.mxu1 %v6970_v23  ;;  %6654 = vmatpush3.bf16.msra.mxu0 %v6971_v19  ;;  %v6977_v23 = vld [vmem:[%s9643_s1 + $0x100] sm:$0xff]   ;;  %v9666_v19 = vor.u32 %v7386_v1, %v7384_v33  ;;  %v290_v1 = vsel %vm7622_vm5, %v7421_v42, %v7481_v27  ;;  %v2122_v33 = vshll.u32 %v5679_v29, 16  ;;  %v7654_v42 = vld [vmem:[%s9643_s1 + $0x178] sm:$0xff]  }
  0x67   : > { %9664 = vst [vmem:[#allocation8_spill] sm:$0xff] %v7607_v59  ;;  %9665 = vst [vmem:[#allocation9_spill] sm:$0xff] %v7609_v47  ;;  %6607 = vmatprep.subr.bf16.mxu1 %v6976_v0  ;;  %6655 = vmatprep.subr.bf16.mxu0 %v6977_v23  ;;  %v2132_v59 = vshll.u32 %v5680_v58, 16  ;;  %v5682_v47 = vld [vmem:[%s7121_s26 + $0x1c] sm:$0xf]  ;;  %v2115_v27 = vrot.slane %v2113_v31, 4  ;;  %v318_v11 = vor.u32 %v7370_v63, %v313_v26 }
  0x68   : > { %v309_v62 = vrot.slane %v9666_v19, 4  ;;  %v7648_v19 = vcombine.low %v290_v1, %v300_v22  ;;  %v2118_v52 = vrot.slane %v2116_v39, 5  ;;  %v2124_v29 = vrot.slane %v2122_v33, 5  ;;  %v5684_v33 = vld [vmem:[%s7121_s26 + $0x24] sm:$0xf]  ;;  %v6963_v39 = vld [vmem:[%s7121_s26 + $0x90] sm:$0xff]  }
  0x69   : > { %v2128_v1 = vrot.slane %v2126_v61, 4  ;;  %v2134_v22 = vrot.slane %v2132_v59, 5  ;;  %v2137_v58 = vshrl.u32 %v5681_v40, 16  ;;  %v9672_v45 = vcombine.low %v7494_v50, %v7191_v49  ;;  %v5685_v53 = vld [vmem:[%s7121_s26 + $0x28] sm:$0xf] }
  0x6a   : > { %6608 = vmatpush3.bf16.msra.mxu1 %v6976_v0  ;;  %6656 = vmatpush3.bf16.msra.mxu0 %v6977_v23  ;;  %v314_v56 = vsel %vm7622_vm5, %v309_v62, %v313_v26  ;;  %v5683_v0 = vld [vmem:[%s7121_s26 + $0x20] sm:$0x1]  ;;  %v9671_v23 = vcombine.low %v7461_v8, %v7174_v34  ;;  %v2119_v31 = vor.u32 %v2118_v52, %v2115_v27  ;;  %v319_v62 = vrot.slane %v318_v11, 4  ;;  %v7669_v34 = vld [vmem:[%s9643_s1 + $0x1b8] sm:$0xff]  }
  0x6b   : > { %v2140_v63 = vshll.u32 %v5681_v40, 16  ;;  %v2146_v26 = vshll.u32 %v5682_v47, 16  ;;  %v2139_v8 = vrot.slane %v2137_v58, 4  ;;  %v2150_v61 = vshrl.u32 %v5682_v47, 16  ;;  %6689 = vmatprep.subr.bf16.mxu1 %v7654_v42  ;;  %6737 = vmatprep.subr.bf16.mxu0 %v7669_v34  ;;  %v6967_v11 = vld [vmem:[%s7121_s26 + $0x9c] sm:$0xff]  }
  0x6c   : > { %6530 = vmatmul.mubr.bf16.gmra.mxu1 %v9671_v23  ;;  %6578 = vmatmul.mubr.bf16.gmra.mxu0 %v6957_v7  ;;  %v2129_v7 = vor.u32 %v2128_v1, %v2124_v29  ;;  %v2156_v59 = vshll.u32 %v5683_v0, 16  ;;  %v2120_v49 = vrot.slane %v2119_v31, 4  ;;  %v324_v50 = vsel %vm7622_vm5, %v319_v62, %v7374_v5  ;;  %v7026_v5 = vld [vmem:[%s7121_s26 + $0x1c] sm:$0xf] }
  0x6d   : > { %6533 = vmatprep.mubr.bf16.mxu1 %v9672_v45  ;;  %6581 = vmatprep.mubr.bf16.mxu0 %v6961_v54  ;;  %v2142_v45 = vrot.slane %v2140_v63, 5  ;;  %v2148_v54 = vrot.slane %v2146_v26, 5  ;;  %v7678_v47 = vcombine.low %v314_v56, %v324_v50  ;;  %v2152_v27 = vrot.slane %v2150_v61, 4  ;;  %v7027_v63 = vld [vmem:[%s7121_s26 + $0x20] sm:$0x1] }
  0x6e   : > { %v2130_v40 = vrot.slane %v2129_v7, 4  ;;  %v2158_v52 = vrot.slane %v2156_v59, 5  ;;  %v2125_v0 = vsel %vm7622_vm5, %v2120_v49, %v2124_v29  ;;  %v335_v1 = vshll.u32 %v7026_v5, 16  ;;  %v5686_v7 = vld [vmem:[%s7121_s26 + $0x2c] sm:$0x1] }
  0x6f   : > { %v2143_v23 = vor.u32 %v2142_v45, %v2139_v8  ;;  %v339_v58 = vshrl.u32 %v7026_v5, 16  ;;  %v2153_v62 = vor.u32 %v2152_v27, %v2148_v54  ;;  %v345_v26 = vshll.u32 %v7027_v63, 16 }
  0x70   : > { %v2135_v31 = vsel %vm7622_vm5, %v2130_v40, %v2134_v22  ;;  %v2161_v56 = vshrl.u32 %v5684_v33, 16  ;;  %v337_v59 = vrot.slane %v335_v1, 5  ;;  %v9673_v29 = vcombine.low %v7502_v24, %v7206_v2 }
  0x71   : > { %v7689_v50 = vcombine.low %v2125_v0, %v2135_v31  ;;  %v2144_v61 = vrot.slane %v2143_v23, 4  ;;  %v341_v60 = vrot.slane %v339_v58, 4  ;;  %v2154_v8 = vrot.slane %v2153_v62, 4 }
  0x72   : > { %v347_v49 = vrot.slane %v345_v26, 5  ;;  %v2163_v22 = vrot.slane %v2161_v56, 4  ;;  %v2164_v45 = vshll.u32 %v5684_v33, 16  ;;  %v9674_v40 = vcombine.low %v7519_v28, %v7243_v43  ;;  %v5687_v28 = vld [vmem:[%s7121_s26 + $0x30] sm:$0xf] }
  0x73   : > { %v2149_v27 = vsel %vm7622_vm5, %v2144_v61, %v2148_v54  ;;  %v338_v2 = vsel %vm7622_vm5, %v7633_v36, %v337_v59  ;;  %v342_v24 = vor.u32 %v341_v60, %v337_v59  ;;  %v2159_v33 = vsel %vm7622_vm5, %v2154_v8, %v2158_v52  ;;  %v6969_v60 = vld [vmem:[%s7121_s26 + $0xa8] sm:$0xff]   ;;  %v5688_v59 = vld [vmem:[%s7121_s26 + $0x34] sm:$0xf] }
  0x74   : > { %6534 = vmatmul.mubr.bf16.gmra.mxu1 %v9673_v29  ;;  %6582 = vmatmul.mubr.bf16.gmra.mxu0 %v6963_v39  ;;  %v2170_v39 = vshll.u32 %v5685_v53, 16  ;;  %v2166_v0 = vrot.slane %v2164_v45, 5  ;;  %v2174_v23 = vshrl.u32 %v5685_v53, 16  ;;  %v2180_v43 = vshll.u32 %v5686_v7, 16  ;;  %v7028_v52 = vld [vmem:[%s7121_s26 + $0x28] sm:$0xf] }
  0x75   : > { %6537 = vmatprep.mubr.bf16.mxu1 %v9674_v40  ;;  %6585 = vmatprep.mubr.bf16.mxu0 %v6967_v11  ;;  %v7705_v11 = vcombine.low %v2149_v27, %v2159_v33  ;;  %v343_v54 = vrot.slane %v342_v24, 4  ;;  %v9675_v36 = vor.u32 %v7414_v25, %v7412_v38  ;;  %v359_v63 = vshll.u32 %v7028_v52, 16  ;;  %v6973_v53 = vld [vmem:[%s7121_s26 + $0xb4] sm:$0xff]   ;;  %v7029_v56 = vld [vmem:[%s7121_s26 + $0x2c] sm:$0x1] }
  0x76   : > { %v2172_v5 = vrot.slane %v2170_v39, 5  ;;  %v2167_v58 = vor.u32 %v2166_v0, %v2163_v22  ;;  %v2176_v31 = vrot.slane %v2174_v23, 4  ;;  %v2182_v62 = vrot.slane %v2180_v43, 5  ;;  %v5689_v22 = vld [vmem:[%s7121_s26 + $0x38] sm:$0x1] }
  0x77   : > { %v357_v1 = vrot.slane %v9675_v36, 4  ;;  %v348_v26 = vsel %vm7622_vm5, %v343_v54, %v347_v49  ;;  %v363_v7 = vshrl.u32 %v7028_v52, 16  ;;  %v369_v61 = vshll.u32 %v7029_v56, 16 }
  0x78   : > { %v2185_v29 = vshrl.u32 %v5687_v28, 16  ;;  %v7717_v8 = vcombine.low %v338_v2, %v348_v26  ;;  %v2168_v38 = vrot.slane %v2167_v58, 4  ;;  %v2177_v25 = vor.u32 %v2176_v31, %v2172_v5  ;;  %v7030_v58 = vld [vmem:[%s7121_s26 + $0x34] sm:$0xf]  ;;  %v6975_v26 = vld [vmem:[%s7121_s26 + $0xc0] sm:$0xff]  }
  0x79   : > { %v361_v45 = vrot.slane %v359_v63, 5  ;;  %v365_v40 = vrot.slane %v363_v7, 4  ;;  %v371_v27 = vrot.slane %v369_v61, 5  ;;  %v2188_v39 = vshll.u32 %v5687_v28, 16 }
  0x7a   : > { %v2187_v24 = vrot.slane %v2185_v29, 4  ;;  %v9676_v33 = vcombine.low %v7539_v6, %v7276_v14  ;;  %v2173_v49 = vsel %vm7622_vm5, %v2168_v38, %v2172_v5  ;;  %v2178_v2 = vrot.slane %v2177_v25, 4  ;;  %v5691_v38 = vld [vmem:[%s7121_s26 + $0x40] sm:$0xf]  ;;  %v5692_v25 = vld [vmem:[%s7121_s26 + $0x44] sm:$0x1] }
  0x7b   : > { %v362_v0 = vsel %vm7622_vm5, %v357_v1, %v361_v45  ;;  %v2194_v23 = vshll.u32 %v5688_v59, 16  ;;  %v9677_v43 = vcombine.low %v7576_v21, %v7306_v48  ;;  %v366_v28 = vor.u32 %v365_v40, %v361_v45  ;;  %v5690_v48 = vld [vmem:[%s7121_s26 + $0x3c] sm:$0xf] }
  0x7c   : > { %6538 = vmatmul.mubr.bf16.gmra.mxu1 %v9676_v33  ;;  %6586 = vmatmul.mubr.bf16.gmra.mxu0 %v6969_v60  ;;  %v2190_v14 = vrot.slane %v2188_v39, 5  ;;  %v2198_v6 = vshrl.u32 %v5688_v59, 16  ;;  %v2204_v54 = vshll.u32 %v5689_v22, 16  ;;  %v2183_v36 = vsel %vm7622_vm5, %v2178_v2, %v2182_v62  ;;  %v7031_v62 = vld [vmem:[%s7121_s26 + $0x38] sm:$0x1] }
  0x7d   : > { %6541 = vmatprep.mubr.bf16.mxu1 %v9677_v43  ;;  %6589 = vmatprep.mubr.bf16.mxu0 %v6973_v53  ;;  %v2196_v5 = vrot.slane %v2194_v23, 5  ;;  %v9678_v60 = vor.u32 %v7423_v44, %v7419_v41  ;;  %v383_v31 = vshll.u32 %v7030_v58, 16  ;;  %v7737_v21 = vcombine.low %v2173_v49, %v2183_v36 }
  0x7e   : > { %v367_v52 = vrot.slane %v366_v28, 4  ;;  %v2191_v63 = vor.u32 %v2190_v14, %v2187_v24  ;;  %v2200_v53 = vrot.slane %v2198_v6, 4  ;;  %v2206_v7 = vrot.slane %v2204_v54, 5 }
  0x7f   : > { %v381_v1 = vrot.slane %v9678_v60, 4  ;;  %v385_v56 = vrot.slane %v383_v31, 5  ;;  %v387_v61 = vshrl.u32 %v7030_v58, 16  ;;  %v393_v59 = vshll.u32 %v7031_v62, 16  ;;  %v5693_v60 = vld [vmem:[%s7121_s26 + $0x48] sm:$0xf] }
  0x80   : > { %v372_v41 = vsel %vm7622_vm5, %v367_v52, %v371_v27  ;;  %v2192_v44 = vrot.slane %v2191_v63, 4  ;;  %v2201_v29 = vor.u32 %v2200_v53, %v2196_v5  ;;  %v2209_v45 = vshrl.u32 %v5690_v48, 16  ;;  %v6981_v62 = vld [vmem:[%s9643_s1 + $0x1b0] sm:$0xff]  }
  0x81   : > { %v7745_v22 = vcombine.low %v362_v0, %v372_v41  ;;  %v386_v40 = vsel %vm7622_vm5, %v381_v1, %v385_v56  ;;  %v389_v24 = vrot.slane %v387_v61, 4  ;;  %v395_v39 = vrot.slane %v393_v59, 5  ;;  %v6980_v61 = vld [vmem:[%s9643_s1 + $0x170] sm:$0xff]  }
  0x82   : > { %v2197_v33 = vsel %vm7622_vm5, %v2192_v44, %v2196_v5  ;;  %v2202_v49 = vrot.slane %v2201_v29, 4  ;;  %v2211_v2 = vrot.slane %v2209_v45, 4  ;;  %v2212_v27 = vshll.u32 %v5690_v48, 16 }
  0x83   : > { %v9679_v23 = vcombine.low %v7585_v3, %v7328_v16  ;;  %v390_v0 = vor.u32 %v389_v24, %v385_v56  ;;  %v2218_v43 = vshll.u32 %v5691_v38, 16  ;;  %v2222_v28 = vshrl.u32 %v5691_v38, 16  ;;  %v7032_v16 = vld [vmem:[%s7121_s26 + $0x40] sm:$0xf]  ;;  %v5695_v38 = vld [vmem:[%s7121_s26 + $0x50] sm:$0x1] }
  0x84   : > { %6590 = vmatmul.mubr.bf16.gmra.mxu0 %v6975_v26  ;;  %v2228_v14 = vshll.u32 %v5692_v25, 16  ;;  %v2207_v6 = vsel %vm7622_vm5, %v2202_v49, %v2206_v7  ;;  %v2214_v54 = vrot.slane %v2212_v27, 5  ;;  %v9680_v36 = vor.u32 %v7463_v13, %v7431_v51  ;;  %v7033_v13 = vld [vmem:[%s7121_s26 + $0x44] sm:$0x1]  ;;  %v5694_v7 = vld [vmem:[%s7121_s26 + $0x4c] sm:$0xf] }
  0x85   : > { %6542 = vmatmul.mubr.bf16.gmra.mxu1 %v9679_v23  ;;  %6657 = vmatprep.mubr.bf16.mxu0 %v7689_v50  ;;  %v407_v3 = vshll.u32 %v7032_v16, 16  ;;  %v7765_v1 = vcombine.low %v2197_v33, %v2207_v6  ;;  %v391_v58 = vrot.slane %v390_v0, 4  ;;  %v2224_v31 = vrot.slane %v2222_v28, 4 }
  0x86   : > { %6609 = vmatprep.mubr.bf16.mxu1 %v7648_v19  ;;  %v7761_v5 = vrot.slane %v9680_v36, 4  ;;  %v2220_v19 = vrot.slane %v2218_v43, 5  ;;  %v2215_v50 = vor.u32 %v2214_v54, %v2211_v2  ;;  %v2230_v48 = vrot.slane %v2228_v14, 5  ;;  %v5696_v14 = vld [vmem:[%s7121_s26 + $0x54] sm:$0xf] }
  0x87   : > { %v409_v52 = vrot.slane %v407_v3, 5  ;;  %v411_v63 = vshrl.u32 %v7032_v16, 16  ;;  %v396_v53 = vsel %vm7622_vm5, %v391_v58, %v395_v39  ;;  %v417_v26 = vshll.u32 %v7033_v13, 16  ;;  %v7035_v3 = vld [vmem:[%s7121_s26 + $0x50] sm:$0x1] }
  0x88   : > { %v2225_v51 = vor.u32 %v2224_v31, %v2220_v19  ;;  %v2233_v56 = vshrl.u32 %v5693_v60, 16  ;;  %v7777_v59 = vcombine.low %v386_v40, %v396_v53  ;;  %v2216_v41 = vrot.slane %v2215_v50, 4  ;;  %v7810_v58 = vld [vmem:[%s7121_s26 + $0x58] sm:$0xf] }
  0x89   : > { %v410_v44 = vsel %vm7622_vm5, %v7761_v5, %v409_v52  ;;  %v413_v29 = vrot.slane %v411_v63, 4  ;;  %v419_v45 = vrot.slane %v417_v26, 5  ;;  %v2236_v39 = vshll.u32 %v5693_v60, 16  ;;  %v7815_v63 = vld [vmem:[%s7121_s26 + $0x5c] sm:$0x1] }
  0x8a   : > { %v2226_v25 = vrot.slane %v2225_v51, 4  ;;  %v2235_v24 = vrot.slane %v2233_v56, 4  ;;  %v2221_v33 = vsel %vm7622_vm5, %v2216_v41, %v2220_v19  ;;  %v2242_v2 = vshll.u32 %v5694_v7, 16 }
  0x8b   : > { %v414_v49 = vor.u32 %v413_v29, %v409_v52  ;;  %v2246_v27 = vshrl.u32 %v5694_v7, 16  ;;  %v2238_v23 = vrot.slane %v2236_v39, 5  ;;  %v2252_v0 = vshll.u32 %v5695_v38, 16  ;;  %v5699_v7 = vld [vmem:[%s7121_s26 + $0x60] sm:$0xf] }
  0x8c   : > { %6658 = vmatmul.mubr.bf16.vlgmr.msra.gmra.mxu0 %v7705_v11  ;;  %v2231_v40 = vsel %vm7622_vm5, %v2226_v25, %v2230_v48  ;;  %v9681_v43 = vor.u32 %v7467_v9, %v7465_v15  ;;  %v2244_v11 = vrot.slane %v2242_v2, 5  ;;  %v6982_v15 = vld [vmem:[%s9643_s1 + $0x168] sm:$0xff]   ;;  %v441_v60 = vshll.u32 %v7035_v3, 16 }
  0x8d   : > { %6610 = vmatmul.mubr.bf16.vlgmr.msra.gmra.mxu1 %v7678_v47  ;;  %6738 = vmatpush3.bf16.msra.mxu0 %v7669_v34  ;;  %v5746_v6 = vcombine.low %v2221_v33, %v2231_v40  ;;  %v415_v47 = vrot.slane %v414_v49, 4  ;;  %v2248_v54 = vrot.slane %v2246_v27, 4  ;;  %v2239_v36 = vor.u32 %v2238_v23, %v2235_v24  ;;  %v6983_v9 = vld [vmem:[%s9643_s1 + $0x1a8] sm:$0xff]   ;;  %v6985_v24 = vld [vmem:[%s9643_s1 + $0x1a0] sm:$0xff]  }
  0x8e   : > { %v7792_v28 = vrot.slane %v9681_v43, 4  ;;  %6690 = vmatpush3.bf16.msra.mxu1 %v7654_v42  ;;  %6613 = vmatprep.mubr.bf16.mxu1 %v7717_v8  ;;  %v2254_v5 = vrot.slane %v2252_v0, 5  ;;  %v7034_v42 = vld [vmem:[%s7121_s26 + $0x4c] sm:$0xf]  ;;  %v2257_v19 = vshrl.u32 %v5696_v14, 16  ;;  %v443_v51 = vrot.slane %v441_v60, 5 }
  0x8f   : > { %6661 = vmatprep.mubr.bf16.mxu0 %v7737_v21  ;;  %v431_v34 = vshll.u32 %v7034_v42, 16  ;;  %v435_v16 = vshrl.u32 %v7034_v42, 16  ;;  %6691 = vmatprep.subr.bf16.mxu1 %v6980_v61  ;;  %v420_v8 = vsel %vm7622_vm5, %v415_v47, %v419_v45  ;;  %v2249_v21 = vor.u32 %v2248_v54, %v2244_v11 }
  0x90   : > { %6739 = vmatprep.subr.bf16.mxu0 %v6981_v62  ;;  %v7812_v31 = vcombine.low %v410_v44, %v420_v8  ;;  %v2240_v50 = vrot.slane %v2239_v36, 4  ;;  %v2259_v13 = vrot.slane %v2257_v19, 4  ;;  %v2260_v26 = vshll.u32 %v5696_v14, 16  ;;  %v7037_v14 = vld [vmem:[%s7121_s26 + $0x5c] sm:$0x1] }
  0x91   : > { %v433_v48 = vrot.slane %v431_v34, 5  ;;  %v437_v52 = vrot.slane %v435_v16, 4  ;;  %6740 = vmatpush3.bf16.msra.mxu0 %v6981_v62  ;;  %v2250_v53 = vrot.slane %v2249_v21, 4  ;;  %v2266_v29 = vshll.u32 %v7810_v58, 16  ;;  %v7850_v36 = vld [vmem:[%s7121_s26 + $0x68] sm:$0x1] }
  0x92   : > { %6692 = vmatpush3.bf16.msra.mxu1 %v6980_v61  ;;  %v2245_v56 = vsel %vm7622_vm5, %v2240_v50, %v2244_v11  ;;  %6741 = vmatprep.subr.bf16.mxu0 %v6983_v9  ;;  %v6984_v61 = vld [vmem:[%s9643_s1 + $0x160] sm:$0xff]   ;;  %v2262_v38 = vrot.slane %v2260_v26, 5  ;;  %v2270_v25 = vshrl.u32 %v7810_v58, 16  ;;  %v2276_v45 = vshll.u32 %v7815_v63, 16  ;;  %v5702_v8 = vld [vmem:[%s7121_s26 + $0x6c] sm:$0xf] }
  0x93   : > { %6693 = vmatprep.subr.bf16.mxu1 %v6982_v15  ;;  %v434_v41 = vsel %vm7622_vm5, %v7792_v28, %v433_v48  ;;  %v438_v44 = vor.u32 %v437_v52, %v433_v48  ;;  %v2255_v62 = vsel %vm7622_vm5, %v2250_v53, %v2254_v5  ;;  %v2268_v49 = vrot.slane %v2266_v29, 5  ;;  %v6986_v5 = vld [vmem:[%s9643_s1 + $0x158] sm:$0xff]  }
  0x94   : > { %6662 = vmatmul.mubr.bf16.gmra.mxu0 %v7765_v1  ;;  %v5747_v39 = vcombine.low %v2245_v56, %v2255_v62  ;;  %v9682_v2 = vor.u32 %v7472_v18, %v7470_v17  ;;  %v2263_v40 = vor.u32 %v2262_v38, %v2259_v13  ;;  %v2272_v23 = vrot.slane %v2270_v25, 4  ;;  %v7847_v17 = vld [vmem:[%s7121_s26 + $0x64] sm:$0xf] }
  0x95   : > { %6614 = vmatmul.mubr.bf16.gmra.mxu1 %v7745_v22  ;;  %v439_v33 = vrot.slane %v438_v44, 4  ;;  %6665 = vmatprep.mubr.bf16.mxu0 %v5746_v6  ;;  %v2278_v0 = vrot.slane %v2276_v45, 5  ;;  %v7036_v22 = vld [vmem:[%s7121_s26 + $0x58] sm:$0xf]  ;;  %v465_v47 = vshll.u32 %v7037_v14, 16  ;;  %v2281_v18 = vshrl.u32 %v5699_v7, 16 }
  0x96   : > { %v7839_v27 = vrot.slane %v9682_v2, 4  ;;  %6617 = vmatprep.mubr.bf16.mxu1 %v7777_v59  ;;  %v455_v43 = vshll.u32 %v7036_v22, 16  ;;  %6694 = vmatpush3.bf16.msra.mxu1 %v6982_v15  ;;  %v459_v28 = vshrl.u32 %v7036_v22, 16  ;;  %v2264_v6 = vrot.slane %v2263_v40, 4  ;;  %v6987_v15 = vld [vmem:[%s9643_s1 + $0x198] sm:$0xff]   ;;  %v6988_v44 = vld [vmem:[%s9643_s1 + $0x150] sm:$0xff]  }
  0x97   : > { %6742 = vmatpush3.bf16.msra.mxu0 %v6983_v9  ;;  %v444_v1 = vsel %vm7622_vm5, %v439_v33, %v443_v51  ;;  %v2273_v11 = vor.u32 %v2272_v23, %v2268_v49  ;;  %6695 = vmatprep.subr.bf16.mxu1 %v6984_v61  ;;  %v467_v42 = vrot.slane %v465_v47, 5  ;;  %v2283_v34 = vrot.slane %v2281_v18, 4  ;;  %v7038_v56 = vld [vmem:[%s7121_s26 + $0x64] sm:$0xf]  ;;  %v7888_v2 = vld [vmem:[%s7121_s26 + $0x74] sm:$0x1] }
  0x98   : > { %v5660_v59 = vcombine.low %v434_v41, %v444_v1  ;;  %v457_v54 = vrot.slane %v455_v43, 5  ;;  %6743 = vmatprep.subr.bf16.mxu0 %v6985_v24  ;;  %v461_v9 = vrot.slane %v459_v28, 4  ;;  %v2284_v16 = vshll.u32 %v5699_v7, 16  ;;  %v6990_v43 = vld [vmem:[%s9643_s1 + $0x148] sm:$0xff]  }
  0x99   : > { %v2269_v21 = vsel %vm7622_vm5, %v2264_v6, %v2268_v49  ;;  %v2274_v3 = vrot.slane %v2273_v11, 4  ;;  %v2290_v19 = vshll.u32 %v7847_v17, 16  ;;  %v2294_v52 = vshrl.u32 %v7847_v17, 16  ;;  %v6991_v18 = vld [vmem:[%s9643_s1 + $0x188] sm:$0xff]  }
  0x9a   : > { %v458_v60 = vsel %vm7622_vm5, %v7839_v27, %v457_v54  ;;  %v462_v50 = vor.u32 %v461_v9, %v457_v54  ;;  %v2286_v48 = vrot.slane %v2284_v16, 5  ;;  %v2300_v53 = vshll.u32 %v7850_v36, 16  ;;  %6696 = vmatpush3.bf16.msra.mxu1 %v6984_v61  ;;  %v7039_v16 = vld [vmem:[%s7121_s26 + $0x70] sm:$0xf] }
  0x9b   : > { %6744 = vmatpush3.bf16.msra.mxu0 %v6985_v24  ;;  %v2279_v51 = vsel %vm7622_vm5, %v2274_v3, %v2278_v0  ;;  %v2292_v13 = vrot.slane %v2290_v19, 5  ;;  %v9683_v26 = vor.u32 %v7484_v37, %v7475_v20  ;;  %v479_v41 = vshll.u32 %v7038_v56, 16  ;;  %6697 = vmatprep.subr.bf16.mxu1 %v6986_v5  ;;  %v6989_v20 = vld [vmem:[%s9643_s1 + $0x190] sm:$0xff]  }
  0x9c   : > { %6745 = vmatprep.subr.bf16.mxu0 %v6987_v15  ;;  %6666 = vmatmul.mubr.bf16.gmra.mxu0 %v5747_v39  ;;  %v5748_v29 = vcombine.low %v2269_v21, %v2279_v51  ;;  %v463_v61 = vrot.slane %v462_v50, 4  ;;  %v2287_v62 = vor.u32 %v2286_v48, %v2283_v34  ;;  %v2296_v38 = vrot.slane %v2294_v52, 4  ;;  %v7883_v24 = vld [vmem:[%s7121_s26 + $0x70] sm:$0xf]  ;;  %v5705_v21 = vld [vmem:[%s7121_s26 + $0x78] sm:$0xf] }
  0x9d   : > { %v7872_v7 = vrot.slane %v9683_v26, 4  ;;  %6618 = vmatmul.mubr.bf16.gmra.mxu1 %v7812_v31  ;;  %v2302_v37 = vrot.slane %v2300_v53, 5  ;;  %v481_v25 = vrot.slane %v479_v41, 5  ;;  %v483_v45 = vshrl.u32 %v7038_v56, 16  ;;  %v6993_v50 = vld [vmem:[%s9643_s1 + $0x180] sm:$0xff]  }
  0x9e   : > { %6621 = vmatprep.mubr.bf16.mxu1 %v5660_v59  ;;  %v2305_v33 = vshrl.u32 %v5702_v8, 16  ;;  %6669 = vmatprep.mubr.bf16.mxu0 %v5748_v29  ;;  %v468_v31 = vsel %vm7622_vm5, %v463_v61, %v467_v42  ;;  %v2288_v39 = vrot.slane %v2287_v62, 4  ;;  %v2297_v49 = vor.u32 %v2296_v38, %v2292_v13  ;;  %v7040_v51 = vld [vmem:[%s7121_s26 + $0x74] sm:$0x1]  ;;  %v7927_v56 = vld [vmem:[%s7121_s26 + $0x80] sm:$0x1] }
  0x9f   : > { %v2308_v27 = vshll.u32 %v5702_v8, 16  ;;  %6698 = vmatpush3.bf16.msra.mxu1 %v6986_v5  ;;  %v5661_v40 = vcombine.low %v458_v60, %v468_v31  ;;  %v482_v23 = vsel %vm7622_vm5, %v7872_v7, %v481_v25  ;;  %v485_v0 = vrot.slane %v483_v45, 4  ;;  %6746 = vmatpush3.bf16.msra.mxu0 %v6987_v15  ;;  %v6992_v15 = vld [vmem:[%s9643_s1 + $0x140] sm:$0xff]  }
  0xa0   : > { %v2307_v22 = vrot.slane %v2305_v33, 4  ;;  %6699 = vmatprep.subr.bf16.mxu1 %v6988_v44  ;;  %v2293_v1 = vsel %vm7622_vm5, %v2288_v39, %v2292_v13  ;;  %v2298_v28 = vrot.slane %v2297_v49, 4  ;;  %v2314_v47 = vshll.u32 %v7883_v24, 16  ;;  %6747 = vmatprep.subr.bf16.mxu0 %v6989_v20 }
  0xa1   : > { %v2310_v14 = vrot.slane %v2308_v27, 5  ;;  %v486_v59 = vor.u32 %v485_v0, %v481_v25  ;;  %v2318_v6 = vshrl.u32 %v7883_v24, 16  ;;  %v2324_v11 = vshll.u32 %v7888_v2, 16  ;;  %v7945_v27 = vld [vmem:[%s9643_s1 + $0x238] sm:$0xff]  }
  0xa2   : > { %v9684_v54 = vor.u32 %v7504_v30, %v7491_v46  ;;  %v2303_v9 = vsel %vm7622_vm5, %v2298_v28, %v2302_v37  ;;  %v2316_v34 = vrot.slane %v2314_v47, 5  ;;  %v503_v8 = vshll.u32 %v7039_v16, 16  ;;  %v7917_v30 = vld [vmem:[%s7121_s26 + $0x7c] sm:$0xf]  ;;  %v5708_v28 = vld [vmem:[%s7121_s26 + $0x84] sm:$0xf] }
  0xa3   : > { %v2311_v42 = vor.u32 %v2310_v14, %v2307_v22  ;;  %6700 = vmatpush3.bf16.msra.mxu1 %v6988_v44  ;;  %v5749_v3 = vcombine.low %v2293_v1, %v2303_v9  ;;  %v487_v60 = vrot.slane %v486_v59, 4  ;;  %v2320_v19 = vrot.slane %v2318_v6, 4  ;;  %6748 = vmatpush3.bf16.msra.mxu0 %v6989_v20  ;;  %v7937_v20 = vld [vmem:[%s9643_s1 + $0x1f8] sm:$0xff]   ;;  %v7955_v6 = vld [vmem:[%s7121_s26 + $0x88] sm:$0xf] }
  0xa4   : > { %v7907_v5 = vrot.slane %v9684_v54, 4  ;;  %v2326_v46 = vrot.slane %v2324_v11, 5  ;;  %6701 = vmatprep.subr.bf16.mxu1 %v6990_v43  ;;  %v505_v52 = vrot.slane %v503_v8, 5  ;;  %v507_v53 = vshrl.u32 %v7039_v16, 16  ;;  %6749 = vmatprep.subr.bf16.mxu0 %v6991_v18  ;;  %v7962_v16 = vld [vmem:[%s7121_s26 + $0x8c] sm:$0x1] }
  0xa5   : > { %6622 = vmatmul.mubr.bf16.gmra.mxu1 %v5661_v40  ;;  %v2312_v48 = vrot.slane %v2311_v42, 4  ;;  %v513_v13 = vshll.u32 %v7040_v51, 16  ;;  %6670 = vmatmul.mubr.bf16.gmra.mxu0 %v5749_v3  ;;  %v492_v26 = vsel %vm7622_vm5, %v487_v60, %v7365_v57  ;;  %v2321_v7 = vor.u32 %v2320_v19, %v2316_v34  ;;  %v7042_v42 = vld [vmem:[%s7121_s26 + $0x80] sm:$0x1] }
  0xa6   : > { %v2329_v41 = vshrl.u32 %v5705_v21, 16  ;;  %v2332_v44 = vshll.u32 %v5705_v21, 16  ;;  %v5662_v29 = vcombine.low %v482_v23, %v492_v26  ;;  %v506_v62 = vsel %vm7622_vm5, %v7907_v5, %v505_v52 }
  0xa7   : > { %v2317_v61 = vsel %vm7622_vm5, %v2312_v48, %v2316_v34  ;;  %v509_v38 = vrot.slane %v507_v53, 4  ;;  %6702 = vmatpush3.bf16.msra.mxu1 %v6990_v43  ;;  %v2322_v57 = vrot.slane %v2321_v7, 4  ;;  %v515_v37 = vrot.slane %v513_v13, 5  ;;  %6750 = vmatpush3.bf16.msra.mxu0 %v6991_v18  ;;  %v7041_v43 = vld [vmem:[%s7121_s26 + $0x7c] sm:$0xf] }
  0xa8   : > { %v2331_v25 = vrot.slane %v2329_v41, 4  ;;  %v2334_v45 = vrot.slane %v2332_v44, 5  ;;  %6703 = vmatprep.subr.bf16.mxu1 %v6992_v15  ;;  %6625 = vmatprep.mubr.bf16.mxu1 %v5662_v29  ;;  %v2338_v31 = vshll.u32 %v7917_v30, 16  ;;  %v2342_v39 = vshrl.u32 %v7917_v30, 16 }
  0xa9   : > { %v510_v33 = vor.u32 %v509_v38, %v505_v52  ;;  %v2348_v49 = vshll.u32 %v7927_v56, 16  ;;  %6751 = vmatprep.subr.bf16.mxu0 %v6993_v50  ;;  %v2327_v40 = vsel %vm7622_vm5, %v2322_v57, %v2326_v46  ;;  %v9685_v0 = vor.u32 %v7529_v10, %v7527_v35  ;;  %v5711_v52 = vld [vmem:[%s7121_s26 + $0x90] sm:$0xf] }
  0xaa   : > { %v2335_v23 = vor.u32 %v2334_v45, %v2331_v25  ;;  %v527_v1 = vshll.u32 %v7041_v43, 16  ;;  %v5750_v14 = vcombine.low %v2317_v61, %v2327_v40  ;;  %v2340_v18 = vrot.slane %v2338_v31, 5  ;;  %v7043_v61 = vld [vmem:[%s7121_s26 + $0x88] sm:$0xf]  ;;  %v7980_v45 = vld [vmem:[%s7121_s26 + $0x94] sm:$0xf] }
  0xab   : > { %v525_v22 = vrot.slane %v9685_v0, 4  ;;  %v511_v47 = vrot.slane %v510_v33, 4  ;;  %v2344_v59 = vrot.slane %v2342_v39, 4  ;;  %6704 = vmatpush3.bf16.msra.mxu1 %v6992_v15  ;;  %v2350_v54 = vrot.slane %v2348_v49, 5  ;;  %6752 = vmatpush3.bf16.msra.mxu0 %v6993_v50  ;;  %v7044_v40 = vld [vmem:[%s7121_s26 + $0x8c] sm:$0x1] }
  0xac   : > { %v2336_v11 = vrot.slane %v2335_v23, 4  ;;  %v529_v5 = vrot.slane %v527_v1, 5  ;;  %v531_v9 = vshrl.u32 %v7041_v43, 16  ;;  %6785 = vmatprep.subr.bf16.mxu1 %v7937_v20  ;;  %6673 = vmatprep.mubr.bf16.mxu0 %v5750_v14  ;;  %v537_v34 = vshll.u32 %v7042_v42, 16  ;;  %v7986_v0 = vld [vmem:[%s7121_s26 + $0x98] sm:$0x1] }
  0xad   : > { %v516_v35 = vsel %vm7622_vm5, %v511_v47, %v515_v37  ;;  %v2345_v10 = vor.u32 %v2344_v59, %v2340_v18  ;;  %v2353_v8 = vshrl.u32 %v5708_v28, 16  ;;  %6833 = vmatprep.subr.bf16.mxu0 %v7945_v27  ;;  %v2356_v48 = vshll.u32 %v5708_v28, 16 }
  0xae   : > { %v5663_v15 = vcombine.low %v506_v62, %v516_v35  ;;  %v2341_v21 = vsel %vm7622_vm5, %v2336_v11, %v2340_v18  ;;  %v530_v3 = vsel %vm7622_vm5, %v525_v22, %v529_v5  ;;  %v533_v60 = vrot.slane %v531_v9, 4 }
  0xaf   : > { %v2346_v19 = vrot.slane %v2345_v10, 4  ;;  %v539_v46 = vrot.slane %v537_v34, 5  ;;  %v2355_v50 = vrot.slane %v2353_v8, 4  ;;  %v2362_v51 = vshll.u32 %v7955_v6, 16 }
  0xb0   : > { %6626 = vmatmul.mubr.bf16.gmra.mxu1 %v5663_v15  ;;  %v534_v53 = vor.u32 %v533_v60, %v529_v5  ;;  %v2366_v13 = vshrl.u32 %v7955_v6, 16  ;;  %v2372_v26 = vshll.u32 %v7962_v16, 16  ;;  %v2358_v41 = vrot.slane %v2356_v48, 5  ;;  %v9687_v15 = vld [vmem:[#allocation3_spill] sm:$0xff]  ;;  %v8002_v48 = vld [vmem:[%s7121_s26 + $0xa0] sm:$0xf] }
  0xb1   : > { %v2351_v7 = vsel %vm7622_vm5, %v2346_v19, %v2350_v54  ;;  %v9686_v44 = vor.u32 %v7546_v12, %v7544_v55  ;;  %v551_v62 = vshll.u32 %v7043_v61, 16  ;;  %v2364_v37 = vrot.slane %v2362_v51, 5  ;;  %v5714_v54 = vld [vmem:[%s7121_s26 + $0x9c] sm:$0xf]  ;;  %v7045_v51 = vld [vmem:[%s7121_s26 + $0x94] sm:$0xf] }
  0xb2   : > { %v5751_v38 = vcombine.low %v2341_v21, %v2351_v7  ;;  %v535_v57 = vrot.slane %v534_v53, 4  ;;  %v2368_v25 = vrot.slane %v2366_v13, 4  ;;  %v2359_v33 = vor.u32 %v2358_v41, %v2355_v50 }
  0xb3   : > { %v549_v29 = vrot.slane %v9686_v44, 4  ;;  %v2374_v31 = vrot.slane %v2372_v26, 5  ;;  %v553_v39 = vrot.slane %v551_v62, 5  ;;  %v555_v49 = vshrl.u32 %v7043_v61, 16 }
  0xb4   : > { %6674 = vmatmul.mubr.bf16.gmra.mxu0 %v5751_v38  ;;  %v540_v55 = vsel %vm7622_vm5, %v535_v57, %v539_v46  ;;  %v2369_v12 = vor.u32 %v2368_v25, %v2364_v37  ;;  %v561_v23 = vshll.u32 %v7044_v40, 16  ;;  %v2377_v22 = vshrl.u32 %v5711_v52, 16 }
  0xb5   : > { %v5664_v43 = vcombine.low %v530_v3, %v540_v55  ;;  %v2360_v1 = vrot.slane %v2359_v33, 4  ;;  %v554_v28 = vsel %vm7622_vm5, %v549_v29, %v553_v39  ;;  %v557_v14 = vrot.slane %v555_v49, 4  ;;  %v8009_v29 = vld [vmem:[%s7121_s26 + $0xa4] sm:$0x1]  ;;  %v5717_v49 = vld [vmem:[%s7121_s26 + $0xa8] sm:$0xf] }
  0xb6   : > { %v2370_v47 = vrot.slane %v2369_v12, 4  ;;  %v563_v18 = vrot.slane %v561_v23, 5  ;;  %v2379_v59 = vrot.slane %v2377_v22, 4  ;;  %v2380_v11 = vshll.u32 %v5711_v52, 16 }
  0xb7   : > { %6629 = vmatprep.mubr.bf16.mxu1 %v5664_v43  ;;  %v2365_v5 = vsel %vm7622_vm5, %v2360_v1, %v2364_v37  ;;  %v558_v9 = vor.u32 %v557_v14, %v553_v39  ;;  %v2386_v35 = vshll.u32 %v7980_v45, 16  ;;  %v2390_v10 = vshrl.u32 %v7980_v45, 16 }
  0xb8   : > { %v2375_v42 = vsel %vm7622_vm5, %v2370_v47, %v2374_v31  ;;  %v2382_v34 = vrot.slane %v2380_v11, 5  ;;  %v2396_v8 = vshll.u32 %v7986_v0, 16  ;;  %v9688_v21 = vor.u32 %v7560_v4, %v9687_v15  ;;  %v7046_v4 = vld [vmem:[%s7121_s26 + $0x98] sm:$0x1]  ;;  %v9690_v11 = vld [vmem:[#allocation4_spill] sm:$0xff] }
  0xb9   : > { %v5752_v60 = vcombine.low %v2365_v5, %v2375_v42  ;;  %v559_v19 = vrot.slane %v558_v9, 4  ;;  %v2388_v46 = vrot.slane %v2386_v35, 5  ;;  %v2392_v50 = vrot.slane %v2390_v10, 4  ;;  %v7047_v42 = vld [vmem:[%s7121_s26 + $0xa0] sm:$0xf] }
  0xba   : > { %v573_v3 = vrot.slane %v9688_v21, 4  ;;  %v2383_v52 = vor.u32 %v2382_v34, %v2379_v59  ;;  %v2398_v53 = vrot.slane %v2396_v8, 5  ;;  %v575_v13 = vshll.u32 %v7045_v51, 16  ;;  %v9689_v59 = vld [vmem:[#allocation5_spill] sm:$0xff]  ;;  %v8026_v8 = vld [vmem:[%s7121_s26 + $0xac] sm:$0xf] }
  0xbb   : > { %v579_v26 = vshrl.u32 %v7045_v51, 16  ;;  %6677 = vmatprep.mubr.bf16.mxu0 %v5752_v60  ;;  %v564_v7 = vsel %vm7622_vm5, %v559_v19, %v563_v18  ;;  %v2393_v41 = vor.u32 %v2392_v50, %v2388_v46  ;;  %v585_v44 = vshll.u32 %v7046_v4, 16  ;;  %v8032_v51 = vld [vmem:[%s7121_s26 + $0xb0] sm:$0x1] }
  0xbc   : > { %v2401_v61 = vshrl.u32 %v5714_v54, 16  ;;  %v5665_v62 = vcombine.low %v554_v28, %v564_v7  ;;  %v2384_v38 = vrot.slane %v2383_v52, 4  ;;  %v577_v57 = vrot.slane %v575_v13, 5 }
  0xbd   : > { %v581_v37 = vrot.slane %v579_v26, 4  ;;  %v2394_v25 = vrot.slane %v2393_v41, 4  ;;  %v587_v33 = vrot.slane %v585_v44, 5  ;;  %v2404_v39 = vshll.u32 %v5714_v54, 16 }
  0xbe   : > { %v2403_v31 = vrot.slane %v2401_v61, 4  ;;  %6630 = vmatmul.mubr.bf16.gmra.mxu1 %v5665_v62  ;;  %v2389_v55 = vsel %vm7622_vm5, %v2384_v38, %v2388_v46  ;;  %v578_v12 = vsel %vm7622_vm5, %v573_v3, %v577_v57  ;;  %v2410_v23 = vshll.u32 %v8002_v48, 16  ;;  %v7048_v3 = vld [vmem:[%s7121_s26 + $0xa4] sm:$0x1]  ;;  %v5720_v38 = vld [vmem:[%s7121_s26 + $0xb4] sm:$0xf] }
  0xbf   : > { %v582_v40 = vor.u32 %v581_v37, %v577_v57  ;;  %v2399_v22 = vsel %vm7622_vm5, %v2394_v25, %v2398_v53  ;;  %v2406_v43 = vrot.slane %v2404_v39, 5  ;;  %v2414_v1 = vshrl.u32 %v8002_v48, 16 }
  0xc0   : > { %v2420_v28 = vshll.u32 %v8009_v29, 16  ;;  %v5753_v14 = vcombine.low %v2389_v55, %v2399_v22  ;;  %v2412_v18 = vrot.slane %v2410_v23, 5  ;;  %v9691_v54 = vor.u32 %v9689_v59, %v9690_v11  ;;  %v9693_v55 = vld [vmem:[#allocation6_spill] sm:$0xff]  ;;  %v7049_v23 = vld [vmem:[%s7121_s26 + $0xac] sm:$0xf] }
  0xc1   : > { %v583_v47 = vrot.slane %v582_v40, 4  ;;  %v2407_v9 = vor.u32 %v2406_v43, %v2403_v31  ;;  %v2416_v35 = vrot.slane %v2414_v1, 4  ;;  %v599_v34 = vshll.u32 %v7047_v42, 16 }
  0xc2   : > { %v597_v5 = vrot.slane %v9691_v54, 4  ;;  %v2422_v10 = vrot.slane %v2420_v28, 5  ;;  %6678 = vmatmul.mubr.bf16.gmra.mxu0 %v5753_v14  ;;  %v603_v21 = vshrl.u32 %v7047_v42, 16  ;;  %v609_v60 = vshll.u32 %v7048_v3, 16  ;;  %v7050_v54 = vld [vmem:[%s7121_s26 + $0xb0] sm:$0x1] }
  0xc3   : > { %v588_v15 = vsel %vm7622_vm5, %v583_v47, %v587_v33  ;;  %v2425_v19 = vshrl.u32 %v5717_v49, 16  ;;  %v2408_v50 = vrot.slane %v2407_v9, 4  ;;  %v2417_v52 = vor.u32 %v2416_v35, %v2412_v18  ;;  %v8049_v47 = vld [vmem:[%s7121_s26 + $0xb8] sm:$0xf]  ;;  %v8055_v42 = vld [vmem:[%s7121_s26 + $0xbc] sm:$0x1] }
  0xc4   : > { %v5666_v46 = vcombine.low %v578_v12, %v588_v15  ;;  %v601_v53 = vrot.slane %v599_v34, 5  ;;  %v605_v13 = vrot.slane %v603_v21, 4  ;;  %v611_v26 = vrot.slane %v609_v60, 5 }
  0xc5   : > { %v2427_v7 = vrot.slane %v2425_v19, 4  ;;  %v2428_v41 = vshll.u32 %v5717_v49, 16  ;;  %v2413_v4 = vsel %vm7622_vm5, %v2408_v50, %v2412_v18  ;;  %v2418_v44 = vrot.slane %v2417_v52, 4  ;;  %v9692_v49 = vld [vmem:[#allocation7_spill] sm:$0xff] }
  0xc6   : > { %6633 = vmatprep.mubr.bf16.mxu1 %v5666_v46  ;;  %v602_v61 = vsel %vm7622_vm5, %v597_v5, %v601_v53  ;;  %v2434_v62 = vshll.u32 %v8026_v8, 16  ;;  %v606_v57 = vor.u32 %v605_v13, %v601_v53  ;;  %v2438_v25 = vshrl.u32 %v8026_v8, 16  ;;  %v5723_v53 = vld [vmem:[%s7121_s26 + $0xc0] sm:$0xf] }
  0xc7   : > { %v2430_v37 = vrot.slane %v2428_v41, 5  ;;  %v2444_v33 = vshll.u32 %v8032_v51, 16  ;;  %v2423_v31 = vsel %vm7622_vm5, %v2418_v44, %v2422_v10  ;;  %v9694_v12 = vor.u32 %v9692_v49, %v9693_v55  ;;  %v8072_v55 = vld [vmem:[%s7121_s26 + $0xc4] sm:$0xf] }
  0xc8   : > { %v2436_v39 = vrot.slane %v2434_v62, 5  ;;  %v623_v22 = vshll.u32 %v7049_v23, 16  ;;  %v5754_v43 = vcombine.low %v2413_v4, %v2423_v31  ;;  %v607_v1 = vrot.slane %v606_v57, 4  ;;  %v9696_v62 = vld [vmem:[#allocation8_spill] sm:$0xff] }
  0xc9   : > { %v621_v40 = vrot.slane %v9694_v12, 4  ;;  %v2431_v28 = vor.u32 %v2430_v37, %v2427_v7  ;;  %v2440_v14 = vrot.slane %v2438_v25, 4  ;;  %v2446_v18 = vrot.slane %v2444_v33, 5 }
  0xca   : > { %v625_v59 = vrot.slane %v623_v22, 5  ;;  %v627_v11 = vshrl.u32 %v7049_v23, 16  ;;  %v633_v5 = vshll.u32 %v7050_v54, 16  ;;  %6681 = vmatprep.mubr.bf16.mxu0 %v5754_v43  ;;  %v612_v9 = vsel %vm7622_vm5, %v607_v1, %v611_v26  ;;  %v8075_v43 = vld [vmem:[%s7121_s26 + $0xc8] sm:$0x1] }
  0xcb   : > { %v2432_v35 = vrot.slane %v2431_v28, 4  ;;  %v2441_v10 = vor.u32 %v2440_v14, %v2436_v39  ;;  %v2449_v34 = vshrl.u32 %v5720_v38, 16  ;;  %v5667_v15 = vcombine.low %v602_v61, %v612_v9  ;;  %v9695_v61 = vld [vmem:[#allocation9_spill] sm:$0xff] }
  0xcc   : > { %v626_v21 = vsel %vm7622_vm5, %v621_v40, %v625_v59  ;;  %v629_v3 = vrot.slane %v627_v11, 4  ;;  %v635_v60 = vrot.slane %v633_v5, 5  ;;  %v2452_v52 = vshll.u32 %v5720_v38, 16  ;;  %v7051_v38 = vld [vmem:[%s7121_s26 + $0xb8] sm:$0xf] }
  0xcd   : > { %v2437_v19 = vsel %vm7622_vm5, %v2432_v35, %v2436_v39  ;;  %v2442_v46 = vrot.slane %v2441_v10, 4  ;;  %v2451_v50 = vrot.slane %v2449_v34, 4  ;;  %6634 = vmatmul.mubr.bf16.gmra.mxu1 %v5667_v15  ;;  %v2458_v26 = vshll.u32 %v8049_v47, 16  ;;  %v7052_v14 = vld [vmem:[%s7121_s26 + $0xbc] sm:$0x1] }
  0xce   : > { %v630_v13 = vor.u32 %v629_v3, %v625_v59  ;;  %v2462_v7 = vshrl.u32 %v8049_v47, 16  ;;  %v2468_v41 = vshll.u32 %v8055_v42, 16  ;;  %v2454_v44 = vrot.slane %v2452_v52, 5  ;;  %v5766_v35 = vld [vmem:[%s7121_s26 + $0xc] sm:$0xe] }
  0xcf   : > { %v2447_v4 = vsel %vm7622_vm5, %v2442_v46, %v2446_v18  ;;  %v9697_v57 = vor.u32 %v9695_v61, %v9696_v62  ;;  %v647_v25 = vshll.u32 %v7051_v38, 16  ;;  %v2460_v39 = vrot.slane %v2458_v26, 5 }
  0xd0   : > { %v5755_v33 = vcombine.low %v2437_v19, %v2447_v4  ;;  %v631_v31 = vrot.slane %v630_v13, 4  ;;  %v2464_v49 = vrot.slane %v2462_v7, 4  ;;  %v2455_v12 = vor.u32 %v2454_v44, %v2451_v50  ;;  %v5767_v19 = vld [vmem:[%s7121_s26 + $0x18] sm:$0xe] }
  0xd1   : > { %v645_v37 = vrot.slane %v9697_v57, 4  ;;  %v2470_v40 = vrot.slane %v2468_v41, 5  ;;  %v649_v23 = vrot.slane %v647_v25, 5  ;;  %v651_v22 = vshrl.u32 %v7051_v38, 16  ;;  %v7053_v57 = vld [vmem:[%s7121_s26 + $0x10] sm:$0xf] }
  0xd2   : > { %6682 = vmatmul.mubr.bf16.gmra.mxu0 %v5755_v33  ;;  %v636_v1 = vsel %vm7622_vm5, %v631_v31, %v635_v60  ;;  %v2465_v28 = vor.u32 %v2464_v49, %v2460_v39  ;;  %v657_v18 = vshll.u32 %v7052_v14, 16  ;;  %v2473_v59 = vshrl.u32 %v5723_v53, 16  ;;  %v7054_v38 = vld [vmem:[%s7121_s26 + $0x14] sm:$0x1]  ;;  %v5768_v33 = vld [vmem:[%s7121_s26 + $0x24] sm:$0xe] }
  0xd3   : > { %v5668_v11 = vcombine.low %v626_v21, %v636_v1  ;;  %v2456_v54 = vrot.slane %v2455_v12, 4  ;;  %v650_v5 = vsel %vm7622_vm5, %v645_v37, %v649_v23  ;;  %v653_v9 = vrot.slane %v651_v22, 4  ;;  %v7055_v12 = vld [vmem:[%s7121_s26 + $0x1c] sm:$0xf] }
  0xd4   : > { %v2466_v10 = vrot.slane %v2465_v28, 4  ;;  %v659_v34 = vrot.slane %v657_v18, 5  ;;  %v2475_v15 = vrot.slane %v2473_v59, 4  ;;  %v2476_v3 = vshll.u32 %v5723_v53, 16  ;;  %v5769_v18 = vld [vmem:[%s7121_s26 + $0x30] sm:$0xe] }
  0xd5   : > { %6637 = vmatprep.mubr.bf16.mxu1 %v5668_v11  ;;  %v2461_v60 = vsel %vm7622_vm5, %v2456_v54, %v2460_v39  ;;  %v654_v46 = vor.u32 %v653_v9, %v649_v23  ;;  %v2482_v21 = vshll.u32 %v8072_v55, 16  ;;  %v2486_v50 = vshrl.u32 %v8072_v55, 16  ;;  %v5770_v59 = vld [vmem:[%s7121_s26 + $0x3c] sm:$0xe] }
  0xd6   : > { %v2471_v52 = vsel %vm7622_vm5, %v2466_v10, %v2470_v40  ;;  %v2478_v13 = vrot.slane %v2476_v3, 5  ;;  %v2492_v26 = vshll.u32 %v8075_v43, 16  ;;  %v5782_v53 = vrot.slane %v5766_v35, 9  ;;  %v7056_v35 = vld [vmem:[%s7121_s26 + $0x20] sm:$0x1] }
  0xd7   : > { %v5756_v7 = vcombine.low %v2461_v60, %v2471_v52  ;;  %v655_v41 = vrot.slane %v654_v46, 4  ;;  %v2484_v4 = vrot.slane %v2482_v21, 5  ;;  %v2488_v44 = vrot.slane %v2486_v50, 4  ;;  %v7057_v3 = vld [vmem:[%s7121_s26 + $0x28] sm:$0xf]  ;;  %v6994_v21 = vld [vmem:[%s7121_s26 + $0x18] sm:$0xff]  }
  0xd8   : > { %v2479_v61 = vor.u32 %v2478_v13, %v2475_v15  ;;  %v2494_v62 = vrot.slane %v2492_v26, 5  ;;  %v2884_v37 = vrot.slane %v7053_v57, 5  ;;  %v2887_v25 = vrot.slane %v7054_v38, 5  ;;  %v7058_v52 = vld [vmem:[%s7121_s26 + $0x2c] sm:$0x1] }
  0xd9   : > { %6685 = vmatprep.mubr.bf16.mxu0 %v5756_v7  ;;  %v660_v31 = vsel %vm7622_vm5, %v655_v41, %v659_v34  ;;  %v2489_v39 = vor.u32 %v2488_v44, %v2484_v4  ;;  %v5783_v49 = vrot.slane %v5767_v19, 9  ;;  %v2891_v40 = vrot.slane %v7055_v12, 5  ;;  %v5771_v41 = vld [vmem:[%s7121_s26 + $0x48] sm:$0xe]  ;;  %v7059_v44 = vld [vmem:[%s7121_s26 + $0x34] sm:$0xf] }
  0xda   : > { %v5669_v23 = vcombine.low %v650_v5, %v660_v31  ;;  %v2480_v22 = vrot.slane %v2479_v61, 4  ;;  %v2885_v28 = vsel %vm7133_vm2, %v5782_v53, %v2884_v37  ;;  %v2886_v14 = vrot.slane %v2884_v37, 4  ;;  %v5772_v12 = vld [vmem:[%s7121_s26 + $0x54] sm:$0xe] }
  0xdb   : > { %v2490_v11 = vrot.slane %v2489_v39, 4  ;;  %v2892_v54 = vsel %vm7133_vm2, %v5783_v49, %v2891_v40  ;;  %v2893_v9 = vrot.slane %v2891_v40, 4  ;;  %v2894_v10 = vrot.slane %v7056_v35, 5  ;;  %v7062_v39 = vld [vmem:[%s7121_s26 + $0x44] sm:$0x1] }
  0xdc   : > { %6638 = vmatmul.mubr.bf16.gmra.mxu1 %v5669_v23  ;;  %v2485_v5 = vsel %vm7622_vm5, %v2480_v22, %v2484_v4  ;;  %v2888_v34 = vsel %vm7133_vm2, %v2886_v14, %v2887_v25  ;;  %v5784_v15 = vrot.slane %v5768_v33, 9  ;;  %v2898_v19 = vrot.slane %v7057_v3, 5  ;;  %v7061_v33 = vld [vmem:[%s7121_s26 + $0x40] sm:$0xf] }
  0xdd   : > { %v2495_v60 = vsel %vm7622_vm5, %v2490_v11, %v2494_v62  ;;  %v5814_v46 = vcombine.low %v2885_v28, %v2888_v34  ;;  %v2895_v50 = vsel %vm7133_vm2, %v2893_v9, %v2894_v10  ;;  %v2901_v13 = vrot.slane %v7058_v52, 5  ;;  %v7060_v62 = vld [vmem:[%s7121_s26 + $0x38] sm:$0x1]  ;;  %v7063_v28 = vld [vmem:[%s7121_s26 + $0x4c] sm:$0xf] }
  0xde   : > { %v5757_v26 = vcombine.low %v2485_v5, %v2495_v60  ;;  %v2899_v53 = vsel %vm7133_vm2, %v5784_v15, %v2898_v19  ;;  %v2900_v7 = vrot.slane %v2898_v19, 4  ;;  %v5785_v4 = vrot.slane %v5769_v18, 9  ;;  %v7064_v9 = vld [vmem:[%s7121_s26 + $0x50] sm:$0x1]  ;;  %v5773_v3 = vld [vmem:[%s7121_s26 + $0x60] sm:$0xe] }
  0xdf   : > { %6705 = vmatprep.mubr.bf16.mxu1 %v5814_v46  ;;  %v2905_v61 = vrot.slane %v7059_v44, 5  ;;  %v2908_v57 = vrot.slane %v7060_v62, 5  ;;  %v5786_v37 = vrot.slane %v5770_v59, 9  ;;  %v5815_v38 = vcombine.low %v2892_v54, %v2895_v50  ;;  %v7000_v59 = vld [vmem:[%s9643_s1 + $0x1f0] sm:$0xff]   ;;  %v6995_v19 = vld [vmem:[%s7121_s26 + $0x24] sm:$0xff]  }
  0xe0   : > { %6686 = vmatmul.mubr.bf16.gmra.mxu0 %v5757_v26  ;;  %v2902_v25 = vsel %vm7133_vm2, %v2900_v7, %v2901_v13  ;;  %v2912_v31 = vrot.slane %v7061_v33, 5  ;;  %v2915_v49 = vrot.slane %v7062_v39, 5  ;;  %v5787_v22 = vrot.slane %v5771_v41, 9  ;;  %v6998_v50 = vld [vmem:[%s7121_s26 + $0x30] sm:$0xff]   ;;  %v8160_v7 = vld [vmem:[%s7121_s26 + $0x6c] sm:$0xe] }
  0xe1   : > { %6753 = vmatprep.mubr.bf16.mxu0 %v6994_v21  ;;  %v5816_v40 = vcombine.low %v2899_v53, %v2902_v25  ;;  %v2907_v23 = vrot.slane %v2905_v61, 4  ;;  %v2919_v14 = vrot.slane %v7063_v28, 5  ;;  %v2906_v18 = vsel %vm7133_vm2, %v5785_v4, %v2905_v61  ;;  %v5775_v21 = vld [vmem:[%s7121_s26 + $0x78] sm:$0xe]  ;;  %v5776_v41 = vld [vmem:[%s7121_s26 + $0x84] sm:$0xe] }
  0xe2   : > { %v8133_v11 = vsel %vm7133_vm2, %v5786_v37, %v2912_v31  ;;  %v2914_v54 = vrot.slane %v2912_v31, 4  ;;  %v2922_v35 = vrot.slane %v7064_v9, 5  ;;  %v5788_v34 = vrot.slane %v5772_v12, 9  ;;  %v7004_v4 = vld [vmem:[%s9643_s1 + $0x1e8] sm:$0xff]   ;;  %v5777_v31 = vld [vmem:[%s7121_s26 + $0x90] sm:$0xe] }
  0xe3   : > { %v2909_v10 = vsel %vm7133_vm2, %v2907_v23, %v2908_v57  ;;  %v2921_v5 = vrot.slane %v2919_v14, 4  ;;  %v2926_v15 = vrot.slane %v7810_v58, 5  ;;  %v2929_v46 = vrot.slane %v7815_v63, 5  ;;  %v7001_v63 = vld [vmem:[%s9643_s1 + $0x230] sm:$0xff]  }
  0xe4   : > { %6706 = vmatmul.mubr.bf16.vlgmr.msra.gmra.mxu1 %v5815_v38  ;;  %v2916_v60 = vsel %vm7133_vm2, %v2914_v54, %v2915_v49  ;;  %v8149_v52 = vsel %vm7133_vm2, %v5787_v22, %v2919_v14  ;;  %v5817_v26 = vcombine.low %v2906_v18, %v2909_v10  ;;  %v5789_v53 = vrot.slane %v5773_v3, 9  ;;  %v7008_v14 = vld [vmem:[%s9643_s1 + $0x1e0] sm:$0xff]  }
  0xe5   : > { %6786 = vmatpush3.bf16.msra.mxu1 %v7937_v20  ;;  %6709 = vmatprep.mubr.bf16.mxu1 %v5816_v40  ;;  %v8153_v58 = vsel %vm7133_vm2, %v2921_v5, %v2922_v35  ;;  %v2928_v13 = vrot.slane %v2926_v15, 4  ;;  %v5818_v20 = vcombine.low %v8133_v11, %v2916_v60  ;;  %v8168_v44 = vsel %vm7133_vm2, %v5788_v34, %v2926_v15  ;;  %v5779_v11 = vld [vmem:[%s7121_s26 + $0xa8] sm:$0xe]  ;;  %v6999_v54 = vld [vmem:[%s7121_s26 + $0x3c] sm:$0xff]  }
  0xe6   : > { %6787 = vmatprep.subr.bf16.mxu1 %v7000_v59  ;;  %v2933_v62 = vrot.slane %v7847_v17, 5  ;;  %v5791_v57 = vrot.slane %v5775_v21, 9  ;;  %v5819_v37 = vcombine.low %v8149_v52, %v8153_v58  ;;  %v2936_v38 = vrot.slane %v7850_v36, 5  ;;  %v7002_v5 = vld [vmem:[%s7121_s26 + $0x48] sm:$0xff]   ;;  %v7006_v52 = vld [vmem:[%s7121_s26 + $0x60] sm:$0xff]  }
  0xe7   : > { %v8172_v61 = vsel %vm7133_vm2, %v2928_v13, %v2929_v46  ;;  %v2940_v25 = vrot.slane %v7883_v24, 5  ;;  %v2947_v33 = vrot.slane %v7917_v30, 5  ;;  %v5790_v39 = vrot.slane %v8160_v7, 9  ;;  %v7005_v24 = vld [vmem:[%s9643_s1 + $0x228] sm:$0xff]   ;;  %v7012_v13 = vld [vmem:[%s9643_s1 + $0x1d8] sm:$0xff]  }
  0xe8   : > { %6754 = vmatmul.mubr.bf16.vlgmr.msra.gmra.mxu0 %v6995_v19  ;;  %v2943_v17 = vrot.slane %v7888_v2, 5  ;;  %v2950_v49 = vrot.slane %v7927_v56, 5  ;;  %v5792_v12 = vrot.slane %v5776_v41, 9  ;;  %v5820_v30 = vcombine.low %v8168_v44, %v8172_v61  ;;  %v5778_v56 = vld [vmem:[%s7121_s26 + $0x9c] sm:$0xe]  ;;  %v7009_v19 = vld [vmem:[%s9643_s1 + $0x220] sm:$0xff]  }
  0xe9   : > { %6834 = vmatpush3.bf16.msra.mxu0 %v7945_v27  ;;  %6757 = vmatprep.mubr.bf16.mxu0 %v6998_v50  ;;  %v8192_v27 = vsel %vm7133_vm2, %v5791_v57, %v2947_v33  ;;  %v2949_v40 = vrot.slane %v2947_v33, 4  ;;  %v2954_v23 = vrot.slane %v7955_v6, 5  ;;  %v8198_v22 = vsel %vm7133_vm2, %v5789_v53, %v2933_v62  ;;  %v8305_v2 = vld [vmem:[%s7121_s26 + $0xc0] sm:$0xe]  ;;  %v7017_v61 = vld [vmem:[%s9643_s1 + $0x210] sm:$0xff]  }
  0xea   : > { %6835 = vmatprep.subr.bf16.mxu0 %v7001_v63  ;;  %6788 = vmatpush3.bf16.msra.mxu1 %v7000_v59  ;;  %v2935_v28 = vrot.slane %v2933_v62, 4  ;;  %v2957_v18 = vrot.slane %v7962_v16, 5  ;;  %v5793_v59 = vrot.slane %v5777_v31, 9  ;;  %v2942_v9 = vrot.slane %v2940_v25, 4 }
  0xeb   : > { %6789 = vmatprep.subr.bf16.mxu1 %v7004_v4  ;;  %v8208_v6 = vsel %vm7133_vm2, %v2949_v40, %v2950_v49  ;;  %v8212_v35 = vsel %vm7133_vm2, %v5792_v12, %v2954_v23  ;;  %v2956_v10 = vrot.slane %v2954_v23, 4  ;;  %v2961_v34 = vrot.slane %v7980_v45, 5  ;;  %v7013_v49 = vld [vmem:[%s9643_s1 + $0x218] sm:$0xff]  }
  0xec   : > { %6710 = vmatmul.mubr.bf16.gmra.mxu1 %v5817_v26  ;;  %v2964_v15 = vrot.slane %v7986_v0, 5  ;;  %v5794_v3 = vrot.slane %v5778_v56, 9  ;;  %v8222_v60 = vpop.f32.mrf.mxu0  ;;  %v8224_v46 = vpop.f32.mrf.mxu1  ;;  %v2968_v45 = vrot.slane %v8002_v48, 5  ;;  %v2971_v0 = vrot.slane %v8009_v29, 5  ;;  %v5780_v48 = vld [vmem:[%s7121_s26 + $0xb4] sm:$0xe] }
  0xed   : > { %6836 = vmatpush3.bf16.msra.mxu0 %v7001_v63  ;;  %6713 = vmatprep.mubr.bf16.mxu1 %v5818_v20  ;;  %9699 = vst [vmem:[#allocation3_spill] sm:$0xff] %v8224_v46  ;;  %v8228_v21 = vsel %vm7133_vm2, %v2956_v10, %v2957_v18  ;;  %v5795_v50 = vrot.slane %v5779_v11, 9  ;;  %v8239_v63 = vsel %vm7133_vm2, %v5793_v59, %v2961_v34  ;;  %v2963_v20 = vrot.slane %v2961_v34, 4  ;;  %v8286_v40 = vld [vmem:[%s7121_s26 + $0x1c] sm:$0xf]  ;;  %v7016_v56 = vld [vmem:[%s9643_s1 + $0x1d0] sm:$0xff]  }
  0xee   : > { %6837 = vmatprep.subr.bf16.mxu0 %v7005_v24  ;;  %6790 = vmatpush3.bf16.msra.mxu1 %v7004_v4  ;;  %v2975_v53 = vrot.slane %v8026_v8, 5  ;;  %v8245_v29 = vsel %vm7133_vm2, %v5790_v39, %v2940_v25  ;;  %v8247_v7 = vpop.f32.mrf.mxu0  ;;  %v8249_v41 = vpop.f32.mrf.mxu1  ;;  %v8253_v4 = vsel %vm7133_vm2, %v5794_v3, %v2968_v45  ;;  %v2970_v62 = vrot.slane %v2968_v45, 4  ;;  %v5910_v39 = vld [vmem:[%s7121_s26 + $0x18] sm:$0xf] }
  0xef   : > { %6791 = vmatprep.subr.bf16.mxu1 %v7008_v14  ;;  %9700 = vst [vmem:[#allocation5_spill] sm:$0xff] %v8249_v41  ;;  %v2978_v57 = vrot.slane %v8032_v51, 5  ;;  %v8258_v8 = vsel %vm7133_vm2, %v2963_v20, %v2964_v15  ;;  %v2982_v31 = vrot.slane %v8049_v47, 5  ;;  %v8270_v51 = vsel %vm7133_vm2, %v2935_v28, %v2936_v38  ;;  %v5916_v47 = vld [vmem:[%s7121_s26 + $0x30] sm:$0xf]  ;;  %v7010_v26 = vld [vmem:[%s7121_s26 + $0x78] sm:$0xff]  }
  0xf0   : > { %6758 = vmatmul.mubr.bf16.gmra.mxu0 %v6999_v54  ;;  %v8262_v25 = vsel %vm7133_vm2, %v5795_v50, %v2975_v53  ;;  %v2977_v33 = vrot.slane %v2975_v53, 4  ;;  %v8275_v12 = vpop.f32.mrf.mxu0  ;;  %v8283_v36 = vsel %vm7133_vm2, %v2970_v62, %v2971_v0  ;;  %v5796_v38 = vrot.slane %v5780_v48, 9  ;;  %v5998_v50 = vld [vmem:[%s7121_s26 + $0x18] sm:$0xe] }
  0xf1   : > { %6761 = vmatprep.mubr.bf16.mxu0 %v7002_v5  ;;  %6838 = vmatpush3.bf16.msra.mxu0 %v7005_v24  ;;  %v8277_v24 = vpop.f32.mrf.mxu1  ;;  %v8292_v23 = vsel %vm7133_vm2, %v2942_v9, %v2943_v17  ;;  %v2985_v18 = vrot.slane %v8055_v42, 5  ;;  %v7003_v17 = vld [vmem:[%s7121_s26 + $0x54] sm:$0xff]   ;;  %v2984_v9 = vrot.slane %v2982_v31, 4  ;;  %v2989_v10 = vrot.slane %v8072_v55, 5  ;;  %v8319_v5 = vld [vmem:[%s7121_s26 + $0x20] sm:$0x1] }
  0xf2   : > { %6839 = vmatprep.subr.bf16.mxu0 %v7009_v19  ;;  %6792 = vmatpush3.bf16.msra.mxu1 %v7008_v14  ;;  %9701 = vst [vmem:[#allocation4_spill] sm:$0xff] %v8277_v24  ;;  %v8301_v14 = vsel %vm7133_vm2, %v2977_v33, %v2978_v57  ;;  %v8311_v59 = vpop.f32.mrf.mxu0  ;;  %v3752_v42 = vshrl.u32 %v5910_v39, 16  ;;  %v5821_v58 = vcombine.low %v8198_v22, %v8270_v51  ;;  %v3761_v34 = vshll.u32 %v8286_v40, 16  ;;  %v7015_v24 = vld [vmem:[%s7121_s26 + $0x9c] sm:$0xff]  }
  0xf3   : > { %6793 = vmatprep.subr.bf16.mxu1 %v7012_v13  ;;  %v8313_v11 = vpop.f32.mrf.mxu1  ;;  %v3765_v15 = vshrl.u32 %v8286_v40, 16  ;;  %v5822_v3 = vcombine.low %v8245_v29, %v8292_v23  ;;  %v8343_v22 = vsel %vm7133_vm2, %v5796_v38, %v2982_v31  ;;  %v3771_v48 = vshll.u32 %v8319_v5, 16  ;;  %v5913_v29 = vld [vmem:[%s7121_s26 + $0x24] sm:$0xf]  ;;  %v8364_v38 = vld [vmem:[%s7121_s26 + $0x28] sm:$0xf] }
  0xf4   : > { %6714 = vmatmul.mubr.bf16.gmra.mxu1 %v5819_v37  ;;  %9702 = vst [vmem:[#allocation7_spill] sm:$0xff] %v8313_v11  ;;  %v3755_v37 = vshll.u32 %v5910_v39, 16  ;;  %v8331_v45 = vpop.f32.mrf.mxu0  ;;  %v3754_v0 = vrot.slane %v3752_v42, 4  ;;  %v8347_v20 = vrot.slane %v3761_v34, 5  ;;  %v8357_v33 = vsel %vm7133_vm2, %v2984_v9, %v2985_v18 }
  0xf5   : > { %6717 = vmatprep.mubr.bf16.mxu1 %v5820_v30  ;;  %6840 = vmatpush3.bf16.msra.mxu0 %v7009_v19  ;;  %v8333_v44 = vpop.f32.mrf.mxu1  ;;  %v7020_v30 = vld [vmem:[%s9643_s1 + $0x1c8] sm:$0xff]   ;;  %v5797_v19 = vrot.slane %v8305_v2, 9  ;;  %v3767_v53 = vrot.slane %v3765_v15, 4  ;;  %v2991_v31 = vrot.slane %v2989_v10, 4  ;;  %v2992_v39 = vrot.slane %v8075_v43, 5 }
  0xf6   : > { %6841 = vmatprep.subr.bf16.mxu0 %v7013_v49  ;;  %6794 = vmatpush3.bf16.msra.mxu1 %v7012_v13  ;;  %9703 = vst [vmem:[#allocation6_spill] sm:$0xff] %v8333_v44  ;;  %v3757_v13 = vrot.slane %v3755_v37, 5  ;;  %v8351_v62 = vpop.f32.mrf.mxu0  ;;  %v4523_v51 = vrot.slane %v8286_v40, 5  ;;  %v4526_v42 = vrot.slane %v8319_v5, 5  ;;  %v8369_v37 = vld [vmem:[%s7121_s26 + $0x2c] sm:$0x1]  ;;  %v9718_v44 = vcombine.low %v8239_v63, %v8258_v8 }
  0xf7   : > { %6795 = vmatprep.subr.bf16.mxu1 %v7016_v56  ;;  %v8353_v57 = vpop.f32.mrf.mxu1  ;;  %v3768_v2 = vor.u32 %v3767_v53, %v8347_v20  ;;  %v7024_v40 = vld [vmem:[%s9643_s1 + $0x1c0] sm:$0xff]   ;;  %v8381_v9 = vrot.slane %v3771_v48, 5  ;;  %v3779_v34 = vshll.u32 %v5913_v29, 16  ;;  %v7007_v53 = vld [vmem:[%s7121_s26 + $0x6c] sm:$0xff]   ;;  %v3795_v28 = vshll.u32 %v8369_v37, 16 }
  0xf8   : > { %6762 = vmatmul.mubr.bf16.gmra.mxu0 %v7003_v17  ;;  %9704 = vst [vmem:[#allocation9_spill] sm:$0xff] %v8353_v57  ;;  %v3758_v23 = vor.u32 %v3757_v13, %v3754_v0  ;;  %v6014_v17 = vrot.slane %v5998_v50, 9  ;;  %v8371_v18 = vpop.f32.mrf.mxu0  ;;  %v4525_v5 = vrot.slane %v4523_v51, 4  ;;  %v3785_v0 = vshll.u32 %v8364_v38, 16  ;;  %v8390_v13 = vld [vmem:[%s7121_s26 + $0x24] sm:$0xe] }
  0xf9   : > { %6765 = vmatprep.mubr.bf16.mxu0 %v7006_v52  ;;  %6842 = vmatpush3.bf16.msra.mxu0 %v7013_v49  ;;  %v8373_v43 = vpop.f32.mrf.mxu1  ;;  %v7021_v49 = vld [vmem:[%s9643_s1 + $0x208] sm:$0xff]   ;;  %v3776_v52 = vshrl.u32 %v5913_v29, 16  ;;  %v8385_v15 = vrot.slane %v3768_v2, 4  ;;  %v3789_v50 = vshrl.u32 %v8364_v38, 16  ;;  %v8401_v29 = vsel %vm7133_vm2, %v5797_v19, %v2989_v10  ;;  %v8421_v19 = vld [vmem:[%s7121_s26 + $0x34] sm:$0xf] }
  0xfa   : > { %6843 = vmatprep.subr.bf16.mxu0 %v7017_v61  ;;  %6796 = vmatpush3.bf16.msra.mxu1 %v7016_v56  ;;  %9705 = vst [vmem:[#allocation8_spill] sm:$0xff] %v8373_v43  ;;  %v8383_v56 = vrot.slane %v3758_v23, 4  ;;  %v8393_v48 = vpop.f32.mrf.mxu0  ;;  %v3781_v2 = vrot.slane %v3779_v34, 5  ;;  %v8412_v16 = vsel %vm7133_vm2, %v6014_v17, %v4523_v51  ;;  %v8416_v55 = vsel %vm7133_vm2, %v4525_v5, %v4526_v42  ;;  %v8531_v57 = vld [vmem:[%s7121_s26 + $0x4c] sm:$0xf] }
  0xfb   : > { %6797 = vmatprep.subr.bf16.mxu1 %v7020_v30  ;;  %v8395_v54 = vpop.f32.mrf.mxu1  ;;  %v3778_v23 = vrot.slane %v3776_v52, 4  ;;  %v8418_v10 = vrot.slane %v3785_v0, 5  ;;  %v3791_v17 = vrot.slane %v3789_v50, 4  ;;  %v3797_v42 = vrot.slane %v3795_v28, 5  ;;  %v7018_v63 = vld [vmem:[%s7121_s26 + $0xa8] sm:$0xff]  }
  0xfc   : > { %6718 = vmatmul.mubr.bf16.gmra.mxu1 %v5821_v58  ;;  %9706 = vst [vmem:[#allocation2_spill] sm:$0xff] %v8395_v54  ;;  %v8408_v58 = vsel %vm7133_vm2, %v2991_v31, %v2992_v39  ;;  %v8423_v52 = vpop.f32.mrf.mxu0  ;;  %v3764_v31 = vsel %vm7622_vm5, %v8383_v56, %v8347_v20  ;;  %v3774_v39 = vsel %vm7622_vm5, %v8385_v15, %v8381_v9  ;;  %v4530_v5 = vrot.slane %v8364_v38, 5  ;;  %v8448_v38 = vld [vmem:[%s7121_s26 + $0x38] sm:$0x1] }
  0xfd   : > { %6721 = vmatprep.mubr.bf16.mxu1 %v5822_v3  ;;  %6844 = vmatpush3.bf16.msra.mxu0 %v7017_v61  ;;  %v8425_v3 = vpop.f32.mrf.mxu1  ;;  %v7025_v61 = vld [vmem:[%s9643_s1 + $0x200] sm:$0xff]   ;;  %v3782_v51 = vor.u32 %v3781_v2, %v3778_v23  ;;  %v3800_v34 = vshrl.u32 %v5916_v47, 16  ;;  %v3792_v20 = vor.u32 %v3791_v17, %v8418_v10  ;;  %v4533_v56 = vrot.slane %v8369_v37, 5 }
  0xfe   : > { %9707 = vst [vmem:[#allocation10_spill] sm:$0xff] %v8425_v3  ;;  %6845 = vmatprep.subr.bf16.mxu0 %v7021_v49  ;;  %6798 = vmatpush3.bf16.msra.mxu1 %v7020_v30  ;;  %v6015_v30 = vrot.slane %v8390_v13, 9  ;;  %v8440_v0 = vpop.f32.mrf.mxu0  ;;  %v3803_v9 = vshll.u32 %v5916_v47, 16  ;;  %v3809_v15 = vshll.u32 %v8421_v19, 16  ;;  %v4532_v50 = vrot.slane %v4530_v5, 4 }
  0xff   : > { %6799 = vmatprep.subr.bf16.mxu1 %v7024_v40  ;;  %v8442_v3 = vpop.f32.mrf.mxu1  ;;  %v3783_v28 = vrot.slane %v3782_v51, 4  ;;  %v3802_v13 = vrot.slane %v3800_v34, 4  ;;  %v3793_v47 = vrot.slane %v3792_v20, 4  ;;  %v7011_v20 = vld [vmem:[%s7121_s26 + $0x84] sm:$0xff]   ;;  %v3819_v17 = vshll.u32 %v8448_v38, 16 }
 0x100   : > { %6766 = vmatmul.mubr.bf16.gmra.mxu0 %v7007_v53  ;;  %9708 = vst [vmem:[#allocation11_spill] sm:$0xff] %v8442_v3  ;;  %v3813_v53 = vshrl.u32 %v8421_v19, 16  ;;  %v8451_v23 = vpop.f32.mrf.mxu0  ;;  %v3805_v37 = vrot.slane %v3803_v9, 5  ;;  %v8464_v3 = vld [vmem:[%s7121_s26 + $0x30] sm:$0xe]  ;;  %v8479_v51 = vsel %vm7133_vm2, %v6015_v30, %v4530_v5  ;;  %v4540_v54 = vrot.slane %v8448_v38, 5 }
 0x101   : > { %6769 = vmatprep.mubr.bf16.mxu0 %v7010_v26  ;;  %6846 = vmatpush3.bf16.msra.mxu0 %v7021_v49  ;;  %v8453_v2 = vpop.f32.mrf.mxu1  ;;  %v8455_v26 = vrot.slane %v3809_v15, 5  ;;  %v8475_v49 = vcombine.low %v3764_v31, %v3774_v39  ;;  %v3788_v31 = vsel %vm7622_vm5, %v3783_v28, %v8418_v10  ;;  %v3798_v39 = vsel %vm7622_vm5, %v3793_v47, %v3797_v42  ;;  %v8499_v5 = vld [vmem:[%s7121_s26 + $0x44] sm:$0x1]  ;;  %v8513_v47 = vld [vmem:[%s7121_s26 + $0x3c] sm:$0xe] }
 0x102   : > { %9709 = vst [vmem:[#allocation12_spill] sm:$0xff] %v8453_v2  ;;  %6847 = vmatprep.subr.bf16.mxu0 %v7025_v61  ;;  %6800 = vmatpush3.bf16.msra.mxu1 %v7024_v40  ;;  %v3815_v34 = vrot.slane %v3813_v53, 4  ;;  %v5919_v2 = vld [vmem:[%s7121_s26 + $0x3c] sm:$0xf]  ;;  %v9710_v40 = vcombine.low %v8192_v27, %v8208_v6  ;;  %v8471_v9 = vpop.f32.mrf.mxu0  ;;  %v8483_v53 = vsel %vm7133_vm2, %v4532_v50, %v4533_v56  ;;  %v8487_v27 = vld [vmem:[%s7121_s26 + $0x40] sm:$0xf] }
 0x103   : > { %v8473_v15 = vpop.f32.mrf.mxu1  ;;  %v9712_v6 = vcombine.low %v8212_v35, %v8228_v21  ;;  %v3806_v30 = vor.u32 %v3805_v37, %v3802_v13  ;;  %v6016_v21 = vrot.slane %v8464_v3, 9  ;;  %v3827_v28 = vshll.u32 %v5919_v2, 16 }
 0x104   : > { %6722 = vmatmul.mubr.bf16.gmra.mxu1 %v9710_v40  ;;  %9711 = vst [vmem:[#allocation13_spill] sm:$0xff] %v8473_v15  ;;  %v7014_v40 = vld [vmem:[%s7121_s26 + $0x90] sm:$0xff]   ;;  %v8501_v56 = vpop.f32.mrf.mxu0  ;;  %v3816_v35 = vor.u32 %v3815_v34, %v8455_v26  ;;  %v3833_v42 = vshll.u32 %v8487_v27, 16  ;;  %v3837_v13 = vshrl.u32 %v8487_v27, 16  ;;  %v8519_v3 = vcombine.low %v3788_v31, %v3798_v39 }
 0x105   : > { %6725 = vmatprep.mubr.bf16.mxu1 %v9712_v6  ;;  %6848 = vmatpush3.bf16.msra.mxu0 %v7025_v61  ;;  %v8503_v50 = vpop.f32.mrf.mxu1  ;;  %v4537_v61 = vrot.slane %v8421_v19, 5  ;;  %v3824_v6 = vshrl.u32 %v5919_v2, 16  ;;  %v8521_v19 = vrot.slane %v3819_v17, 5  ;;  %v3843_v10 = vshll.u32 %v8499_v5, 16  ;;  %v5922_v2 = vld [vmem:[%s7121_s26 + $0x48] sm:$0xf] }
 0x106   : > { %9713 = vst [vmem:[#allocation14_spill] sm:$0xff] %v8503_v50  ;;  %v8515_v37 = vpop.f32.mrf.mxu0  ;;  %v8525_v15 = vrot.slane %v3806_v30, 4  ;;  %v3829_v43 = vrot.slane %v3827_v28, 5  ;;  %v8537_v39 = vrot.slane %v3816_v35, 4  ;;  %v6017_v38 = vrot.slane %v8513_v47, 9 }
 0x107   : > { %9714 = vst [vmem:[#allocation15_spill] sm:$0xff] %v8515_v37  ;;  %v8517_v34 = vpop.f32.mrf.mxu1  ;;  %v3826_v50 = vrot.slane %v3824_v6, 4  ;;  %v4539_v6 = vrot.slane %v4537_v61, 4  ;;  %v4544_v28 = vrot.slane %v8487_v27, 5  ;;  %v9721_v27 = vcombine.low %v8253_v4, %v8283_v36 }
 0x108   : > { %6770 = vmatmul.mubr.bf16.gmra.mxu0 %v7011_v20  ;;  %9715 = vst [vmem:[#allocation16_spill] sm:$0xff] %v8517_v34  ;;  %v8528_v20 = vrot.slane %v3833_v42, 5  ;;  %v8533_v31 = vpop.f32.mrf.mxu0  ;;  %v3839_v34 = vrot.slane %v3837_v13, 4  ;;  %v3848_v42 = vshrl.u32 %v5922_v2, 16  ;;  %v4547_v47 = vrot.slane %v8499_v5, 5 }
 0x109   : > { %6773 = vmatprep.mubr.bf16.mxu0 %v7014_v40  ;;  %9716 = vst [vmem:[#allocation17_spill] sm:$0xff] %v8533_v31  ;;  %v8535_v17 = vpop.f32.mrf.mxu1  ;;  %v8539_v40 = vrot.slane %v3843_v10, 5  ;;  %v3830_v30 = vor.u32 %v3829_v43, %v3826_v50  ;;  %v3851_v10 = vshll.u32 %v5922_v2, 16  ;;  %v3857_v43 = vshll.u32 %v8531_v57, 16 }
 0x10a   : > { %9717 = vst [vmem:[#allocation18_spill] sm:$0xff] %v8535_v17  ;;  %v8547_v41 = vpop.f32.mrf.mxu0  ;;  %v3840_v13 = vor.u32 %v3839_v34, %v8528_v20  ;;  %v8553_v17 = vld [vmem:[%s7121_s26 + $0x50] sm:$0x1]  ;;  %v3861_v50 = vshrl.u32 %v8531_v57, 16  ;;  %v3850_v11 = vrot.slane %v3848_v42, 4  ;;  %v3812_v4 = vsel %vm7622_vm5, %v8525_v15, %v8455_v26 }
 0x10b   : > { %9719 = vst [vmem:[#allocation19_spill] sm:$0xff] %v8547_v41  ;;  %v8549_v35 = vpop.f32.mrf.mxu1  ;;  %v3831_v8 = vrot.slane %v3830_v30, 4  ;;  %v3853_v2 = vrot.slane %v3851_v10, 5  ;;  %v8564_v41 = vrot.slane %v3857_v43, 5  ;;  %v8575_v36 = vsel %vm7133_vm2, %v6016_v21, %v4537_v61  ;;  %v5925_v21 = vld [vmem:[%s7121_s26 + $0x54] sm:$0xf] }
 0x10c   : > { %6726 = vmatmul.mubr.bf16.gmra.mxu1 %v9718_v44  ;;  %9720 = vst [vmem:[#allocation20_spill] sm:$0xff] %v8549_v35  ;;  %v4546_v44 = vrot.slane %v4544_v28, 4  ;;  %v8562_v46 = vpop.f32.mrf.mxu0  ;;  %v3841_v34 = vrot.slane %v3840_v13, 4  ;;  %v3863_v31 = vrot.slane %v3861_v50, 4  ;;  %v3867_v5 = vshll.u32 %v8553_v17, 16 }
 0x10d   : > { %6729 = vmatprep.mubr.bf16.mxu1 %v9721_v27  ;;  %v6515_v35 = vpop.f32.mrf.mxu1  ;;  %9722 = vst [vmem:[#allocation21_spill] sm:$0xff] %v8562_v46  ;;  %v3854_v26 = vor.u32 %v3853_v2, %v3850_v11  ;;  %v8591_v61 = vld [vmem:[%s7121_s26 + $0x58] sm:$0xf]  ;;  %v3872_v10 = vshrl.u32 %v5925_v21, 16  ;;  %v3875_v43 = vshll.u32 %v5925_v21, 16  ;;  %v9725_v27 = vcombine.low %v8262_v25, %v8301_v14 }
 0x10e   : > { %v8567_v37 = vadd.f32 %v6515_v35, %v8222_v60  ;;  %v8578_v42 = vpop.f32.mrf.mxu0  ;;  %v3822_v60 = vsel %vm7622_vm5, %v8537_v39, %v8521_v19  ;;  %v8586_v35 = vsel %vm7133_vm2, %v4539_v6, %v4540_v54  ;;  %v3864_v15 = vor.u32 %v3863_v31, %v8564_v41 }
 0x10f   : > { %v1309_v30 = vpop.f32.mrf.mxu1  ;;  %9723 = vst [vmem:[#allocation22_spill] sm:$0xff] %v8578_v42  ;;  %v3836_v19 = vsel %vm7622_vm5, %v3831_v8, %v8528_v20  ;;  %v8601_v54 = vsel %vm7133_vm2, %v6017_v38, %v4544_v28  ;;  %v8605_v11 = vsel %vm7133_vm2, %v4546_v44, %v4547_v47  ;;  %v8612_v6 = vrot.slane %v3854_v26, 4  ;;  %v8622_v28 = vld [vmem:[%s7121_s26 + $0x48] sm:$0xe]  ;;  %v6003_v26 = vld [vmem:[%s7121_s26 + $0x54] sm:$0xe] }
 0x110   : > { %6774 = vmatmul.mubr.bf16.gmra.mxu0 %v7015_v24  ;;  %v8594_v24 = vadd.f32 %v1309_v30, %v8247_v7  ;;  %v8607_v39 = vpop.f32.mrf.mxu0  ;;  %v3846_v7 = vsel %vm7622_vm5, %v3841_v34, %v8539_v40  ;;  %v8614_v13 = vrot.slane %v3864_v15, 4  ;;  %v8616_v20 = vrot.slane %v3867_v5, 5  ;;  %v7019_v40 = vld [vmem:[%s7121_s26 + $0xb4] sm:$0xff]   ;;  %v8687_v34 = vld [vmem:[%s7121_s26 + $0x68] sm:$0x1] }
 0x111   : > { %6777 = vmatprep.mubr.bf16.mxu0 %v7018_v63  ;;  %v6516_v31 = vpop.f32.mrf.mxu1  ;;  %9724 = vst [vmem:[#allocation23_spill] sm:$0xff] %v8607_v39  ;;  %v3881_v50 = vshll.u32 %v8591_v61, 16  ;;  %v7022_v63 = vld [vmem:[%s7121_s26 + $0xc0] sm:$0xff]   ;;  %v8632_v47 = vcombine.low %v3812_v4, %v3822_v60  ;;  %v4551_v2 = vrot.slane %v8531_v57, 5  ;;  %v9727_v25 = vcombine.low %v8343_v22, %v8357_v33  ;;  %v8648_v4 = vld [vmem:[%s7121_s26 + $0x5c] sm:$0x1] }
 0x112   : > { %v8619_v38 = vadd.f32 %v6516_v31, %v8275_v12  ;;  %v8630_v44 = vpop.f32.mrf.mxu0  ;;  %v8645_v5 = vcombine.low %v3836_v19, %v3846_v7  ;;  %v3874_v30 = vrot.slane %v3872_v10, 4  ;;  %v3877_v60 = vrot.slane %v3875_v43, 5  ;;  %v5928_v33 = vld [vmem:[%s7121_s26 + $0x60] sm:$0xf]  ;;  %v8858_v42 = vld [vmem:[%s7121_s26 + $0x8c] sm:$0x1] }
 0x113   : > { %v1312_v8 = vpop.f32.mrf.mxu1  ;;  %9726 = vst [vmem:[#allocation24_spill] sm:$0xff] %v8630_v44  ;;  %v6018_v57 = vrot.slane %v8622_v28, 9  ;;  %v4554_v31 = vrot.slane %v8553_v17, 5  ;;  %v8655_v22 = vrot.slane %v3881_v50, 5  ;;  %v3860_v7 = vsel %vm7622_vm5, %v8612_v6, %v8564_v41  ;;  %v8671_v17 = vld [vmem:[%s7121_s26 + $0x64] sm:$0xf] }
 0x114   : > { %6730 = vmatmul.mubr.bf16.gmra.mxu1 %v9725_v27  ;;  %v8643_v14 = vadd.f32 %v1312_v8, %v8311_v59  ;;  %v8651_v21 = vpop.f32.mrf.mxu0  ;;  %v3885_v59 = vshrl.u32 %v8591_v61, 16  ;;  %v3870_v28 = vsel %vm7622_vm5, %v8614_v13, %v8616_v20  ;;  %v3878_v10 = vor.u32 %v3877_v60, %v3874_v30 }
 0x115   : > { %6733 = vmatprep.mubr.bf16.mxu1 %v9727_v25  ;;  %v6519_v15 = vpop.f32.mrf.mxu1  ;;  %9728 = vst [vmem:[#allocation25_spill] sm:$0xff] %v8651_v21  ;;  %v3891_v8 = vshll.u32 %v8648_v4, 16  ;;  %v4558_v25 = vrot.slane %v8591_v61, 5  ;;  %v6019_v6 = vrot.slane %v6003_v26, 9  ;;  %v3896_v13 = vshrl.u32 %v5928_v33, 16 }
 0x116   : > { %v8660_v19 = vadd.f32 %v6519_v15, %v8331_v45  ;;  %v8673_v50 = vpop.f32.mrf.mxu0  ;;  %v4553_v45 = vrot.slane %v4551_v2, 4  ;;  %v3887_v27 = vrot.slane %v3885_v59, 4  ;;  %v3899_v20 = vshll.u32 %v5928_v33, 16 }
 0x117   : > { %v1325_v43 = vpop.f32.mrf.mxu1  ;;  %9729 = vst [vmem:[#allocation26_spill] sm:$0xff] %v8673_v50  ;;  %v8682_v60 = vrot.slane %v3878_v10, 4  ;;  %v4561_v59 = vrot.slane %v8648_v4, 5  ;;  %v3905_v61 = vshll.u32 %v8671_v17, 16  ;;  %v3898_v26 = vrot.slane %v3896_v13, 4  ;;  %v7023_v10 = vld [vmem:[%s7121_s26 + $0xcc] sm:$0xff]  }
 0x118   : > { %6778 = vmatmul.mubr.bf16.gmra.mxu0 %v7019_v40  ;;  %v8678_v41 = vadd.f32 %v1325_v43, %v8351_v62  ;;  %v8680_v40 = vpop.f32.mrf.mxu0  ;;  %v3888_v15 = vor.u32 %v3887_v27, %v8655_v22  ;;  %v3901_v33 = vrot.slane %v3899_v20, 5  ;;  %v9731_v43 = vcombine.low %v8401_v29, %v8408_v58 }
 0x119   : > { %6781 = vmatprep.mubr.bf16.mxu0 %v7022_v63  ;;  %v6520_v30 = vpop.f32.mrf.mxu1  ;;  %9730 = vst [vmem:[#allocation27_spill] sm:$0xff] %v8680_v40  ;;  %v4560_v63 = vrot.slane %v4558_v25, 4  ;;  %v3893_v40 = vrot.slane %v3891_v8, 5  ;;  %v8699_v44 = vrot.slane %v3905_v61, 5  ;;  %v8708_v29 = vsel %vm7133_vm2, %v6018_v57, %v4551_v2 }
 0x11a   : > { %v8691_v62 = vadd.f32 %v6520_v30, %v8371_v18  ;;  %v8697_v27 = vpop.f32.mrf.mxu0  ;;  %v3889_v4 = vrot.slane %v3888_v15, 4  ;;  %v3909_v18 = vshrl.u32 %v8671_v17, 16  ;;  %v3902_v58 = vor.u32 %v3901_v33, %v3898_v26  ;;  %v6004_v30 = vld [vmem:[%s7121_s26 + $0x60] sm:$0xe] }
 0x11b   : > { %v1328_v12 = vpop.f32.mrf.mxu1  ;;  %9732 = vst [vmem:[#allocation28_spill] sm:$0xff] %v8697_v27  ;;  %v3915_v20 = vshll.u32 %v8687_v34, 16  ;;  %v8712_v15 = vcombine.low %v3860_v7, %v3870_v28  ;;  %v8716_v8 = vsel %vm7133_vm2, %v4553_v45, %v4554_v31  ;;  %v3884_v57 = vsel %vm7622_vm5, %v8682_v60, %v8655_v22  ;;  %v8738_v28 = vld [vmem:[%s7121_s26 + $0x70] sm:$0xf] }
 0x11c   : > { %6734 = vmatmul.mubr.bf16.gmra.mxu1 %v9731_v43  ;;  %v8704_v13 = vadd.f32 %v1328_v12, %v8393_v48  ;;  %v3911_v48 = vrot.slane %v3909_v18, 4  ;;  %v4565_v12 = vrot.slane %v8671_v17, 5  ;;  %v5931_v43 = vld [vmem:[%s7121_s26 + $0x6c] sm:$0xf]  ;;  %v8731_v31 = vsel %vm7133_vm2, %v6019_v6, %v4558_v25 }
 0x11d   : > { %6801 = vmatprep.mubr.bf16.mxu1 %v8475_v49  ;;  %v6523_v61 = vpop.f32.mrf.mxu1  ;;  %v8718_v49 = vpop.f32.mrf.mxu0  ;;  %v8735_v7 = vsel %vm7133_vm2, %v4560_v63, %v4561_v59  ;;  %v3903_v26 = vrot.slane %v3902_v58, 4  ;;  %v6020_v60 = vrot.slane %v6004_v30, 9  ;;  %v9735_v25 = vcombine.low %v8412_v16, %v8416_v55  ;;  %v8752_v63 = vld [vmem:[%s7121_s26 + $0x74] sm:$0x1] }
 0x11e   : > { %9733 = vst [vmem:[#allocation29_spill] sm:$0xff] %v8718_v49  ;;  %v8723_v2 = vadd.f32 %v6523_v61, %v8423_v52  ;;  %v3894_v52 = vsel %vm7622_vm5, %v3889_v4, %v3893_v40  ;;  %v3912_v22 = vor.u32 %v3911_v48, %v8699_v44  ;;  %v3917_v59 = vrot.slane %v3915_v20, 5 }
 0x11f   : > { %v1341_v17 = vpop.f32.mrf.mxu1  ;;  %v8742_v45 = vpop.f32.mrf.mxu0  ;;  %v3920_v33 = vshrl.u32 %v5931_v43, 16  ;;  %v4567_v18 = vrot.slane %v4565_v12, 4  ;;  %v4568_v58 = vrot.slane %v8687_v34, 5  ;;  %v3929_v30 = vshll.u32 %v8738_v28, 16 }
 0x120   : > { %6782 = vmatmul.mubr.bf16.gmra.mxu0 %v7023_v10  ;;  %9734 = vst [vmem:[#allocation30_spill] sm:$0xff] %v8742_v45  ;;  %v8749_v6 = vadd.f32 %v1341_v17, %v8440_v0  ;;  %v3923_v10 = vshll.u32 %v5931_v43, 16  ;;  %v3933_v16 = vshrl.u32 %v8738_v28, 16  ;;  %v3913_v0 = vrot.slane %v3912_v22, 4  ;;  %v5934_v45 = vld [vmem:[%s7121_s26 + $0x78] sm:$0xf] }
 0x121   : > { %6849 = vmatprep.mubr.bf16.mxu0 %v9735_v25  ;;  %v6524_v40 = vpop.f32.mrf.mxu1  ;;  %v8754_v4 = vpop.f32.mrf.mxu0  ;;  %v3922_v20 = vrot.slane %v3920_v33, 4  ;;  %v8767_v34 = vrot.slane %v3929_v30, 5  ;;  %v3939_v39 = vshll.u32 %v8752_v63, 16  ;;  %v8787_v30 = vsel %vm7133_vm2, %v6020_v60, %v4565_v12 }
 0x122   : > { %v8760_v55 = vadd.f32 %v6524_v40, %v8451_v23  ;;  %v3925_v61 = vrot.slane %v3923_v10, 5  ;;  %v3935_v25 = vrot.slane %v3933_v16, 4  ;;  %v8772_v23 = vcombine.low %v3884_v57, %v3894_v52  ;;  %v8780_v10 = vld [vmem:[%s7121_s26 + $0x7c] sm:$0xf] }
 0x123   : > { %v1344_v43 = vpop.f32.mrf.mxu1  ;;  %v8765_v17 = vpop.f32.mrf.mxu0  ;;  %v3908_v40 = vsel %vm7622_vm5, %v3903_v26, %v8699_v44  ;;  %v3918_v16 = vsel %vm7622_vm5, %v3913_v0, %v3917_v59  ;;  %v3944_v44 = vshrl.u32 %v5934_v45, 16  ;;  %v3947_v26 = vshll.u32 %v5934_v45, 16  ;;  %v9738_v0 = vld [vmem:[#allocation15_spill] sm:$0xff] }
 0x124   : > { %6802 = vmatmul.mubr.bf16.vlgmr.msra.gmra.mxu1 %v8519_v3  ;;  %v8777_v3 = vadd.f32 %v1344_v43, %v8471_v9  ;;  %v3926_v33 = vor.u32 %v3925_v61, %v3922_v20  ;;  %v3936_v9 = vor.u32 %v3935_v25, %v8767_v34  ;;  %v9736_v12 = vcombine.low %v8479_v51, %v8483_v53  ;;  %v8818_v53 = vld [vmem:[%s7121_s26 + $0x80] sm:$0x1] }
 0x125   : > { %6805 = vmatprep.mubr.bf16.mxu1 %v8632_v47  ;;  %v8791_v47 = vsel %vm7133_vm2, %v4567_v18, %v4568_v58  ;;  %v6527_v57 = vpop.f32.mrf.mxu1  ;;  %v8793_v52 = vpop.f32.mrf.mxu0  ;;  %v3941_v18 = vrot.slane %v3939_v39, 5  ;;  %v6005_v58 = vld [vmem:[%s7121_s26 + $0x6c] sm:$0xe]  ;;  %v4572_v61 = vrot.slane %v8738_v28, 5  ;;  %v3953_v59 = vshll.u32 %v8780_v10, 16 }
 0x126   : > { %v8799_v20 = vadd.f32 %v6527_v57, %v8501_v56  ;;  %v8804_v60 = vrot.slane %v3926_v33, 4  ;;  %v9737_v56 = vcombine.low %v8575_v36, %v8586_v35  ;;  %v3937_v45 = vrot.slane %v3936_v9, 4  ;;  %v5937_v35 = vld [vmem:[%s7121_s26 + $0x84] sm:$0xf] }
 0x127   : > { %v1357_v43 = vpop.f32.mrf.mxu1  ;;  %v8808_v25 = vpop.f32.mrf.mxu0  ;;  %v3946_v39 = vrot.slane %v3944_v44, 4  ;;  %v3949_v33 = vrot.slane %v3947_v26, 5  ;;  %v8820_v28 = vcombine.low %v3908_v40, %v3918_v16  ;;  %v8826_v48 = vrot.slane %v3953_v59, 5  ;;  %v6006_v16 = vld [vmem:[%s7121_s26 + $0x78] sm:$0xe] }
 0x128   : > { %6850 = vmatmul.mubr.bf16.vlgmr.msra.gmra.mxu0 %v9736_v12  ;;  %v8815_v51 = vadd.f32 %v1357_v43, %v9738_v0  ;;  %v3957_v36 = vshrl.u32 %v8780_v10, 16  ;;  %v6021_v9 = vrot.slane %v6005_v58, 9  ;;  %v4575_v43 = vrot.slane %v8752_v63, 5 }
 0x129   : > { %6853 = vmatprep.mubr.bf16.mxu0 %v9737_v56  ;;  %v6528_v12 = vpop.f32.mrf.mxu1  ;;  %v8824_v22 = vpop.f32.mrf.mxu0  ;;  %v9739_v56 = vld [vmem:[#allocation17_spill] sm:$0xff]  ;;  %v3950_v40 = vor.u32 %v3949_v33, %v3946_v39  ;;  %v4574_v26 = vrot.slane %v4572_v61, 4  ;;  %v3963_v49 = vshll.u32 %v8818_v53, 16  ;;  %v4579_v58 = vrot.slane %v8780_v10, 5  ;;  %v9740_v39 = vld [vmem:[#allocation19_spill] sm:$0xff] }
 0x12a   : > { %v8832_v44 = vadd.f32 %v6528_v12, %v9739_v56  ;;  %v3959_v59 = vrot.slane %v3957_v36, 4  ;;  %v3932_v63 = vsel %vm7622_vm5, %v8804_v60, %v8767_v34  ;;  %v8851_v12 = vld [vmem:[%s7121_s26 + $0x88] sm:$0xf]  ;;  %v3968_v36 = vshrl.u32 %v5937_v35, 16 }
 0x12b   : > { %v1360_v0 = vpop.f32.mrf.mxu1  ;;  %v8836_v57 = vpop.f32.mrf.mxu0  ;;  %v3951_v56 = vrot.slane %v3950_v40, 4  ;;  %v6022_v10 = vrot.slane %v6006_v16, 9  ;;  %v4581_v34 = vrot.slane %v4579_v58, 4  ;;  %v9742_v60 = vld [vmem:[#allocation3_spill] sm:$0xff]  ;;  %v9743_v40 = vcombine.low %v8601_v54, %v8605_v11 }
 0x12c   : > { %6806 = vmatmul.mubr.bf16.gmra.mxu1 %v8645_v5  ;;  %v3942_v5 = vsel %vm7622_vm5, %v3937_v45, %v3941_v18  ;;  %v8848_v33 = vadd.f32 %v1360_v0, %v9740_v39  ;;  %v3960_v27 = vor.u32 %v3959_v59, %v8826_v48  ;;  %v3970_v45 = vrot.slane %v3968_v36, 4 }
 0x12d   : > { %6809 = vmatprep.mubr.bf16.mxu1 %v8712_v15  ;;  %v4582_v15 = vrot.slane %v8818_v53, 5  ;;  %v6531_v50 = vpop.f32.mrf.mxu1  ;;  %v8855_v21 = vpop.f32.mrf.mxu0  ;;  %v3971_v0 = vshll.u32 %v5937_v35, 16  ;;  %v3965_v16 = vrot.slane %v3963_v49, 5  ;;  %v3977_v53 = vshll.u32 %v8851_v12, 16  ;;  %v6007_v49 = vld [vmem:[%s7121_s26 + $0x84] sm:$0xe] }
 0x12e   : > { %9741 = vst [vmem:[#allocation15_spill] sm:$0xff] %v8855_v21  ;;  %v8861_v18 = vadd.f32 %v6531_v50, %v9742_v60  ;;  %v3961_v59 = vrot.slane %v3960_v27, 4  ;;  %v3981_v39 = vshrl.u32 %v8851_v12, 16  ;;  %v9745_v50 = vcombine.low %v8708_v29, %v8716_v8 }
 0x12f   : > { %v8868_v21 = vpop.f32.mrf.mxu1  ;;  %v8870_v46 = vpop.f32.mrf.mxu0  ;;  %v8877_v35 = vsel %vm7133_vm2, %v6021_v9, %v4572_v61  ;;  %v8881_v54 = vsel %vm7133_vm2, %v4574_v26, %v4575_v43  ;;  %v3973_v11 = vrot.slane %v3971_v0, 5  ;;  %v3987_v27 = vshll.u32 %v8858_v42, 16  ;;  %v5940_v61 = vld [vmem:[%s7121_s26 + $0x90] sm:$0xf] }
 0x130   : > { %6854 = vmatmul.mubr.bf16.gmra.mxu0 %v9743_v40  ;;  %9744 = vst [vmem:[#allocation17_spill] sm:$0xff] %v8870_v46  ;;  %v5981_v36 = vcombine.low %v3932_v63, %v3942_v5  ;;  %v8885_v60 = vrot.slane %v3977_v53, 5  ;;  %v3983_v40 = vrot.slane %v3981_v39, 4  ;;  %v4586_v29 = vrot.slane %v8851_v12, 5  ;;  %v8905_v5 = vld [vmem:[%s7121_s26 + $0x94] sm:$0xf] }
 0x131   : > { %6857 = vmatprep.mubr.bf16.mxu0 %v9745_v50  ;;  %v8888_v8 = vpop.f32.mrf.mxu1  ;;  %v8890_v50 = vpop.f32.mrf.mxu0  ;;  %v3956_v9 = vsel %vm7622_vm5, %v3951_v56, %v8826_v48  ;;  %v8898_v43 = vsel %vm7133_vm2, %v6022_v10, %v4579_v58  ;;  %v8902_v26 = vsel %vm7133_vm2, %v4581_v34, %v4582_v15  ;;  %v3974_v63 = vor.u32 %v3973_v11, %v3970_v45  ;;  %v9748_v34 = vld [vmem:[#allocation7_spill] sm:$0xff]  ;;  %v5943_v46 = vld [vmem:[%s7121_s26 + $0x9c] sm:$0xf] }
 0x132   : > { %9746 = vst [vmem:[#allocation19_spill] sm:$0xff] %v8890_v50  ;;  %v3966_v12 = vsel %vm7622_vm5, %v3961_v59, %v3965_v16  ;;  %v3984_v0 = vor.u32 %v3983_v40, %v8885_v60  ;;  %v8911_v48 = vrot.slane %v3987_v27, 5  ;;  %v6023_v56 = vrot.slane %v6007_v49, 9 }
 0x133   : > { %v1376_v53 = vpop.f32.mrf.mxu1  ;;  %v8913_v58 = vpop.f32.mrf.mxu0  ;;  %v4588_v10 = vrot.slane %v4586_v29, 4  ;;  %v4589_v15 = vrot.slane %v8858_v42, 5  ;;  %v3992_v59 = vshrl.u32 %v5940_v61, 16  ;;  %v3975_v16 = vrot.slane %v3974_v63, 4  ;;  %v6008_v63 = vld [vmem:[%s7121_s26 + $0x90] sm:$0xe] }
 0x134   : > { %6810 = vmatmul.mubr.bf16.gmra.mxu1 %v8772_v23  ;;  %9747 = vst [vmem:[#allocation3_spill] sm:$0xff] %v8913_v58  ;;  %v8918_v45 = vadd.f32 %v1376_v53, %v9748_v34  ;;  %v8921_v23 = vld [vmem:[%s7121_s26 + $0x98] sm:$0x1]  ;;  %v3985_v39 = vrot.slane %v3984_v0, 4  ;;  %v3995_v11 = vshll.u32 %v5940_v61, 16  ;;  %v4001_v27 = vshll.u32 %v8905_v5, 16 }
 0x135   : > { %6813 = vmatprep.mubr.bf16.mxu1 %v8820_v28  ;;  %v8924_v49 = vpop.f32.mrf.mxu1  ;;  %v8926_v40 = vpop.f32.mrf.mxu0  ;;  %v6053_v28 = vcombine.low %v8877_v35, %v8881_v54  ;;  %v6054_v42 = vcombine.low %v8898_v43, %v8902_v26  ;;  %v3994_v53 = vrot.slane %v3992_v59, 4  ;;  %v4005_v34 = vshrl.u32 %v8905_v5, 16 }
 0x136   : > { %9749 = vst [vmem:[#allocation7_spill] sm:$0xff] %v8926_v40  ;;  %v9750_v61 = vcombine.low %v8731_v31, %v8735_v7  ;;  %v5982_v0 = vcombine.low %v3956_v9, %v3966_v12  ;;  %v3997_v58 = vrot.slane %v3995_v11, 5  ;;  %v4003_v50 = vrot.slane %v4001_v27, 5  ;;  %v5944_v12 = vld [vmem:[%s7121_s26 + $0xa0] sm:$0xf] }
 0x137   : > { %v4011_v40 = vshll.u32 %v8921_v23, 16  ;;  %v8939_v35 = vpop.f32.mrf.mxu1  ;;  %v8941_v54 = vpop.f32.mrf.mxu0  ;;  %v9753_v43 = vcombine.low %v8787_v30, %v8791_v47  ;;  %v8948_v26 = vsel %vm7133_vm2, %v6023_v56, %v4586_v29  ;;  %v8952_v31 = vsel %vm7133_vm2, %v4588_v10, %v4589_v15  ;;  %v5945_v56 = vld [vmem:[%s7121_s26 + $0xa4] sm:$0x1] }
 0x138   : > { %6858 = vmatmul.mubr.bf16.gmra.mxu0 %v9750_v61  ;;  %9751 = vst [vmem:[#allocation31_spill] sm:$0xff] %v8939_v35  ;;  %9752 = vst [vmem:[#allocation32_spill] sm:$0xff] %v8941_v54  ;;  %v4007_v7 = vrot.slane %v4005_v34, 4  ;;  %v4593_v9 = vrot.slane %v8905_v5, 5  ;;  %v3980_v59 = vsel %vm7622_vm5, %v3975_v16, %v8885_v60  ;;  %v3990_v30 = vsel %vm7622_vm5, %v3985_v39, %v8911_v48  ;;  %v6009_v54 = vld [vmem:[%s7121_s26 + $0x9c] sm:$0xe] }
 0x139   : > { %6861 = vmatprep.mubr.bf16.mxu0 %v9753_v43  ;;  %v3998_v47 = vor.u32 %v3997_v58, %v3994_v53  ;;  %v6024_v29 = vrot.slane %v6008_v63, 9  ;;  %v8963_v11 = vpop.f32.mrf.mxu1  ;;  %v8965_v10 = vpop.f32.mrf.mxu0  ;;  %v4013_v27 = vrot.slane %v4011_v40, 5  ;;  %v4596_v5 = vrot.slane %v8921_v23, 5 }
 0x13a   : > { %9754 = vst [vmem:[#allocation33_spill] sm:$0xff] %v8965_v10  ;;  %v4008_v15 = vor.u32 %v4007_v7, %v4003_v50  ;;  %v4016_v34 = vshrl.u32 %v5943_v46, 16  ;;  %v4019_v60 = vshll.u32 %v5943_v46, 16  ;;  %v4025_v16 = vshll.u32 %v5944_v12, 16  ;;  %v5946_v10 = vld [vmem:[%s7121_s26 + $0xa8] sm:$0xf] }
 0x13b   : > { %v3999_v61 = vrot.slane %v3998_v47, 4  ;;  %v4029_v43 = vshrl.u32 %v5944_v12, 16  ;;  %v8969_v35 = vpop.f32.mrf.mxu1  ;;  %v8971_v48 = vpop.f32.mrf.mxu0  ;;  %v4595_v39 = vrot.slane %v4593_v9, 4  ;;  %v4035_v63 = vshll.u32 %v5945_v56, 16 }
 0x13c   : > { %6814 = vmatmul.mubr.bf16.gmra.mxu1 %v5981_v36  ;;  %9755 = vst [vmem:[#allocation34_spill] sm:$0xff] %v8969_v35  ;;  %9756 = vst [vmem:[#allocation35_spill] sm:$0xff] %v8971_v48  ;;  %v4009_v58 = vrot.slane %v4008_v15, 4  ;;  %v4018_v53 = vrot.slane %v4016_v34, 4  ;;  %v6055_v23 = vcombine.low %v8948_v26, %v8952_v31  ;;  %v4021_v36 = vrot.slane %v4019_v60, 5 }
 0x13d   : > { %6817 = vmatprep.mubr.bf16.mxu1 %v5982_v0  ;;  %v4004_v46 = vsel %vm7622_vm5, %v3999_v61, %v4003_v50  ;;  %v4027_v40 = vrot.slane %v4025_v16, 5  ;;  %v8977_v7 = vpop.f32.mrf.mxu1  ;;  %v8979_v47 = vpop.f32.mrf.mxu0  ;;  %v5983_v48 = vcombine.low %v3980_v59, %v3990_v30  ;;  %v4031_v15 = vrot.slane %v4029_v43, 4  ;;  %v5947_v60 = vld [vmem:[%s7121_s26 + $0xac] sm:$0xf] }
 0x13e   : > { %9757 = vst [vmem:[#allocation36_spill] sm:$0xff] %v8977_v7  ;;  %9758 = vst [vmem:[#allocation37_spill] sm:$0xff] %v8979_v47  ;;  %v4014_v0 = vsel %vm7622_vm5, %v4009_v58, %v4013_v27  ;;  %v6025_v34 = vrot.slane %v6009_v54, 9  ;;  %v4594_v26 = vsel %vm7133_vm2, %v6024_v29, %v4593_v9  ;;  %v4022_v31 = vor.u32 %v4021_v36, %v4018_v53 }
 0x13f   : > { %v4600_v50 = vrot.slane %v5944_v12, 5  ;;  %v4603_v61 = vrot.slane %v5945_v56, 5  ;;  %v8987_v16 = vpop.f32.mrf.mxu1  ;;  %v8989_v7 = vpop.f32.mrf.mxu0  ;;  %v5984_v59 = vcombine.low %v4004_v46, %v4014_v0  ;;  %v4597_v30 = vsel %vm7133_vm2, %v4595_v39, %v4596_v5  ;;  %v6010_v39 = vld [vmem:[%s7121_s26 + $0xa8] sm:$0xe] }
 0x140   : > { %6862 = vmatmul.mubr.bf16.gmra.mxu0 %v6053_v28  ;;  %9759 = vst [vmem:[#allocation38_spill] sm:$0xff] %v8987_v16  ;;  %9760 = vst [vmem:[#allocation39_spill] sm:$0xff] %v8989_v7  ;;  %v4032_v54 = vor.u32 %v4031_v15, %v4027_v40  ;;  %v4037_v27 = vrot.slane %v4035_v63, 5  ;;  %v5948_v28 = vld [vmem:[%s7121_s26 + $0xb0] sm:$0x1]  ;;  %v4023_v43 = vrot.slane %v4022_v31, 4 }
 0x141   : > { %6865 = vmatprep.mubr.bf16.mxu0 %v6054_v42  ;;  %v8996_v9 = vsel %vm7133_vm2, %v6025_v34, %v4600_v50  ;;  %v4602_v12 = vrot.slane %v4600_v50, 4  ;;  %v4040_v29 = vshrl.u32 %v5946_v10, 16  ;;  %v8998_v56 = vpop.f32.mrf.mxu1  ;;  %v9000_v58 = vpop.f32.mrf.mxu0  ;;  %v4043_v53 = vshll.u32 %v5946_v10, 16 }
 0x142   : > { %9761 = vst [vmem:[#allocation40_spill] sm:$0xff] %v8998_v56  ;;  %9762 = vst [vmem:[#allocation41_spill] sm:$0xff] %v9000_v58  ;;  %v4033_v42 = vrot.slane %v4032_v54, 4  ;;  %v4049_v46 = vshll.u32 %v5947_v60, 16  ;;  %v4053_v5 = vshrl.u32 %v5947_v60, 16  ;;  %v4028_v63 = vsel %vm7622_vm5, %v4023_v43, %v4027_v40 }
 0x143   : > { %v9007_v36 = vsel %vm7133_vm2, %v4602_v12, %v4603_v61  ;;  %v4042_v0 = vrot.slane %v4040_v29, 4  ;;  %v4059_v15 = vshll.u32 %v5948_v28, 16  ;;  %v9009_v34 = vpop.f32.mrf.mxu1  ;;  %v9011_v31 = vpop.f32.mrf.mxu0  ;;  %v6056_v10 = vcombine.low %v4594_v26, %v4597_v30  ;;  %v5949_v58 = vld [vmem:[%s7121_s26 + $0xb4] sm:$0xf]  ;;  %v5950_v40 = vld [vmem:[%s7121_s26 + $0xb8] sm:$0xf] }
 0x144   : > { %6818 = vmatmul.mubr.bf16.gmra.mxu1 %v5983_v48  ;;  %9763 = vst [vmem:[#allocation42_spill] sm:$0xff] %v9009_v34  ;;  %9764 = vst [vmem:[#allocation43_spill] sm:$0xff] %v9011_v31  ;;  %v4038_v50 = vsel %vm7622_vm5, %v4033_v42, %v4037_v27  ;;  %v4045_v54 = vrot.slane %v4043_v53, 5  ;;  %v4051_v48 = vrot.slane %v4049_v46, 5  ;;  %v6057_v61 = vcombine.low %v8996_v9, %v9007_v36  ;;  %v5951_v53 = vld [vmem:[%s7121_s26 + $0xbc] sm:$0x1] }
 0x145   : > { %6821 = vmatprep.mubr.bf16.mxu1 %v5984_v59  ;;  %v5985_v43 = vcombine.low %v4028_v63, %v4038_v50  ;;  %v4055_v12 = vrot.slane %v4053_v5, 4  ;;  %v6026_v29 = vrot.slane %v6010_v39, 9  ;;  %v9019_v7 = vpop.f32.mrf.mxu1  ;;  %v9021_v47 = vpop.f32.mrf.mxu0  ;;  %v4061_v26 = vrot.slane %v4059_v15, 5  ;;  %v6011_v15 = vld [vmem:[%s7121_s26 + $0xb4] sm:$0xe] }
 0x146   : > { %9765 = vst [vmem:[#allocation44_spill] sm:$0xff] %v9019_v7  ;;  %9766 = vst [vmem:[#allocation45_spill] sm:$0xff] %v9021_v47  ;;  %v4046_v59 = vor.u32 %v4045_v54, %v4042_v0  ;;  %v4607_v30 = vrot.slane %v5947_v60, 5  ;;  %v4610_v27 = vrot.slane %v5948_v28, 5  ;;  %v4064_v46 = vshrl.u32 %v5949_v58, 16 }
 0x147   : > { %v4056_v42 = vor.u32 %v4055_v12, %v4051_v48  ;;  %v4067_v31 = vshll.u32 %v5949_v58, 16  ;;  %v4073_v63 = vshll.u32 %v5950_v40, 16  ;;  %v9024_v50 = vpop.f32.mrf.mxu1  ;;  %v9026_v9 = vpop.f32.mrf.mxu0  ;;  %v4077_v0 = vshrl.u32 %v5950_v40, 16 }
 0x148   : > { %6866 = vmatmul.mubr.bf16.gmra.mxu0 %v6055_v23  ;;  %9767 = vst [vmem:[#allocation46_spill] sm:$0xff] %v9024_v50  ;;  %9768 = vst [vmem:[#allocation47_spill] sm:$0xff] %v9026_v9  ;;  %v4047_v5 = vrot.slane %v4046_v59, 4  ;;  %v4608_v39 = vsel %vm7133_vm2, %v6026_v29, %v4607_v30  ;;  %v4609_v36 = vrot.slane %v4607_v30, 4  ;;  %v4066_v28 = vrot.slane %v4064_v46, 4 }
 0x149   : > { %6869 = vmatprep.mubr.bf16.mxu0 %v6056_v10  ;;  %v4057_v60 = vrot.slane %v4056_v42, 4  ;;  %v4069_v23 = vrot.slane %v4067_v31, 5  ;;  %v4075_v54 = vrot.slane %v4073_v63, 5  ;;  %v9031_v12 = vpop.f32.mrf.mxu1  ;;  %v9033_v58 = vpop.f32.mrf.mxu0  ;;  %v4079_v29 = vrot.slane %v4077_v0, 4  ;;  %v5952_v50 = vld [vmem:[%s7121_s26 + $0xc0] sm:$0xf] }
 0x14a   : > { %9769 = vst [vmem:[#allocation48_spill] sm:$0xff] %v9031_v12  ;;  %9770 = vst [vmem:[#allocation49_spill] sm:$0xff] %v9033_v58  ;;  %v4052_v9 = vsel %vm7622_vm5, %v4047_v5, %v4051_v48  ;;  %v4611_v10 = vsel %vm7133_vm2, %v4609_v36, %v4610_v27  ;;  %v4083_v59 = vshll.u32 %v5951_v53, 16  ;;  %v6027_v46 = vrot.slane %v6011_v15, 9  ;;  %v5953_v27 = vld [vmem:[%s7121_s26 + $0xc4] sm:$0xf] }
 0x14b   : > { %v4062_v31 = vsel %vm7622_vm5, %v4057_v60, %v4061_v26  ;;  %v6058_v30 = vcombine.low %v4608_v39, %v4611_v10  ;;  %v4070_v42 = vor.u32 %v4069_v23, %v4066_v28  ;;  %v9041_v63 = vpop.f32.mrf.mxu1  ;;  %v9043_v58 = vpop.f32.mrf.mxu0  ;;  %v4080_v48 = vor.u32 %v4079_v29, %v4075_v54  ;;  %v6012_v23 = vld [vmem:[%s7121_s26 + $0xc0] sm:$0xe] }
 0x14c   : > { %6822 = vmatmul.mubr.bf16.gmra.mxu1 %v5985_v43  ;;  %9771 = vst [vmem:[#allocation50_spill] sm:$0xff] %v9041_v63  ;;  %9772 = vst [vmem:[#allocation51_spill] sm:$0xff] %v9043_v58  ;;  %v5986_v47 = vcombine.low %v4052_v9, %v4062_v31  ;;  %v4085_v5 = vrot.slane %v4083_v59, 5  ;;  %v4614_v12 = vrot.slane %v5950_v40, 5  ;;  %v4617_v0 = vrot.slane %v5951_v53, 5 }
 0x14d   : > { %v4071_v36 = vrot.slane %v4070_v42, 4  ;;  %v5954_v43 = vld [vmem:[%s7121_s26 + $0xc8] sm:$0x1]  ;;  %v9048_v7 = vpop.f32.mrf.mxu1  ;;  %v9050_v26 = vpop.f32.mrf.mxu0  ;;  %v4081_v39 = vrot.slane %v4080_v48, 4  ;;  %v4088_v9 = vshrl.u32 %v5952_v50, 16  ;;  %v4091_v28 = vshll.u32 %v5952_v50, 16 }
 0x14e   : > { %9773 = vst [vmem:[#allocation52_spill] sm:$0xff] %v9048_v7  ;;  %6825 = vmatprep.mubr.bf16.mxu1 %v5986_v47  ;;  %v4615_v15 = vsel %vm7133_vm2, %v6027_v46, %v4614_v12  ;;  %v4616_v60 = vrot.slane %v4614_v12, 4  ;;  %v4097_v53 = vshll.u32 %v5953_v27, 16  ;;  %v4101_v12 = vshrl.u32 %v5953_v27, 16  ;;  %v5955_v46 = vld [vmem:[%s7121_s26 + $0xcc] sm:$0xf] }
 0x14f   : > { %v4076_v40 = vsel %vm7622_vm5, %v4071_v36, %v4075_v54  ;;  %v9057_v10 = vpop.f32.mrf.mxu1  ;;  %v9059_v29 = vpop.f32.mrf.mxu0  ;;  %v4086_v47 = vsel %vm7622_vm5, %v4081_v39, %v4085_v5  ;;  %v4107_v59 = vshll.u32 %v5954_v43, 16  ;;  %v4090_v54 = vrot.slane %v4088_v9, 4  ;;  %v5956_v50 = vld [vmem:[%s7121_s26 + $0xd0] sm:$0xf] }
 0x150   : > { %6870 = vmatmul.mubr.bf16.gmra.mxu0 %v6057_v61  ;;  %9774 = vst [vmem:[#allocation53_spill] sm:$0xff] %v9057_v10  ;;  %v4618_v61 = vsel %vm7133_vm2, %v4616_v60, %v4617_v0  ;;  %v5987_v31 = vcombine.low %v4076_v40, %v4086_v47  ;;  %v4093_v42 = vrot.slane %v4091_v28, 5  ;;  %v4103_v10 = vrot.slane %v4101_v12, 4  ;;  %v5957_v47 = vld [vmem:[%s7121_s26 + $0xd4] sm:$0x1] }
 0x151   : > { %6873 = vmatprep.mubr.bf16.mxu0 %v6058_v30  ;;  %v9067_v48 = vpop.f32.mrf.mxu1  ;;  %v9069_v36 = vpop.f32.mrf.mxu0  ;;  %v6059_v58 = vcombine.low %v4615_v15, %v4618_v61  ;;  %v4099_v30 = vrot.slane %v4097_v53, 5  ;;  %v6028_v63 = vrot.slane %v6012_v23, 9  ;;  %v4109_v0 = vrot.slane %v4107_v59, 5  ;;  %v6013_v61 = vld [vmem:[%s7121_s26 + $0xcc] sm:$0xe] }
 0x152   : > { %9775 = vst [vmem:[#allocation54_spill] sm:$0xff] %v9067_v48  ;;  %v4094_v5 = vor.u32 %v4093_v42, %v4090_v54  ;;  %v4621_v39 = vrot.slane %v5953_v27, 5  ;;  %v4624_v60 = vrot.slane %v5954_v43, 5  ;;  %v4112_v7 = vshrl.u32 %v5955_v46, 16 }
 0x153   : > { %v9071_v40 = vpop.f32.mrf.mxu1  ;;  %v2662_v9 = vpop.f32.mrf.mxu0  ;;  %v4104_v28 = vor.u32 %v4103_v10, %v4099_v30  ;;  %v4115_v34 = vshll.u32 %v5955_v46, 16  ;;  %v4121_v48 = vshll.u32 %v5956_v50, 16  ;;  %v4125_v23 = vshrl.u32 %v5956_v50, 16 }
 0x154   : > { %6826 = vmatmul.mubr.bf16.gmra.mxu1 %v5987_v31  ;;  %9776 = vst [vmem:[#allocation55_spill] sm:$0xff] %v9071_v40  ;;  %v4095_v56 = vrot.slane %v4094_v5, 4  ;;  %v4622_v15 = vsel %vm7133_vm2, %v6028_v63, %v4621_v39  ;;  %v4623_v53 = vrot.slane %v4621_v39, 4  ;;  %v4114_v43 = vrot.slane %v4112_v7, 4 }
 0x155   : > { %v9077_v12 = vpop.f32.mrf.mxu1  ;;  %v6663_v59 = vpop.f32.mrf.mxu0  ;;  %v4105_v27 = vrot.slane %v4104_v28, 4  ;;  %v4117_v31 = vrot.slane %v4115_v34, 5  ;;  %v4123_v54 = vrot.slane %v4121_v48, 5  ;;  %v4127_v46 = vrot.slane %v4125_v23, 4 }
 0x156   : > { %9777 = vst [vmem:[#allocation56_spill] sm:$0xff] %v9077_v12  ;;  %v4100_v10 = vsel %vm7622_vm5, %v4095_v56, %v4099_v30  ;;  %v4625_v42 = vsel %vm7133_vm2, %v4623_v53, %v4624_v60  ;;  %v4131_v5 = vshll.u32 %v5957_v47, 16  ;;  %v6029_v7 = vrot.slane %v6013_v61, 9 }
 0x157   : > { %v9083_v63 = vpop.f32.mrf.mxu1  ;;  %v2675_v39 = vpop.f32.mrf.mxu0  ;;  %v4110_v40 = vsel %vm7622_vm5, %v4105_v27, %v4109_v0  ;;  %v6060_v12 = vcombine.low %v4622_v15, %v4625_v42  ;;  %v4118_v28 = vor.u32 %v4117_v31, %v4114_v43  ;;  %v4128_v48 = vor.u32 %v4127_v46, %v4123_v54 }
 0x158   : > { %6874 = vmatmul.mubr.bf16.gmra.mxu0 %v6059_v58  ;;  %9778 = vst [vmem:[#allocation57_spill] sm:$0xff] %v9083_v63  ;;  %v5988_v34 = vcombine.low %v4100_v10, %v4110_v40  ;;  %v4133_v58 = vrot.slane %v4131_v5, 5  ;;  %v4628_v16 = vrot.slane %v5956_v50, 5  ;;  %v4631_v60 = vrot.slane %v5957_v47, 5 }
 0x159   : > { %v9087_v35 = vpop.f32.mrf.mxu1  ;;  %v6664_v56 = vpop.f32.mrf.mxu0  ;;  %6877 = vmatprep.mubr.bf16.mxu0 %v6060_v12  ;;  %v4119_v30 = vrot.slane %v4118_v28, 4  ;;  %v4129_v53 = vrot.slane %v4128_v48, 4  ;;  %v9097_v50 = vadd.f32 %v9050_v26, %v8567_v37  ;;  %v9105_v12 = vadd.f32 %v9059_v29, %v8594_v24 }
 0x15a   : > { %9779 = vst [vmem:[#allocation58_spill] sm:$0xff] %v9087_v35  ;;  %6829 = vmatprep.mubr.bf16.mxu1 %v5988_v34  ;;  %v4629_v23 = vsel %vm7133_vm2, %v6029_v7, %v4628_v16  ;;  %v4630_v63 = vrot.slane %v4628_v16, 4  ;;  %v9114_v37 = vadd.f32 %v2662_v9, %v8643_v14  ;;  %v9117_v32 = vadd.f32 %v6663_v59, %v8660_v19  ;;  %v9813_v35 = vld [vmem:[#allocation21_spill] sm:$0xff] }
 0x15b   : > { %v9091_v0 = vpop.f32.mrf.mxu1  ;;  %v2678_v15 = vpop.f32.mrf.mxu0  ;;  %v4124_v40 = vsel %vm7622_vm5, %v4119_v30, %v4123_v54  ;;  %v4134_v61 = vsel %vm7622_vm5, %v4129_v53, %v4133_v58  ;;  %v9111_v54 = vadd.f32 %v9069_v36, %v8619_v38  ;;  %v9122_v24 = vadd.f32 %v2675_v39, %v8678_v41 }
 0x15c   : > { %v4632_v47 = vsel %vm7133_vm2, %v4630_v63, %v4631_v60  ;;  %v5989_v43 = vcombine.low %v4124_v40, %v4134_v61  ;;  %9781 = vst [vmem:[#allocation60_spill] sm:$0xff] %v9114_v37  ;;  %v9125_v29 = vadd.f32 %v6664_v56, %v8691_v62  ;;  %v9128_v38 = vadd.f32 %v2678_v15, %v8704_v13  ;;  %v9783_v56 = vld [vmem:[#allocation5_spill] sm:$0xff] }
 0x15d   : > { %v9107_v16 = vpop.f32.mrf.mxu1  ;;  %v6667_v27 = vpop.f32.mrf.mxu0  ;;  %v6061_v31 = vcombine.low %v4629_v23, %v4632_v47  ;;  %9780 = vst [vmem:[#allocation59_spill] sm:$0xff] %v9111_v54  ;;  %v9814_v54 = vld [vmem:[#allocation52_spill] sm:$0xff] }
 0x15e   : > { %6830 = vmatmul.mubr.bf16.gmra.mxu1 %v5989_v43  ;;  %9782 = vst [vmem:[#allocation61_spill] sm:$0xff] %v9125_v29  ;;  %v9131_v14 = vadd.f32 %v6667_v27, %v8723_v2  ;;  %v9808_v29 = vld [vmem:[#allocation46_spill] sm:$0xff] }
 0x15f   : > { %v9119_v1 = vpop.f32.mrf.mxu1  ;;  %v2691_v26 = vpop.f32.mrf.mxu0 }
 0x160   : > { %6878 = vmatmul.mubr.bf16.gmra.mxu0 %v6061_v31  ;;  %v9134_v9 = vadd.f32 %v2691_v26, %v8749_v6  ;;  %v9787_v26 = vld [vmem:[#allocation31_spill] sm:$0xff] }
 0x161   : > { %v6620_v36 = vpop.f32.mrf.mxu1  ;;  %v6668_v19 = vpop.f32.mrf.mxu0 }
 0x162   : > { %v9137_v59 = vadd.f32 %v6620_v36, %v8754_v4  ;;  %v9140_v41 = vadd.f32 %v6668_v19, %v8760_v55 }
 0x163   : > { %v1972_v10 = vpop.f32.mrf.mxu1  ;;  %v2694_v62 = vpop.f32.mrf.mxu0 }
 0x164   : > { %v9143_v42 = vadd.f32 %v1972_v10, %v8765_v17  ;;  %v9146_v13 = vadd.f32 %v2694_v62, %v8777_v3  ;;  %v9788_v62 = vld [vmem:[#allocation8_spill] sm:$0xff] }
 0x165   : > { %v6623_v2 = vpop.f32.mrf.mxu1  ;;  %v6671_v6 = vpop.f32.mrf.mxu0 }
 0x166   : > { %v9149_v46 = vadd.f32 %v6623_v2, %v8793_v52  ;;  %v9152_v5 = vadd.f32 %v6671_v6, %v8799_v20  ;;  %v1401_v2 = vadd.f32 %v8963_v11, %v9788_v62  ;;  %v9791_v11 = vld [vmem:[#allocation10_spill] sm:$0xff] }
 0x167   : > { %v1985_v4 = vpop.f32.mrf.mxu1  ;;  %v2707_v63 = vpop.f32.mrf.mxu0 }
 0x168   : > { %v9155_v55 = vadd.f32 %v1985_v4, %v8808_v25  ;;  %v9158_v39 = vadd.f32 %v2707_v63, %v8815_v51  ;;  %v9789_v63 = vld [vmem:[#allocation2_spill] sm:$0xff] }
 0x169   : > { %v6624_v17 = vpop.f32.mrf.mxu1  ;;  %v6672_v28 = vpop.f32.mrf.mxu0 }
 0x16a   : > { %v9161_v3 = vadd.f32 %v6624_v17, %v8824_v22  ;;  %v9164_v52 = vadd.f32 %v6672_v28, %v8832_v44  ;;  %v1374_v22 = vadd.f32 %v8868_v21, %v9783_v56  ;;  %v9790_v17 = vld [vmem:[#allocation34_spill] sm:$0xff] }
 0x16b   : > { %v1988_v7 = vpop.f32.mrf.mxu1  ;;  %v2710_v34 = vpop.f32.mrf.mxu0 }
 0x16c   : > { %v9167_v20 = vadd.f32 %v1988_v7, %v8836_v57  ;;  %v9170_v25 = vadd.f32 %v2710_v34, %v8848_v33  ;;  %v9784_v57 = vld [vmem:[#allocation4_spill] sm:$0xff] }
 0x16d   : > { %v1385_v53 = vadd.f32 %v8888_v8, %v9784_v57  ;;  %v9786_v8 = vld [vmem:[#allocation9_spill] sm:$0xff] }
 0x16e   : > { %v1390_v36 = vadd.f32 %v9787_v26, %v9786_v8  ;;  %v9795_v26 = vld [vmem:[#allocation12_spill] sm:$0xff] }
 0x170   : > { %v9172_v48 = vpop.f32.mrf.mxu1 }
 0x172   : > { %v9174_v51 = vpop.f32.mrf.mxu1 }
 0x174   : > { %v6675_v58 = vpop.f32.mrf.mxu0  ;;  %v9181_v60 = vpop.f32.mrf.mxu1 }
 0x175   : > { %v9179_v30 = vadd.f32 %v6675_v58, %v8861_v18  ;;  %v9785_v18 = vld [vmem:[#allocation6_spill] sm:$0xff] }
 0x176   : > { %v2723_v44 = vpop.f32.mrf.mxu0  ;;  %v9189_v40 = vpop.f32.mrf.mxu1  ;;  %v1398_v27 = vadd.f32 %v8924_v49, %v9785_v18  ;;  %v1393_v49 = vadd.f32 %v9790_v17, %v9789_v63  ;;  %v9799_v63 = vld [vmem:[#allocation42_spill] sm:$0xff] }
 0x177   : > { %v9185_v23 = vadd.f32 %v2723_v44, %v1374_v22  ;;  %v9792_v44 = vld [vmem:[#allocation36_spill] sm:$0xff] }
 0x178   : > { %v6676_v33 = vpop.f32.mrf.mxu0  ;;  %v1414_v57 = vadd.f32 %v9792_v44, %v9791_v11 }
 0x179   : > { %v9187_v15 = vadd.f32 %v6676_v33, %v1385_v53  ;;  %v9793_v33 = vld [vmem:[#allocation11_spill] sm:$0xff] }
 0x17a   : > { %v2726_v61 = vpop.f32.mrf.mxu0 }
 0x17b   : > { %v9192_v47 = vadd.f32 %v2726_v61, %v8918_v45  ;;  %v9794_v61 = vld [vmem:[#allocation38_spill] sm:$0xff] }
 0x17c   : > { %v1406_v18 = vadd.f32 %v9794_v61, %v9793_v33  ;;  %v9804_v33 = vld [vmem:[#allocation14_spill] sm:$0xff]  ;;  %v9805_v61 = vld [vmem:[#allocation44_spill] sm:$0xff] }
 0x17e   : > { %v9194_v21 = vpop.f32.mrf.mxu1 }
 0x180   : > { %v9198_v43 = vpop.f32.mrf.mxu1 }
 0x182   : > { %v6679_v31 = vpop.f32.mrf.mxu0  ;;  %v9208_v45 = vpop.f32.mrf.mxu1 }
 0x183   : > { %v9202_v19 = vadd.f32 %v6679_v31, %v1398_v27 }
 0x184   : > { %v2739_v10 = vpop.f32.mrf.mxu0  ;;  %v9214_v34 = vpop.f32.mrf.mxu1 }
 0x185   : > { %v9206_v6 = vadd.f32 %v2739_v10, %v1390_v36  ;;  %v9796_v36 = vld [vmem:[#allocation40_spill] sm:$0xff] }
 0x186   : > { %v6680_v4 = vpop.f32.mrf.mxu0  ;;  %v1417_v10 = vadd.f32 %v9796_v36, %v9795_v26  ;;  %v1430_v26 = vadd.f32 %v9805_v61, %v9804_v33  ;;  %v9807_v36 = vld [vmem:[#allocation16_spill] sm:$0xff] }
 0x187   : > { %v9212_v28 = vadd.f32 %v6680_v4, %v1401_v2  ;;  %v9798_v4 = vld [vmem:[#allocation13_spill] sm:$0xff] }
 0x188   : > { %v2742_v7 = vpop.f32.mrf.mxu0  ;;  %v1409_v17 = vadd.f32 %v9799_v63, %v9798_v4  ;;  %v1422_v4 = vadd.f32 %v9808_v29, %v9807_v36  ;;  %v9818_v29 = vld [vmem:[#allocation53_spill] sm:$0xff] }
 0x189   : > { %v9216_v58 = vadd.f32 %v2742_v7, %v1393_v49 }
 0x18d   : > { %v9218_v56 = vpop.f32.mrf.mxu1 }
 0x18f   : > { %v9220_v22 = vpop.f32.mrf.mxu1 }
 0x191   : > { %v9228_v8 = vpop.f32.mrf.mxu1 }
 0x192   : > { %v6683_v53 = vpop.f32.mrf.mxu0 }
 0x193   : > { %v9226_v27 = vadd.f32 %v6683_v53, %v1414_v57  ;;  %v9238_v7 = vpop.f32.mrf.mxu1 }
 0x194   : > { %v2755_v31 = vpop.f32.mrf.mxu0 }
 0x195   : > { %v9232_v62 = vadd.f32 %v2755_v31, %v1406_v18 }
 0x196   : > { %v6684_v2 = vpop.f32.mrf.mxu0 }
 0x197   : > { %9797 = vst [vmem:[#allocation5_spill] sm:$0xff] %v9232_v62  ;;  %v9236_v49 = vadd.f32 %v6684_v2, %v1417_v10 }
 0x198   : > { %v2758_v11 = vpop.f32.mrf.mxu0 }
 0x199   : > { %9800 = vst [vmem:[#allocation4_spill] sm:$0xff] %v9236_v49  ;;  %v9240_v44 = vadd.f32 %v2758_v11, %v1409_v17  ;;  %v9811_v17 = vld [vmem:[#allocation18_spill] sm:$0xff]  ;;  %v9812_v11 = vld [vmem:[#allocation48_spill] sm:$0xff] }
 0x19a   : > { %v1433_v37 = vadd.f32 %v9812_v11, %v9811_v17 }
 0x19b   : > { %9801 = vst [vmem:[#allocation6_spill] sm:$0xff] %v9240_v44  ;;  %v1946_v44 = vadd.f32 %v9814_v54, %v9813_v35 }
 0x19c   : > { %v9242_v57 = vpop.f32.mrf.mxu1 }
 0x19d   : > { %9802 = vst [vmem:[#allocation9_spill] sm:$0xff] %v9242_v57  ;;  %v9817_v57 = vld [vmem:[#allocation22_spill] sm:$0xff] }
 0x19e   : > { %v9244_v53 = vpop.f32.mrf.mxu1 }
 0x19f   : > { %9803 = vst [vmem:[#allocation31_spill] sm:$0xff] %v9244_v53  ;;  %v9815_v53 = vld [vmem:[#allocation20_spill] sm:$0xff] }
 0x1a0   : > { %v6687_v18 = vpop.f32.mrf.mxu0  ;;  %v9248_v31 = vpop.f32.mrf.mxu1 }
 0x1a1   : > { %9806 = vst [vmem:[#allocation8_spill] sm:$0xff] %v9248_v31  ;;  %v9252_v10 = vadd.f32 %v6687_v18, %v1430_v26  ;;  %v9816_v31 = vld [vmem:[#allocation50_spill] sm:$0xff]  ;;  %v1938_v26 = vadd.f32 %v9818_v29, %v9817_v57  ;;  %v9821_v57 = vld [vmem:[#allocation25_spill] sm:$0xff] }
 0x1a2   : > { %v2771_v2 = vpop.f32.mrf.mxu0  ;;  %v9254_v63 = vpop.f32.mrf.mxu1  ;;  %v1425_v62 = vadd.f32 %v9816_v31, %v9815_v53 }
 0x1a3   : > { %9809 = vst [vmem:[#allocation2_spill] sm:$0xff] %v9252_v10  ;;  %9810 = vst [vmem:[#allocation34_spill] sm:$0xff] %v9254_v63  ;;  %v9260_v49 = vadd.f32 %v2771_v2, %v1422_v4 }
 0x1a4   : > { %v6688_v33 = vpop.f32.mrf.mxu0  ;;  %v6707_v61 = vpop.f32.mrf.mxu1 }
 0x1a5   : > { %v9266_v18 = vadd.f32 %v6688_v33, %v1433_v37  ;;  %v9268_v36 = vadd.f32 %v6707_v61, %v1946_v44  ;;  %v9822_v37 = vld [vmem:[#allocation56_spill] sm:$0xff] }
 0x1a6   : > { %v2774_v10 = vpop.f32.mrf.mxu0  ;;  %v3157_v63 = vpop.f32.mrf.mxu1  ;;  %v1962_v2 = vadd.f32 %v9822_v37, %v9821_v57  ;;  %v9828_v57 = vld [vmem:[#allocation28_spill] sm:$0xff] }
 0x1a7   : > { %v9270_v17 = vadd.f32 %v2774_v10, %v1425_v62  ;;  %v9272_v11 = vadd.f32 %v3157_v63, %v1938_v26  ;;  %v9825_v10 = vld [vmem:[#allocation26_spill] sm:$0xff]  ;;  %v9826_v63 = vld [vmem:[#allocation57_spill] sm:$0xff] }
 0x1a8   : > { %v6755_v35 = vpop.f32.mrf.mxu0  ;;  %v9274_v54 = vpop.f32.mrf.mxu1  ;;  %v1954_v61 = vadd.f32 %v9826_v63, %v9825_v10 }
 0x1a9   : > { %9819 = vst [vmem:[#allocation10_spill] sm:$0xff] %v9272_v11  ;;  %v9277_v4 = vadd.f32 %v6755_v35, %v9097_v50 }
 0x1aa   : > { %v3544_v53 = vpop.f32.mrf.mxu0  ;;  %v9279_v31 = vpop.f32.mrf.mxu1 }
 0x1ab   : > { %9820 = vst [vmem:[#allocation36_spill] sm:$0xff] %v9279_v31  ;;  %v9284_v44 = vadd.f32 %v3544_v53, %v9105_v12  ;;  %v1957_v12 = vadd.f32 %v9091_v0, %v9828_v57 }
 0x1ac   : > { %v9286_v33 = vpop.f32.mrf.mxu0  ;;  %v6711_v62 = vpop.f32.mrf.mxu1 }
 0x1ad   : > { %9823 = vst [vmem:[#allocation11_spill] sm:$0xff] %v9284_v44  ;;  %9824 = vst [vmem:[#allocation38_spill] sm:$0xff] %v9286_v33  ;;  %v9290_v29 = vadd.f32 %v6711_v62, %v1962_v2  ;;  %v9830_v33 = vld [vmem:[#allocation29_spill] sm:$0xff] }
 0x1ae   : > { %v9292_v26 = vpop.f32.mrf.mxu0  ;;  %v3173_v50 = vpop.f32.mrf.mxu1  ;;  %v1978_v2 = vadd.f32 %v9107_v16, %v9830_v33 }
 0x1af   : > { %v9294_v35 = vadd.f32 %v3173_v50, %v1954_v61  ;;  %v9831_v50 = vld [vmem:[#allocation30_spill] sm:$0xff] }
 0x1b0   : > { %v6759_v31 = vpop.f32.mrf.mxu0  ;;  %v9296_v11 = vpop.f32.mrf.mxu1 }
 0x1b1   : > { %9827 = vst [vmem:[#allocation12_spill] sm:$0xff] %v9294_v35  ;;  %v9301_v53 = vadd.f32 %v6759_v31, %v9117_v32  ;;  %v1970_v35 = vadd.f32 %v9119_v1, %v9831_v50 }
 0x1b2   : > { %v3560_v37 = vpop.f32.mrf.mxu0  ;;  %v3176_v44 = vpop.f32.mrf.mxu1 }
 0x1b3   : > { %9829 = vst [vmem:[#allocation40_spill] sm:$0xff] %v9301_v53  ;;  %v9306_v62 = vadd.f32 %v3560_v37, %v9122_v24  ;;  %v9308_v10 = vadd.f32 %v3176_v44, %v1957_v12 }
 0x1b4   : > { %v9310_v63 = vpop.f32.mrf.mxu0  ;;  %v6715_v61 = vpop.f32.mrf.mxu1 }
 0x1b5   : > { %v9314_v0 = vadd.f32 %v6715_v61, %v1978_v2 }
 0x1b6   : > { %v3563_v32 = vpop.f32.mrf.mxu0  ;;  %v3189_v31 = vpop.f32.mrf.mxu1 }
 0x1b7   : > { %v9317_v57 = vadd.f32 %v3563_v32, %v9128_v38  ;;  %v9319_v53 = vadd.f32 %v3189_v31, %v1970_v35 }
 0x1b8   : > { %v6763_v16 = vpop.f32.mrf.mxu0  ;;  %v6716_v24 = vpop.f32.mrf.mxu1 }
 0x1b9   : > { %v9322_v44 = vadd.f32 %v6763_v16, %v9131_v14  ;;  %v9325_v33 = vadd.f32 %v6716_v24, %v9137_v59 }
 0x1ba   : > { %v3576_v12 = vpop.f32.mrf.mxu0  ;;  %v3192_v37 = vpop.f32.mrf.mxu1 }
 0x1bb   : > { %v9328_v1 = vadd.f32 %v3576_v12, %v9134_v9  ;;  %v9331_v2 = vadd.f32 %v3192_v37, %v9143_v42 }
 0x1bc   : > { %v6764_v38 = vpop.f32.mrf.mxu0  ;;  %v6719_v61 = vpop.f32.mrf.mxu1 }
 0x1bd   : > { %v9334_v35 = vadd.f32 %v6764_v38, %v9140_v41  ;;  %v9337_v50 = vadd.f32 %v6719_v61, %v9149_v46  ;;  %v9833_v46 = vld [vmem:[#allocation15_spill] sm:$0xff] }
 0x1be   : > { %v3579_v14 = vpop.f32.mrf.mxu0  ;;  %v3205_v32 = vpop.f32.mrf.mxu1  ;;  %v2010_v37 = vadd.f32 %v9172_v48, %v9833_v46  ;;  %v9836_v46 = vld [vmem:[#allocation3_spill] sm:$0xff] }
 0x1bf   : > { %v9340_v59 = vadd.f32 %v3579_v14, %v9146_v13  ;;  %v9343_v31 = vadd.f32 %v3205_v32, %v9155_v55  ;;  %v9834_v14 = vld [vmem:[#allocation17_spill] sm:$0xff] }
 0x1c0   : > { %v6767_v9 = vpop.f32.mrf.mxu0  ;;  %v6720_v16 = vpop.f32.mrf.mxu1 }
 0x1c1   : > { %v9346_v42 = vadd.f32 %v6767_v9, %v9152_v5  ;;  %v9349_v24 = vadd.f32 %v6720_v16, %v9161_v3  ;;  %v2002_v5 = vadd.f32 %v9174_v51, %v9834_v14  ;;  %v2005_v51 = vadd.f32 %v9189_v40, %v9836_v46  ;;  %v9837_v14 = vld [vmem:[#allocation7_spill] sm:$0xff]  ;;  %v9839_v46 = vld [vmem:[#allocation33_spill] sm:$0xff] }
 0x1c2   : > { %v3592_v41 = vpop.f32.mrf.mxu0  ;;  %v3208_v12 = vpop.f32.mrf.mxu1 }
 0x1c3   : > { %9832 = vst [vmem:[#allocation13_spill] sm:$0xff] %v9349_v24  ;;  %v9354_v38 = vadd.f32 %v3592_v41, %v9158_v39  ;;  %v9357_v13 = vadd.f32 %v3208_v12, %v9167_v20  ;;  %v9835_v24 = vld [vmem:[#allocation19_spill] sm:$0xff] }
 0x1c4   : > { %v6768_v55 = vpop.f32.mrf.mxu0  ;;  %v6723_v61 = vpop.f32.mrf.mxu1  ;;  %v2013_v48 = vadd.f32 %v9181_v60, %v9835_v24  ;;  %v2026_v60 = vadd.f32 %v9194_v21, %v9837_v14  ;;  %v2029_v21 = vadd.f32 %v9208_v45, %v9839_v46  ;;  %v9840_v14 = vld [vmem:[#allocation35_spill] sm:$0xff] }
 0x1c5   : > { %v9362_v32 = vadd.f32 %v6768_v55, %v9164_v52  ;;  %v9364_v3 = vadd.f32 %v6723_v61, %v2010_v37  ;;  %v9843_v46 = vld [vmem:[#allocation39_spill] sm:$0xff] }
 0x1c6   : > { %v3595_v9 = vpop.f32.mrf.mxu0  ;;  %v3221_v16 = vpop.f32.mrf.mxu1 }
 0x1c7   : > { %v9369_v39 = vadd.f32 %v3595_v9, %v9170_v25  ;;  %v9371_v20 = vadd.f32 %v3221_v16, %v2002_v5  ;;  %v9838_v16 = vld [vmem:[#allocation32_spill] sm:$0xff] }
 0x1c8   : > { %v6771_v41 = vpop.f32.mrf.mxu0  ;;  %v6724_v12 = vpop.f32.mrf.mxu1  ;;  %v2018_v40 = vadd.f32 %v9198_v43, %v9838_v16  ;;  %v2021_v43 = vadd.f32 %v9214_v34, %v9840_v14  ;;  %v9841_v16 = vld [vmem:[#allocation37_spill] sm:$0xff]  ;;  %v2034_v34 = vadd.f32 %v9220_v22, %v9843_v46 }
 0x1c9   : > { %v9376_v52 = vadd.f32 %v6771_v41, %v9179_v30  ;;  %v9378_v37 = vadd.f32 %v6724_v12, %v2013_v48  ;;  %v2042_v45 = vadd.f32 %v9218_v56, %v9841_v16  ;;  %v9846_v14 = vld [vmem:[#allocation41_spill] sm:$0xff]  ;;  %v9849_v16 = vld [vmem:[#allocation43_spill] sm:$0xff] }
 0x1ca   : > { %v3608_v55 = vpop.f32.mrf.mxu0  ;;  %v3224_v61 = vpop.f32.mrf.mxu1  ;;  %v2045_v56 = vadd.f32 %v9228_v8, %v9846_v14  ;;  %v2037_v22 = vadd.f32 %v9238_v7, %v9849_v16  ;;  %v9852_v46 = vld [vmem:[#allocation45_spill] sm:$0xff]  ;;  %v9859_v16 = vld [vmem:[#allocation4_spill] sm:$0xff] }
 0x1cb   : > { %v9383_v25 = vadd.f32 %v3608_v55, %v9185_v23  ;;  %v9385_v24 = vadd.f32 %v3224_v61, %v2005_v51  ;;  %v9854_v14 = vld [vmem:[#allocation5_spill] sm:$0xff] }
 0x1cc   : > { %v6772_v5 = vpop.f32.mrf.mxu0  ;;  %v6727_v9 = vpop.f32.mrf.mxu1 }
 0x1cd   : > { %v9390_v30 = vadd.f32 %v6772_v5, %v9187_v15  ;;  %v9392_v48 = vadd.f32 %v6727_v9, %v2026_v60 }
 0x1ce   : > { %v3611_v41 = vpop.f32.mrf.mxu0  ;;  %v3237_v12 = vpop.f32.mrf.mxu1 }
 0x1cf   : > { %v9397_v23 = vadd.f32 %v3611_v41, %v9192_v47  ;;  %v9399_v51 = vadd.f32 %v3237_v12, %v2018_v40 }
 0x1d0   : > { %v6775_v55 = vpop.f32.mrf.mxu0  ;;  %v6728_v61 = vpop.f32.mrf.mxu1 }
 0x1d1   : > { %v9404_v15 = vadd.f32 %v6775_v55, %v9202_v19  ;;  %v9406_v60 = vadd.f32 %v6728_v61, %v2029_v21 }
 0x1d2   : > { %v3624_v5 = vpop.f32.mrf.mxu0  ;;  %v3240_v9 = vpop.f32.mrf.mxu1 }
 0x1d3   : > { %v9411_v47 = vadd.f32 %v3624_v5, %v9206_v6  ;;  %v9413_v40 = vadd.f32 %v3240_v9, %v2021_v43 }
 0x1d4   : > { %v6776_v41 = vpop.f32.mrf.mxu0  ;;  %v6731_v12 = vpop.f32.mrf.mxu1 }
 0x1d5   : > { %9842 = vst [vmem:[#allocation42_spill] sm:$0xff] %v9413_v40  ;;  %v9418_v19 = vadd.f32 %v6776_v41, %v9212_v28  ;;  %v9420_v21 = vadd.f32 %v6731_v12, %v2042_v45 }
 0x1d6   : > { %v3627_v55 = vpop.f32.mrf.mxu0  ;;  %v3253_v61 = vpop.f32.mrf.mxu1 }
 0x1d7   : > { %9844 = vst [vmem:[#allocation14_spill] sm:$0xff] %v9418_v19  ;;  %9845 = vst [vmem:[#allocation44_spill] sm:$0xff] %v9420_v21  ;;  %v9425_v6 = vadd.f32 %v3627_v55, %v9216_v58  ;;  %v9427_v43 = vadd.f32 %v3253_v61, %v2034_v34  ;;  %v9853_v21 = vld [vmem:[#allocation9_spill] sm:$0xff] }
 0x1d8   : > { %v6779_v5 = vpop.f32.mrf.mxu0  ;;  %v6732_v9 = vpop.f32.mrf.mxu1  ;;  %v2058_v8 = vadd.f32 %v9853_v21, %v9852_v46  ;;  %v9864_v46 = vld [vmem:[#allocation6_spill] sm:$0xff] }
 0x1d9   : > { %9847 = vst [vmem:[#allocation16_spill] sm:$0xff] %v9425_v6  ;;  %9848 = vst [vmem:[#allocation46_spill] sm:$0xff] %v9427_v43  ;;  %v9432_v28 = vadd.f32 %v6779_v5, %v9226_v27  ;;  %v9434_v45 = vadd.f32 %v6732_v9, %v2045_v56  ;;  %v9857_v43 = vld [vmem:[#allocation47_spill] sm:$0xff] }
 0x1da   : > { %v3640_v41 = vpop.f32.mrf.mxu0  ;;  %v3256_v12 = vpop.f32.mrf.mxu1  ;;  %v9858_v6 = vld [vmem:[#allocation31_spill] sm:$0xff] }
 0x1db   : > { %9850 = vst [vmem:[#allocation18_spill] sm:$0xff] %v9432_v28  ;;  %9851 = vst [vmem:[#allocation48_spill] sm:$0xff] %v9434_v45  ;;  %v9439_v58 = vadd.f32 %v3640_v41, %v9854_v14  ;;  %v9441_v34 = vadd.f32 %v3256_v12, %v2037_v22  ;;  %v2050_v7 = vadd.f32 %v9858_v6, %v9857_v43  ;;  %v9862_v45 = vld [vmem:[#allocation49_spill] sm:$0xff]  ;;  %v9863_v28 = vld [vmem:[#allocation8_spill] sm:$0xff] }
 0x1dc   : > { %v6780_v55 = vpop.f32.mrf.mxu0  ;;  %v6735_v61 = vpop.f32.mrf.mxu1  ;;  %v2061_v21 = vadd.f32 %v9863_v28, %v9862_v45  ;;  %v9869_v43 = vld [vmem:[#allocation2_spill] sm:$0xff] }
 0x1dd   : > { %9855 = vst [vmem:[#allocation21_spill] sm:$0xff] %v9439_v58  ;;  %9856 = vst [vmem:[#allocation52_spill] sm:$0xff] %v9441_v34  ;;  %v9446_v27 = vadd.f32 %v6780_v55, %v9859_v16  ;;  %v9448_v56 = vadd.f32 %v6735_v61, %v2058_v8  ;;  %v9867_v34 = vld [vmem:[#allocation51_spill] sm:$0xff]  ;;  %v9868_v58 = vld [vmem:[#allocation34_spill] sm:$0xff] }
 0x1de   : > { %v3643_v5 = vpop.f32.mrf.mxu0  ;;  %v3269_v9 = vpop.f32.mrf.mxu1  ;;  %v2053_v6 = vadd.f32 %v9868_v58, %v9867_v34  ;;  %v9875_v58 = vld [vmem:[#allocation23_spill] sm:$0xff]  ;;  %v9876_v34 = vld [vmem:[#allocation54_spill] sm:$0xff] }
 0x1df   : > { %9860 = vst [vmem:[#allocation20_spill] sm:$0xff] %v9446_v27  ;;  %9861 = vst [vmem:[#allocation50_spill] sm:$0xff] %v9448_v56  ;;  %v9453_v41 = vadd.f32 %v3643_v5, %v9864_v46  ;;  %v9455_v22 = vadd.f32 %v3269_v9, %v2050_v7  ;;  %v9887_v27 = vld [vmem:[#allocation60_spill] sm:$0xff] }
 0x1e0   : > { %v6783_v12 = vpop.f32.mrf.mxu0  ;;  %v6736_v14 = vpop.f32.mrf.mxu1  ;;  %v3672_v40 = vadd.f32 %v9292_v26, %v9887_v27  ;;  %v9888_v27 = vld [vmem:[#allocation12_spill] sm:$0xff] }
 0x1e1   : > { %9865 = vst [vmem:[#allocation22_spill] sm:$0xff] %v9453_v41  ;;  %9866 = vst [vmem:[#allocation53_spill] sm:$0xff] %v9455_v22  ;;  %v9460_v55 = vadd.f32 %v6783_v12, %v9869_v43  ;;  %v9462_v8 = vadd.f32 %v6736_v14, %v2061_v21  ;;  %v1949_v12 = vadd.f32 %v9876_v34, %v9875_v58  ;;  %v9486_v58 = vld [vmem:[%s9644_s2] ss:$0 sm:$0xff]  ;;  %v9881_v34 = vld [vmem:[#allocation59_spill] sm:$0xff] }
 0x1e2   : > { %v3656_v61 = vpop.f32.mrf.mxu0  ;;  %v3272_v16 = vpop.f32.mrf.mxu1  ;;  %v9885_v22 = vld [vmem:[#allocation27_spill] sm:$0xff] }
 0x1e3   : > { %9870 = vst [vmem:[#allocation25_spill] sm:$0xff] %v9460_v55  ;;  %9871 = vst [vmem:[#allocation56_spill] sm:$0xff] %v9462_v8  ;;  %v9465_v56 = vadd.f32 %v3656_v61, %v9260_v49  ;;  %v9467_v28 = vadd.f32 %v3272_v16, %v2053_v6  ;;  %v3287_v6 = vadd.f32 %v9274_v54, %v1949_v12  ;;  %v9878_v16 = vld [vmem:[#allocation10_spill] sm:$0xff]  ;;  %v9883_v8 = vld [vmem:[#allocation11_spill] sm:$0xff] }
 0x1e4   : > { %v6784_v45 = vpop.f32.mrf.mxu0  ;;  %v6803_v7 = vpop.f32.mrf.mxu1  ;;  %v9886_v55 = vld [vmem:[#allocation58_spill] sm:$0xff] }
 0x1e5   : > { %9872 = vst [vmem:[#allocation26_spill] sm:$0xff] %v9465_v56  ;;  %9873 = vst [vmem:[#allocation57_spill] sm:$0xff] %v9467_v28  ;;  %v9470_v5 = vadd.f32 %v6784_v45, %v9266_v18  ;;  %v4427_v14 = vadd.f32 %v6803_v7, %v9268_v36  ;;  %v9879_v18 = vld [vmem:[#allocation24_spill] sm:$0xff]  ;;  %v9880_v45 = vld [vmem:[#allocation55_spill] sm:$0xff]  ;;  %v1965_v41 = vadd.f32 %v9886_v55, %v9885_v22 }
 0x1e6   : > { %v3659_v9 = vpop.f32.mrf.mxu0  ;;  %v4298_v46 = vpop.f32.mrf.mxu1  ;;  %v9882_v36 = vld [vmem:[#allocation38_spill] sm:$0xff] }
 0x1e7   : > { %9874 = vst [vmem:[#allocation28_spill] sm:$0xff] %v9470_v5  ;;  %v9475_v21 = vadd.f32 %v3659_v9, %v9270_v17  ;;  %v4425_v28 = vadd.f32 %v4298_v46, %v9878_v16  ;;  %v1941_v5 = vadd.f32 %v9880_v45, %v9879_v18  ;;  %v3674_v7 = vadd.f32 %v9882_v36, %v9881_v34  ;;  %v9889_v36 = vld [vmem:[#allocation61_spill] sm:$0xff] }
 0x1e8   : > { %v6851_v43 = vpop.f32.mrf.mxu0  ;;  %v6804_v49 = vpop.f32.mrf.mxu1 }
 0x1e9   : > { %9877 = vst [vmem:[#allocation29_spill] sm:$0xff] %v9475_v21  ;;  %v4925_v61 = vadd.f32 %v6851_v43, %v9277_v4  ;;  %v4428_v12 = vadd.f32 %v6804_v49, %v3287_v6  ;;  %v9884_v4 = vld [vmem:[#allocation36_spill] sm:$0xff]  ;;  %v3291_v6 = vadd.f32 %v9296_v11, %v1965_v41 }
 0x1ea   : > { %v4796_v17 = vpop.f32.mrf.mxu0  ;;  %v4301_v9 = vpop.f32.mrf.mxu1  ;;  %v3285_v43 = vadd.f32 %v9884_v4, %v1941_v5 }
 0x1eb   : > { %v4957_v21 = vadd.f32 %v4925_v61, %v4427_v14  ;;  %v4923_v54 = vadd.f32 %v4796_v17, %v9883_v8 }
 0x1ec   : > { %v6852_v46 = vpop.f32.mrf.mxu0  ;;  %v6807_v16 = vpop.f32.mrf.mxu1  ;;  %v4426_v19 = vadd.f32 %v4301_v9, %v3285_v43 }
 0x1ed   : > { %v4996_v18 = vadd.f32 %v9486_v58, %v4957_v21  ;;  %v4955_v45 = vadd.f32 %v4923_v54, %v4425_v28  ;;  %v4926_v56 = vadd.f32 %v6852_v46, %v3674_v7  ;;  %v4431_v28 = vadd.f32 %v6807_v16, %v9290_v29 }
 0x1ee   : > { %v4799_v34 = vpop.f32.mrf.mxu0  ;;  %v4314_v14 = vpop.f32.mrf.mxu1  ;;  %v3678_v7 = vadd.f32 %v9310_v63, %v9889_v36 }
 0x1ef   : > { %vm5028_vm6 = vcmp.gt.f32.partialorder %v4996_v18, 0.0  ;;  %v5060_v8 = vmul.f32 0.01, %v4996_v18  ;;  %v4994_v5 = vadd.f32 %v9486_v58, %v4955_v45  ;;  %v4958_v49 = vadd.f32 %v4926_v56, %v4428_v12  ;;  %v9890_v56 = vld [vmem:[#allocation40_spill] sm:$0xff] }
 0x1f0   : > { %v4924_v21 = vadd.f32 %v4799_v34, %v3672_v40  ;;  %v6855_v61 = vpop.f32.mrf.mxu0  ;;  %v6808_v17 = vpop.f32.mrf.mxu1  ;;  %v4429_v9 = vadd.f32 %v4314_v14, %v9888_v27 }
 0x1f1   : > { %v5092_v22 = vsel %vm5028_vm6, %v4996_v18, %v5060_v8  ;;  %v5058_v55 = vmul.f32 0.01, %v4994_v5  ;;  %v4997_v26 = vadd.f32 %v9486_v58, %v4958_v49  ;;  %vm5026_vm7 = vcmp.gt.f32.partialorder %v4994_v5, 0.0 }
 0x1f2   : > { %v4956_v54 = vadd.f32 %v4924_v21, %v4426_v19  ;;  %v4929_v12 = vadd.f32 %v6855_v61, %v9890_v56  ;;  %v4812_v11 = vpop.f32.mrf.mxu0  ;;  %v4317_v40 = vpop.f32.mrf.mxu1  ;;  %v4432_v4 = vadd.f32 %v6808_v17, %v3291_v6  ;;  %v5321_v43 = vmul.f32 %v5092_v22, %v5092_v22 }
 0x1f3   : > { %vm5029_vm8 = vcmp.gt.f32.partialorder %v4997_v26, 0.0  ;;  %v5061_v29 = vmul.f32 0.01, %v4997_v26  ;;  %v4927_v41 = vadd.f32 %v4812_v11, %v9306_v62  ;;  %v5090_v34 = vsel %vm5026_vm7, %v4994_v5, %v5058_v55 }
 0x1f4   : > { %v4995_v46 = vadd.f32 %v9486_v58, %v4956_v54  ;;  %v4961_v16 = vadd.f32 %v4929_v12, %v4431_v28  ;;  %v6856_v18 = vpop.f32.mrf.mxu0  ;;  %v6811_v45 = vpop.f32.mrf.mxu1  ;;  %v4430_v49 = vadd.f32 %v4317_v40, %v9308_v10  ;;  %v5319_v55 = vmul.f32 %v5090_v34, %v5090_v34 }
 0x1f5   : > { %v5093_v63 = vsel %vm5029_vm8, %v4997_v26, %v5061_v29  ;;  %v4959_v19 = vadd.f32 %v4927_v41, %v4429_v9  ;;  %v4930_v14 = vadd.f32 %v6856_v18, %v3678_v7  ;;  %v4435_v27 = vadd.f32 %v6811_v45, %v9314_v0 }
 0x1f6   : > { %v6146_v8 = vpack.c.bf16 %v5093_v63, %v5092_v22  ;;  %vm5027_vm9 = vcmp.gt.f32.partialorder %v4995_v46, 0.0  ;;  %v5059_v62 = vmul.f32 0.01, %v4995_v46  ;;  %v4815_v6 = vpop.f32.mrf.mxu0  ;;  %v4330_v21 = vpop.f32.mrf.mxu1  ;;  %v5000_v28 = vadd.f32 %v9486_v58, %v4961_v16 }
 0x1f7   : > { %v4998_v5 = vadd.f32 %v9486_v58, %v4959_v19  ;;  %v4962_v61 = vadd.f32 %v4930_v14, %v4432_v4  ;;  %v4928_v17 = vadd.f32 %v4815_v6, %v9317_v57  ;;  %v4433_v36 = vadd.f32 %v4330_v21, %v9319_v53 }
 0x1f8   : > { %6218 = vst [vmem:[%s9511_s5 + $0x8] sm:$0xff] %v6146_v8   ;;  %v5091_v26 = vsel %vm5027_vm9, %v4995_v46, %v5059_v62  ;;  %v6859_v9 = vpop.f32.mrf.mxu0  ;;  %v6812_v7 = vpop.f32.mrf.mxu1  ;;  %vm5032_vm10 = vcmp.gt.f32.partialorder %v5000_v28, 0.0  ;;  %v5064_v12 = vmul.f32 0.01, %v5000_v28  ;;  %v5322_v19 = vmul.f32 %v5093_v63, %v5093_v63 }
 0x1f9   : > { %v6141_v10 = vpack.c.bf16 %v5091_v26, %v5090_v34  ;;  %v5282_v54 = vadd.f32 %v5091_v26, %v5090_v34  ;;  %v5320_v56 = vmul.f32 %v5091_v26, %v5091_v26  ;;  %vm5030_vm11 = vcmp.gt.f32.partialorder %v4998_v5, 0.0 }
 0x1fa   : > { %v5062_v11 = vmul.f32 0.01, %v4998_v5  ;;  %v5001_v40 = vadd.f32 %v9486_v58, %v4962_v61  ;;  %v4828_v57 = vpop.f32.mrf.mxu0  ;;  %v4333_v29 = vpop.f32.mrf.mxu1  ;;  %v4960_v46 = vadd.f32 %v4928_v17, %v4430_v49  ;;  %v4933_v0 = vadd.f32 %v6859_v9, %v9322_v44 }
 0x1fb   : > { %6142 = vst [vmem:[%s9511_s5] sm:$0xff] %v6141_v10   ;;  %v5283_v41 = vadd.f32 %v5282_v54, %v5092_v22  ;;  %v5351_v4 = vadd.f32 %v5320_v56, %v5319_v55  ;;  %v5096_v16 = vsel %vm5032_vm10, %v5000_v28, %v5064_v12  ;;  %v4931_v22 = vadd.f32 %v4828_v57, %v9328_v1 }
 0x1fc   : > { %v5094_v53 = vsel %vm5030_vm11, %v4998_v5, %v5062_v11  ;;  %vm5033_vm12 = vcmp.gt.f32.partialorder %v5001_v40, 0.0  ;;  %v5065_v18 = vmul.f32 0.01, %v5001_v40  ;;  %v6860_v45 = vpop.f32.mrf.mxu0  ;;  %v6815_v34 = vpop.f32.mrf.mxu1  ;;  %v5325_v8 = vmul.f32 %v5096_v16, %v5096_v16 }
 0x1fd   : > { %v5352_v14 = vadd.f32 %v5351_v4, %v5321_v43  ;;  %v5284_v62 = vadd.f32 %v5283_v41, %v5093_v63  ;;  %v4999_v21 = vadd.f32 %v9486_v58, %v4960_v46  ;;  %v4965_v61 = vadd.f32 %v4933_v0, %v4435_v27 }
 0x1fe   : > { %v5097_v6 = vsel %vm5033_vm12, %v5001_v40, %v5065_v18  ;;  %v4831_v49 = vpop.f32.mrf.mxu0  ;;  %v4346_v17 = vpop.f32.mrf.mxu1  ;;  %v5323_v28 = vmul.f32 %v5094_v53, %v5094_v53  ;;  %v4963_v43 = vadd.f32 %v4931_v22, %v4433_v36  ;;  %v4436_v56 = vadd.f32 %v6812_v7, %v9325_v33 }
 0x1ff   : > { %v5285_v44 = vadd.f32 %v5284_v62, %v5094_v53  ;;  %v5353_v5 = vadd.f32 %v5352_v14, %v5322_v19  ;;  %v6156_v55 = vpack.c.bf16 %v5097_v6, %v5096_v16  ;;  %vm5031_vm13 = vcmp.gt.f32.partialorder %v4999_v21, 0.0 }
 0x200   : > { %v5063_v26 = vmul.f32 0.01, %v4999_v21  ;;  %v5004_v9 = vadd.f32 %v9486_v58, %v4965_v61  ;;  %v6863_v10 = vpop.f32.mrf.mxu0  ;;  %v6816_v63 = vpop.f32.mrf.mxu1  ;;  %v4934_v27 = vadd.f32 %v6860_v45, %v9334_v35  ;;  %v4434_v1 = vadd.f32 %v4333_v29, %v9331_v2 }
 0x201   : > { %v5354_v54 = vadd.f32 %v5353_v5, %v5323_v28  ;;  %6220 = vst [vmem:[%s9511_s5 + $0x18] sm:$0xff] %v6156_v55   ;;  %v5002_v40 = vadd.f32 %v9486_v58, %v4963_v43  ;;  %v5326_v18 = vmul.f32 %v5097_v6, %v5097_v6  ;;  %v4932_v33 = vadd.f32 %v4831_v49, %v9340_v59 }
 0x202   : > { %v5095_v12 = vsel %vm5031_vm13, %v4999_v21, %v5063_v26  ;;  %vm5036_vm14 = vcmp.gt.f32.partialorder %v5004_v9, 0.0  ;;  %v5068_v11 = vmul.f32 0.01, %v5004_v9  ;;  %v4844_v57 = vpop.f32.mrf.mxu0  ;;  %v4349_v41 = vpop.f32.mrf.mxu1  ;;  %v4966_v0 = vadd.f32 %v4934_v27, %v4436_v56 }
 0x203   : > { %v6151_v4 = vpack.c.bf16 %v5095_v12, %v5094_v53  ;;  %v5286_v36 = vadd.f32 %v5285_v44, %v5095_v12  ;;  %v5324_v46 = vmul.f32 %v5095_v12, %v5095_v12  ;;  %vm5034_vm15 = vcmp.gt.f32.partialorder %v5002_v40, 0.0 }
 0x204   : > { %v5066_v19 = vmul.f32 0.01, %v5002_v40  ;;  %v6864_v35 = vpop.f32.mrf.mxu0  ;;  %v6819_v7 = vpop.f32.mrf.mxu1  ;;  %v5100_v45 = vsel %vm5036_vm14, %v5004_v9, %v5068_v11  ;;  %v5005_v14 = vadd.f32 %v9486_v58, %v4966_v0  ;;  %v4964_v21 = vadd.f32 %v4932_v33, %v4434_v1 }
 0x205   : > { %6219 = vst [vmem:[%s9511_s5 + $0x10] sm:$0xff] %v6151_v4   ;;  %v5287_v2 = vadd.f32 %v5286_v36, %v5096_v16  ;;  %v5355_v29 = vadd.f32 %v5354_v54, %v5324_v46  ;;  %v4439_v53 = vadd.f32 %v6815_v34, %v9337_v50  ;;  %v4937_v61 = vadd.f32 %v6863_v10, %v9346_v42  ;;  %v9891_v42 = vld [vmem:[#allocation13_spill] sm:$0xff] }
 0x206   : > { %v5098_v62 = vsel %vm5034_vm15, %v5002_v40, %v5066_v19  ;;  %v4847_v22 = vpop.f32.mrf.mxu0  ;;  %v4362_v44 = vpop.f32.mrf.mxu1  ;;  %vm5037_vm0 = vcmp.gt.f32.partialorder %v5005_v14, 0.0  ;;  %v5069_v49 = vmul.f32 0.01, %v5005_v14  ;;  %v5003_v16 = vadd.f32 %v9486_v58, %v4964_v21 }
 0x207   : > { %v5356_v28 = vadd.f32 %v5355_v29, %v5325_v8  ;;  %v5288_v5 = vadd.f32 %v5287_v2, %v5097_v6  ;;  %v5327_v59 = vmul.f32 %v5098_v62, %v5098_v62  ;;  %v4969_v55 = vadd.f32 %v4937_v61, %v4439_v53 }
 0x208   : > { %v4437_v26 = vadd.f32 %v4346_v17, %v9343_v31  ;;  %v6867_v9 = vpop.f32.mrf.mxu0  ;;  %v9539_v43 = vpop.f32.mrf.mxu1  ;;  %v4935_v50 = vadd.f32 %v4844_v57, %v9354_v38  ;;  %v4440_v34 = vadd.f32 %v6816_v63, %v9891_v42  ;;  %v5101_v10 = vsel %vm5037_vm0, %v5005_v14, %v5069_v49 }
 0x209   : > { %v5289_v54 = vadd.f32 %v5288_v5, %v5098_v62  ;;  %v5357_v56 = vadd.f32 %v5356_v28, %v5326_v18  ;;  %vm5035_vm1 = vcmp.gt.f32.partialorder %v5003_v16, 0.0  ;;  %v5067_v8 = vmul.f32 0.01, %v5003_v16 }
 0x20a   : > { %v5008_v6 = vadd.f32 %v9486_v58, %v4969_v55  ;;  %v4860_v27 = vpop.f32.mrf.mxu0  ;;  %v9544_v1 = vpop.f32.mrf.mxu1  ;;  %v5329_v12 = vmul.f32 %v5100_v45, %v5100_v45  ;;  %v6166_v17 = vpack.c.bf16 %v5101_v10, %v5100_v45  ;;  %v4967_v11 = vadd.f32 %v4935_v50, %v4437_v26 }
 0x20b   : > { %v5358_v31 = vadd.f32 %v5357_v56, %v5327_v59  ;;  %v5099_v40 = vsel %vm5035_vm1, %v5003_v16, %v5067_v8  ;;  %v4938_v38 = vadd.f32 %v6864_v35, %v9362_v32  ;;  %v5330_v19 = vmul.f32 %v5101_v10, %v5101_v10 }
 0x20c   : > { %vm5040_vm2 = vcmp.gt.f32.partialorder %v5008_v6, 0.0  ;;  %v5072_v4 = vmul.f32 0.01, %v5008_v6  ;;  %v6868_v63 = vpop.f32.mrf.mxu0  ;;  %v9547_v57 = vpop.f32.mrf.mxu1  ;;  %6222 = vst [vmem:[%s9511_s5 + $0x28] sm:$0xff] %v6166_v17   ;;  %v6161_v36 = vpack.c.bf16 %v5099_v40, %v5098_v62  ;;  %v5290_v46 = vadd.f32 %v5289_v54, %v5099_v40 }
 0x20d   : > { %v5328_v0 = vmul.f32 %v5099_v40, %v5099_v40  ;;  %v5006_v18 = vadd.f32 %v9486_v58, %v4967_v11  ;;  %v4970_v33 = vadd.f32 %v4938_v38, %v4440_v34  ;;  %v4438_v2 = vadd.f32 %v4349_v41, %v9357_v13 }
 0x20e   : > { %v4936_v29 = vadd.f32 %v4847_v22, %v9369_v39  ;;  %v4863_v14 = vpop.f32.mrf.mxu0  ;;  %v9553_v21 = vpop.f32.mrf.mxu1  ;;  %6221 = vst [vmem:[%s9511_s5 + $0x20] sm:$0xff] %v6161_v36   ;;  %v5291_v32 = vadd.f32 %v5290_v46, %v5100_v45  ;;  %v5104_v53 = vsel %vm5040_vm2, %v5008_v6, %v5072_v4  ;;  %v4443_v5 = vadd.f32 %v6819_v7, %v9364_v3 }
 0x20f   : > { %v5359_v35 = vadd.f32 %v5358_v31, %v5328_v0  ;;  %vm5038_vm3 = vcmp.gt.f32.partialorder %v5006_v18, 0.0  ;;  %v5070_v62 = vmul.f32 0.01, %v5006_v18  ;;  %v5009_v61 = vadd.f32 %v9486_v58, %v4970_v33 }
 0x210   : > { %v4968_v28 = vadd.f32 %v4936_v29, %v4438_v2  ;;  %v6871_v59 = vpop.f32.mrf.mxu0  ;;  %v9559_v49 = vpop.f32.mrf.mxu1  ;;  %v5292_v39 = vadd.f32 %v5291_v32, %v5101_v10  ;;  %v4941_v41 = vadd.f32 %v6867_v9, %v9376_v52  ;;  %v4441_v22 = vadd.f32 %v4362_v44, %v9371_v20 }
 0x211   : > { %v5360_v13 = vadd.f32 %v5359_v35, %v5329_v12  ;;  %v5102_v45 = vsel %vm5038_vm3, %v5006_v18, %v5070_v62  ;;  %vm5041_vm4 = vcmp.gt.f32.partialorder %v5009_v61, 0.0  ;;  %v5073_v16 = vmul.f32 0.01, %v5009_v61 }
 0x212   : > { %v5007_v55 = vadd.f32 %v9486_v58, %v4968_v28  ;;  %v4876_v26 = vpop.f32.mrf.mxu0  ;;  %v5293_v54 = vadd.f32 %v5292_v39, %v5102_v45  ;;  %v5331_v56 = vmul.f32 %v5102_v45, %v5102_v45  ;;  %v4973_v42 = vadd.f32 %v4941_v41, %v4443_v5  ;;  %v9564_v3 = vpop.f32.mrf.mxu1 }
 0x213   : > { %v5361_v50 = vadd.f32 %v5360_v13, %v5330_v19  ;;  %v5105_v7 = vsel %vm5041_vm4, %v5009_v61, %v5073_v16  ;;  %v4939_v52 = vadd.f32 %v4860_v27, %v9383_v25  ;;  %v5333_v20 = vmul.f32 %v5104_v53, %v5104_v53 }
 0x214   : > { %vm5039_vm5 = vcmp.gt.f32.partialorder %v5007_v55, 0.0  ;;  %v5071_v34 = vmul.f32 0.01, %v5007_v55  ;;  %v6872_v9 = vpop.f32.mrf.mxu0  ;;  %v6176_v10 = vpack.c.bf16 %v5105_v7, %v5104_v53  ;;  %v5012_v8 = vadd.f32 %v9486_v58, %v4973_v42  ;;  %v6827_v25 = vpop.f32.mrf.mxu1 }
 0x215   : > { %v5362_v44 = vadd.f32 %v5361_v50, %v5331_v56  ;;  %v4971_v12 = vadd.f32 %v4939_v52, %v4441_v22  ;;  %v4444_v31 = vadd.f32 %v9539_v43, %v9378_v37  ;;  %v4942_v17 = vadd.f32 %v6868_v63, %v9390_v30 }
 0x216   : > { %v5103_v6 = vsel %vm5039_vm5, %v5007_v55, %v5071_v34  ;;  %v4879_v11 = vpop.f32.mrf.mxu0  ;;  %6224 = vst [vmem:[%s9511_s5 + $0x38] sm:$0xff] %v6176_v10   ;;  %vm5044_vm6 = vcmp.gt.f32.partialorder %v5012_v8, 0.0  ;;  %v5076_v27 = vmul.f32 0.01, %v5012_v8  ;;  %v4442_v0 = vadd.f32 %v9544_v1, %v9385_v24  ;;  %v4394_v1 = vpop.f32.mrf.mxu1 }
 0x217   : > { %v6171_v40 = vpack.c.bf16 %v5103_v6, %v5102_v45  ;;  %v5294_v4 = vadd.f32 %v5293_v54, %v5103_v6  ;;  %v5332_v38 = vmul.f32 %v5103_v6, %v5103_v6  ;;  %v5010_v36 = vadd.f32 %v9486_v58, %v4971_v12 }
 0x218   : > { %v4974_v46 = vadd.f32 %v4942_v17, %v4444_v31  ;;  %v9575_v18 = vpop.f32.mrf.mxu0  ;;  %v5334_v19 = vmul.f32 %v5105_v7, %v5105_v7  ;;  %v4940_v43 = vadd.f32 %v4863_v14, %v9397_v23  ;;  %v4447_v2 = vadd.f32 %v9547_v57, %v9392_v48  ;;  %v6828_v55 = vpop.f32.mrf.mxu1  ;;  %v9895_v17 = vld [vmem:[#allocation44_spill] sm:$0xff] }
 0x219   : > { %6223 = vst [vmem:[%s9511_s5 + $0x30] sm:$0xff] %v6171_v40   ;;  %v5295_v37 = vadd.f32 %v5294_v4, %v5104_v53  ;;  %v5363_v30 = vadd.f32 %v5362_v44, %v5332_v38  ;;  %vm5042_vm7 = vcmp.gt.f32.partialorder %v5010_v36, 0.0  ;;  %v5074_v63 = vmul.f32 0.01, %v5010_v36 }
 0x21a   : > { %v5013_v33 = vadd.f32 %v9486_v58, %v4974_v46  ;;  %v5108_v32 = vsel %vm5044_vm6, %v5012_v8, %v5076_v27  ;;  %v4972_v24 = vadd.f32 %v4940_v43, %v4442_v0  ;;  %v9583_v62 = vpop.f32.mrf.mxu0  ;;  %v4945_v23 = vadd.f32 %v6871_v59, %v9404_v15  ;;  %v9896_v46 = vld [vmem:[#allocation18_spill] sm:$0xff] }
 0x21b   : > { %v5364_v29 = vadd.f32 %v5363_v30, %v5333_v20  ;;  %v5296_v35 = vadd.f32 %v5295_v37, %v5105_v7  ;;  %v5106_v61 = vsel %vm5042_vm7, %v5010_v36, %v5074_v63  ;;  %v4445_v39 = vadd.f32 %v9553_v21, %v9399_v51  ;;  %v9892_v7 = vld [vmem:[#allocation14_spill] sm:$0xff]  ;;  %v9894_v21 = vld [vmem:[#allocation16_spill] sm:$0xff] }
 0x21c   : > { %vm5045_vm8 = vcmp.gt.f32.partialorder %v5013_v33, 0.0  ;;  %v5077_v53 = vmul.f32 0.01, %v5013_v33  ;;  %v5335_v28 = vmul.f32 %v5106_v61, %v5106_v61  ;;  %v5011_v13 = vadd.f32 %v9486_v58, %v4972_v24  ;;  %v6876_v54 = vpop.f32.mrf.mxu0  ;;  %v9893_v51 = vld [vmem:[#allocation42_spill] sm:$0xff] }
 0x21d   : > { %v5297_v14 = vadd.f32 %v5296_v35, %v5106_v61  ;;  %v5365_v5 = vadd.f32 %v5364_v29, %v5334_v19  ;;  %v4977_v57 = vadd.f32 %v4945_v23, %v4447_v2  ;;  %v4943_v41 = vadd.f32 %v4876_v26, %v9411_v47  ;;  %v9897_v19 = vld [vmem:[#allocation46_spill] sm:$0xff]  ;;  %v9899_v23 = vld [vmem:[#allocation48_spill] sm:$0xff] }
 0x21e   : > { %v5109_v48 = vsel %vm5045_vm8, %v5013_v33, %v5077_v53  ;;  %v5337_v22 = vmul.f32 %v5108_v32, %v5108_v32  ;;  %vm5043_vm9 = vcmp.gt.f32.partialorder %v5011_v13, 0.0  ;;  %v5075_v15 = vmul.f32 0.01, %v5011_v13 }
 0x21f   : > { %v5366_v45 = vadd.f32 %v5365_v5, %v5335_v28  ;;  %v6186_v16 = vpack.c.bf16 %v5109_v48, %v5108_v32  ;;  %v5016_v59 = vadd.f32 %v9486_v58, %v4977_v57  ;;  %v4975_v56 = vadd.f32 %v4943_v41, %v4445_v39  ;;  %v9900_v5 = vld [vmem:[#allocation20_spill] sm:$0xff] }
 0x220   : > { %v4448_v50 = vadd.f32 %v9559_v49, %v9406_v60  ;;  %v5338_v42 = vmul.f32 %v5109_v48, %v5109_v48  ;;  %v4946_v34 = vadd.f32 %v6872_v9, %v9892_v7  ;;  %v4446_v47 = vadd.f32 %v9564_v3, %v9893_v51  ;;  %v4397_v60 = vpop.f32.mrf.mxu1  ;;  %v4895_v49 = vpop.f32.mrf.mxu0 }
 0x221   : > { %6226 = vst [vmem:[%s9511_s5 + $0x48] sm:$0xff] %v6186_v16   ;;  %v4944_v26 = vadd.f32 %v4879_v11, %v9894_v21  ;;  %v5107_v52 = vsel %vm5043_vm9, %v5011_v13, %v5075_v15  ;;  %vm5048_vm10 = vcmp.gt.f32.partialorder %v5016_v59, 0.0  ;;  %v5080_v20 = vmul.f32 0.01, %v5016_v59 }
 0x222   : > { %v5014_v44 = vadd.f32 %v9486_v58, %v4975_v56  ;;  %v6181_v10 = vpack.c.bf16 %v5107_v52, %v5106_v61  ;;  %v5298_v8 = vadd.f32 %v5297_v14, %v5107_v52  ;;  %v5336_v6 = vmul.f32 %v5107_v52, %v5107_v52  ;;  %v6879_v33 = vpop.f32.mrf.mxu0  ;;  %v9898_v61 = vld [vmem:[#allocation21_spill] sm:$0xff]  ;;  %v9901_v56 = vld [vmem:[#allocation52_spill] sm:$0xff] }
 0x223   : > { %v4978_v12 = vadd.f32 %v4946_v34, %v4448_v50  ;;  %v4976_v9 = vadd.f32 %v4944_v26, %v4446_v47  ;;  %v4451_v40 = vadd.f32 %v6827_v25, %v9895_v17  ;;  %v5112_v11 = vsel %vm5048_vm10, %v5016_v59, %v5080_v20  ;;  %v6831_v25 = vpop.f32.mrf.mxu1  ;;  %v9903_v47 = vld [vmem:[#allocation50_spill] sm:$0xff] }
 0x224   : > { %vm5046_vm11 = vcmp.gt.f32.partialorder %v5014_v44, 0.0  ;;  %v5078_v31 = vmul.f32 0.01, %v5014_v44  ;;  %6225 = vst [vmem:[%s9511_s5 + $0x40] sm:$0xff] %v6181_v10   ;;  %v5299_v3 = vadd.f32 %v5298_v8, %v5108_v32  ;;  %v5367_v4 = vadd.f32 %v5366_v45, %v5336_v6  ;;  %v4908_v45 = vpop.f32.mrf.mxu0 }
 0x225   : > { %v5017_v38 = vadd.f32 %v9486_v58, %v4978_v12  ;;  %v5015_v36 = vadd.f32 %v9486_v58, %v4976_v9  ;;  %v4949_v0 = vadd.f32 %v9575_v18, %v9896_v46  ;;  %v4449_v37 = vadd.f32 %v4394_v1, %v9897_v19 }
 0x226   : > { %v5110_v27 = vsel %vm5046_vm11, %v5014_v44, %v5078_v31  ;;  %v5368_v30 = vadd.f32 %v5367_v4, %v5337_v22  ;;  %v5300_v43 = vadd.f32 %v5299_v3, %v5109_v48  ;;  %v4947_v53 = vadd.f32 %v9583_v62, %v9898_v61  ;;  %v4410_v22 = vpop.f32.mrf.mxu1  ;;  %v6880_v8 = vpop.f32.mrf.mxu0  ;;  %v9904_v31 = vld [vmem:[#allocation25_spill] sm:$0xff] }
 0x227   : > { %v5339_v63 = vmul.f32 %v5110_v27, %v5110_v27  ;;  %vm5049_vm12 = vcmp.gt.f32.partialorder %v5017_v38, 0.0  ;;  %v5081_v2 = vmul.f32 0.01, %v5017_v38  ;;  %vm5047_vm13 = vcmp.gt.f32.partialorder %v5015_v36, 0.0 }
 0x228   : > { %v5079_v29 = vmul.f32 0.01, %v5015_v36  ;;  %v4981_v32 = vadd.f32 %v4949_v0, %v4451_v40  ;;  %v5301_v35 = vadd.f32 %v5300_v43, %v5110_v27  ;;  %v5369_v24 = vadd.f32 %v5368_v30, %v5338_v42  ;;  %v9902_v42 = vld [vmem:[#allocation22_spill] sm:$0xff]  ;;  %v6832_v10 = vpop.f32.mrf.mxu1  ;;  %v9907_v0 = vld [vmem:[#allocation56_spill] sm:$0xff] }
 0x229   : > { %v4452_v18 = vadd.f32 %v6828_v55, %v9899_v23  ;;  %v5113_v1 = vsel %vm5049_vm12, %v5017_v38, %v5081_v2  ;;  %v4950_v13 = vadd.f32 %v6876_v54, %v9900_v5  ;;  %v5341_v48 = vmul.f32 %v5112_v11, %v5112_v11  ;;  %v9906_v38 = vld [vmem:[#allocation26_spill] sm:$0xff] }
 0x22a   : > { %v5111_v14 = vsel %vm5047_vm13, %v5015_v36, %v5079_v29  ;;  %v5020_v28 = vadd.f32 %v9486_v58, %v4981_v32  ;;  %v5370_v57 = vadd.f32 %v5369_v24, %v5339_v63  ;;  %v6196_v39 = vpack.c.bf16 %v5113_v1, %v5112_v11  ;;  %v4413_v43 = vpop.f32.mrf.mxu1  ;;  %v4911_v63 = vpop.f32.mrf.mxu0 }
 0x22b   : > { %v6191_v41 = vpack.c.bf16 %v5111_v14, %v5110_v27  ;;  %v5302_v16 = vadd.f32 %v5301_v35, %v5111_v14  ;;  %v5340_v15 = vmul.f32 %v5111_v14, %v5111_v14  ;;  %v4979_v55 = vadd.f32 %v4947_v53, %v4449_v37  ;;  %v9908_v37 = vld [vmem:[#allocation28_spill] sm:$0xff]  ;;  %v9909_v53 = vld [vmem:[#allocation57_spill] sm:$0xff] }
 0x22c   : > { %vm5052_vm14 = vcmp.gt.f32.partialorder %v5020_v28, 0.0  ;;  %v5084_v62 = vmul.f32 0.01, %v5020_v28  ;;  %6228 = vst [vmem:[%s9511_s5 + $0x58] sm:$0xff] %v6196_v39   ;;  %v4982_v59 = vadd.f32 %v4950_v13, %v4452_v18  ;;  %v4450_v50 = vadd.f32 %v4397_v60, %v9901_v56  ;;  %v9905_v60 = vld [vmem:[#allocation53_spill] sm:$0xff] }
 0x22d   : > { %6227 = vst [vmem:[%s9511_s5 + $0x50] sm:$0xff] %v6191_v41   ;;  %v4948_v7 = vadd.f32 %v4895_v49, %v9902_v42  ;;  %v5342_v34 = vmul.f32 %v5113_v1, %v5113_v1  ;;  %v5303_v54 = vadd.f32 %v5302_v16, %v5112_v11  ;;  %v5371_v51 = vadd.f32 %v5370_v57, %v5340_v15  ;;  %v9910_v18 = vld [vmem:[#allocation29_spill] sm:$0xff] }
 0x22e   : > { %v4455_v21 = vadd.f32 %v6831_v25, %v9903_v47  ;;  %v5116_v26 = vsel %vm5052_vm14, %v5020_v28, %v5084_v62  ;;  %v5018_v52 = vadd.f32 %v9486_v58, %v4979_v55  ;;  %v5021_v20 = vadd.f32 %v9486_v58, %v4982_v59 }
 0x22f   : > { %v4980_v44 = vadd.f32 %v4948_v7, %v4450_v50  ;;  %v5372_v6 = vadd.f32 %v5371_v51, %v5341_v48  ;;  %v5304_v12 = vadd.f32 %v5303_v54, %v5113_v1  ;;  %v4953_v9 = vadd.f32 %v6879_v33, %v9904_v31 }
 0x230   : > { %v4453_v17 = vadd.f32 %v4410_v22, %v9905_v60  ;;  %vm5050_vm15 = vcmp.gt.f32.partialorder %v5018_v52, 0.0  ;;  %v5082_v49 = vmul.f32 0.01, %v5018_v52  ;;  %vm5053_vm0 = vcmp.gt.f32.partialorder %v5021_v20, 0.0 }
 0x231   : > { %v5085_v40 = vmul.f32 0.01, %v5021_v20  ;;  %v5373_v3 = vadd.f32 %v5372_v6, %v5342_v34  ;;  %v5019_v4 = vadd.f32 %v9486_v58, %v4980_v44  ;;  %v4985_v11 = vadd.f32 %v4953_v9, %v4455_v21 }
 0x232   : > { %v4951_v27 = vadd.f32 %v4908_v45, %v9906_v38  ;;  %v5114_v36 = vsel %vm5050_vm15, %v5018_v52, %v5082_v49  ;;  %v4456_v19 = vadd.f32 %v6832_v10, %v9907_v0  ;;  %v4954_v30 = vadd.f32 %v6880_v8, %v9908_v37 }
 0x233   : > { %v5117_v46 = vsel %vm5053_vm0, %v5021_v20, %v5085_v40  ;;  %v5305_v25 = vadd.f32 %v5304_v12, %v5114_v36  ;;  %v5343_v33 = vmul.f32 %v5114_v36, %v5114_v36  ;;  %vm5051_vm1 = vcmp.gt.f32.partialorder %v5019_v4, 0.0 }
 0x234   : > { %v6206_v2 = vpack.c.bf16 %v5117_v46, %v5116_v26  ;;  %v5083_v29 = vmul.f32 0.01, %v5019_v4  ;;  %v5024_v32 = vadd.f32 %v9486_v58, %v4985_v11  ;;  %v4983_v35 = vadd.f32 %v4951_v27, %v4453_v17 }
 0x235   : > { %v5374_v24 = vadd.f32 %v5373_v3, %v5343_v33  ;;  %v4986_v61 = vadd.f32 %v4954_v30, %v4456_v19  ;;  %v4454_v23 = vadd.f32 %v4413_v43, %v9909_v53  ;;  %v4952_v1 = vadd.f32 %v4911_v63, %v9910_v18 }
 0x236   : > { %6230 = vst [vmem:[%s9511_s5 + $0x68] sm:$0xff] %v6206_v2   ;;  %v5345_v14 = vmul.f32 %v5116_v26, %v5116_v26  ;;  %v5115_v28 = vsel %vm5051_vm1, %v5019_v4, %v5083_v29  ;;  %v5022_v5 = vadd.f32 %v9486_v58, %v4983_v35  ;;  %v5088_v41 = vmul.f32 0.01, %v5024_v32 }
 0x237   : > { %v6201_v13 = vpack.c.bf16 %v5115_v28, %v5114_v36  ;;  %v5306_v48 = vadd.f32 %v5305_v25, %v5115_v28  ;;  %v5344_v57 = vmul.f32 %v5115_v28, %v5115_v28  ;;  %v5025_v39 = vadd.f32 %v9486_v58, %v4986_v61 }
 0x238   : > { %vm5054_vm2 = vcmp.gt.f32.partialorder %v5022_v5, 0.0  ;;  %v5086_v22 = vmul.f32 0.01, %v5022_v5  ;;  %v4984_v45 = vadd.f32 %v4952_v1, %v4454_v23  ;;  %vm5056_vm3 = vcmp.gt.f32.partialorder %v5024_v32, 0.0 }
 0x239   : > { %6229 = vst [vmem:[%s9511_s5 + $0x60] sm:$0xff] %v6201_v13   ;;  %v5307_v16 = vadd.f32 %v5306_v48, %v5116_v26  ;;  %v5375_v15 = vadd.f32 %v5374_v24, %v5344_v57  ;;  %vm5057_vm4 = vcmp.gt.f32.partialorder %v5025_v39, 0.0  ;;  %v5089_v55 = vmul.f32 0.01, %v5025_v39 }
 0x23a   : > { %v5118_v62 = vsel %vm5054_vm2, %v5022_v5, %v5086_v22  ;;  %v5023_v59 = vadd.f32 %v9486_v58, %v4984_v45  ;;  %v5346_v56 = vmul.f32 %v5117_v46, %v5117_v46  ;;  %v5120_v7 = vsel %vm5056_vm3, %v5024_v32, %v5088_v41 }
 0x23b   : > { %v5376_v50 = vadd.f32 %v5375_v15, %v5345_v14  ;;  %v5308_v42 = vadd.f32 %v5307_v16, %v5117_v46  ;;  %v5121_v34 = vsel %vm5057_vm4, %v5025_v39, %v5089_v55  ;;  %v5347_v47 = vmul.f32 %v5118_v62, %v5118_v62 }
 0x23c   : > { %vm5055_vm5 = vcmp.gt.f32.partialorder %v5023_v59, 0.0  ;;  %v5087_v54 = vmul.f32 0.01, %v5023_v59  ;;  %v6216_v26 = vpack.c.bf16 %v5121_v34, %v5120_v7  ;;  %v5349_v6 = vmul.f32 %v5120_v7, %v5120_v7 }
 0x23d   : > { %v5309_v51 = vadd.f32 %v5308_v42, %v5118_v62  ;;  %v5377_v21 = vadd.f32 %v5376_v50, %v5346_v56  ;;  %v5350_v31 = vmul.f32 %v5121_v34, %v5121_v34  ;;  %vm5388_vm6 = vcmask 1040384  }
 0x23e   : > { %v5119_v52 = vsel %vm5055_vm5, %v5023_v59, %v5087_v54  ;;  %6232 = vst [vmem:[%s9511_s5 + $0x78] sm:$0xff] %v6216_v26  }
 0x23f   : > { %v5378_v20 = vadd.f32 %v5377_v21, %v5347_v47  ;;  %v6211_v44 = vpack.c.bf16 %v5119_v52, %v5118_v62  ;;  %v5310_v10 = vadd.f32 %v5309_v51, %v5119_v52  ;;  %v5348_v8 = vmul.f32 %v5119_v52, %v5119_v52 }
 0x241   : > { %6231 = vst [vmem:[%s9511_s5 + $0x70] sm:$0xff] %v6211_v44   ;;  %v5311_v58 = vadd.f32 %v5310_v10, %v5120_v7  ;;  %v5379_v12 = vadd.f32 %v5378_v20, %v5348_v8 }
 0x243   : > { %v5312_v9 = vadd.f32 %v5311_v58, %v5121_v34  ;;  %v5380_v60 = vadd.f32 %v5379_v12, %v5349_v6 }
 0x245   : > { %v5313_v17 = vrot.slane %v5312_v9, 4  ;;  %v5381_v49 = vadd.f32 %v5380_v60, %v5350_v31 }
 0x247   : > { %v5314_v40 = vadd.f32 %v5313_v17, %v5312_v9  ;;  %v5382_v3 = vrot.slane %v5381_v49, 4 }
 0x249   : > { %v5315_v4 = vrot.slane %v5314_v40, 2  ;;  %v5383_v11 = vadd.f32 %v5382_v3, %v5381_v49 }
 0x24b   : > { %v5316_v38 = vadd.f32 %v5315_v4, %v5314_v40  ;;  %v5384_v27 = vrot.slane %v5383_v11, 2 }
 0x24d   : > { %v5317_v36 = vrot.slane %v5316_v38, 1  ;;  %v5385_v46 = vadd.f32 %v5384_v27, %v5383_v11 }
 0x24f   : > { %v5386_v0 = vrot.slane %v5385_v46, 1  ;;  %v5318_v19 = vadd.f32 %v5317_v36, %v5316_v38 }
 0x251   : > { %v5387_v37 = vadd.f32 %v5386_v0, %v5385_v46 }
 0x253   : > { %v5389_v30 = vsel %vm5388_vm6, %v5318_v19, %v5387_v37 }
 0x254   : > { %5390 = vst [vmem:[%s208_s9] sm:$0x3] %v5389_v30 }
 0x255 PF: > { %s15_s15 = sadd.s32 1, %s7071_s15  }
 0x256   : > { %p12_p4 = scmp.ge.s32.totalorder %s15_s15, 4  }
 0x258   :  { %14 = sbr.rel (!%p12_p4) target bundleno = 1 (0x1), region = 84 }

</bundles_post_ra>
